<compile_context>
chip_gen: v7x
topology: tpu7x:2x2x1
jax: 0.10.0
libtpu: 0.0.40
codegen_flags: <defaults>
</compile_context>

<pallas_src>
import jax
import jax.numpy as jnp
from jax.experimental import pallas as pl
from jax.experimental.pallas import tpu as pltpu

_EPS = 1e-5

# Set to jnp.bfloat16 on v6e/v7x to run the tap matmuls on the bf16 MXU path
# (accumulation and all BatchNorm statistics stay in float32).  Default None
# keeps full f32 to match the PyTorch reference numerics.
_MXU_DTYPE = None

_PARALLEL = pltpu.CompilerParams(dimension_semantics=("parallel",))


def _round_up(x, m):
    return (x + m - 1) // m * m


# ---------------------------------------------------------------------------
# Kernel 1: 3x3 same-conv as 9 accumulated matmuls + masked BN partial stats.
#   xe   : (N, L, Cin)   extended-flat input (zero halo of E rows each side)
#   w    : (9, Cin, Cout) per-tap weights (channel padded, zero rows/cols)
#   mask : (P8, Cout)    1.0 at valid (interior) padded-flat positions
# returns
#   y     : (N, P8, Cout) pre-BatchNorm conv output in padded-flat layout
#   stats : (N, 8, Cout)  row 0 = sum(y*mask), row 1 = sum((y*mask)^2)
# ---------------------------------------------------------------------------
def _conv3x3_stats(xe, w, mask, *, Wp, P8, E):
    N, L, cin = xe.shape
    cout = w.shape[2]

    def kernel(xe_ref, w_ref, m_ref, y_ref, st_ref):
        acc = jnp.zeros((P8, cout), jnp.float32)
        for t in range(9):                              # unrolled 9 taps
            dh, dw = divmod(t, 3)
            off = E + (dh - 1) * Wp + (dw - 1)          # static row shift
            xs = xe_ref[0, off:off + P8, :]
            wt = w_ref[t]
            if _MXU_DTYPE is not None:
                xs = xs.astype(_MXU_DTYPE)
                wt = wt.astype(_MXU_DTYPE)
            acc = acc + jnp.dot(xs, wt, preferred_element_type=jnp.float32)
        y_ref[0] = acc
        accv = acc * m_ref[...]                         # drop pad-border rows
        s = jnp.sum(accv, axis=0, keepdims=True)        # (1, Cout)
        ss = jnp.sum(accv * accv, axis=0, keepdims=True)
        row = jax.lax.broadcasted_iota(jnp.int32, (8, cout), 0)
        st_ref[0] = jnp.where(row == 0, s, 0.0) + jnp.where(row == 1, ss, 0.0)

    return pl.pallas_call(
        kernel,
        out_shape=(jax.ShapeDtypeStruct((N, P8, cout), jnp.float32),
                   jax.ShapeDtypeStruct((N, 8, cout), jnp.float32)),
        grid=(N,),
        in_specs=[pl.BlockSpec((1, L, cin), lambda n: (n, 0, 0)),
                  pl.BlockSpec((9, cin, cout), lambda n: (0, 0, 0)),
                  pl.BlockSpec((P8, cout), lambda n: (0, 0))],
        out_specs=(pl.BlockSpec((1, P8, cout), lambda n: (n, 0, 0)),
                   pl.BlockSpec((1, 8, cout), lambda n: (n, 0, 0))),
        compiler_params=_PARALLEL,
    )(xe, w, mask)


# ---------------------------------------------------------------------------
# Fold training-mode BatchNorm into per-channel scale/shift (tiny XLA glue).
# ---------------------------------------------------------------------------
def _bn_affine(stats, gamma, beta, count):
    s = jnp.sum(stats[:, 0, :], axis=0)
    ss = jnp.sum(stats[:, 1, :], axis=0)
    mean = s / count
    var = ss / count - mean * mean                      # biased, E[y^2]-E[y]^2
    scale = gamma * jax.lax.rsqrt(var + _EPS)
    shift = beta - mean * scale
    return scale, shift


# ---------------------------------------------------------------------------
# Kernel 2a: BN(scale,shift) + ReLU, re-emitted as the NEXT layer's
# extended-flat input (zero halo written in-kernel -> no wrapper jnp.pad).
# ---------------------------------------------------------------------------
def _bn_relu_repack(y, scale, shift, mask, *, E, L):
    N, P8, cout = y.shape

    def kernel(y_ref, sc_ref, sh_ref, m_ref, o_ref):
        act = jnp.maximum(y_ref[0] * sc_ref[...] + sh_ref[...], 0.0) * m_ref[...]
        o_ref[0, 0:E, :] = jnp.zeros((E, cout), jnp.float32)
        o_ref[0, E:E + P8, :] = act
        o_ref[0, E + P8:L, :] = jnp.zeros((L - E - P8, cout), jnp.float32)

    return pl.pallas_call(
        kernel,
        out_shape=jax.ShapeDtypeStruct((N, L, cout), jnp.float32),
        grid=(N,),
        in_specs=[pl.BlockSpec((1, P8, cout), lambda n: (n, 0, 0)),
                  pl.BlockSpec((1, cout), lambda n: (0, 0)),
                  pl.BlockSpec((1, cout), lambda n: (0, 0)),
                  pl.BlockSpec((P8, cout), lambda n: (0, 0))],
        out_specs=pl.BlockSpec((1, L, cout), lambda n: (n, 0, 0)),
        compiler_params=_PARALLEL,
    )(y, scale.reshape(1, cout), shift.reshape(1, cout), mask)


# ---------------------------------------------------------------------------
# Kernel 2b: fused BN + ReLU + MaxPool2d(2, 2, return_indices=True).
# Inputs are the four 2x2 tap views of the (pre-BN) last conv output.
# ---------------------------------------------------------------------------
def _bn_relu_maxpool(v00, v01, v10, v11, scale, shift, *, W_out):
    N, H2, W2, cout = v00.shape

    def kernel(r00, r01, r10, r11, sc_ref, sh_ref, o_ref, i_ref):
        sc = sc_ref[...]
        sh = sh_ref[...]
        best = jnp.maximum(r00[...] * sc + sh, 0.0)
        bdi = jnp.zeros(best.shape, jnp.int32)
        bdj = jnp.zeros(best.shape, jnp.int32)
        for di, dj, r in ((0, 1, r01), (1, 0, r10), (1, 1, r11)):
            v = jnp.maximum(r[...] * sc + sh, 0.0)
            take = v > best                 # strict >: first max wins on ties
            best = jnp.where(take, v, best)
            bdi = jnp.where(take, jnp.int32(di), bdi)
            bdj = jnp.where(take, jnp.int32(dj), bdj)
        h2 = jax.lax.broadcasted_iota(jnp.int32, best.shape, 1)
        w2 = jax.lax.broadcasted_iota(jnp.int32, best.shape, 2)
        o_ref[...] = best
        i_ref[...] = (2 * h2 + bdi) * W_out + (2 * w2 + bdj)

    vspec = pl.BlockSpec((1, H2, W2, cout), lambda n: (n, 0, 0, 0))
    cspec = pl.BlockSpec((1, 1, 1, cout), lambda n: (0, 0, 0, 0))
    return pl.pallas_call(
        kernel,
        out_shape=(jax.ShapeDtypeStruct((N, H2, W2, cout), jnp.float32),
                   jax.ShapeDtypeStruct((N, H2, W2, cout), jnp.int32)),
        grid=(N,),
        in_specs=[vspec, vspec, vspec, vspec, cspec, cspec],
        out_specs=(vspec, vspec),
        compiler_params=_PARALLEL,
    )(v00, v01, v10, v11,
      scale.reshape(1, 1, 1, cout), shift.reshape(1, 1, 1, cout))


# ---------------------------------------------------------------------------
# Full Encoder forward
# ---------------------------------------------------------------------------
def _encoder_forward_impl(x_nchw, params, l):
    N, c_in, H, W = x_nchw.shape
    n_out = params["g0"].shape[0]
    assert H % 2 == 0 and W % 2 == 0, "pool assumes even spatial sizes"

    Hp, Wp = H + 2, W + 2
    P = Hp * Wp                      # padded-flat positions per image
    P8 = _round_up(P, 8)             # conv-output rows per image (8-aligned)
    E = _round_up(Wp + 1, 8)         # zero halo rows before/after the image
    L = P8 + 2 * E                   # extended-flat input length (8-aligned)

    cin_p = _round_up(c_in, 8)       # sublane-friendly input channels
    cout_p = _round_up(n_out, 128)   # lane-dense output channels

    # --- parameters: im2col (9*Cin, Cout) -> per-tap (9, Cin, Cout), channel pad
    w0 = jnp.pad(params["w0"].reshape(9, c_in, n_out),
                 ((0, 0), (0, cin_p - c_in), (0, cout_p - n_out)))
    w1 = jnp.pad(params["w1"].reshape(9, n_out, n_out),
                 ((0, 0), (0, cout_p - n_out), (0, cout_p - n_out)))
    g0 = jnp.pad(params["g0"], (0, cout_p - n_out))
    be0 = jnp.pad(params["be0"], (0, cout_p - n_out))
    g1 = jnp.pad(params["g1"], (0, cout_p - n_out))
    be1 = jnp.pad(params["be1"], (0, cout_p - n_out))
    # NOTE: conv biases params["b0"]/params["b1"] are intentionally unused: a
    # per-channel constant is exactly cancelled by training-mode BN mean
    # subtraction that immediately follows each conv.

    # --- validity mask over padded-flat positions (interior of padded image)
    r = jnp.arange(P8)
    valid = (r // Wp >= 1) & (r // Wp <= H) & (r % Wp >= 1) & (r % Wp <= W)
    mask = jnp.broadcast_to(valid.astype(jnp.float32)[:, None], (P8, cout_p))

    # --- layer-0 input: NCHW -> NHWC, channel pad, spatial pad, flatten, extend
    x = jnp.transpose(x_nchw, (0, 2, 3, 1)).astype(jnp.float32)
    xp = jnp.pad(x, ((0, 0), (1, 1), (1, 1), (0, cin_p - c_in)))
    xe = jnp.pad(xp.reshape(N, P, cin_p), ((0, 0), (E, L - E - P), (0, 0)))

    # self.block once, then self.block_out = the SAME (conv, bn, act) l times.
    layers = [(w0, g0, be0)] + [(w1, g1, be1)] * l
    count = float(N * H * W)
    out = idx = None
    for i, (w, g, be) in enumerate(layers):
        y, stats = _conv3x3_stats(xe, w, mask, Wp=Wp, P8=P8, E=E)
        scale, shift = _bn_affine(stats, g, be, count)
        if i + 1 < len(layers):
            xe = _bn_relu_repack(y, scale, shift, mask, E=E, L=L)
        else:
            # Fused BN + ReLU + 2x2 max-pool: feed the four tap views of the
            # pre-BN conv output; normalization/activation happen in-kernel.
            y_sp = y[:, :P, :].reshape(N, Hp, Wp, cout_p)[:, 1:H + 1, 1:W + 1, :]
            out, idx = _bn_relu_maxpool(
                y_sp[:, 0::2, 0::2, :], y_sp[:, 0::2, 1::2, :],
                y_sp[:, 1::2, 0::2, :], y_sp[:, 1::2, 1::2, :],
                scale, shift, W_out=W)

    out = jnp.transpose(out[..., :n_out], (0, 3, 1, 2))   # NHWC -> NCHW
    idx = jnp.transpose(idx[..., :n_out], (0, 3, 1, 2))
    return out, idx


encoder_forward = jax.jit(_encoder_forward_impl, static_argnames=("l",))


if __name__ == "__main__":
    n_in, n_out, l = 4, 8, 2
    N, H, W = 2, 16, 16

    key = jax.random.PRNGKey(0)
    k1, k2, k3, k4, kx = jax.random.split(key, 5)

    # w* are (9*Cin, Cout) im2col matrices: row index (dh*3 + dw)*Cin + cin,
    # matching torch weight[cout, cin, dh, dw].
    params = {
        "w0": jax.random.normal(k1, (9 * n_in, n_out), jnp.float32) * 0.1,
        "b0": jax.random.normal(k2, (n_out,), jnp.float32) * 0.1,
        "g0": jnp.ones((n_out,), jnp.float32),
        "be0": jnp.zeros((n_out,), jnp.float32),
        "w1": jax.random.normal(k3, (9 * n_out, n_out), jnp.float32) * 0.1,
        "b1": jax.random.normal(k4, (n_out,), jnp.float32) * 0.1,
        "g1": jnp.ones((n_out,), jnp.float32),
        "be1": jnp.zeros((n_out,), jnp.float32),
    }

    x = jax.random.normal(kx, (N, n_in, H, W), jnp.float32)  # NCHW like PyTorch

    out, idx = encoder_forward(x, params, l=l)
    jax.block_until_ready((out, idx))

    assert out.shape == (N, n_out, H // 2, W // 2)
    assert idx.shape == (N, n_out, H // 2, W // 2)
    assert bool(jnp.isfinite(out).all())
    assert int(idx.min()) >= 0 and int(idx.max()) < H * W
    print("KERNEL_OK")
</pallas_src>

<mosaic_0001>
module attributes {stable_mosaic.version = 11 : i64} {
  func.func @kernel(%arg0: i32, %arg1: memref<1x328x128xf32, #tpu.memory_space<vmem>>, %arg2: memref<1x128xf32, #tpu.memory_space<vmem>>, %arg3: memref<1x128xf32, #tpu.memory_space<vmem>>, %arg4: memref<328x128xf32, #tpu.memory_space<vmem>>, %arg5: memref<1x376x128xf32, #tpu.memory_space<vmem>>) attributes {dimension_semantics = [#tpu.dimension_semantics<parallel>], iteration_bounds = array<i64: 2>, scalar_prefetch = 0 : i64, scratch_operands = 0 : i64, tpu.core_type = #tpu.core_type<tc>, window_params = [{transform_indices = @transform_0, window_bounds = array<i64: 1, 328, 128>}, {pipeline_mode = #tpu.pipeline_mode<synchronous>, transform_indices = @transform_1, window_bounds = array<i64: 1, 128>}, {pipeline_mode = #tpu.pipeline_mode<synchronous>, transform_indices = @transform_2, window_bounds = array<i64: 1, 128>}, {pipeline_mode = #tpu.pipeline_mode<synchronous>, transform_indices = @transform_3, window_bounds = array<i64: 328, 128>}, {transform_indices = @transform_4, window_bounds = array<i64: 1, 376, 128>}]} {
    %c0 = arith.constant 0 : index
    %c0_0 = arith.constant 0 : index
    %c0_1 = arith.constant 0 : index
    %0 = vector.load %arg1[%c0, %c0_0, %c0_1] : memref<1x328x128xf32, #tpu.memory_space<vmem>>, vector<1x328x128xf32>
    %1 = vector.shape_cast %0 : vector<1x328x128xf32> to vector<328x128xf32>
    %c0_2 = arith.constant 0 : index
    %c0_3 = arith.constant 0 : index
    %2 = vector.load %arg2[%c0_2, %c0_3] : memref<1x128xf32, #tpu.memory_space<vmem>>, vector<1x128xf32>
    %3 = vector.broadcast %2 : vector<1x128xf32> to vector<328x128xf32>
    %4 = arith.mulf %1, %3 : vector<328x128xf32>
    %c0_4 = arith.constant 0 : index
    %c0_5 = arith.constant 0 : index
    %5 = vector.load %arg3[%c0_4, %c0_5] : memref<1x128xf32, #tpu.memory_space<vmem>>, vector<1x128xf32>
    %6 = vector.broadcast %5 : vector<1x128xf32> to vector<328x128xf32>
    %7 = arith.addf %4, %6 : vector<328x128xf32>
    %cst = arith.constant 0.000000e+00 : f32
    %8 = vector.broadcast %cst : f32 to vector<328x128xf32>
    %9 = arith.maximumf %7, %8 : vector<328x128xf32>
    %c0_6 = arith.constant 0 : index
    %c0_7 = arith.constant 0 : index
    %10 = vector.load %arg4[%c0_6, %c0_7] : memref<328x128xf32, #tpu.memory_space<vmem>>, vector<328x128xf32>
    %11 = arith.mulf %9, %10 : vector<328x128xf32>
    %cst_8 = arith.constant 0.000000e+00 : f32
    %12 = vector.broadcast %cst_8 : f32 to vector<24x128xf32>
    %c0_9 = arith.constant 0 : index
    %c0_10 = arith.constant 0 : index
    %c0_11 = arith.constant 0 : index
    %13 = vector.load %arg5[%c0_9, %c0_10, %c0_11] : memref<1x376x128xf32, #tpu.memory_space<vmem>>, vector<1x24x128xf32>
    %14 = vector.shape_cast %13 : vector<1x24x128xf32> to vector<24x128xf32>
    %15 = vector.shape_cast %12 : vector<24x128xf32> to vector<1x24x128xf32>
    tpu.vector_store %arg5[%c0_9, %c0_10, %c0_11], %15 {strides = array<i32>} : memref<1x376x128xf32, #tpu.memory_space<vmem>>, vector<1x24x128xf32>,
    %c0_12 = arith.constant 0 : index
    %c24 = arith.constant 24 : index
    %c0_13 = arith.constant 0 : index
    %16 = vector.load %arg5[%c0_12, %c24, %c0_13] : memref<1x376x128xf32, #tpu.memory_space<vmem>>, vector<1x328x128xf32>
    %17 = vector.shape_cast %16 : vector<1x328x128xf32> to vector<328x128xf32>
    %18 = vector.shape_cast %11 : vector<328x128xf32> to vector<1x328x128xf32>
    tpu.vector_store %arg5[%c0_12, %c24, %c0_13], %18 {strides = array<i32>} : memref<1x376x128xf32, #tpu.memory_space<vmem>>, vector<1x328x128xf32>,
    %cst_14 = arith.constant 0.000000e+00 : f32
    %19 = vector.broadcast %cst_14 : f32 to vector<24x128xf32>
    %c0_15 = arith.constant 0 : index
    %c352 = arith.constant 352 : index
    %c0_16 = arith.constant 0 : index
    %20 = vector.load %arg5[%c0_15, %c352, %c0_16] : memref<1x376x128xf32, #tpu.memory_space<vmem>>, vector<1x24x128xf32>
    %21 = vector.shape_cast %20 : vector<1x24x128xf32> to vector<24x128xf32>
    %22 = vector.shape_cast %19 : vector<24x128xf32> to vector<1x24x128xf32>
    tpu.vector_store %arg5[%c0_15, %c352, %c0_16], %22 {strides = array<i32>} : memref<1x376x128xf32, #tpu.memory_space<vmem>>, vector<1x24x128xf32>,
    return
  }
  func.func @transform_0(%arg0: i32) -> (i32, i32, i32) {
    %c0_i32 = arith.constant 0 : i32
    %c0_i32_0 = arith.constant 0 : i32
    %c0_i32_1 = arith.constant 0 : i32
    return %arg0, %c0_i32, %c0_i32_0 : i32, i32, i32
  }
  func.func @transform_1(%arg0: i32) -> (i32, i32) {
    %c0_i32 = arith.constant 0 : i32
    %c0_i32_0 = arith.constant 0 : i32
    %c0_i32_1 = arith.constant 0 : i32
    return %c0_i32, %c0_i32_0 : i32, i32
  }
  func.func @transform_2(%arg0: i32) -> (i32, i32) {
    %c0_i32 = arith.constant 0 : i32
    %c0_i32_0 = arith.constant 0 : i32
    %c0_i32_1 = arith.constant 0 : i32
    return %c0_i32, %c0_i32_0 : i32, i32
  }
  func.func @transform_3(%arg0: i32) -> (i32, i32) {
    %c0_i32 = arith.constant 0 : i32
    %c0_i32_0 = arith.constant 0 : i32
    %c0_i32_1 = arith.constant 0 : i32
    return %c0_i32, %c0_i32_0 : i32, i32
  }
  func.func @transform_4(%arg0: i32) -> (i32, i32, i32) {
    %c0_i32 = arith.constant 0 : i32
    %c0_i32_0 = arith.constant 0 : i32
    %c0_i32_1 = arith.constant 0 : i32
    return %arg0, %c0_i32, %c0_i32_0 : i32, i32, i32
  }
}

module attributes {stable_mosaic.version = 11 : i64} {
  func.func @kernel(%arg0: i32, %arg1: memref<1x376x8xf32, #tpu.memory_space<vmem>>, %arg2: memref<9x8x128xf32, #tpu.memory_space<vmem>>, %arg3: memref<328x128xf32, #tpu.memory_space<vmem>>, %arg4: memref<1x328x128xf32, #tpu.memory_space<vmem>>, %arg5: memref<1x8x128xf32, #tpu.memory_space<vmem>>) attributes {dimension_semantics = [#tpu.dimension_semantics<parallel>], iteration_bounds = array<i64: 2>, scalar_prefetch = 0 : i64, scratch_operands = 0 : i64, tpu.core_type = #tpu.core_type<tc>, window_params = [{transform_indices = @transform_0, window_bounds = array<i64: 1, 376, 8>}, {pipeline_mode = #tpu.pipeline_mode<synchronous>, transform_indices = @transform_1, window_bounds = array<i64: 9, 8, 128>}, {pipeline_mode = #tpu.pipeline_mode<synchronous>, transform_indices = @transform_2, window_bounds = array<i64: 328, 128>}, {transform_indices = @transform_3, window_bounds = array<i64: 1, 328, 128>}, {transform_indices = @transform_4, window_bounds = array<i64: 1, 8, 128>}]} {
    %cst = arith.constant 0.000000e+00 : f32
    %0 = vector.broadcast %cst : f32 to vector<328x128xf32>
    %c0 = arith.constant 0 : index
    %c5 = arith.constant 5 : index
    %c0_0 = arith.constant 0 : index
    %1 = vector.load %arg1[%c0, %c5, %c0_0] : memref<1x376x8xf32, #tpu.memory_space<vmem>>, vector<1x328x8xf32>
    %2 = vector.shape_cast %1 : vector<1x328x8xf32> to vector<328x8xf32>
    %c0_1 = arith.constant 0 : index
    %c0_2 = arith.constant 0 : index
    %c0_3 = arith.constant 0 : index
    %3 = vector.load %arg2[%c0_1, %c0_2, %c0_3] : memref<9x8x128xf32, #tpu.memory_space<vmem>>, vector<1x8x128xf32>
    %4 = vector.shape_cast %3 : vector<1x8x128xf32> to vector<8x128xf32>
    %cst_4 = arith.constant dense<0.000000e+00> : vector<328x128xf32>
    %5 = tpu.matmul %2, %4, %cst_4 {dimension_numbers = #tpu.dot_dimension_numbers<[1], [0], [0], [1], [0, 0, 1, 1], [], []>} : vector<328x8xf32>, vector<8x128xf32>, vector<328x128xf32> -> vector<328x128xf32>
    %6 = arith.addf %0, %5 : vector<328x128xf32>
    %c0_5 = arith.constant 0 : index
    %c6 = arith.constant 6 : index
    %c0_6 = arith.constant 0 : index
    %7 = vector.load %arg1[%c0_5, %c6, %c0_6] : memref<1x376x8xf32, #tpu.memory_space<vmem>>, vector<1x328x8xf32>
    %8 = vector.shape_cast %7 : vector<1x328x8xf32> to vector<328x8xf32>
    %c1 = arith.constant 1 : index
    %c0_7 = arith.constant 0 : index
    %c0_8 = arith.constant 0 : index
    %9 = vector.load %arg2[%c1, %c0_7, %c0_8] : memref<9x8x128xf32, #tpu.memory_space<vmem>>, vector<1x8x128xf32>
    %10 = vector.shape_cast %9 : vector<1x8x128xf32> to vector<8x128xf32>
    %cst_9 = arith.constant dense<0.000000e+00> : vector<328x128xf32>
    %11 = tpu.matmul %8, %10, %cst_9 {dimension_numbers = #tpu.dot_dimension_numbers<[1], [0], [0], [1], [0, 0, 1, 1], [], []>} : vector<328x8xf32>, vector<8x128xf32>, vector<328x128xf32> -> vector<328x128xf32>
    %12 = arith.addf %6, %11 : vector<328x128xf32>
    %c0_10 = arith.constant 0 : index
    %c7 = arith.constant 7 : index
    %c0_11 = arith.constant 0 : index
    %13 = vector.load %arg1[%c0_10, %c7, %c0_11] : memref<1x376x8xf32, #tpu.memory_space<vmem>>, vector<1x328x8xf32>
    %14 = vector.shape_cast %13 : vector<1x328x8xf32> to vector<328x8xf32>
    %c2 = arith.constant 2 : index
    %c0_12 = arith.constant 0 : index
    %c0_13 = arith.constant 0 : index
    %15 = vector.load %arg2[%c2, %c0_12, %c0_13] : memref<9x8x128xf32, #tpu.memory_space<vmem>>, vector<1x8x128xf32>
    %16 = vector.shape_cast %15 : vector<1x8x128xf32> to vector<8x128xf32>
    %cst_14 = arith.constant dense<0.000000e+00> : vector<328x128xf32>
    %17 = tpu.matmul %14, %16, %cst_14 {dimension_numbers = #tpu.dot_dimension_numbers<[1], [0], [0], [1], [0, 0, 1, 1], [], []>} : vector<328x8xf32>, vector<8x128xf32>, vector<328x128xf32> -> vector<328x128xf32>
    %18 = arith.addf %12, %17 : vector<328x128xf32>
    %c0_15 = arith.constant 0 : index
    %c23 = arith.constant 23 : index
    %c0_16 = arith.constant 0 : index
    %19 = vector.load %arg1[%c0_15, %c23, %c0_16] : memref<1x376x8xf32, #tpu.memory_space<vmem>>, vector<1x328x8xf32>
    %20 = vector.shape_cast %19 : vector<1x328x8xf32> to vector<328x8xf32>
    %c3 = arith.constant 3 : index
    %c0_17 = arith.constant 0 : index
    %c0_18 = arith.constant 0 : index
    %21 = vector.load %arg2[%c3, %c0_17, %c0_18] : memref<9x8x128xf32, #tpu.memory_space<vmem>>, vector<1x8x128xf32>
    %22 = vector.shape_cast %21 : vector<1x8x128xf32> to vector<8x128xf32>
    %cst_19 = arith.constant dense<0.000000e+00> : vector<328x128xf32>
    %23 = tpu.matmul %20, %22, %cst_19 {dimension_numbers = #tpu.dot_dimension_numbers<[1], [0], [0], [1], [0, 0, 1, 1], [], []>} : vector<328x8xf32>, vector<8x128xf32>, vector<328x128xf32> -> vector<328x128xf32>
    %24 = arith.addf %18, %23 : vector<328x128xf32>
    %c0_20 = arith.constant 0 : index
    %c24 = arith.constant 24 : index
    %c0_21 = arith.constant 0 : index
    %25 = vector.load %arg1[%c0_20, %c24, %c0_21] : memref<1x376x8xf32, #tpu.memory_space<vmem>>, vector<1x328x8xf32>
    %26 = vector.shape_cast %25 : vector<1x328x8xf32> to vector<328x8xf32>
    %c4 = arith.constant 4 : index
    %c0_22 = arith.constant 0 : index
    %c0_23 = arith.constant 0 : index
    %27 = vector.load %arg2[%c4, %c0_22, %c0_23] : memref<9x8x128xf32, #tpu.memory_space<vmem>>, vector<1x8x128xf32>
    %28 = vector.shape_cast %27 : vector<1x8x128xf32> to vector<8x128xf32>
    %cst_24 = arith.constant dense<0.000000e+00> : vector<328x128xf32>
    %29 = tpu.matmul %26, %28, %cst_24 {dimension_numbers = #tpu.dot_dimension_numbers<[1], [0], [0], [1], [0, 0, 1, 1], [], []>} : vector<328x8xf32>, vector<8x128xf32>, vector<328x128xf32> -> vector<328x128xf32>
    %30 = arith.addf %24, %29 : vector<328x128xf32>
    %c0_25 = arith.constant 0 : index
    %c25 = arith.constant 25 : index
    %c0_26 = arith.constant 0 : index
    %31 = vector.load %arg1[%c0_25, %c25, %c0_26] : memref<1x376x8xf32, #tpu.memory_space<vmem>>, vector<1x328x8xf32>
    %32 = vector.shape_cast %31 : vector<1x328x8xf32> to vector<328x8xf32>
    %c5_27 = arith.constant 5 : index
    %c0_28 = arith.constant 0 : index
    %c0_29 = arith.constant 0 : index
    %33 = vector.load %arg2[%c5_27, %c0_28, %c0_29] : memref<9x8x128xf32, #tpu.memory_space<vmem>>, vector<1x8x128xf32>
    %34 = vector.shape_cast %33 : vector<1x8x128xf32> to vector<8x128xf32>
    %cst_30 = arith.constant dense<0.000000e+00> : vector<328x128xf32>
    %35 = tpu.matmul %32, %34, %cst_30 {dimension_numbers = #tpu.dot_dimension_numbers<[1], [0], [0], [1], [0, 0, 1, 1], [], []>} : vector<328x8xf32>, vector<8x128xf32>, vector<328x128xf32> -> vector<328x128xf32>
    %36 = arith.addf %30, %35 : vector<328x128xf32>
    %c0_31 = arith.constant 0 : index
    %c41 = arith.constant 41 : index
    %c0_32 = arith.constant 0 : index
    %37 = vector.load %arg1[%c0_31, %c41, %c0_32] : memref<1x376x8xf32, #tpu.memory_space<vmem>>, vector<1x328x8xf32>
    %38 = vector.shape_cast %37 : vector<1x328x8xf32> to vector<328x8xf32>
    %c6_33 = arith.constant 6 : index
    %c0_34 = arith.constant 0 : index
    %c0_35 = arith.constant 0 : index
    %39 = vector.load %arg2[%c6_33, %c0_34, %c0_35] : memref<9x8x128xf32, #tpu.memory_space<vmem>>, vector<1x8x128xf32>
    %40 = vector.shape_cast %39 : vector<1x8x128xf32> to vector<8x128xf32>
    %cst_36 = arith.constant dense<0.000000e+00> : vector<328x128xf32>
    %41 = tpu.matmul %38, %40, %cst_36 {dimension_numbers = #tpu.dot_dimension_numbers<[1], [0], [0], [1], [0, 0, 1, 1], [], []>} : vector<328x8xf32>, vector<8x128xf32>, vector<328x128xf32> -> vector<328x128xf32>
    %42 = arith.addf %36, %41 : vector<328x128xf32>
    %c0_37 = arith.constant 0 : index
    %c42 = arith.constant 42 : index
    %c0_38 = arith.constant 0 : index
    %43 = vector.load %arg1[%c0_37, %c42, %c0_38] : memref<1x376x8xf32, #tpu.memory_space<vmem>>, vector<1x328x8xf32>
    %44 = vector.shape_cast %43 : vector<1x328x8xf32> to vector<328x8xf32>
    %c7_39 = arith.constant 7 : index
    %c0_40 = arith.constant 0 : index
    %c0_41 = arith.constant 0 : index
    %45 = vector.load %arg2[%c7_39, %c0_40, %c0_41] : memref<9x8x128xf32, #tpu.memory_space<vmem>>, vector<1x8x128xf32>
    %46 = vector.shape_cast %45 : vector<1x8x128xf32> to vector<8x128xf32>
    %cst_42 = arith.constant dense<0.000000e+00> : vector<328x128xf32>
    %47 = tpu.matmul %44, %46, %cst_42 {dimension_numbers = #tpu.dot_dimension_numbers<[1], [0], [0], [1], [0, 0, 1, 1], [], []>} : vector<328x8xf32>, vector<8x128xf32>, vector<328x128xf32> -> vector<328x128xf32>
    %48 = arith.addf %42, %47 : vector<328x128xf32>
    %c0_43 = arith.constant 0 : index
    %c43 = arith.constant 43 : index
    %c0_44 = arith.constant 0 : index
    %49 = vector.load %arg1[%c0_43, %c43, %c0_44] : memref<1x376x8xf32, #tpu.memory_space<vmem>>, vector<1x328x8xf32>
    %50 = vector.shape_cast %49 : vector<1x328x8xf32> to vector<328x8xf32>
    %c8 = arith.constant 8 : index
    %c0_45 = arith.constant 0 : index
    %c0_46 = arith.constant 0 : index
    %51 = vector.load %arg2[%c8, %c0_45, %c0_46] : memref<9x8x128xf32, #tpu.memory_space<vmem>>, vector<1x8x128xf32>
    %52 = vector.shape_cast %51 : vector<1x8x128xf32> to vector<8x128xf32>
    %cst_47 = arith.constant dense<0.000000e+00> : vector<328x128xf32>
    %53 = tpu.matmul %50, %52, %cst_47 {dimension_numbers = #tpu.dot_dimension_numbers<[1], [0], [0], [1], [0, 0, 1, 1], [], []>} : vector<328x8xf32>, vector<8x128xf32>, vector<328x128xf32> -> vector<328x128xf32>
    %54 = arith.addf %48, %53 : vector<328x128xf32>
    %c0_48 = arith.constant 0 : index
    %c0_49 = arith.constant 0 : index
    %c0_50 = arith.constant 0 : index
    %55 = vector.load %arg4[%c0_48, %c0_49, %c0_50] : memref<1x328x128xf32, #tpu.memory_space<vmem>>, vector<1x328x128xf32>
    %56 = vector.shape_cast %55 : vector<1x328x128xf32> to vector<328x128xf32>
    %57 = vector.shape_cast %54 : vector<328x128xf32> to vector<1x328x128xf32>
    tpu.vector_store %arg4[%c0_48, %c0_49, %c0_50], %57 {strides = array<i32>} : memref<1x328x128xf32, #tpu.memory_space<vmem>>, vector<1x328x128xf32>,
    %c0_51 = arith.constant 0 : index
    %c0_52 = arith.constant 0 : index
    %58 = vector.load %arg3[%c0_51, %c0_52] : memref<328x128xf32, #tpu.memory_space<vmem>>, vector<328x128xf32>
    %59 = arith.mulf %54, %58 : vector<328x128xf32>
    %cst_53 = arith.constant dense<0.000000e+00> : vector<128xf32>
    %60 = vector.multi_reduction <add>, %59, %cst_53 [0] : vector<328x128xf32> to vector<128xf32>
    %61 = vector.shape_cast %60 : vector<128xf32> to vector<1x128xf32>
    %62 = arith.mulf %59, %59 : vector<328x128xf32>
    %cst_54 = arith.constant dense<0.000000e+00> : vector<128xf32>
    %63 = vector.multi_reduction <add>, %62, %cst_54 [0] : vector<328x128xf32> to vector<128xf32>
    %64 = vector.shape_cast %63 : vector<128xf32> to vector<1x128xf32>
    %65 = tpu.iota {dimensions = array<i32: 0>} : vector<8x128xi32>
    %c0_i32 = arith.constant 0 : i32
    %66 = vector.broadcast %c0_i32 : i32 to vector<8x128xi32>
    %67 = arith.cmpi eq, %65, %66 : vector<8x128xi32>
    %cst_55 = arith.constant 0.000000e+00 : f32
    %68 = vector.shape_cast %61 : vector<1x128xf32> to vector<1x128xf32>
    %69 = vector.broadcast %68 : vector<1x128xf32> to vector<8x128xf32>
    %70 = vector.broadcast %cst_55 : f32 to vector<8x128xf32>
    %71 = arith.select %67, %69, %70 : vector<8x128xi1>, vector<8x128xf32>
    %c1_i32 = arith.constant 1 : i32
    %72 = vector.broadcast %c1_i32 : i32 to vector<8x128xi32>
    %73 = arith.cmpi eq, %65, %72 : vector<8x128xi32>
    %cst_56 = arith.constant 0.000000e+00 : f32
    %74 = vector.shape_cast %64 : vector<1x128xf32> to vector<1x128xf32>
    %75 = vector.broadcast %74 : vector<1x128xf32> to vector<8x128xf32>
    %76 = vector.broadcast %cst_56 : f32 to vector<8x128xf32>
    %77 = arith.select %73, %75, %76 : vector<8x128xi1>, vector<8x128xf32>
    %78 = arith.addf %71, %77 : vector<8x128xf32>
    %c0_57 = arith.constant 0 : index
    %c0_58 = arith.constant 0 : index
    %c0_59 = arith.constant 0 : index
    %79 = vector.load %arg5[%c0_57, %c0_58, %c0_59] : memref<1x8x128xf32, #tpu.memory_space<vmem>>, vector<1x8x128xf32>
    %80 = vector.shape_cast %79 : vector<1x8x128xf32> to vector<8x128xf32>
    %81 = vector.shape_cast %78 : vector<8x128xf32> to vector<1x8x128xf32>
    tpu.vector_store %arg5[%c0_57, %c0_58, %c0_59], %81 {strides = array<i32>} : memref<1x8x128xf32, #tpu.memory_space<vmem>>, vector<1x8x128xf32>,
    return
  }
  func.func @transform_0(%arg0: i32) -> (i32, i32, i32) {
    %c0_i32 = arith.constant 0 : i32
    %c0_i32_0 = arith.constant 0 : i32
    %c0_i32_1 = arith.constant 0 : i32
    return %arg0, %c0_i32, %c0_i32_0 : i32, i32, i32
  }
  func.func @transform_1(%arg0: i32) -> (i32, i32, i32) {
    %c0_i32 = arith.constant 0 : i32
    %c0_i32_0 = arith.constant 0 : i32
    %c0_i32_1 = arith.constant 0 : i32
    %c0_i32_2 = arith.constant 0 : i32
    return %c0_i32, %c0_i32_0, %c0_i32_1 : i32, i32, i32
  }
  func.func @transform_2(%arg0: i32) -> (i32, i32) {
    %c0_i32 = arith.constant 0 : i32
    %c0_i32_0 = arith.constant 0 : i32
    %c0_i32_1 = arith.constant 0 : i32
    return %c0_i32, %c0_i32_0 : i32, i32
  }
  func.func @transform_3(%arg0: i32) -> (i32, i32, i32) {
    %c0_i32 = arith.constant 0 : i32
    %c0_i32_0 = arith.constant 0 : i32
    %c0_i32_1 = arith.constant 0 : i32
    return %arg0, %c0_i32, %c0_i32_0 : i32, i32, i32
  }
  func.func @transform_4(%arg0: i32) -> (i32, i32, i32) {
    %c0_i32 = arith.constant 0 : i32
    %c0_i32_0 = arith.constant 0 : i32
    %c0_i32_1 = arith.constant 0 : i32
    return %arg0, %c0_i32, %c0_i32_0 : i32, i32, i32
  }
}

module attributes {stable_mosaic.version = 11 : i64} {
  func.func @kernel(%arg0: i32, %arg1: memref<1x376x128xf32, #tpu.memory_space<vmem>>, %arg2: memref<9x128x128xf32, #tpu.memory_space<vmem>>, %arg3: memref<328x128xf32, #tpu.memory_space<vmem>>, %arg4: memref<1x328x128xf32, #tpu.memory_space<vmem>>, %arg5: memref<1x8x128xf32, #tpu.memory_space<vmem>>) attributes {dimension_semantics = [#tpu.dimension_semantics<parallel>], iteration_bounds = array<i64: 2>, scalar_prefetch = 0 : i64, scratch_operands = 0 : i64, tpu.core_type = #tpu.core_type<tc>, window_params = [{transform_indices = @transform_0, window_bounds = array<i64: 1, 376, 128>}, {pipeline_mode = #tpu.pipeline_mode<synchronous>, transform_indices = @transform_1, window_bounds = array<i64: 9, 128, 128>}, {pipeline_mode = #tpu.pipeline_mode<synchronous>, transform_indices = @transform_2, window_bounds = array<i64: 328, 128>}, {transform_indices = @transform_3, window_bounds = array<i64: 1, 328, 128>}, {transform_indices = @transform_4, window_bounds = array<i64: 1, 8, 128>}]} {
    %cst = arith.constant 0.000000e+00 : f32
    %0 = vector.broadcast %cst : f32 to vector<328x128xf32>
    %c0 = arith.constant 0 : index
    %c5 = arith.constant 5 : index
    %c0_0 = arith.constant 0 : index
    %1 = vector.load %arg1[%c0, %c5, %c0_0] : memref<1x376x128xf32, #tpu.memory_space<vmem>>, vector<1x328x128xf32>
    %2 = vector.shape_cast %1 : vector<1x328x128xf32> to vector<328x128xf32>
    %c0_1 = arith.constant 0 : index
    %c0_2 = arith.constant 0 : index
    %c0_3 = arith.constant 0 : index
    %3 = vector.load %arg2[%c0_1, %c0_2, %c0_3] : memref<9x128x128xf32, #tpu.memory_space<vmem>>, vector<1x128x128xf32>
    %4 = vector.shape_cast %3 : vector<1x128x128xf32> to vector<128x128xf32>
    %cst_4 = arith.constant dense<0.000000e+00> : vector<328x128xf32>
    %5 = tpu.matmul %2, %4, %cst_4 {dimension_numbers = #tpu.dot_dimension_numbers<[1], [0], [0], [1], [0, 0, 1, 1], [], []>} : vector<328x128xf32>, vector<128x128xf32>, vector<328x128xf32> -> vector<328x128xf32>
    %6 = arith.addf %0, %5 : vector<328x128xf32>
    %c0_5 = arith.constant 0 : index
    %c6 = arith.constant 6 : index
    %c0_6 = arith.constant 0 : index
    %7 = vector.load %arg1[%c0_5, %c6, %c0_6] : memref<1x376x128xf32, #tpu.memory_space<vmem>>, vector<1x328x128xf32>
    %8 = vector.shape_cast %7 : vector<1x328x128xf32> to vector<328x128xf32>
    %c1 = arith.constant 1 : index
    %c0_7 = arith.constant 0 : index
    %c0_8 = arith.constant 0 : index
    %9 = vector.load %arg2[%c1, %c0_7, %c0_8] : memref<9x128x128xf32, #tpu.memory_space<vmem>>, vector<1x128x128xf32>
    %10 = vector.shape_cast %9 : vector<1x128x128xf32> to vector<128x128xf32>
    %cst_9 = arith.constant dense<0.000000e+00> : vector<328x128xf32>
    %11 = tpu.matmul %8, %10, %cst_9 {dimension_numbers = #tpu.dot_dimension_numbers<[1], [0], [0], [1], [0, 0, 1, 1], [], []>} : vector<328x128xf32>, vector<128x128xf32>, vector<328x128xf32> -> vector<328x128xf32>
    %12 = arith.addf %6, %11 : vector<328x128xf32>
    %c0_10 = arith.constant 0 : index
    %c7 = arith.constant 7 : index
    %c0_11 = arith.constant 0 : index
    %13 = vector.load %arg1[%c0_10, %c7, %c0_11] : memref<1x376x128xf32, #tpu.memory_space<vmem>>, vector<1x328x128xf32>
    %14 = vector.shape_cast %13 : vector<1x328x128xf32> to vector<328x128xf32>
    %c2 = arith.constant 2 : index
    %c0_12 = arith.constant 0 : index
    %c0_13 = arith.constant 0 : index
    %15 = vector.load %arg2[%c2, %c0_12, %c0_13] : memref<9x128x128xf32, #tpu.memory_space<vmem>>, vector<1x128x128xf32>
    %16 = vector.shape_cast %15 : vector<1x128x128xf32> to vector<128x128xf32>
    %cst_14 = arith.constant dense<0.000000e+00> : vector<328x128xf32>
    %17 = tpu.matmul %14, %16, %cst_14 {dimension_numbers = #tpu.dot_dimension_numbers<[1], [0], [0], [1], [0, 0, 1, 1], [], []>} : vector<328x128xf32>, vector<128x128xf32>, vector<328x128xf32> -> vector<328x128xf32>
    %18 = arith.addf %12, %17 : vector<328x128xf32>
    %c0_15 = arith.constant 0 : index
    %c23 = arith.constant 23 : index
    %c0_16 = arith.constant 0 : index
    %19 = vector.load %arg1[%c0_15, %c23, %c0_16] : memref<1x376x128xf32, #tpu.memory_space<vmem>>, vector<1x328x128xf32>
    %20 = vector.shape_cast %19 : vector<1x328x128xf32> to vector<328x128xf32>
    %c3 = arith.constant 3 : index
    %c0_17 = arith.constant 0 : index
    %c0_18 = arith.constant 0 : index
    %21 = vector.load %arg2[%c3, %c0_17, %c0_18] : memref<9x128x128xf32, #tpu.memory_space<vmem>>, vector<1x128x128xf32>
    %22 = vector.shape_cast %21 : vector<1x128x128xf32> to vector<128x128xf32>
    %cst_19 = arith.constant dense<0.000000e+00> : vector<328x128xf32>
    %23 = tpu.matmul %20, %22, %cst_19 {dimension_numbers = #tpu.dot_dimension_numbers<[1], [0], [0], [1], [0, 0, 1, 1], [], []>} : vector<328x128xf32>, vector<128x128xf32>, vector<328x128xf32> -> vector<328x128xf32>
    %24 = arith.addf %18, %23 : vector<328x128xf32>
    %c0_20 = arith.constant 0 : index
    %c24 = arith.constant 24 : index
    %c0_21 = arith.constant 0 : index
    %25 = vector.load %arg1[%c0_20, %c24, %c0_21] : memref<1x376x128xf32, #tpu.memory_space<vmem>>, vector<1x328x128xf32>
    %26 = vector.shape_cast %25 : vector<1x328x128xf32> to vector<328x128xf32>
    %c4 = arith.constant 4 : index
    %c0_22 = arith.constant 0 : index
    %c0_23 = arith.constant 0 : index
    %27 = vector.load %arg2[%c4, %c0_22, %c0_23] : memref<9x128x128xf32, #tpu.memory_space<vmem>>, vector<1x128x128xf32>
    %28 = vector.shape_cast %27 : vector<1x128x128xf32> to vector<128x128xf32>
    %cst_24 = arith.constant dense<0.000000e+00> : vector<328x128xf32>
    %29 = tpu.matmul %26, %28, %cst_24 {dimension_numbers = #tpu.dot_dimension_numbers<[1], [0], [0], [1], [0, 0, 1, 1], [], []>} : vector<328x128xf32>, vector<128x128xf32>, vector<328x128xf32> -> vector<328x128xf32>
    %30 = arith.addf %24, %29 : vector<328x128xf32>
    %c0_25 = arith.constant 0 : index
    %c25 = arith.constant 25 : index
    %c0_26 = arith.constant 0 : index
    %31 = vector.load %arg1[%c0_25, %c25, %c0_26] : memref<1x376x128xf32, #tpu.memory_space<vmem>>, vector<1x328x128xf32>
    %32 = vector.shape_cast %31 : vector<1x328x128xf32> to vector<328x128xf32>
    %c5_27 = arith.constant 5 : index
    %c0_28 = arith.constant 0 : index
    %c0_29 = arith.constant 0 : index
    %33 = vector.load %arg2[%c5_27, %c0_28, %c0_29] : memref<9x128x128xf32, #tpu.memory_space<vmem>>, vector<1x128x128xf32>
    %34 = vector.shape_cast %33 : vector<1x128x128xf32> to vector<128x128xf32>
    %cst_30 = arith.constant dense<0.000000e+00> : vector<328x128xf32>
    %35 = tpu.matmul %32, %34, %cst_30 {dimension_numbers = #tpu.dot_dimension_numbers<[1], [0], [0], [1], [0, 0, 1, 1], [], []>} : vector<328x128xf32>, vector<128x128xf32>, vector<328x128xf32> -> vector<328x128xf32>
    %36 = arith.addf %30, %35 : vector<328x128xf32>
    %c0_31 = arith.constant 0 : index
    %c41 = arith.constant 41 : index
    %c0_32 = arith.constant 0 : index
    %37 = vector.load %arg1[%c0_31, %c41, %c0_32] : memref<1x376x128xf32, #tpu.memory_space<vmem>>, vector<1x328x128xf32>
    %38 = vector.shape_cast %37 : vector<1x328x128xf32> to vector<328x128xf32>
    %c6_33 = arith.constant 6 : index
    %c0_34 = arith.constant 0 : index
    %c0_35 = arith.constant 0 : index
    %39 = vector.load %arg2[%c6_33, %c0_34, %c0_35] : memref<9x128x128xf32, #tpu.memory_space<vmem>>, vector<1x128x128xf32>
    %40 = vector.shape_cast %39 : vector<1x128x128xf32> to vector<128x128xf32>
    %cst_36 = arith.constant dense<0.000000e+00> : vector<328x128xf32>
    %41 = tpu.matmul %38, %40, %cst_36 {dimension_numbers = #tpu.dot_dimension_numbers<[1], [0], [0], [1], [0, 0, 1, 1], [], []>} : vector<328x128xf32>, vector<128x128xf32>, vector<328x128xf32> -> vector<328x128xf32>
    %42 = arith.addf %36, %41 : vector<328x128xf32>
    %c0_37 = arith.constant 0 : index
    %c42 = arith.constant 42 : index
    %c0_38 = arith.constant 0 : index
    %43 = vector.load %arg1[%c0_37, %c42, %c0_38] : memref<1x376x128xf32, #tpu.memory_space<vmem>>, vector<1x328x128xf32>
    %44 = vector.shape_cast %43 : vector<1x328x128xf32> to vector<328x128xf32>
    %c7_39 = arith.constant 7 : index
    %c0_40 = arith.constant 0 : index
    %c0_41 = arith.constant 0 : index
    %45 = vector.load %arg2[%c7_39, %c0_40, %c0_41] : memref<9x128x128xf32, #tpu.memory_space<vmem>>, vector<1x128x128xf32>
    %46 = vector.shape_cast %45 : vector<1x128x128xf32> to vector<128x128xf32>
    %cst_42 = arith.constant dense<0.000000e+00> : vector<328x128xf32>
    %47 = tpu.matmul %44, %46, %cst_42 {dimension_numbers = #tpu.dot_dimension_numbers<[1], [0], [0], [1], [0, 0, 1, 1], [], []>} : vector<328x128xf32>, vector<128x128xf32>, vector<328x128xf32> -> vector<328x128xf32>
    %48 = arith.addf %42, %47 : vector<328x128xf32>
    %c0_43 = arith.constant 0 : index
    %c43 = arith.constant 43 : index
    %c0_44 = arith.constant 0 : index
    %49 = vector.load %arg1[%c0_43, %c43, %c0_44] : memref<1x376x128xf32, #tpu.memory_space<vmem>>, vector<1x328x128xf32>
    %50 = vector.shape_cast %49 : vector<1x328x128xf32> to vector<328x128xf32>
    %c8 = arith.constant 8 : index
    %c0_45 = arith.constant 0 : index
    %c0_46 = arith.constant 0 : index
    %51 = vector.load %arg2[%c8, %c0_45, %c0_46] : memref<9x128x128xf32, #tpu.memory_space<vmem>>, vector<1x128x128xf32>
    %52 = vector.shape_cast %51 : vector<1x128x128xf32> to vector<128x128xf32>
    %cst_47 = arith.constant dense<0.000000e+00> : vector<328x128xf32>
    %53 = tpu.matmul %50, %52, %cst_47 {dimension_numbers = #tpu.dot_dimension_numbers<[1], [0], [0], [1], [0, 0, 1, 1], [], []>} : vector<328x128xf32>, vector<128x128xf32>, vector<328x128xf32> -> vector<328x128xf32>
    %54 = arith.addf %48, %53 : vector<328x128xf32>
    %c0_48 = arith.constant 0 : index
    %c0_49 = arith.constant 0 : index
    %c0_50 = arith.constant 0 : index
    %55 = vector.load %arg4[%c0_48, %c0_49, %c0_50] : memref<1x328x128xf32, #tpu.memory_space<vmem>>, vector<1x328x128xf32>
    %56 = vector.shape_cast %55 : vector<1x328x128xf32> to vector<328x128xf32>
    %57 = vector.shape_cast %54 : vector<328x128xf32> to vector<1x328x128xf32>
    tpu.vector_store %arg4[%c0_48, %c0_49, %c0_50], %57 {strides = array<i32>} : memref<1x328x128xf32, #tpu.memory_space<vmem>>, vector<1x328x128xf32>,
    %c0_51 = arith.constant 0 : index
    %c0_52 = arith.constant 0 : index
    %58 = vector.load %arg3[%c0_51, %c0_52] : memref<328x128xf32, #tpu.memory_space<vmem>>, vector<328x128xf32>
    %59 = arith.mulf %54, %58 : vector<328x128xf32>
    %cst_53 = arith.constant dense<0.000000e+00> : vector<128xf32>
    %60 = vector.multi_reduction <add>, %59, %cst_53 [0] : vector<328x128xf32> to vector<128xf32>
    %61 = vector.shape_cast %60 : vector<128xf32> to vector<1x128xf32>
    %62 = arith.mulf %59, %59 : vector<328x128xf32>
    %cst_54 = arith.constant dense<0.000000e+00> : vector<128xf32>
    %63 = vector.multi_reduction <add>, %62, %cst_54 [0] : vector<328x128xf32> to vector<128xf32>
    %64 = vector.shape_cast %63 : vector<128xf32> to vector<1x128xf32>
    %65 = tpu.iota {dimensions = array<i32: 0>} : vector<8x128xi32>
    %c0_i32 = arith.constant 0 : i32
    %66 = vector.broadcast %c0_i32 : i32 to vector<8x128xi32>
    %67 = arith.cmpi eq, %65, %66 : vector<8x128xi32>
    %cst_55 = arith.constant 0.000000e+00 : f32
    %68 = vector.shape_cast %61 : vector<1x128xf32> to vector<1x128xf32>
    %69 = vector.broadcast %68 : vector<1x128xf32> to vector<8x128xf32>
    %70 = vector.broadcast %cst_55 : f32 to vector<8x128xf32>
    %71 = arith.select %67, %69, %70 : vector<8x128xi1>, vector<8x128xf32>
    %c1_i32 = arith.constant 1 : i32
    %72 = vector.broadcast %c1_i32 : i32 to vector<8x128xi32>
    %73 = arith.cmpi eq, %65, %72 : vector<8x128xi32>
    %cst_56 = arith.constant 0.000000e+00 : f32
    %74 = vector.shape_cast %64 : vector<1x128xf32> to vector<1x128xf32>
    %75 = vector.broadcast %74 : vector<1x128xf32> to vector<8x128xf32>
    %76 = vector.broadcast %cst_56 : f32 to vector<8x128xf32>
    %77 = arith.select %73, %75, %76 : vector<8x128xi1>, vector<8x128xf32>
    %78 = arith.addf %71, %77 : vector<8x128xf32>
    %c0_57 = arith.constant 0 : index
    %c0_58 = arith.constant 0 : index
    %c0_59 = arith.constant 0 : index
    %79 = vector.load %arg5[%c0_57, %c0_58, %c0_59] : memref<1x8x128xf32, #tpu.memory_space<vmem>>, vector<1x8x128xf32>
    %80 = vector.shape_cast %79 : vector<1x8x128xf32> to vector<8x128xf32>
    %81 = vector.shape_cast %78 : vector<8x128xf32> to vector<1x8x128xf32>
    tpu.vector_store %arg5[%c0_57, %c0_58, %c0_59], %81 {strides = array<i32>} : memref<1x8x128xf32, #tpu.memory_space<vmem>>, vector<1x8x128xf32>,
    return
  }
  func.func @transform_0(%arg0: i32) -> (i32, i32, i32) {
    %c0_i32 = arith.constant 0 : i32
    %c0_i32_0 = arith.constant 0 : i32
    %c0_i32_1 = arith.constant 0 : i32
    return %arg0, %c0_i32, %c0_i32_0 : i32, i32, i32
  }
  func.func @transform_1(%arg0: i32) -> (i32, i32, i32) {
    %c0_i32 = arith.constant 0 : i32
    %c0_i32_0 = arith.constant 0 : i32
    %c0_i32_1 = arith.constant 0 : i32
    %c0_i32_2 = arith.constant 0 : i32
    return %c0_i32, %c0_i32_0, %c0_i32_1 : i32, i32, i32
  }
  func.func @transform_2(%arg0: i32) -> (i32, i32) {
    %c0_i32 = arith.constant 0 : i32
    %c0_i32_0 = arith.constant 0 : i32
    %c0_i32_1 = arith.constant 0 : i32
    return %c0_i32, %c0_i32_0 : i32, i32
  }
  func.func @transform_3(%arg0: i32) -> (i32, i32, i32) {
    %c0_i32 = arith.constant 0 : i32
    %c0_i32_0 = arith.constant 0 : i32
    %c0_i32_1 = arith.constant 0 : i32
    return %arg0, %c0_i32, %c0_i32_0 : i32, i32, i32
  }
  func.func @transform_4(%arg0: i32) -> (i32, i32, i32) {
    %c0_i32 = arith.constant 0 : i32
    %c0_i32_0 = arith.constant 0 : i32
    %c0_i32_1 = arith.constant 0 : i32
    return %arg0, %c0_i32, %c0_i32_0 : i32, i32, i32
  }
}

module attributes {stable_mosaic.version = 11 : i64} {
  func.func @kernel(%arg0: i32, %arg1: memref<1x8x8x128xf32, #tpu.memory_space<vmem>>, %arg2: memref<1x8x8x128xf32, #tpu.memory_space<vmem>>, %arg3: memref<1x8x8x128xf32, #tpu.memory_space<vmem>>, %arg4: memref<1x8x8x128xf32, #tpu.memory_space<vmem>>, %arg5: memref<1x1x1x128xf32, #tpu.memory_space<vmem>>, %arg6: memref<1x1x1x128xf32, #tpu.memory_space<vmem>>, %arg7: memref<1x8x8x128xf32, #tpu.memory_space<vmem>>, %arg8: memref<1x8x8x128xi32, #tpu.memory_space<vmem>>) attributes {dimension_semantics = [#tpu.dimension_semantics<parallel>], iteration_bounds = array<i64: 2>, scalar_prefetch = 0 : i64, scratch_operands = 0 : i64, tpu.core_type = #tpu.core_type<tc>, window_params = [{transform_indices = @transform_0, window_bounds = array<i64: 1, 8, 8, 128>}, {transform_indices = @transform_1, window_bounds = array<i64: 1, 8, 8, 128>}, {transform_indices = @transform_2, window_bounds = array<i64: 1, 8, 8, 128>}, {transform_indices = @transform_3, window_bounds = array<i64: 1, 8, 8, 128>}, {pipeline_mode = #tpu.pipeline_mode<synchronous>, transform_indices = @transform_4, window_bounds = array<i64: 1, 1, 1, 128>}, {pipeline_mode = #tpu.pipeline_mode<synchronous>, transform_indices = @transform_5, window_bounds = array<i64: 1, 1, 1, 128>}, {transform_indices = @transform_6, window_bounds = array<i64: 1, 8, 8, 128>}, {transform_indices = @transform_7, window_bounds = array<i64: 1, 8, 8, 128>}]} {
    %c0 = arith.constant 0 : index
    %c0_0 = arith.constant 0 : index
    %c0_1 = arith.constant 0 : index
    %c0_2 = arith.constant 0 : index
    %0 = vector.load %arg5[%c0, %c0_0, %c0_1, %c0_2] : memref<1x1x1x128xf32, #tpu.memory_space<vmem>>, vector<1x1x1x128xf32>
    %c0_3 = arith.constant 0 : index
    %c0_4 = arith.constant 0 : index
    %c0_5 = arith.constant 0 : index
    %c0_6 = arith.constant 0 : index
    %1 = vector.load %arg6[%c0_3, %c0_4, %c0_5, %c0_6] : memref<1x1x1x128xf32, #tpu.memory_space<vmem>>, vector<1x1x1x128xf32>
    %c0_7 = arith.constant 0 : index
    %c0_8 = arith.constant 0 : index
    %c0_9 = arith.constant 0 : index
    %c0_10 = arith.constant 0 : index
    %2 = vector.load %arg1[%c0_7, %c0_8, %c0_9, %c0_10] : memref<1x8x8x128xf32, #tpu.memory_space<vmem>>, vector<1x8x8x128xf32>
    %3 = vector.broadcast %0 : vector<1x1x1x128xf32> to vector<1x8x8x128xf32>
    %4 = arith.mulf %2, %3 : vector<1x8x8x128xf32>
    %5 = vector.broadcast %1 : vector<1x1x1x128xf32> to vector<1x8x8x128xf32>
    %6 = arith.addf %4, %5 : vector<1x8x8x128xf32>
    %cst = arith.constant 0.000000e+00 : f32
    %7 = vector.broadcast %cst : f32 to vector<1x8x8x128xf32>
    %8 = arith.maximumf %6, %7 : vector<1x8x8x128xf32>
    %c0_i32 = arith.constant 0 : i32
    %9 = vector.broadcast %c0_i32 : i32 to vector<1x8x8x128xi32>
    %c0_i32_11 = arith.constant 0 : i32
    %10 = vector.broadcast %c0_i32_11 : i32 to vector<1x8x8x128xi32>
    %c0_12 = arith.constant 0 : index
    %c0_13 = arith.constant 0 : index
    %c0_14 = arith.constant 0 : index
    %c0_15 = arith.constant 0 : index
    %11 = vector.load %arg2[%c0_12, %c0_13, %c0_14, %c0_15] : memref<1x8x8x128xf32, #tpu.memory_space<vmem>>, vector<1x8x8x128xf32>
    %12 = vector.broadcast %0 : vector<1x1x1x128xf32> to vector<1x8x8x128xf32>
    %13 = arith.mulf %11, %12 : vector<1x8x8x128xf32>
    %14 = vector.broadcast %1 : vector<1x1x1x128xf32> to vector<1x8x8x128xf32>
    %15 = arith.addf %13, %14 : vector<1x8x8x128xf32>
    %cst_16 = arith.constant 0.000000e+00 : f32
    %16 = vector.broadcast %cst_16 : f32 to vector<1x8x8x128xf32>
    %17 = arith.maximumf %15, %16 : vector<1x8x8x128xf32>
    %18 = arith.cmpf ogt, %17, %8 : vector<1x8x8x128xf32>
    %19 = arith.select %18, %17, %8 : vector<1x8x8x128xi1>, vector<1x8x8x128xf32>
    %c0_i32_17 = arith.constant 0 : i32
    %20 = vector.broadcast %c0_i32_17 : i32 to vector<1x8x8x128xi32>
    %21 = arith.select %18, %20, %9 : vector<1x8x8x128xi1>, vector<1x8x8x128xi32>
    %c1_i32 = arith.constant 1 : i32
    %22 = vector.broadcast %c1_i32 : i32 to vector<1x8x8x128xi32>
    %23 = arith.select %18, %22, %10 : vector<1x8x8x128xi1>, vector<1x8x8x128xi32>
    %c0_18 = arith.constant 0 : index
    %c0_19 = arith.constant 0 : index
    %c0_20 = arith.constant 0 : index
    %c0_21 = arith.constant 0 : index
    %24 = vector.load %arg3[%c0_18, %c0_19, %c0_20, %c0_21] : memref<1x8x8x128xf32, #tpu.memory_space<vmem>>, vector<1x8x8x128xf32>
    %25 = vector.broadcast %0 : vector<1x1x1x128xf32> to vector<1x8x8x128xf32>
    %26 = arith.mulf %24, %25 : vector<1x8x8x128xf32>
    %27 = vector.broadcast %1 : vector<1x1x1x128xf32> to vector<1x8x8x128xf32>
    %28 = arith.addf %26, %27 : vector<1x8x8x128xf32>
    %cst_22 = arith.constant 0.000000e+00 : f32
    %29 = vector.broadcast %cst_22 : f32 to vector<1x8x8x128xf32>
    %30 = arith.maximumf %28, %29 : vector<1x8x8x128xf32>
    %31 = arith.cmpf ogt, %30, %19 : vector<1x8x8x128xf32>
    %32 = arith.select %31, %30, %19 : vector<1x8x8x128xi1>, vector<1x8x8x128xf32>
    %c1_i32_23 = arith.constant 1 : i32
    %33 = vector.broadcast %c1_i32_23 : i32 to vector<1x8x8x128xi32>
    %34 = arith.select %31, %33, %21 : vector<1x8x8x128xi1>, vector<1x8x8x128xi32>
    %c0_i32_24 = arith.constant 0 : i32
    %35 = vector.broadcast %c0_i32_24 : i32 to vector<1x8x8x128xi32>
    %36 = arith.select %31, %35, %23 : vector<1x8x8x128xi1>, vector<1x8x8x128xi32>
    %c0_25 = arith.constant 0 : index
    %c0_26 = arith.constant 0 : index
    %c0_27 = arith.constant 0 : index
    %c0_28 = arith.constant 0 : index
    %37 = vector.load %arg4[%c0_25, %c0_26, %c0_27, %c0_28] : memref<1x8x8x128xf32, #tpu.memory_space<vmem>>, vector<1x8x8x128xf32>
    %38 = vector.broadcast %0 : vector<1x1x1x128xf32> to vector<1x8x8x128xf32>
    %39 = arith.mulf %37, %38 : vector<1x8x8x128xf32>
    %40 = vector.broadcast %1 : vector<1x1x1x128xf32> to vector<1x8x8x128xf32>
    %41 = arith.addf %39, %40 : vector<1x8x8x128xf32>
    %cst_29 = arith.constant 0.000000e+00 : f32
    %42 = vector.broadcast %cst_29 : f32 to vector<1x8x8x128xf32>
    %43 = arith.maximumf %41, %42 : vector<1x8x8x128xf32>
    %44 = arith.cmpf ogt, %43, %32 : vector<1x8x8x128xf32>
    %45 = arith.select %44, %43, %32 : vector<1x8x8x128xi1>, vector<1x8x8x128xf32>
    %c1_i32_30 = arith.constant 1 : i32
    %46 = vector.broadcast %c1_i32_30 : i32 to vector<1x8x8x128xi32>
    %47 = arith.select %44, %46, %34 : vector<1x8x8x128xi1>, vector<1x8x8x128xi32>
    %c1_i32_31 = arith.constant 1 : i32
    %48 = vector.broadcast %c1_i32_31 : i32 to vector<1x8x8x128xi32>
    %49 = arith.select %44, %48, %36 : vector<1x8x8x128xi1>, vector<1x8x8x128xi32>
    %50 = tpu.iota {dimensions = array<i32: 1>} : vector<1x8x8x128xi32>
    %51 = tpu.iota {dimensions = array<i32: 2>} : vector<1x8x8x128xi32>
    %c0_32 = arith.constant 0 : index
    %c0_33 = arith.constant 0 : index
    %c0_34 = arith.constant 0 : index
    %c0_35 = arith.constant 0 : index
    %52 = vector.load %arg7[%c0_32, %c0_33, %c0_34, %c0_35] : memref<1x8x8x128xf32, #tpu.memory_space<vmem>>, vector<1x8x8x128xf32>
    tpu.vector_store %arg7[%c0_32, %c0_33, %c0_34, %c0_35], %45 {strides = array<i32>} : memref<1x8x8x128xf32, #tpu.memory_space<vmem>>, vector<1x8x8x128xf32>,
    %c2_i32 = arith.constant 2 : i32
    %53 = vector.broadcast %c2_i32 : i32 to vector<1x8x8x128xi32>
    %54 = arith.muli %53, %50 : vector<1x8x8x128xi32>
    %55 = arith.addi %54, %47 : vector<1x8x8x128xi32>
    %c16_i32 = arith.constant 16 : i32
    %56 = vector.broadcast %c16_i32 : i32 to vector<1x8x8x128xi32>
    %57 = arith.muli %55, %56 : vector<1x8x8x128xi32>
    %c2_i32_36 = arith.constant 2 : i32
    %58 = vector.broadcast %c2_i32_36 : i32 to vector<1x8x8x128xi32>
    %59 = arith.muli %58, %51 : vector<1x8x8x128xi32>
    %60 = arith.addi %59, %49 : vector<1x8x8x128xi32>
    %61 = arith.addi %57, %60 : vector<1x8x8x128xi32>
    %c0_37 = arith.constant 0 : index
    %c0_38 = arith.constant 0 : index
    %c0_39 = arith.constant 0 : index
    %c0_40 = arith.constant 0 : index
    %62 = vector.load %arg8[%c0_37, %c0_38, %c0_39, %c0_40] : memref<1x8x8x128xi32, #tpu.memory_space<vmem>>, vector<1x8x8x128xi32>
    tpu.vector_store %arg8[%c0_37, %c0_38, %c0_39, %c0_40], %61 {strides = array<i32>} : memref<1x8x8x128xi32, #tpu.memory_space<vmem>>, vector<1x8x8x128xi32>,
    return
  }
  func.func @transform_0(%arg0: i32) -> (i32, i32, i32, i32) {
    %c0_i32 = arith.constant 0 : i32
    %c0_i32_0 = arith.constant 0 : i32
    %c0_i32_1 = arith.constant 0 : i32
    %c0_i32_2 = arith.constant 0 : i32
    return %arg0, %c0_i32, %c0_i32_0, %c0_i32_1 : i32, i32, i32, i32
  }
  func.func @transform_1(%arg0: i32) -> (i32, i32, i32, i32) {
    %c0_i32 = arith.constant 0 : i32
    %c0_i32_0 = arith.constant 0 : i32
    %c0_i32_1 = arith.constant 0 : i32
    %c0_i32_2 = arith.constant 0 : i32
    return %arg0, %c0_i32, %c0_i32_0, %c0_i32_1 : i32, i32, i32, i32
  }
  func.func @transform_2(%arg0: i32) -> (i32, i32, i32, i32) {
    %c0_i32 = arith.constant 0 : i32
    %c0_i32_0 = arith.constant 0 : i32
    %c0_i32_1 = arith.constant 0 : i32
    %c0_i32_2 = arith.constant 0 : i32
    return %arg0, %c0_i32, %c0_i32_0, %c0_i32_1 : i32, i32, i32, i32
  }
  func.func @transform_3(%arg0: i32) -> (i32, i32, i32, i32) {
    %c0_i32 = arith.constant 0 : i32
    %c0_i32_0 = arith.constant 0 : i32
    %c0_i32_1 = arith.constant 0 : i32
    %c0_i32_2 = arith.constant 0 : i32
    return %arg0, %c0_i32, %c0_i32_0, %c0_i32_1 : i32, i32, i32, i32
  }
  func.func @transform_4(%arg0: i32) -> (i32, i32, i32, i32) {
    %c0_i32 = arith.constant 0 : i32
    %c0_i32_0 = arith.constant 0 : i32
    %c0_i32_1 = arith.constant 0 : i32
    %c0_i32_2 = arith.constant 0 : i32
    %c0_i32_3 = arith.constant 0 : i32
    return %c0_i32, %c0_i32_0, %c0_i32_1, %c0_i32_2 : i32, i32, i32, i32
  }
  func.func @transform_5(%arg0: i32) -> (i32, i32, i32, i32) {
    %c0_i32 = arith.constant 0 : i32
    %c0_i32_0 = arith.constant 0 : i32
    %c0_i32_1 = arith.constant 0 : i32
    %c0_i32_2 = arith.constant 0 : i32
    %c0_i32_3 = arith.constant 0 : i32
    return %c0_i32, %c0_i32_0, %c0_i32_1, %c0_i32_2 : i32, i32, i32, i32
  }
  func.func @transform_6(%arg0: i32) -> (i32, i32, i32, i32) {
    %c0_i32 = arith.constant 0 : i32
    %c0_i32_0 = arith.constant 0 : i32
    %c0_i32_1 = arith.constant 0 : i32
    %c0_i32_2 = arith.constant 0 : i32
    return %arg0, %c0_i32, %c0_i32_0, %c0_i32_1 : i32, i32, i32, i32
  }
  func.func @transform_7(%arg0: i32) -> (i32, i32, i32, i32) {
    %c0_i32 = arith.constant 0 : i32
    %c0_i32_0 = arith.constant 0 : i32
    %c0_i32_1 = arith.constant 0 : i32
    %c0_i32_2 = arith.constant 0 : i32
    return %arg0, %c0_i32, %c0_i32_0, %c0_i32_1 : i32, i32, i32, i32
  }
}

</mosaic_0001>

<bundles_post_ra>
// kernel: _encoder_forward_impl.7
= control target key start
LH: loop header
LB: loop body
LE: loop exit
PB: predicated region body
PF: predicated region fallthrough
CT: control target
= control target key end

     0   :  { %s616_s15 = smov 0   ;;  %s940_s0 = inlined_call_operand.vmem [shape: f32[2,328,128], index: 0, kind: input, shape index: {}]   ;;  %s941_s1 = inlined_call_operand.vmem [shape: f32[1,128], index: 1, kind: input, shape index: {}]   ;;  %s942_s2 = inlined_call_operand.vmem [shape: f32[1,128], index: 2, kind: input, shape index: {}]   ;;  %s943_s3 = inlined_call_operand.vmem [shape: f32[328,128], index: 3, kind: input, shape index: {}]   ;;  %s944_s4 = inlined_call_operand.vmem [shape: f32[2,376,128], index: 4, kind: output, shape index: {}]  }
   0x1 LB: > { %s560_s16 = sadd.s32 4294967295, %s588_s15   ;;  %p564_p0 = scmp.ge.s32.totalorder %s588_s15, 1  ;;  %s588_s15 = sphi %s616_s15, %s14_s15  }
   0x2   : > { %p162_p1 = scmp.lt.s32.totalorder %s588_s15, 3 }
   0x4   : > { %p163_p2 = pnand %p564_p0, %p162_p1 }
   0x5   : > { %p188_p3 = scmp.lt.s32.totalorder (!%p163_p2), %s560_s16, 1  ;;  %v632_v0 = vld [vmem:[%s941_s1] ss:$0 sm:$0xff] (!%p163_p2)  ;;  %v590_v1 = vmov (!%p163_p2), 0.0   ;;  %v377_v20 = vld [vmem:[%s943_s3 + $0x8] sm:$0xff] (!%p163_p2)  ;;  %v378_v23 = vld [vmem:[%s943_s3 + $0x10] sm:$0xff] (!%p163_p2) }
   0x6   : > { %166 = sbr.rel (%p163_p2) target bundleno = 72 (0x48), region = 36  ;;  %v648_v2 = vld [vmem:[%s942_s2] ss:$0 sm:$0xff] (!%p163_p2)  ;;  %v379_v25 = vld [vmem:[%s943_s3 + $0x18] sm:$0xff] (!%p163_p2)  ;;  %v381_v33 = vld [vmem:[%s943_s3 + $0x28] sm:$0xff] (!%p163_p2) }
   0x7   : > { %v376_v18 = vld [vmem:[%s943_s3] sm:$0xff] (!%p163_p2)  ;;  %v382_v35 = vld [vmem:[%s943_s3 + $0x30] sm:$0xff] (!%p163_p2)  ;;  %v383_v36 = vld [vmem:[%s943_s3 + $0x38] sm:$0xff] (!%p163_p2) }
   0x8   : > { %v380_v27 = vld [vmem:[%s943_s3 + $0x20] sm:$0xff] (!%p163_p2) }
   0xd   : > { %s946_s16 = smov (!%p188_p3, %s560_s16), 1 }
   0xe   : > { %s572_s17 = smul.u32 376, %s946_s16 }
   0xf   : > { %s571_s18 = smul.u32 328, %s946_s16 }
  0x10   : > { %s627_s21 = scalar_lea.vmem %s944_s4, %s572_s17 }
  0x11   : > { %458 = vst [vmem:[%s627_s21] sm:$0xff] %v590_v1  ;;  %459 = vst [vmem:[%s627_s21 + $0x8] sm:$0xff] %v590_v1  ;;  %s643_s26 = scalar_lea.vmem %s940_s0, %s571_s18 }
  0x12   : > { %460 = vst [vmem:[%s627_s21 + $0x10] sm:$0xff] %v590_v1  ;;  %502 = vst [vmem:[%s627_s21 + $0x160] sm:$0xff] %v590_v1  ;;  %v198_v3 = vld [vmem:[%s643_s26] sm:$0xff]  ;;  %v199_v4 = vld [vmem:[%s643_s26 + $0x8] sm:$0xff] }
  0x13   : > { %503 = vst [vmem:[%s627_s21 + $0x168] sm:$0xff] %v590_v1  ;;  %504 = vst [vmem:[%s627_s21 + $0x170] sm:$0xff] %v590_v1  ;;  %v200_v5 = vld [vmem:[%s643_s26 + $0x10] sm:$0xff]  ;;  %v246_v6 = vmul.f32 %v632_v0, %v198_v3  ;;  %v247_v7 = vmul.f32 %v632_v0, %v199_v4  ;;  %v201_v9 = vld [vmem:[%s643_s26 + $0x18] sm:$0xff] }
  0x14   : > { %v248_v8 = vmul.f32 %v632_v0, %v200_v5  ;;  %v202_v10 = vld [vmem:[%s643_s26 + $0x20] sm:$0xff]  ;;  %v203_v11 = vld [vmem:[%s643_s26 + $0x28] sm:$0xff]  ;;  %v249_v12 = vmul.f32 %v632_v0, %v201_v9  ;;  %v204_v15 = vld [vmem:[%s643_s26 + $0x30] sm:$0xff] }
  0x15   : > { %v250_v13 = vmul.f32 %v632_v0, %v202_v10  ;;  %v251_v14 = vmul.f32 %v632_v0, %v203_v11  ;;  %v205_v16 = vld [vmem:[%s643_s26 + $0x38] sm:$0xff]  ;;  %v294_v17 = vadd.f32 %v648_v2, %v246_v6  ;;  %v295_v19 = vadd.f32 %v648_v2, %v247_v7  ;;  %v206_v41 = vld [vmem:[%s643_s26 + $0x40] sm:$0xff]  ;;  %v207_v42 = vld [vmem:[%s643_s26 + $0x48] sm:$0xff] }
  0x16   : > { %v296_v21 = vadd.f32 %v648_v2, %v248_v8  ;;  %v252_v22 = vmul.f32 %v632_v0, %v204_v15  ;;  %v297_v24 = vadd.f32 %v648_v2, %v249_v12  ;;  %v253_v29 = vmul.f32 %v632_v0, %v205_v16  ;;  %v208_v43 = vld [vmem:[%s643_s26 + $0x50] sm:$0xff]  ;;  %v209_v48 = vld [vmem:[%s643_s26 + $0x58] sm:$0xff]  ;;  %v210_v49 = vld [vmem:[%s643_s26 + $0x60] sm:$0xff] }
  0x17   : > { %v298_v26 = vadd.f32 %v648_v2, %v250_v13  ;;  %v299_v28 = vadd.f32 %v648_v2, %v251_v14  ;;  %v335_v30 = vmax.f32 %v294_v17, 0.0  ;;  %v336_v31 = vmax.f32 %v295_v19, 0.0  ;;  %v211_v50 = vld [vmem:[%s643_s26 + $0x68] sm:$0xff]  ;;  %v212_v55 = vld [vmem:[%s643_s26 + $0x70] sm:$0xff]  ;;  %v213_v60 = vld [vmem:[%s643_s26 + $0x78] sm:$0xff] }
  0x18   : > { %v337_v32 = vmax.f32 %v296_v21, 0.0  ;;  %v300_v34 = vadd.f32 %v648_v2, %v252_v22  ;;  %v338_v37 = vmax.f32 %v297_v24, 0.0  ;;  %v301_v40 = vadd.f32 %v648_v2, %v253_v29  ;;  %v384_v4 = vld [vmem:[%s943_s3 + $0x40] sm:$0xff]  ;;  %v385_v6 = vld [vmem:[%s943_s3 + $0x48] sm:$0xff]  ;;  %v386_v9 = vld [vmem:[%s943_s3 + $0x50] sm:$0xff] }
  0x19   : > { %v339_v38 = vmax.f32 %v298_v26, 0.0  ;;  %v340_v39 = vmax.f32 %v299_v28, 0.0  ;;  %v417_v44 = vmul.f32 %v376_v18, %v335_v30  ;;  %v418_v45 = vmul.f32 %v377_v20, %v336_v31  ;;  %v387_v11 = vld [vmem:[%s943_s3 + $0x58] sm:$0xff]  ;;  %v388_v13 = vld [vmem:[%s943_s3 + $0x60] sm:$0xff]  ;;  %v389_v19 = vld [vmem:[%s943_s3 + $0x68] sm:$0xff] }
  0x1a   : > { %v419_v46 = vmul.f32 %v378_v23, %v337_v32  ;;  %v341_v47 = vmax.f32 %v300_v34, 0.0  ;;  %v420_v51 = vmul.f32 %v379_v25, %v338_v37  ;;  %v342_v54 = vmax.f32 %v301_v40, 0.0  ;;  %v390_v21 = vld [vmem:[%s943_s3 + $0x70] sm:$0xff]  ;;  %v391_v22 = vld [vmem:[%s943_s3 + $0x78] sm:$0xff]  ;;  %v215_v28 = vld [vmem:[%s643_s26 + $0x88] sm:$0xff] }
  0x1b   : > { %v421_v52 = vmul.f32 %v380_v27, %v339_v38  ;;  %v422_v53 = vmul.f32 %v381_v33, %v340_v39  ;;  %461 = vst [vmem:[%s627_s21 + $0x18] sm:$0xff] %v417_v44  ;;  %462 = vst [vmem:[%s627_s21 + $0x20] sm:$0xff] %v418_v45  ;;  %v254_v57 = vmul.f32 %v632_v0, %v206_v41  ;;  %v214_v27 = vld [vmem:[%s643_s26 + $0x80] sm:$0xff]  ;;  %v216_v29 = vld [vmem:[%s643_s26 + $0x90] sm:$0xff] }
  0x1c   : > { %463 = vst [vmem:[%s627_s21 + $0x28] sm:$0xff] %v419_v46  ;;  %v423_v56 = vmul.f32 %v382_v35, %v341_v47  ;;  %v255_v58 = vmul.f32 %v632_v0, %v207_v42  ;;  %v256_v59 = vmul.f32 %v632_v0, %v208_v43  ;;  %464 = vst [vmem:[%s627_s21 + $0x30] sm:$0xff] %v420_v51  ;;  %v217_v34 = vld [vmem:[%s643_s26 + $0x98] sm:$0xff]  ;;  %v218_v35 = vld [vmem:[%s643_s26 + $0xa0] sm:$0xff] }
  0x1d   : > { %465 = vst [vmem:[%s627_s21 + $0x38] sm:$0xff] %v421_v52  ;;  %466 = vst [vmem:[%s627_s21 + $0x40] sm:$0xff] %v422_v53  ;;  %v424_v61 = vmul.f32 %v383_v36, %v342_v54  ;;  %v257_v62 = vmul.f32 %v632_v0, %v209_v48  ;;  %v258_v63 = vmul.f32 %v632_v0, %v210_v49  ;;  %v219_v36 = vld [vmem:[%s643_s26 + $0xa8] sm:$0xff]  ;;  %v220_v41 = vld [vmem:[%s643_s26 + $0xb0] sm:$0xff] }
  0x1e   : > { %v259_v1 = vmul.f32 %v632_v0, %v211_v50  ;;  %467 = vst [vmem:[%s627_s21 + $0x48] sm:$0xff] %v423_v56  ;;  %v302_v3 = vadd.f32 %v648_v2, %v254_v57  ;;  %v303_v5 = vadd.f32 %v648_v2, %v255_v58  ;;  %v304_v7 = vadd.f32 %v648_v2, %v256_v59  ;;  %v221_v46 = vld [vmem:[%s643_s26 + $0xb8] sm:$0xff]  ;;  %v392_v52 = vld [vmem:[%s943_s3 + $0x80] sm:$0xff]  ;;  %v393_v54 = vld [vmem:[%s943_s3 + $0x88] sm:$0xff] }
  0x1f   : > { %v260_v8 = vmul.f32 %v632_v0, %v212_v55  ;;  %468 = vst [vmem:[%s627_s21 + $0x50] sm:$0xff] %v424_v61  ;;  %v305_v10 = vadd.f32 %v648_v2, %v257_v62  ;;  %v306_v12 = vadd.f32 %v648_v2, %v258_v63  ;;  %v261_v15 = vmul.f32 %v632_v0, %v213_v60  ;;  %v394_v57 = vld [vmem:[%s943_s3 + $0x90] sm:$0xff]  ;;  %v395_v59 = vld [vmem:[%s943_s3 + $0x98] sm:$0xff]  ;;  %v396_v61 = vld [vmem:[%s943_s3 + $0xa0] sm:$0xff] }
  0x20   : > { %v307_v14 = vadd.f32 %v648_v2, %v259_v1  ;;  %v343_v16 = vmax.f32 %v302_v3, 0.0  ;;  %v344_v17 = vmax.f32 %v303_v5, 0.0  ;;  %v345_v18 = vmax.f32 %v304_v7, 0.0  ;;  %v397_v5 = vld [vmem:[%s943_s3 + $0xa8] sm:$0xff]  ;;  %v398_v7 = vld [vmem:[%s943_s3 + $0xb0] sm:$0xff] }
  0x21   : > { %v308_v20 = vadd.f32 %v648_v2, %v260_v8  ;;  %v346_v23 = vmax.f32 %v305_v10, 0.0  ;;  %v347_v24 = vmax.f32 %v306_v12, 0.0  ;;  %v309_v26 = vadd.f32 %v648_v2, %v261_v15  ;;  %v399_v8 = vld [vmem:[%s943_s3 + $0xb8] sm:$0xff]  ;;  %v224_v15 = vld [vmem:[%s643_s26 + $0xd0] sm:$0xff] }
  0x22   : > { %v348_v25 = vmax.f32 %v307_v14, 0.0  ;;  %v425_v30 = vmul.f32 %v384_v4, %v343_v16  ;;  %v426_v31 = vmul.f32 %v385_v6, %v344_v17  ;;  %v427_v32 = vmul.f32 %v386_v9, %v345_v18  ;;  %v223_v14 = vld [vmem:[%s643_s26 + $0xc8] sm:$0xff] }
  0x23   : > { %v349_v33 = vmax.f32 %v308_v20, 0.0  ;;  %v428_v37 = vmul.f32 %v387_v11, %v346_v23  ;;  %v429_v38 = vmul.f32 %v388_v13, %v347_v24  ;;  %v350_v40 = vmax.f32 %v309_v26, 0.0  ;;  %v222_v13 = vld [vmem:[%s643_s26 + $0xc0] sm:$0xff]  ;;  %v225_v20 = vld [vmem:[%s643_s26 + $0xd8] sm:$0xff] }
  0x24   : > { %v430_v39 = vmul.f32 %v389_v19, %v348_v25  ;;  %469 = vst [vmem:[%s627_s21 + $0x58] sm:$0xff] %v425_v30  ;;  %470 = vst [vmem:[%s627_s21 + $0x60] sm:$0xff] %v426_v31  ;;  %v262_v43 = vmul.f32 %v632_v0, %v214_v27  ;;  %v263_v44 = vmul.f32 %v632_v0, %v215_v28  ;;  %v228_v27 = vld [vmem:[%s643_s26 + $0xf0] sm:$0xff] }
  0x25   : > { %471 = vst [vmem:[%s627_s21 + $0x68] sm:$0xff] %v427_v32  ;;  %v431_v42 = vmul.f32 %v390_v21, %v349_v33  ;;  %v264_v45 = vmul.f32 %v632_v0, %v216_v29  ;;  %472 = vst [vmem:[%s627_s21 + $0x70] sm:$0xff] %v428_v37  ;;  %v432_v47 = vmul.f32 %v391_v22, %v350_v40  ;;  %v226_v21 = vld [vmem:[%s643_s26 + $0xe0] sm:$0xff]  ;;  %v227_v22 = vld [vmem:[%s643_s26 + $0xe8] sm:$0xff] }
  0x26   : > { %473 = vst [vmem:[%s627_s21 + $0x78] sm:$0xff] %v429_v38  ;;  %474 = vst [vmem:[%s627_s21 + $0x80] sm:$0xff] %v430_v39  ;;  %v265_v48 = vmul.f32 %v632_v0, %v217_v34  ;;  %v266_v49 = vmul.f32 %v632_v0, %v218_v35  ;;  %v267_v50 = vmul.f32 %v632_v0, %v219_v36  ;;  %v229_v32 = vld [vmem:[%s643_s26 + $0xf8] sm:$0xff]  ;;  %v400_v38 = vld [vmem:[%s943_s3 + $0xc0] sm:$0xff] }
  0x27   : > { %475 = vst [vmem:[%s627_s21 + $0x88] sm:$0xff] %v431_v42  ;;  %v310_v51 = vadd.f32 %v648_v2, %v262_v43  ;;  %v311_v53 = vadd.f32 %v648_v2, %v263_v44  ;;  %v312_v55 = vadd.f32 %v648_v2, %v264_v45  ;;  %v268_v56 = vmul.f32 %v632_v0, %v220_v41  ;;  %v401_v40 = vld [vmem:[%s943_s3 + $0xc8] sm:$0xff]  ;;  %v402_v43 = vld [vmem:[%s943_s3 + $0xd0] sm:$0xff]  ;;  %v403_v45 = vld [vmem:[%s943_s3 + $0xd8] sm:$0xff] }
  0x28   : > { %476 = vst [vmem:[%s627_s21 + $0x90] sm:$0xff] %v432_v47  ;;  %v313_v58 = vadd.f32 %v648_v2, %v265_v48  ;;  %v314_v60 = vadd.f32 %v648_v2, %v266_v49  ;;  %v315_v62 = vadd.f32 %v648_v2, %v267_v50  ;;  %v269_v63 = vmul.f32 %v632_v0, %v221_v46  ;;  %v404_v47 = vld [vmem:[%s943_s3 + $0xe0] sm:$0xff] }
  0x29   : > { %v351_v1 = vmax.f32 %v310_v51, 0.0  ;;  %v352_v3 = vmax.f32 %v311_v53, 0.0  ;;  %v353_v4 = vmax.f32 %v312_v55, 0.0  ;;  %v316_v6 = vadd.f32 %v648_v2, %v268_v56  ;;  %v405_v53 = vld [vmem:[%s943_s3 + $0xe8] sm:$0xff]  ;;  %v406_v55 = vld [vmem:[%s943_s3 + $0xf0] sm:$0xff]  ;;  %v407_v56 = vld [vmem:[%s943_s3 + $0xf8] sm:$0xff] }
  0x2a   : > { %v354_v9 = vmax.f32 %v313_v58, 0.0  ;;  %v355_v10 = vmax.f32 %v314_v60, 0.0  ;;  %v356_v11 = vmax.f32 %v315_v62, 0.0  ;;  %v317_v12 = vadd.f32 %v648_v2, %v269_v63  ;;  %v231_v62 = vld [vmem:[%s643_s26 + $0x108] sm:$0xff]  ;;  %v232_v63 = vld [vmem:[%s643_s26 + $0x110] sm:$0xff] }
  0x2b   : > { %v433_v16 = vmul.f32 %v392_v52, %v351_v1  ;;  %v434_v17 = vmul.f32 %v393_v54, %v352_v3  ;;  %v435_v18 = vmul.f32 %v394_v57, %v353_v4  ;;  %v357_v19 = vmax.f32 %v316_v6, 0.0  ;;  %v233_v6 = vld [vmem:[%s643_s26 + $0x118] sm:$0xff] }
  0x2c   : > { %v436_v23 = vmul.f32 %v395_v59, %v354_v9  ;;  %v437_v24 = vmul.f32 %v396_v61, %v355_v10  ;;  %v438_v25 = vmul.f32 %v397_v5, %v356_v11  ;;  %v358_v26 = vmax.f32 %v317_v12, 0.0  ;;  %v230_v61 = vld [vmem:[%s643_s26 + $0x100] sm:$0xff] }
  0x2d   : > { %477 = vst [vmem:[%s627_s21 + $0x98] sm:$0xff] %v433_v16  ;;  %478 = vst [vmem:[%s627_s21 + $0xa0] sm:$0xff] %v434_v17  ;;  %v439_v28 = vmul.f32 %v398_v7, %v357_v19  ;;  %v270_v29 = vmul.f32 %v632_v0, %v222_v13  ;;  %v271_v30 = vmul.f32 %v632_v0, %v223_v14  ;;  %v234_v7 = vld [vmem:[%s643_s26 + $0x120] sm:$0xff]  ;;  %v236_v13 = vld [vmem:[%s643_s26 + $0x130] sm:$0xff] }
  0x2e   : > { %479 = vst [vmem:[%s627_s21 + $0xa8] sm:$0xff] %v435_v18  ;;  %v272_v31 = vmul.f32 %v632_v0, %v224_v15  ;;  %480 = vst [vmem:[%s627_s21 + $0xb0] sm:$0xff] %v436_v23  ;;  %v440_v33 = vmul.f32 %v399_v8, %v358_v26  ;;  %v273_v34 = vmul.f32 %v632_v0, %v225_v20  ;;  %v235_v8 = vld [vmem:[%s643_s26 + $0x128] sm:$0xff]  ;;  %v237_v18 = vld [vmem:[%s643_s26 + $0x138] sm:$0xff] }
  0x2f   : > { %481 = vst [vmem:[%s627_s21 + $0xb8] sm:$0xff] %v437_v24  ;;  %482 = vst [vmem:[%s627_s21 + $0xc0] sm:$0xff] %v438_v25  ;;  %v274_v35 = vmul.f32 %v632_v0, %v226_v21  ;;  %v275_v36 = vmul.f32 %v632_v0, %v227_v22  ;;  %v318_v37 = vadd.f32 %v648_v2, %v270_v29  ;;  %v410_v29 = vld [vmem:[%s943_s3 + $0x110] sm:$0xff] }
  0x30   : > { %483 = vst [vmem:[%s627_s21 + $0xc8] sm:$0xff] %v439_v28  ;;  %v319_v39 = vadd.f32 %v648_v2, %v271_v30  ;;  %v320_v41 = vadd.f32 %v648_v2, %v272_v31  ;;  %v276_v42 = vmul.f32 %v632_v0, %v228_v27  ;;  %484 = vst [vmem:[%s627_s21 + $0xd0] sm:$0xff] %v440_v33  ;;  %v408_v27 = vld [vmem:[%s943_s3 + $0x100] sm:$0xff]  ;;  %v409_v28 = vld [vmem:[%s943_s3 + $0x108] sm:$0xff] }
  0x31   : > { %v321_v44 = vadd.f32 %v648_v2, %v273_v34  ;;  %v322_v46 = vadd.f32 %v648_v2, %v274_v35  ;;  %v323_v48 = vadd.f32 %v648_v2, %v275_v36  ;;  %v277_v49 = vmul.f32 %v632_v0, %v229_v32 }
  0x32   : > { %v359_v50 = vmax.f32 %v318_v37, 0.0  ;;  %v360_v51 = vmax.f32 %v319_v39, 0.0  ;;  %v361_v52 = vmax.f32 %v320_v41, 0.0  ;;  %v324_v54 = vadd.f32 %v648_v2, %v276_v42  ;;  %v411_v37 = vld [vmem:[%s943_s3 + $0x118] sm:$0xff]  ;;  %v413_v39 = vld [vmem:[%s943_s3 + $0x128] sm:$0xff] }
  0x33   : > { %v362_v57 = vmax.f32 %v321_v44, 0.0  ;;  %v363_v58 = vmax.f32 %v322_v46, 0.0  ;;  %v364_v59 = vmax.f32 %v323_v48, 0.0  ;;  %v325_v60 = vadd.f32 %v648_v2, %v277_v49  ;;  %v414_v44 = vld [vmem:[%s943_s3 + $0x130] sm:$0xff]  ;;  %v238_v46 = vld [vmem:[%s643_s26 + $0x140] sm:$0xff] }
  0x34   : > { %v441_v1 = vmul.f32 %v400_v38, %v359_v50  ;;  %v442_v3 = vmul.f32 %v401_v40, %v360_v51  ;;  %v443_v4 = vmul.f32 %v402_v43, %v361_v52  ;;  %v365_v5 = vmax.f32 %v324_v54, 0.0  ;;  %v412_v38 = vld [vmem:[%s943_s3 + $0x120] sm:$0xff]  ;;  %v415_v51 = vld [vmem:[%s943_s3 + $0x138] sm:$0xff] }
  0x35   : > { %v444_v9 = vmul.f32 %v403_v45, %v362_v57  ;;  %v445_v10 = vmul.f32 %v404_v47, %v363_v58  ;;  %v446_v11 = vmul.f32 %v405_v53, %v364_v59  ;;  %v366_v12 = vmax.f32 %v325_v60, 0.0  ;;  %v416_v60 = vld [vmem:[%s943_s3 + $0x140] sm:$0xff] }
  0x36   : > { %485 = vst [vmem:[%s627_s21 + $0xd8] sm:$0xff] %v441_v1  ;;  %486 = vst [vmem:[%s627_s21 + $0xe0] sm:$0xff] %v442_v3  ;;  %v447_v14 = vmul.f32 %v406_v55, %v365_v5  ;;  %v278_v15 = vmul.f32 %v632_v0, %v230_v61  ;;  %v279_v16 = vmul.f32 %v632_v0, %v231_v62 }
  0x37   : > { %487 = vst [vmem:[%s627_s21 + $0xe8] sm:$0xff] %v443_v4  ;;  %v280_v17 = vmul.f32 %v632_v0, %v232_v63  ;;  %488 = vst [vmem:[%s627_s21 + $0xf0] sm:$0xff] %v444_v9  ;;  %v448_v19 = vmul.f32 %v407_v56, %v366_v12  ;;  %v281_v20 = vmul.f32 %v632_v0, %v233_v6 }
  0x38   : > { %489 = vst [vmem:[%s627_s21 + $0xf8] sm:$0xff] %v445_v10  ;;  %490 = vst [vmem:[%s627_s21 + $0x100] sm:$0xff] %v446_v11  ;;  %v282_v21 = vmul.f32 %v632_v0, %v234_v7  ;;  %v283_v22 = vmul.f32 %v632_v0, %v235_v8  ;;  %v326_v23 = vadd.f32 %v648_v2, %v278_v15 }
  0x39   : > { %491 = vst [vmem:[%s627_s21 + $0x108] sm:$0xff] %v447_v14  ;;  %v327_v24 = vadd.f32 %v648_v2, %v279_v16  ;;  %v328_v25 = vadd.f32 %v648_v2, %v280_v17  ;;  %v284_v26 = vmul.f32 %v632_v0, %v236_v13  ;;  %492 = vst [vmem:[%s627_s21 + $0x110] sm:$0xff] %v448_v19 }
  0x3a   : > { %v329_v30 = vadd.f32 %v648_v2, %v281_v20  ;;  %v330_v31 = vadd.f32 %v648_v2, %v282_v21  ;;  %v331_v32 = vadd.f32 %v648_v2, %v283_v22  ;;  %v285_v33 = vmul.f32 %v632_v0, %v237_v18 }
  0x3b   : > { %v367_v34 = vmax.f32 %v326_v23, 0.0  ;;  %v368_v35 = vmax.f32 %v327_v24, 0.0  ;;  %v369_v36 = vmax.f32 %v328_v25, 0.0  ;;  %v332_v40 = vadd.f32 %v648_v2, %v284_v26 }
  0x3c   : > { %v370_v41 = vmax.f32 %v329_v30, 0.0  ;;  %v371_v42 = vmax.f32 %v330_v31, 0.0  ;;  %v372_v43 = vmax.f32 %v331_v32, 0.0  ;;  %v333_v45 = vadd.f32 %v648_v2, %v285_v33 }
  0x3d   : > { %v449_v47 = vmul.f32 %v408_v27, %v367_v34  ;;  %v450_v48 = vmul.f32 %v409_v28, %v368_v35  ;;  %v451_v49 = vmul.f32 %v410_v29, %v369_v36  ;;  %v373_v50 = vmax.f32 %v332_v40, 0.0 }
  0x3e   : > { %v452_v52 = vmul.f32 %v411_v37, %v370_v41  ;;  %v453_v53 = vmul.f32 %v412_v38, %v371_v42  ;;  %v454_v54 = vmul.f32 %v413_v39, %v372_v43  ;;  %v374_v55 = vmax.f32 %v333_v45, 0.0 }
  0x3f   : > { %493 = vst [vmem:[%s627_s21 + $0x118] sm:$0xff] %v449_v47  ;;  %494 = vst [vmem:[%s627_s21 + $0x120] sm:$0xff] %v450_v48  ;;  %v455_v56 = vmul.f32 %v414_v44, %v373_v50  ;;  %v286_v57 = vmul.f32 %v632_v0, %v238_v46 }
  0x40   : > { %495 = vst [vmem:[%s627_s21 + $0x128] sm:$0xff] %v451_v49  ;;  %496 = vst [vmem:[%s627_s21 + $0x130] sm:$0xff] %v452_v52  ;;  %v456_v58 = vmul.f32 %v415_v51, %v374_v55 }
  0x41   : > { %497 = vst [vmem:[%s627_s21 + $0x138] sm:$0xff] %v453_v53  ;;  %498 = vst [vmem:[%s627_s21 + $0x140] sm:$0xff] %v454_v54  ;;  %v334_v59 = vadd.f32 %v648_v2, %v286_v57 }
  0x42   : > { %499 = vst [vmem:[%s627_s21 + $0x148] sm:$0xff] %v455_v56  ;;  %500 = vst [vmem:[%s627_s21 + $0x150] sm:$0xff] %v456_v58 }
  0x43   : > { %v375_v61 = vmax.f32 %v334_v59, 0.0 }
  0x45   : > { %v457_v62 = vmul.f32 %v416_v60, %v375_v61 }
  0x47   : > { %501 = vst [vmem:[%s627_s21 + $0x158] sm:$0xff] %v457_v62 }
  0x48 PF: > { %s14_s15 = sadd.s32 1, %s588_s15  }
  0x49   : > { %p11_p4 = scmp.ge.s32.totalorder %s14_s15, 4  }
  0x4b   :  { %13 = sbr.rel (!%p11_p4) target bundleno = 1 (0x1), region = 66 }

// kernel: _encoder_forward_impl.11
= control target key start
LH: loop header
LB: loop body
LE: loop exit
PB: predicated region body
PF: predicated region fallthrough
CT: control target
= control target key end

     0   :  { %s841_s24 = smov 0   ;;  %s1262_s0 = inlined_call_operand.vmem [shape: f32[2,8,8,128], index: 0, kind: input, shape index: {}]   ;;  %s1263_s1 = inlined_call_operand.vmem [shape: f32[2,8,8,128], index: 1, kind: input, shape index: {}]   ;;  %s1264_s2 = inlined_call_operand.vmem [shape: f32[2,8,8,128], index: 2, kind: input, shape index: {}]   ;;  %s1265_s3 = inlined_call_operand.vmem [shape: f32[2,8,8,128], index: 3, kind: input, shape index: {}]   ;;  %s1266_s4 = inlined_call_operand.vmem [shape: f32[1,1,1,128], index: 4, kind: input, shape index: {}]   ;;  %s1267_s5 = inlined_call_operand.vmem [shape: f32[1,1,1,128], index: 5, kind: input, shape index: {}]   ;;  %s1268_s6 = inlined_call_operand.vmem [shape: f32[2,8,8,128], index: 6, kind: output, shape index: {0}]   ;;  %s1269_s7 = inlined_call_operand.vmem [shape: s32[2,8,8,128], index: 7, kind: output, shape index: {1}]  }
   0x1 LB: > { %s756_s25 = sadd.s32 4294967295, %s798_s24   ;;  %p760_p0 = scmp.ge.s32.totalorder %s798_s24, 1  ;;  %s798_s24 = sphi %s841_s24, %s18_s24  }
   0x2   : > { %p270_p1 = scmp.lt.s32.totalorder %s798_s24, 3 }
   0x4   : > { %p271_p2 = pnand %p760_p0, %p270_p1 }
   0x5   : > { %p322_p3 = scmp.lt.s32.totalorder (!%p271_p2), %s756_s25, 1  ;;  %v582_v0 = vlaneseq (!%p271_p2)  ;;  %v854_v1 = vld [vmem:[%s1266_s4] ss:$0 sm:$0xff] (!%p271_p2) }
   0x6   : > { %274 = sbr.rel (%p271_p2) target bundleno = 81 (0x51), region = 44  ;;  %v871_v3 = vld [vmem:[%s1267_s5] ss:$0 sm:$0xff] (!%p271_p2) }
   0x7   : > { %v583_v2 = vshrl.u32 (!%p271_p2), %v582_v0, 7 }
   0x9   : > { %v899_v18 = vmul.u32 (!%p271_p2), 2, %v583_v2 }
   0xd   : > { %s1335_s25 = smov (!%p322_p3, %s756_s25), 1 }
   0xe   : > { %s849_s26 = sshll.u32 %s1335_s25, 6 }
   0xf   : > { %s860_s8 = scalar_lea.vmem %s1262_s0, %s849_s26  ;;  %s866_s11 = scalar_lea.vmem %s1263_s1, %s849_s26 }
  0x10   : > { %s877_s16 = scalar_lea.vmem %s1264_s2, %s849_s26  ;;  %s883_s19 = scalar_lea.vmem %s1265_s3, %s849_s26  ;;  %v354_v4 = vld [vmem:[%s860_s8] sm:$0xff]  ;;  %v355_v6 = vld [vmem:[%s860_s8 + $0x8] sm:$0xff]  ;;  %v356_v27 = vld [vmem:[%s860_s8 + $0x10] sm:$0xff] }
  0x11   : > { %v398_v5 = vld [vmem:[%s866_s11] sm:$0xff]  ;;  %v368_v7 = vmul.f32 %v854_v1, %v354_v4  ;;  %v369_v11 = vmul.f32 %v854_v1, %v355_v6  ;;  %v399_v12 = vld [vmem:[%s866_s11 + $0x8] sm:$0xff]  ;;  %v400_v28 = vld [vmem:[%s866_s11 + $0x10] sm:$0xff]  ;;  %v370_v40 = vmul.f32 %v854_v1, %v356_v27  ;;  %s940_s22 = scalar_lea.vmem %s1268_s6, %s849_s26  ;;  %s1157_s27 = scalar_lea.vmem %s1269_s7, %s849_s26 }
  0x12   : > { %v406_v8 = vmul.f32 %v854_v1, %v398_v5  ;;  %v454_v9 = vld [vmem:[%s877_s16] sm:$0xff]  ;;  %v407_v15 = vmul.f32 %v854_v1, %v399_v12  ;;  %v455_v16 = vld [vmem:[%s877_s16 + $0x8] sm:$0xff]  ;;  %v456_v33 = vld [vmem:[%s877_s16 + $0x10] sm:$0xff]  ;;  %v408_v41 = vmul.f32 %v854_v1, %v400_v28 }
  0x13   : > { %v518_v10 = vld [vmem:[%s883_s19] sm:$0xff]  ;;  %v462_v13 = vmul.f32 %v854_v1, %v454_v9  ;;  %v519_v17 = vld [vmem:[%s883_s19 + $0x8] sm:$0xff]  ;;  %v382_v19 = vadd.f32 %v871_v3, %v368_v7  ;;  %v383_v21 = vadd.f32 %v871_v3, %v369_v11  ;;  %v463_v22 = vmul.f32 %v854_v1, %v455_v16  ;;  %v520_v42 = vld [vmem:[%s883_s19 + $0x10] sm:$0xff] }
  0x14   : > { %v526_v14 = vmul.f32 %v854_v1, %v518_v10  ;;  %v414_v20 = vadd.f32 %v871_v3, %v406_v8  ;;  %v415_v25 = vadd.f32 %v871_v3, %v407_v15  ;;  %v527_v26 = vmul.f32 %v854_v1, %v519_v17  ;;  %v357_v55 = vld [vmem:[%s860_s8 + $0x18] sm:$0xff]  ;;  %v358_v5 = vld [vmem:[%s860_s8 + $0x20] sm:$0xff] }
  0x15   : > { %v470_v23 = vadd.f32 %v871_v3, %v462_v13  ;;  %v390_v29 = vmax.f32 %v382_v19, 0.0  ;;  %v391_v31 = vmax.f32 %v383_v21, 0.0  ;;  %v471_v32 = vadd.f32 %v871_v3, %v463_v22  ;;  %v401_v56 = vld [vmem:[%s866_s11 + $0x18] sm:$0xff]  ;;  %v402_v10 = vld [vmem:[%s866_s11 + $0x20] sm:$0xff] }
  0x16   : > { %v534_v24 = vadd.f32 %v871_v3, %v526_v14  ;;  %v422_v30 = vmax.f32 %v414_v20, 0.0  ;;  %v423_v36 = vmax.f32 %v415_v25, 0.0  ;;  %v535_v37 = vadd.f32 %v871_v3, %v527_v26  ;;  %v457_v61 = vld [vmem:[%s877_s16 + $0x18] sm:$0xff]  ;;  %v522_v25 = vld [vmem:[%s883_s19 + $0x20] sm:$0xff] }
  0x17   : > { %v478_v34 = vmax.f32 %v470_v23, 0.0  ;;  %v479_v39 = vmax.f32 %v471_v32, 0.0  ;;  %v464_v46 = vmul.f32 %v854_v1, %v456_v33  ;;  %v384_v49 = vadd.f32 %v871_v3, %v370_v40  ;;  %v521_v62 = vld [vmem:[%s883_s19 + $0x18] sm:$0xff] }
  0x18   : > { %v542_v35 = vmax.f32 %v534_v24, 0.0  ;;  %vm914_vm0 = vcmp.gt.f32.partialorder %v422_v30, %v390_v29  ;;  %vm923_vm1 = vcmp.gt.f32.partialorder %v423_v36, %v391_v31  ;;  %v543_v45 = vmax.f32 %v535_v37, 0.0  ;;  %v458_v24 = vld [vmem:[%s877_s16 + $0x20] sm:$0xff] }
  0x19   : > { %v438_v43 = vsel %vm914_vm0, %v422_v30, %v390_v29  ;;  %v439_v48 = vsel %vm923_vm1, %v423_v36, %v391_v31  ;;  %v416_v50 = vadd.f32 %v871_v3, %v408_v41  ;;  %v472_v53 = vadd.f32 %v871_v3, %v464_v46  ;;  %v359_v30 = vld [vmem:[%s860_s8 + $0x28] sm:$0xff] }
  0x1a   : > { %vm928_vm2 = vcmp.gt.f32.partialorder %v478_v34, %v438_v43  ;;  %vm944_vm3 = vcmp.gt.f32.partialorder %v479_v39, %v439_v48  ;;  %v528_v54 = vmul.f32 %v854_v1, %v520_v42  ;;  %v392_v59 = vmax.f32 %v384_v49, 0.0  ;;  %v403_v31 = vld [vmem:[%s866_s11 + $0x28] sm:$0xff] }
  0x1b   : > { %v494_v51 = vsel %vm928_vm2, %v478_v34, %v438_v43  ;;  %v495_v58 = vsel %vm944_vm3, %v479_v39, %v439_v48  ;;  %v424_v60 = vmax.f32 %v416_v50, 0.0  ;;  %v480_v2 = vmax.f32 %v472_v53, 0.0  ;;  %v459_v36 = vld [vmem:[%s877_s16 + $0x28] sm:$0xff] }
  0x1c   : > { %vm952_vm4 = vcmp.gt.f32.partialorder %v542_v35, %v494_v51  ;;  %vm962_vm5 = vcmp.gt.f32.partialorder %v543_v45, %v495_v58  ;;  %v536_v4 = vadd.f32 %v871_v3, %v528_v54  ;;  %v371_v8 = vmul.f32 %v854_v1, %v357_v55 }
  0x1d   : > { %v558_v63 = vsel %vm952_vm4, %v542_v35, %v494_v51  ;;  %v559_v6 = vsel %vm962_vm5, %v543_v45, %v495_v58  ;;  %vm971_vm6 = vcmp.gt.f32.partialorder %v424_v60, %v392_v59  ;;  %v409_v9 = vmul.f32 %v854_v1, %v401_v56  ;;  %v523_v58 = vld [vmem:[%s883_s19 + $0x28] sm:$0xff] }
  0x1e   : > { %584 = vst [vmem:[%s940_s22] sm:$0xff] %v558_v63  ;;  %585 = vst [vmem:[%s940_s22 + $0x8] sm:$0xff] %v559_v6  ;;  %v440_v11 = vsel %vm971_vm6, %v424_v60, %v392_v59  ;;  %v544_v12 = vmax.f32 %v536_v4, 0.0  ;;  %v465_v13 = vmul.f32 %v854_v1, %v457_v61  ;;  %v529_v14 = vmul.f32 %v854_v1, %v521_v62  ;;  %v360_v59 = vld [vmem:[%s860_s8 + $0x30] sm:$0xff] }
  0x1f   : > { %vm983_vm7 = vcmp.gt.f32.partialorder %v480_v2, %v440_v11  ;;  %v385_v16 = vadd.f32 %v871_v3, %v371_v8  ;;  %v417_v17 = vadd.f32 %v871_v3, %v409_v9  ;;  %v372_v19 = vmul.f32 %v854_v1, %v358_v5  ;;  %v404_v60 = vld [vmem:[%s866_s11 + $0x30] sm:$0xff] }
  0x20   : > { %v496_v20 = vsel %vm983_vm7, %v480_v2, %v440_v11  ;;  %v473_v21 = vadd.f32 %v871_v3, %v465_v13  ;;  %v537_v22 = vadd.f32 %v871_v3, %v529_v14  ;;  %v410_v23 = vmul.f32 %v854_v1, %v402_v10  ;;  %v460_v4 = vld [vmem:[%s877_s16 + $0x30] sm:$0xff] }
  0x21   : > { %vm997_vm8 = vcmp.gt.f32.partialorder %v544_v12, %v496_v20  ;;  %v393_v27 = vmax.f32 %v385_v16, 0.0  ;;  %v425_v28 = vmax.f32 %v417_v17, 0.0  ;;  %v386_v29 = vadd.f32 %v871_v3, %v372_v19 }
  0x22   : > { %v560_v32 = vsel %vm997_vm8, %v544_v12, %v496_v20  ;;  %v481_v33 = vmax.f32 %v473_v21, 0.0  ;;  %v545_v34 = vmax.f32 %v537_v22, 0.0  ;;  %v418_v35 = vadd.f32 %v871_v3, %v410_v23  ;;  %v524_v20 = vld [vmem:[%s883_s19 + $0x30] sm:$0xff] }
  0x23   : > { %586 = vst [vmem:[%s940_s22 + $0x10] sm:$0xff] %v560_v32  ;;  %vm1009_vm9 = vcmp.gt.f32.partialorder %v425_v28, %v393_v27  ;;  %v394_v39 = vmax.f32 %v386_v29, 0.0  ;;  %v466_v40 = vmul.f32 %v854_v1, %v458_v24  ;;  %v530_v41 = vmul.f32 %v854_v1, %v522_v25  ;;  %v361_v25 = vld [vmem:[%s860_s8 + $0x38] sm:$0xff] }
  0x24   : > { %v441_v42 = vsel %vm1009_vm9, %v425_v28, %v393_v27  ;;  %v426_v43 = vmax.f32 %v418_v35, 0.0  ;;  %v373_v45 = vmul.f32 %v854_v1, %v359_v30  ;;  %v411_v46 = vmul.f32 %v854_v1, %v403_v31  ;;  %v405_v27 = vld [vmem:[%s866_s11 + $0x38] sm:$0xff] }
  0x25   : > { %vm1019_vm10 = vcmp.gt.f32.partialorder %v481_v33, %v441_v42  ;;  %v474_v49 = vadd.f32 %v871_v3, %v466_v40  ;;  %v538_v50 = vadd.f32 %v871_v3, %v530_v41  ;;  %v467_v51 = vmul.f32 %v854_v1, %v459_v36  ;;  %v461_v32 = vld [vmem:[%s877_s16 + $0x38] sm:$0xff] }
  0x26   : > { %v497_v53 = vsel %vm1019_vm10, %v481_v33, %v441_v42  ;;  %vm1028_vm11 = vcmp.gt.f32.partialorder %v426_v43, %v394_v39  ;;  %v387_v55 = vadd.f32 %v871_v3, %v373_v45  ;;  %v419_v56 = vadd.f32 %v871_v3, %v411_v46  ;;  %v525_v33 = vld [vmem:[%s883_s19 + $0x38] sm:$0xff] }
  0x27   : > { %vm1037_vm12 = vcmp.gt.f32.partialorder %v545_v34, %v497_v53  ;;  %v442_v62 = vsel %vm1028_vm11, %v426_v43, %v394_v39  ;;  %v482_v63 = vmax.f32 %v474_v49, 0.0  ;;  %v546_v2 = vmax.f32 %v538_v50, 0.0 }
  0x28   : > { %v561_v5 = vsel %vm1037_vm12, %v545_v34, %v497_v53  ;;  %v395_v6 = vmax.f32 %v387_v55, 0.0  ;;  %v427_v8 = vmax.f32 %v419_v56, 0.0  ;;  %v475_v9 = vadd.f32 %v871_v3, %v467_v51 }
  0x29   : > { %587 = vst [vmem:[%s940_s22 + $0x18] sm:$0xff] %v561_v5  ;;  %vm1048_vm13 = vcmp.gt.f32.partialorder %v482_v63, %v442_v62  ;;  %v1306_v10 = vmov 0  ;;  %v531_v11 = vmul.f32 %v854_v1, %v523_v58  ;;  %v374_v12 = vmul.f32 %v854_v1, %v360_v59 }
  0x2a   : > { %v1307_v10 = vsel %vm1048_vm13, 4294967295, %v1306_v10  ;;  %v412_v13 = vmul.f32 %v854_v1, %v404_v60  ;;  %v498_v14 = vsel %vm1048_vm13, %v482_v63, %v442_v62  ;;  %vm1057_vm14 = vcmp.gt.f32.partialorder %v427_v8, %v395_v6 }
  0x2b   : > { %v1308_v16 = vmov 0  ;;  %v483_v17 = vmax.f32 %v475_v9, 0.0  ;;  %v468_v19 = vmul.f32 %v854_v1, %v460_v4  ;;  %vm1063_vm15 = vcmp.gt.f32.partialorder %v546_v2, %v498_v14 }
  0x2c   : > { %v1309_v16 = vsel %vm1057_vm14, 4294967295, %v1308_v16  ;;  %v1310_v21 = vmov 0  ;;  %v443_v22 = vsel %vm1057_vm14, %v427_v8, %v395_v6  ;;  %v539_v23 = vadd.f32 %v871_v3, %v531_v11 }
  0x2d   : > { %v1311_v21 = vsel %vm1063_vm15, 4294967295, %v1310_v21  ;;  %v388_v24 = vadd.f32 %v871_v3, %v374_v12  ;;  %v562_v28 = vsel %vm1063_vm15, %v546_v2, %v498_v14  ;;  %vm1075_vm13 = vcmp.gt.f32.partialorder %v483_v17, %v443_v22 }
  0x2e   : > { %v1312_v29 = vmov 0  ;;  %v420_v30 = vadd.f32 %v871_v3, %v412_v13  ;;  %v476_v31 = vadd.f32 %v871_v3, %v468_v19  ;;  %588 = vst [vmem:[%s940_s22 + $0x20] sm:$0xff] %v562_v28  ;;  %v499_v34 = vsel %vm1075_vm13, %v483_v17, %v443_v22 }
  0x2f   : > { %v1313_v29 = vsel %vm1075_vm13, 4294967295, %v1312_v29  ;;  %v547_v35 = vmax.f32 %v539_v23, 0.0  ;;  %v396_v36 = vmax.f32 %v388_v24, 0.0  ;;  %v532_v39 = vmul.f32 %v854_v1, %v524_v20 }
  0x30   : > { %v428_v40 = vmax.f32 %v420_v30, 0.0  ;;  %v484_v41 = vmax.f32 %v476_v31, 0.0  ;;  %v375_v42 = vmul.f32 %v854_v1, %v361_v25  ;;  %v413_v43 = vmul.f32 %v854_v1, %v405_v27 }
  0x31   : > { %vm1089_vm14 = vcmp.gt.f32.partialorder %v547_v35, %v499_v34  ;;  %v1314_v45 = vmov 0  ;;  %v540_v46 = vadd.f32 %v871_v3, %v532_v39  ;;  %v469_v49 = vmul.f32 %v854_v1, %v461_v32 }
  0x32   : > { %v1315_v45 = vsel %vm1089_vm14, 4294967295, %v1314_v45  ;;  %v533_v50 = vmul.f32 %v854_v1, %v525_v33  ;;  %v563_v51 = vsel %vm1089_vm14, %v547_v35, %v499_v34  ;;  %vm1098_vm13 = vcmp.gt.f32.partialorder %v428_v40, %v396_v36 }
  0x33   : > { %v1316_v53 = vmov 0  ;;  %v389_v55 = vadd.f32 %v871_v3, %v375_v42  ;;  %v421_v56 = vadd.f32 %v871_v3, %v413_v43  ;;  %589 = vst [vmem:[%s940_s22 + $0x28] sm:$0xff] %v563_v51  ;;  %v444_v58 = vsel %vm1098_vm13, %v428_v40, %v396_v36 }
  0x34   : > { %v1317_v53 = vsel %vm1098_vm13, 4294967295, %v1316_v53  ;;  %v548_v59 = vmax.f32 %v540_v46, 0.0  ;;  %v477_v60 = vadd.f32 %v871_v3, %v469_v49  ;;  %v541_v1 = vadd.f32 %v871_v3, %v533_v50 }
  0x35   : > { %vm1109_vm15 = vcmp.gt.f32.partialorder %v484_v41, %v444_v58  ;;  %v397_v63 = vmax.f32 %v389_v55, 0.0  ;;  %v429_v2 = vmax.f32 %v421_v56, 0.0  ;;  %v800_v4 = vmov 0  }
  0x36   : > { %v446_v5 = vsel %vm914_vm0, 1, %v800_v4  ;;  %v500_v6 = vsel %vm1109_vm15, %v484_v41, %v444_v58  ;;  %v485_v8 = vmax.f32 %v477_v60, 0.0  ;;  %v549_v9 = vmax.f32 %v541_v1, 0.0 }
  0x37   : > { %v502_v3 = vsel %vm928_vm2, 1, %v800_v4  ;;  %vm1121_vm13 = vcmp.gt.f32.partialorder %v548_v59, %v500_v6  ;;  %vm1125_vm14 = vcmp.gt.f32.partialorder %v429_v2, %v397_v63  ;;  %v510_v38 = vsel %vm928_vm2, 0, %v446_v5 }
  0x38   : > { %v566_v13 = vsel %vm952_vm4, 1, %v502_v3  ;;  %v564_v14 = vsel %vm1121_vm13, %v548_v59, %v500_v6  ;;  %v445_v17 = vsel %vm1125_vm14, %v429_v2, %v397_v63  ;;  %v574_v19 = vsel %vm952_vm4, 1, %v510_v38 }
  0x39   : > { %v599_v20 = vmul.u32 16, %v566_v13  ;;  %590 = vst [vmem:[%s940_s22 + $0x30] sm:$0xff] %v564_v14  ;;  %vm1140_vm0 = vcmp.gt.f32.partialorder %v485_v8, %v445_v17  ;;  %v608_v47 = vadd.s32 %v899_v18, %v574_v19  ;;  %v447_v23 = vsel %vm923_vm1, 1, %v800_v4 }
  0x3a   : > { %v503_v24 = vsel %vm944_vm3, 1, %v800_v4  ;;  %v501_v57 = vsel %vm1140_vm0, %v485_v8, %v445_v17  ;;  %v511_v25 = vsel %vm944_vm3, 0, %v447_v23  ;;  %v448_v27 = vsel %vm971_vm6, 1, %v800_v4 }
  0x3b   : > { %v567_v44 = vsel %vm962_vm5, 1, %v503_v24  ;;  %vm1166_vm1 = vcmp.gt.f32.partialorder %v549_v9, %v501_v57  ;;  %v616_v30 = vadd.s32 %v608_v47, %v599_v20  ;;  %v575_v31 = vsel %vm962_vm5, 1, %v511_v25 }
  0x3c   : > { %v592_v32 = vadd.s32 2, %v567_v44  ;;  %v565_v52 = vsel %vm1166_vm1, %v549_v9, %v501_v57  ;;  %v609_v33 = vadd.s32 %v899_v18, %v575_v31  ;;  %v504_v34 = vsel %vm983_vm7, 1, %v800_v4 }
  0x3d   : > { %v512_v7 = vsel %vm983_vm7, 0, %v448_v27  ;;  %591 = vst [vmem:[%s940_s22 + $0x38] sm:$0xff] %v565_v52  ;;  %624 = vst [vmem:[%s1157_s27] sm:$0xff] %v616_v30  ;;  %v568_v0 = vsel %vm997_vm8, 1, %v504_v34  ;;  %v449_v39 = vsel %vm1009_vm9, 1, %v800_v4  ;;  %v505_v15 = vsel %vm1019_vm10, 1, %v800_v4 }
  0x3e   : > { %v600_v35 = vmul.u32 16, %v592_v32  ;;  %v576_v36 = vsel %vm997_vm8, 1, %v512_v7  ;;  %v593_v40 = vadd.s32 4, %v568_v0  ;;  %v513_v42 = vsel %vm1019_vm10, 0, %v449_v39 }
  0x3f   : > { %v610_v41 = vadd.s32 %v899_v18, %v576_v36  ;;  %v569_v46 = vsel %vm1037_vm12, 1, %v505_v15  ;;  %v577_v26 = vsel %vm1037_vm12, 1, %v513_v42  ;;  %v450_v37 = vsel %vm1028_vm11, 1, %v800_v4 }
  0x40   : > { %v617_v43 = vadd.s32 %v609_v33, %v600_v35  ;;  %v601_v49 = vmul.u32 16, %v593_v40  ;;  %v594_v50 = vadd.s32 6, %v569_v46  ;;  %v611_v51 = vadd.s32 %v899_v18, %v577_v26 }
  0x41   : > { %vm1328_vm2 = vnez %v1307_v10  ;;  %vm1329_vm3 = vnez %v1311_v21  ;;  %vm1330_vm4 = vnez %v1309_v16  ;;  %vm1331_vm5 = vnez %v1313_v29 }
  0x42   : > { %v506_v48 = vsel %vm1328_vm2, 1, %v800_v4  ;;  %625 = vst [vmem:[%s1157_s27 + $0x8] sm:$0xff] %v617_v43  ;;  %v514_v55 = vsel %vm1328_vm2, 0, %v450_v37  ;;  %v451_v54 = vsel %vm1330_vm4, 1, %v800_v4  ;;  %v507_v56 = vsel %vm1331_vm5, 1, %v800_v4 }
  0x43   : > { %v570_v61 = vsel %vm1329_vm3, 1, %v506_v48  ;;  %v618_v58 = vadd.s32 %v610_v41, %v601_v49  ;;  %v602_v59 = vmul.u32 16, %v594_v50  ;;  %v578_v60 = vsel %vm1329_vm3, 1, %v514_v55 }
  0x44   : > { %v595_v1 = vadd.s32 8, %v570_v61  ;;  %v612_v10 = vadd.s32 %v899_v18, %v578_v60  ;;  %v515_v63 = vsel %vm1331_vm5, 0, %v451_v54  ;;  %vm1332_vm6 = vnez %v1315_v45 }
  0x45   : > { %v571_v16 = vsel %vm1332_vm6, 1, %v507_v56  ;;  %vm1333_vm7 = vnez %v1317_v53  ;;  %626 = vst [vmem:[%s1157_s27 + $0x10] sm:$0xff] %v618_v58  ;;  %v619_v5 = vadd.s32 %v611_v51, %v602_v59  ;;  %v579_v21 = vsel %vm1332_vm6, 1, %v515_v63 }
  0x46   : > { %v452_v2 = vsel %vm1333_vm7, 1, %v800_v4  ;;  %v603_v6 = vmul.u32 16, %v595_v1  ;;  %v596_v8 = vadd.s32 10, %v571_v16  ;;  %v613_v9 = vadd.s32 %v899_v18, %v579_v21 }
  0x47   : > { %v508_v29 = vsel %vm1109_vm15, 1, %v800_v4  ;;  %v516_v3 = vsel %vm1109_vm15, 0, %v452_v2  ;;  %v453_v53 = vsel %vm1125_vm14, 1, %v800_v4  ;;  %627 = vst [vmem:[%s1157_s27 + $0x18] sm:$0xff] %v619_v5  ;;  %v509_v12 = vsel %vm1140_vm0, 1, %v800_v4 }
  0x48   : > { %v620_v38 = vadd.s32 %v612_v10, %v603_v6  ;;  %v604_v45 = vmul.u32 16, %v596_v8  ;;  %v572_v13 = vsel %vm1121_vm13, 1, %v508_v29  ;;  %v580_v14 = vsel %vm1121_vm13, 1, %v516_v3 }
  0x49   : > { %v597_v17 = vadd.s32 12, %v572_v13  ;;  %v614_v62 = vadd.s32 %v899_v18, %v580_v14  ;;  %v517_v19 = vsel %vm1140_vm0, 0, %v453_v53  ;;  %v573_v47 = vsel %vm1166_vm1, 1, %v509_v12 }
  0x4a   : > { %628 = vst [vmem:[%s1157_s27 + $0x20] sm:$0xff] %v620_v38  ;;  %v621_v20 = vadd.s32 %v613_v9, %v604_v45  ;;  %v581_v11 = vsel %vm1166_vm1, 1, %v517_v19  ;;  %v598_v24 = vadd.s32 14, %v573_v47 }
  0x4b   : > { %v605_v23 = vmul.u32 16, %v597_v17  ;;  %v615_v57 = vadd.s32 %v899_v18, %v581_v11 }
  0x4c   : > { %629 = vst [vmem:[%s1157_s27 + $0x28] sm:$0xff] %v621_v20  ;;  %v606_v44 = vmul.u32 16, %v598_v24 }
  0x4d   : > { %v622_v25 = vadd.s32 %v614_v62, %v605_v23 }
  0x4e   : > { %v623_v4 = vadd.s32 %v615_v57, %v606_v44 }
  0x4f   : > { %630 = vst [vmem:[%s1157_s27 + $0x30] sm:$0xff] %v622_v25 }
  0x50   : > { %631 = vst [vmem:[%s1157_s27 + $0x38] sm:$0xff] %v623_v4 }
  0x51 PF: > { %s18_s24 = sadd.s32 1, %s798_s24  }
  0x52   : > { %p15_p4 = scmp.ge.s32.totalorder %s18_s24, 4  }
  0x54   :  { %17 = sbr.rel (!%p15_p4) target bundleno = 1 (0x1), region = 95 }

// kernel: _encoder_forward_impl.8
= control target key start
LH: loop header
LB: loop body
LE: loop exit
PB: predicated region body
PF: predicated region fallthrough
CT: control target
= control target key end

     0   :  { %s6739_s15 = smov 0   ;;  %s8884_s0 = inlined_call_operand.vmem [shape: f32[2,376,128], index: 0, kind: input, shape index: {}]   ;;  %s8885_s1 = inlined_call_operand.vmem [shape: f32[9,128,128], index: 1, kind: input, shape index: {}]   ;;  %s8886_s2 = inlined_call_operand.vmem [shape: f32[328,128], index: 2, kind: input, shape index: {}]   ;;  %s8887_s3 = inlined_call_operand.vmem [shape: f32[2,328,128], index: 3, kind: output, shape index: {0}]   ;;  %s8888_s4 = inlined_call_operand.vmem [shape: f32[2,8,128], index: 4, kind: output, shape index: {1}]  }
   0x1 LB: > { %s3797_s16 = sadd.s32 4294967295, %s6709_s15   ;;  %p3801_p0 = scmp.ge.s32.totalorder %s6709_s15, 1  ;;  %s6709_s15 = sphi %s6739_s15, %s15_s15  }
   0x2   : > { %p165_p1 = scmp.lt.s32.totalorder %s6709_s15, 3 }
   0x4   : > { %p166_p2 = pnand %p3801_p0, %p165_p1 }
   0x5   : > { %v3805_v0 = vld [vmem:[%s8885_s1 + $0x80] sm:$0xff] (!%p166_p2)  ;;  %v3806_v1 = vld [vmem:[%s8885_s1 + $0x88] sm:$0xff] (!%p166_p2)  ;;  %v6711_v3 = vmov (!%p166_p2), 0.0|0.0   ;;  %v3807_v6 = vld [vmem:[%s8885_s1 + $0x90] sm:$0xff] (!%p166_p2)  ;;  %vm6712_vm0 = vmmov (!%p166_p2), 0   ;;  %v6713_v11 = vmov (!%p166_p2), 0.0  }
   0x6   : > { %169 = sbr.rel (%p166_p2) target bundleno = 1012 (0x3f4), region = 32  ;;  %v3853_v2 = vld [vmem:[%s8885_s1 + $0x200] sm:$0xff] (!%p166_p2)  ;;  %5843 = vmatprep.subr.bf16.mxu1 (!%p166_p2), %v6711_v3  ;;  %5939 = vmatprep.subr.bf16.mxu0 (!%p166_p2), %v6711_v3  ;;  %v5844_v4 = vpack.c.bf16 (!%p166_p2), %v3806_v1, %v3805_v0  ;;  %v3854_v5 = vld [vmem:[%s8885_s1 + $0x208] sm:$0xff] (!%p166_p2)  ;;  %v3808_v7 = vld [vmem:[%s8885_s1 + $0x98] sm:$0xff] (!%p166_p2)  ;;  %p195_p3 = scmp.lt.s32.totalorder (!%p166_p2), %s3797_s16, 1 }
   0x7   : > { %v6767_v8 = vpack.c.bf16 (!%p166_p2), %v3854_v5, %v3853_v2  ;;  %v3855_v9 = vld [vmem:[%s8885_s1 + $0x210] sm:$0xff] (!%p166_p2)  ;;  %v3856_v10 = vld [vmem:[%s8885_s1 + $0x218] sm:$0xff] (!%p166_p2)  ;;  %4480 = vmatprep.mubr.msk.f32.mxu1 (!%p166_p2), %vm6712_vm0, %v6713_v11  ;;  %5100 = vmatprep.mubr.msk.f32.mxu0 (!%p166_p2), %vm6712_vm0, %v6713_v11  ;;  %v5847_v12 = vpack.c.bf16 (!%p166_p2), %v3808_v7, %v3807_v6  ;;  %v3809_v14 = vld [vmem:[%s8885_s1 + $0xa0] sm:$0xff] (!%p166_p2) }
   0x8   : > { %5845 = vmatpush3.bf16.msra.mxu1 (!%p166_p2), %v5844_v4  ;;  %v6781_v13 = vpack.c.bf16 (!%p166_p2), %v3856_v10, %v3855_v9  ;;  %v3810_v15 = vld [vmem:[%s8885_s1 + $0xa8] sm:$0xff] (!%p166_p2)  ;;  %v3857_v16 = vld [vmem:[%s8885_s1 + $0x220] sm:$0xff] (!%p166_p2)  ;;  %v3811_v20 = vld [vmem:[%s8885_s1 + $0xb0] sm:$0xff] (!%p166_p2) }
   0x9   : > { %5941 = vmatpush3.bf16.msra.mxu0 (!%p166_p2), %v6767_v8  ;;  %5846 = vmatprep.subr.bf16.mxu1 (!%p166_p2), %v6711_v3  ;;  %v3858_v17 = vld [vmem:[%s8885_s1 + $0x228] sm:$0xff] (!%p166_p2)  ;;  %v5850_v18 = vpack.c.bf16 (!%p166_p2), %v3810_v15, %v3809_v14  ;;  %v3812_v21 = vld [vmem:[%s8885_s1 + $0xb8] sm:$0xff] (!%p166_p2)  ;;  %v3859_v22 = vld [vmem:[%s8885_s1 + $0x230] sm:$0xff] (!%p166_p2) }
   0xa   : > { %5942 = vmatprep.subr.bf16.mxu0 (!%p166_p2), %v6711_v3  ;;  %v6798_v19 = vpack.c.bf16 (!%p166_p2), %v3858_v17, %v3857_v16  ;;  %v3860_v23 = vld [vmem:[%s8885_s1 + $0x238] sm:$0xff] (!%p166_p2)  ;;  %v5853_v24 = vpack.c.bf16 (!%p166_p2), %v3812_v21, %v3811_v20  ;;  %v3813_v26 = vld [vmem:[%s8885_s1 + $0xc0] sm:$0xff] (!%p166_p2)  ;;  %v3814_v27 = vld [vmem:[%s8885_s1 + $0xc8] sm:$0xff] (!%p166_p2) }
   0xb   : > { %v6815_v25 = vpack.c.bf16 (!%p166_p2), %v3860_v23, %v3859_v22  ;;  %v3861_v28 = vld [vmem:[%s8885_s1 + $0x240] sm:$0xff] (!%p166_p2)  ;;  %v3862_v29 = vld [vmem:[%s8885_s1 + $0x248] sm:$0xff] (!%p166_p2)  ;;  %v5856_v30 = vpack.c.bf16 (!%p166_p2), %v3814_v27, %v3813_v26  ;;  %v3815_v32 = vld [vmem:[%s8885_s1 + $0xd0] sm:$0xff] (!%p166_p2) }
   0xc   : > { %5848 = vmatpush3.bf16.msra.mxu1 (!%p166_p2), %v5847_v12  ;;  %v6832_v31 = vpack.c.bf16 (!%p166_p2), %v3862_v29, %v3861_v28  ;;  %v3816_v33 = vld [vmem:[%s8885_s1 + $0xd8] sm:$0xff] (!%p166_p2)  ;;  %v3863_v34 = vld [vmem:[%s8885_s1 + $0x250] sm:$0xff] (!%p166_p2)  ;;  %v3817_v38 = vld [vmem:[%s8885_s1 + $0xe0] sm:$0xff] (!%p166_p2) }
   0xd   : > { %5944 = vmatpush3.bf16.msra.mxu0 %v6781_v13  ;;  %5849 = vmatprep.subr.bf16.mxu1 %v6711_v3  ;;  %v3864_v35 = vld [vmem:[%s8885_s1 + $0x258] sm:$0xff]  ;;  %v5859_v36 = vpack.c.bf16 %v3816_v33, %v3815_v32  ;;  %v3818_v39 = vld [vmem:[%s8885_s1 + $0xe8] sm:$0xff]  ;;  %s8890_s16 = smov (!%p195_p3, %s3797_s16), 1  ;;  %v3865_v40 = vld [vmem:[%s8885_s1 + $0x260] sm:$0xff] }
   0xe   : > { %5945 = vmatprep.subr.bf16.mxu0 %v6711_v3  ;;  %v6851_v37 = vpack.c.bf16 %v3864_v35, %v3863_v34  ;;  %v3866_v41 = vld [vmem:[%s8885_s1 + $0x268] sm:$0xff]  ;;  %v5862_v42 = vpack.c.bf16 %v3818_v39, %v3817_v38  ;;  %v3819_v44 = vld [vmem:[%s8885_s1 + $0xf0] sm:$0xff]  ;;  %v3820_v45 = vld [vmem:[%s8885_s1 + $0xf8] sm:$0xff]  ;;  %s6690_s29 = smul.u32 376, %s8890_s16  ;;  %s3804_s23 = sshll.u32 %s8890_s16, 3 }
   0xf   : > { %v6872_v43 = vpack.c.bf16 %v3866_v41, %v3865_v40  ;;  %v3867_v46 = vld [vmem:[%s8885_s1 + $0x270] sm:$0xff]  ;;  %v3868_v47 = vld [vmem:[%s8885_s1 + $0x278] sm:$0xff]  ;;  %v5865_v48 = vpack.c.bf16 %v3820_v45, %v3819_v44  ;;  %v3869_v50 = vld [vmem:[%s8885_s1 + $0x280] sm:$0xff]  ;;  %s208_s25 = scalar_lea.vmem %s8888_s4, %s3804_s23 }
  0x10   : > { %5851 = vmatpush3.bf16.msra.mxu1 %v5850_v18  ;;  %v6890_v49 = vpack.c.bf16 %v3868_v47, %v3867_v46  ;;  %s6895_s10 = scalar_lea.vmem %s8884_s0, %s6690_s29  ;;  %v3870_v51 = vld [vmem:[%s8885_s1 + $0x288] sm:$0xff]  ;;  %v250_v52 = vld [vmem:[%s8885_s1] sm:$0xff]  ;;  %v3871_v58 = vld [vmem:[%s8885_s1 + $0x290] sm:$0xff] }
  0x11   : > { %5947 = vmatpush3.bf16.msra.mxu0 %v6798_v19  ;;  %5852 = vmatprep.subr.bf16.mxu1 %v6711_v3  ;;  %v251_v53 = vld [vmem:[%s8885_s1 + $0x8] sm:$0xff]  ;;  %v1602_v55 = vld [vmem:[%s6895_s10 + $0x18] sm:$0xff]  ;;  %v5964_v56 = vpack.c.bf16 %v3870_v51, %v3869_v50  ;;  %v252_v60 = vld [vmem:[%s8885_s1 + $0x10] sm:$0xff] }
  0x12   : > { %5948 = vmatprep.subr.bf16.mxu0 %v6711_v3  ;;  %v266_v54 = vld [vmem:[%s6895_s10 + $0x6] sm:$0xff]  ;;  %v5868_v57 = vpack.c.bf16 %v251_v53, %v250_v52  ;;  %v3872_v59 = vld [vmem:[%s8885_s1 + $0x298] sm:$0xff]  ;;  %v267_v62 = vld [vmem:[%s6895_s10 + $0xe] sm:$0xff] }
  0x13   : > { %v253_v61 = vld [vmem:[%s8885_s1 + $0x18] sm:$0xff]  ;;  %v1603_v63 = vld [vmem:[%s6895_s10 + $0x20] sm:$0xff]  ;;  %v5967_v0 = vpack.c.bf16 %v3872_v59, %v3871_v58  ;;  %v3874_v2 = vld [vmem:[%s8885_s1 + $0x2a8] sm:$0xff] }
  0x14   : > { %5854 = vmatpush3.bf16.msra.mxu1 %v5853_v24  ;;  %v3873_v1 = vld [vmem:[%s8885_s1 + $0x2a0] sm:$0xff]  ;;  %v5871_v4 = vpack.c.bf16 %v253_v61, %v252_v60  ;;  %v255_v6 = vld [vmem:[%s8885_s1 + $0x28] sm:$0xff]  ;;  %v268_v7 = vld [vmem:[%s6895_s10 + $0x16] sm:$0xff] }
  0x15   : > { %5950 = vmatpush3.bf16.msra.mxu0 %v6815_v25  ;;  %5855 = vmatprep.subr.bf16.mxu1 %v6711_v3  ;;  %v254_v5 = vld [vmem:[%s8885_s1 + $0x20] sm:$0xff]  ;;  %v1604_v9 = vld [vmem:[%s6895_s10 + $0x28] sm:$0xff]  ;;  %v5970_v10 = vpack.c.bf16 %v3874_v2, %v3873_v1  ;;  %v3875_v12 = vld [vmem:[%s8885_s1 + $0x2b0] sm:$0xff] }
  0x16   : > { %5951 = vmatprep.subr.bf16.mxu0 %v6711_v3  ;;  %v3876_v14 = vld [vmem:[%s8885_s1 + $0x2b8] sm:$0xff]  ;;  %v5874_v15 = vpack.c.bf16 %v255_v6, %v254_v5  ;;  %v256_v16 = vld [vmem:[%s8885_s1 + $0x30] sm:$0xff]  ;;  %v3877_v22 = vld [vmem:[%s8885_s1 + $0x2c0] sm:$0xff] }
  0x17   : > { %v257_v17 = vld [vmem:[%s8885_s1 + $0x38] sm:$0xff]  ;;  %v1605_v20 = vld [vmem:[%s6895_s10 + $0x30] sm:$0xff]  ;;  %v5973_v21 = vpack.c.bf16 %v3876_v14, %v3875_v12  ;;  %v3878_v23 = vld [vmem:[%s8885_s1 + $0x2c8] sm:$0xff] }
  0x18   : > { %5857 = vmatpush3.bf16.msra.mxu1 %v5856_v30  ;;  %v269_v18 = vld [vmem:[%s6895_s10 + $0x1e] sm:$0xff]  ;;  %v5877_v24 = vpack.c.bf16 %v257_v17, %v256_v16  ;;  %v259_v27 = vld [vmem:[%s8885_s1 + $0x48] sm:$0xff]  ;;  %v5976_v30 = vpack.c.bf16 %v3878_v23, %v3877_v22  ;;  %v3879_v32 = vld [vmem:[%s8885_s1 + $0x2d0] sm:$0xff] }
  0x19   : > { %5953 = vmatpush3.bf16.msra.mxu0 %v6832_v31  ;;  %5858 = vmatprep.subr.bf16.mxu1 %v6711_v3  ;;  %v258_v26 = vld [vmem:[%s8885_s1 + $0x40] sm:$0xff]  ;;  %v1606_v29 = vld [vmem:[%s6895_s10 + $0x38] sm:$0xff]  ;;  %v260_v35 = vld [vmem:[%s8885_s1 + $0x50] sm:$0xff] }
  0x1a   : > { %5954 = vmatprep.subr.bf16.mxu0 %v6711_v3  ;;  %v270_v28 = vld [vmem:[%s6895_s10 + $0x26] sm:$0xff]  ;;  %v3880_v33 = vld [vmem:[%s8885_s1 + $0x2d8] sm:$0xff]  ;;  %v5880_v34 = vpack.c.bf16 %v259_v27, %v258_v26  ;;  %v271_v38 = vld [vmem:[%s6895_s10 + $0x2e] sm:$0xff] }
  0x1b   : > { %v1607_v39 = vld [vmem:[%s6895_s10 + $0x40] sm:$0xff]  ;;  %v5979_v40 = vpack.c.bf16 %v3880_v33, %v3879_v32  ;;  %v263_v46 = vld [vmem:[%s8885_s1 + $0x68] sm:$0xff]  ;;  %v272_v47 = vld [vmem:[%s6895_s10 + $0x36] sm:$0xff] }
  0x1c   : > { %5860 = vmatpush3.bf16.msra.mxu1 %v5859_v36  ;;  %v261_v36 = vld [vmem:[%s8885_s1 + $0x58] sm:$0xff]  ;;  %v3881_v41 = vld [vmem:[%s8885_s1 + $0x2e0] sm:$0xff]  ;;  %v3883_v51 = vld [vmem:[%s8885_s1 + $0x2f0] sm:$0xff] }
  0x1d   : > { %5956 = vmatpush3.bf16.msra.mxu0 %v6851_v37  ;;  %5861 = vmatprep.subr.bf16.mxu1 %v6711_v3  ;;  %v5883_v44 = vpack.c.bf16 %v261_v36, %v260_v35  ;;  %v262_v45 = vld [vmem:[%s8885_s1 + $0x60] sm:$0xff]  ;;  %v3884_v52 = vld [vmem:[%s8885_s1 + $0x2f8] sm:$0xff]  ;;  %v1612_v1 = vld [vmem:[%s6895_s10 + $0x68] sm:$0xff] }
  0x1e   : > { %5957 = vmatprep.subr.bf16.mxu0 %v6711_v3  ;;  %v5886_v53 = vpack.c.bf16 %v263_v46, %v262_v45  ;;  %v5985_v58 = vpack.c.bf16 %v3884_v52, %v3883_v51  ;;  %v274_v60 = vld [vmem:[%s6895_s10 + $0x46] sm:$0xff]  ;;  %v1610_v61 = vld [vmem:[%s6895_s10 + $0x58] sm:$0xff]  ;;  %v3891_v46 = vld [vmem:[%s8885_s1 + $0x330] sm:$0xff] }
  0x1f   : > { %v277_v2 = vld [vmem:[%s6895_s10 + $0x5e] sm:$0xff]  ;;  %v278_v5 = vld [vmem:[%s6895_s10 + $0x66] sm:$0xff]  ;;  %v288_v36 = vld [vmem:[%s6895_s10 + $0xb6] sm:$0xff] }
  0x20   : > { %5863 = vmatpush3.bf16.msra.mxu1 %v5862_v42  ;;  %v3882_v42 = vld [vmem:[%s8885_s1 + $0x2e8] sm:$0xff]  ;;  %v1614_v6 = vld [vmem:[%s6895_s10 + $0x78] sm:$0xff]  ;;  %v3893_v52 = vld [vmem:[%s8885_s1 + $0x340] sm:$0xff] }
  0x21   : > { %5959 = vmatpush3.bf16.msra.mxu0 %v6872_v43  ;;  %5864 = vmatprep.subr.bf16.mxu1 %v6711_v3  ;;  %v5982_v50 = vpack.c.bf16 %v3882_v42, %v3881_v41  ;;  %v1616_v12 = vld [vmem:[%s6895_s10 + $0x88] sm:$0xff]  ;;  %v281_v14 = vld [vmem:[%s6895_s10 + $0x7e] sm:$0xff] }
  0x22   : > { %5960 = vmatprep.subr.bf16.mxu0 %v6711_v3  ;;  %v282_v16 = vld [vmem:[%s6895_s10 + $0x86] sm:$0xff]  ;;  %v1618_v17 = vld [vmem:[%s6895_s10 + $0x98] sm:$0xff] }
  0x23   : > { %v1620_v22 = vld [vmem:[%s6895_s10 + $0xa8] sm:$0xff]  ;;  %v285_v23 = vld [vmem:[%s6895_s10 + $0x9e] sm:$0xff] }
  0x24   : > { %5866 = vmatpush3.bf16.msra.mxu1 %v5865_v48  ;;  %v1608_v48 = vld [vmem:[%s6895_s10 + $0x48] sm:$0xff]  ;;  %v1622_v27 = vld [vmem:[%s6895_s10 + $0xb8] sm:$0xff] }
  0x25   : > { %5962 = vmatpush3.bf16.msra.mxu0 %v6890_v49  ;;  %5867 = vmatprep.subr.bf16.mxu1 %v6711_v3  ;;  %v286_v26 = vld [vmem:[%s6895_s10 + $0xa6] sm:$0xff]  ;;  %v1971_v32 = vld [vmem:[%s6895_s10 + $0x19] sm:$0xff] }
  0x26   : > { %5963 = vmatprep.subr.bf16.mxu0 %v6711_v3  ;;  %v3888_v35 = vld [vmem:[%s8885_s1 + $0x318] sm:$0xff]  ;;  %v3890_v41 = vld [vmem:[%s8885_s1 + $0x328] sm:$0xff] }
  0x27   : > { %4481 = vmatmul.mubr.f32.vlgmr.msra.gmra.mrb[0].mxu1 %v266_v54  ;;  %v264_v54 = vld [vmem:[%s8885_s1 + $0x70] sm:$0xff]  ;;  %v289_v42 = vld [vmem:[%s6895_s10 + $0xbe] sm:$0xff] }
  0x28   : > { %5101 = vmatmul.mubr.f32.vlgmr.msra.gmra.mrb[0].mxu0 %v1602_v55  ;;  %4483 = vmatprep.mubr.msk.f32.mxu1 %vm6712_vm0, %v6713_v11  ;;  %v265_v55 = vld [vmem:[%s8885_s1 + $0x78] sm:$0xff] }
  0x29   : > { %5965 = vmatpush3.bf16.msra.mxu0 %v5964_v56  ;;  %5103 = vmatprep.mubr.msk.f32.mxu0 %vm6712_vm0, %v6713_v11  ;;  %v273_v56 = vld [vmem:[%s6895_s10 + $0x3e] sm:$0xff]  ;;  %v5889_v59 = vpack.c.bf16 %v265_v55, %v264_v54  ;;  %v291_v54 = vld [vmem:[%s6895_s10 + $0xce] sm:$0xff] }
  0x2a   : > { %5869 = vmatpush3.bf16.msra.mxu1 %v5868_v57  ;;  %5966 = vmatprep.subr.bf16.mxu0 %v6711_v3  ;;  %v1609_v57 = vld [vmem:[%s6895_s10 + $0x50] sm:$0xff]  ;;  %v7204_v55 = vld [vmem:[%s6895_s10 + $0x39] sm:$0xff] }
  0x2b   : > { %4484 = vmatmul.mubr.f32.gmra.mrb[2].mxu1 %v267_v62  ;;  %5870 = vmatprep.subr.bf16.mxu1 %v6711_v3  ;;  %v275_v62 = vld [vmem:[%s6895_s10 + $0x4e] sm:$0xff] }
  0x2c   : > { %5104 = vmatmul.mubr.f32.gmra.mrb[2].mxu0 %v1603_v63  ;;  %4486 = vmatprep.mubr.msk.f32.mxu1 %vm6712_vm0, %v6713_v11  ;;  %v1611_v63 = vld [vmem:[%s6895_s10 + $0x60] sm:$0xff] }
  0x2d   : > { %5106 = vmatprep.mubr.msk.f32.mxu0 %vm6712_vm0, %v6713_v11  ;;  %5968 = vmatpush3.bf16.msra.mxu0 %v5967_v0  ;;  %v276_v0 = vld [vmem:[%s6895_s10 + $0x56] sm:$0xff] }
  0x2e   : > { %5969 = vmatprep.subr.bf16.mxu0 %v6711_v3  ;;  %5872 = vmatpush3.bf16.msra.mxu1 %v5871_v4  ;;  %v1613_v4 = vld [vmem:[%s6895_s10 + $0x70] sm:$0xff] }
  0x2f   : > { %4487 = vmatmul.mubr.f32.gmra.mrb[4].mxu1 %v268_v7  ;;  %5873 = vmatprep.subr.bf16.mxu1 %v6711_v3  ;;  %v279_v7 = vld [vmem:[%s6895_s10 + $0x6e] sm:$0xff] }
  0x30   : > { %5107 = vmatmul.mubr.f32.gmra.mrb[4].mxu0 %v1604_v9  ;;  %4489 = vmatprep.mubr.msk.f32.mxu1 %vm6712_vm0, %v6713_v11  ;;  %v1615_v9 = vld [vmem:[%s6895_s10 + $0x80] sm:$0xff] }
  0x31   : > { %5109 = vmatprep.mubr.msk.f32.mxu0 %vm6712_vm0, %v6713_v11  ;;  %5971 = vmatpush3.bf16.msra.mxu0 %v5970_v10  ;;  %v280_v10 = vld [vmem:[%s6895_s10 + $0x76] sm:$0xff] }
  0x32   : > { %5972 = vmatprep.subr.bf16.mxu0 %v6711_v3  ;;  %5875 = vmatpush3.bf16.msra.mxu1 %v5874_v15  ;;  %v1617_v15 = vld [vmem:[%s6895_s10 + $0x90] sm:$0xff] }
  0x33   : > { %4490 = vmatmul.mubr.f32.gmra.mrb[6].mxu1 %v269_v18  ;;  %5876 = vmatprep.subr.bf16.mxu1 %v6711_v3  ;;  %v283_v18 = vld [vmem:[%s6895_s10 + $0x8e] sm:$0xff] }
  0x34   : > { %5110 = vmatmul.mubr.f32.gmra.mrb[6].mxu0 %v1605_v20  ;;  %4492 = vmatprep.mubr.msk.f32.mxu1 %vm6712_vm0, %v6713_v11  ;;  %v1619_v20 = vld [vmem:[%s6895_s10 + $0xa0] sm:$0xff] }
  0x35   : > { %5112 = vmatprep.mubr.msk.f32.mxu0 %vm6712_vm0, %v6713_v11  ;;  %5974 = vmatpush3.bf16.msra.mxu0 %v5973_v21  ;;  %v284_v21 = vld [vmem:[%s6895_s10 + $0x96] sm:$0xff] }
  0x36   : > { %5975 = vmatprep.subr.bf16.mxu0 %v6711_v3  ;;  %5878 = vmatpush3.bf16.msra.mxu1 %v5877_v24  ;;  %v1621_v24 = vld [vmem:[%s6895_s10 + $0xb0] sm:$0xff] }
  0x37   : > { %4493 = vmatmul.mubr.f32.gmra.mrb[8].mxu1 %v270_v28  ;;  %5879 = vmatprep.subr.bf16.mxu1 %v6711_v3  ;;  %v3885_v28 = vld [vmem:[%s8885_s1 + $0x300] sm:$0xff] }
  0x38   : > { %5113 = vmatmul.mubr.f32.gmra.mrb[8].mxu0 %v1606_v29  ;;  %4495 = vmatprep.mubr.msk.f32.mxu1 %vm6712_vm0, %v6713_v11  ;;  %v3886_v29 = vld [vmem:[%s8885_s1 + $0x308] sm:$0xff] }
  0x39   : > { %5115 = vmatprep.mubr.msk.f32.mxu0 %vm6712_vm0, %v6713_v11  ;;  %5977 = vmatpush3.bf16.msra.mxu0 %v5976_v30  ;;  %v287_v30 = vld [vmem:[%s6895_s10 + $0xae] sm:$0xff]  ;;  %v5988_v33 = vpack.c.bf16 %v3886_v29, %v3885_v28  ;;  %v302_v28 = vld [vmem:[%s6895_s10 + $0x126] sm:$0xff] }
  0x3a   : > { %5978 = vmatprep.subr.bf16.mxu0 %v6711_v3  ;;  %5881 = vmatpush3.bf16.msra.mxu1 %v5880_v34  ;;  %v3887_v34 = vld [vmem:[%s8885_s1 + $0x310] sm:$0xff] }
  0x3b   : > { %4496 = vmatmul.mubr.f32.gmra.mrb[10].mxu1 %v271_v38  ;;  %5882 = vmatprep.subr.bf16.mxu1 %v6711_v3  ;;  %v1972_v38 = vld [vmem:[%s6895_s10 + $0x21] sm:$0xff]  ;;  %v7326_v29 = vld [vmem:[%s6895_s10 + $0x91] sm:$0xff] }
  0x3c   : > { %5116 = vmatmul.mubr.f32.gmra.mrb[10].mxu0 %v1607_v39  ;;  %4498 = vmatprep.mubr.msk.f32.mxu1 %vm6712_vm0, %v6713_v11  ;;  %v5991_v39 = vpack.c.bf16 %v3888_v35, %v3887_v34  ;;  %v7344_v34 = vld [vmem:[%s6895_s10 + $0xa1] sm:$0xff] }
  0x3d   : > { %5118 = vmatprep.mubr.msk.f32.mxu0 %vm6712_vm0, %v6713_v11  ;;  %5980 = vmatpush3.bf16.msra.mxu0 %v5979_v40  ;;  %v3889_v40 = vld [vmem:[%s8885_s1 + $0x320] sm:$0xff] }
  0x3e   : > { %5981 = vmatprep.subr.bf16.mxu0 %v6711_v3  ;;  %5884 = vmatpush3.bf16.msra.mxu1 %v5883_v44  ;;  %v7172_v44 = vld [vmem:[%s6895_s10 + $0x29] sm:$0xff]  ;;  %v5994_v45 = vpack.c.bf16 %v3890_v41, %v3889_v40  ;;  %v305_v35 = vld [vmem:[%s6895_s10 + $0x13e] sm:$0xff] }
  0x3f   : > { %4499 = vmatmul.mubr.f32.gmra.mrb[12].mxu1 %v272_v47  ;;  %5885 = vmatprep.subr.bf16.mxu1 %v6711_v3  ;;  %v3892_v47 = vld [vmem:[%s8885_s1 + $0x338] sm:$0xff]  ;;  %v3821_v40 = vld [vmem:[%s8885_s1 + $0x100] sm:$0xff]  ;;  %v3822_v41 = vld [vmem:[%s8885_s1 + $0x108] sm:$0xff] }
  0x40   : > { %5119 = vmatmul.mubr.f32.gmra.mrb[12].mxu0 %v1608_v48  ;;  %4501 = vmatprep.mubr.msk.f32.mxu1 %vm6712_vm0, %v6713_v11  ;;  %v290_v48 = vld [vmem:[%s6895_s10 + $0xc6] sm:$0xff]  ;;  %v5997_v51 = vpack.c.bf16 %v3892_v47, %v3891_v46  ;;  %v5892_v46 = vpack.c.bf16 %v3822_v41, %v3821_v40  ;;  %v3823_v47 = vld [vmem:[%s8885_s1 + $0x110] sm:$0xff]  ;;  %v3836_v40 = vld [vmem:[%s8885_s1 + $0x178] sm:$0xff] }
  0x41   : > { %5121 = vmatprep.mubr.msk.f32.mxu0 %vm6712_vm0, %v6713_v11  ;;  %5983 = vmatpush3.bf16.msra.mxu0 %v5982_v50  ;;  %v7188_v50 = vld [vmem:[%s6895_s10 + $0x31] sm:$0xff]  ;;  %v216_v41 = vld [vmem:[%s6895_s10 + $0x3d] sm:$0xff] }
  0x42   : > { %5984 = vmatprep.subr.bf16.mxu0 %v6711_v3  ;;  %5887 = vmatpush3.bf16.msra.mxu1 %v5886_v53  ;;  %v3894_v53 = vld [vmem:[%s8885_s1 + $0x348] sm:$0xff] }
  0x43   : > { %4502 = vmatmul.mubr.f32.gmra.mrb[14].mxu1 %v273_v56  ;;  %5888 = vmatprep.subr.bf16.mxu1 %v6711_v3  ;;  %v6000_v56 = vpack.c.bf16 %v3894_v53, %v3893_v52  ;;  %v7392_v52 = vld [vmem:[%s6895_s10 + $0xc1] sm:$0xff] }
  0x44   : > { %5122 = vmatmul.mubr.f32.gmra.mrb[14].mxu0 %v1609_v57  ;;  %4504 = vmatprep.mubr.msk.f32.mxu1 %vm6712_vm0, %v6713_v11  ;;  %v3895_v57 = vld [vmem:[%s8885_s1 + $0x350] sm:$0xff] }
  0x45   : > { %5124 = vmatprep.mubr.msk.f32.mxu0 %vm6712_vm0, %v6713_v11  ;;  %5986 = vmatpush3.bf16.msra.mxu0 %v5985_v58  ;;  %v3896_v58 = vld [vmem:[%s8885_s1 + $0x358] sm:$0xff] }
  0x46   : > { %5987 = vmatprep.subr.bf16.mxu0 %v6711_v3  ;;  %5890 = vmatpush3.bf16.msra.mxu1 %v5889_v59  ;;  %v292_v59 = vld [vmem:[%s6895_s10 + $0xd6] sm:$0xff] }
  0x47   : > { %4505 = vmatmul.mubr.f32.gmra.mrb[16].mxu1 %v274_v60  ;;  %5891 = vmatprep.subr.bf16.mxu1 %v6711_v3  ;;  %v7220_v60 = vld [vmem:[%s6895_s10 + $0x41] sm:$0xff] }
  0x48   : > { %5125 = vmatmul.mubr.f32.gmra.mrb[16].mxu0 %v1610_v61  ;;  %4507 = vmatprep.mubr.msk.f32.mxu1 %vm6712_vm0, %v6713_v11  ;;  %v6003_v61 = vpack.c.bf16 %v3896_v58, %v3895_v57  ;;  %v211_v57 = vld [vmem:[%s6895_s10 + $0x15] sm:$0xff]  ;;  %v7408_v58 = vld [vmem:[%s6895_s10 + $0xc9] sm:$0xff] }
  0x49   : > { %5127 = vmatprep.mubr.msk.f32.mxu0 %vm6712_vm0, %v6713_v11 }
  0x4b   : > { %4508 = vmatmul.mubr.f32.gmra.mrb[18].mxu1 %v275_v62  ;;  %v3897_v62 = vld [vmem:[%s8885_s1 + $0x360] sm:$0xff] }
  0x4c   : > { %5128 = vmatmul.mubr.f32.gmra.mrb[18].mxu0 %v1611_v63  ;;  %4510 = vmatprep.mubr.msk.f32.mxu1 %vm6712_vm0, %v6713_v11  ;;  %v3898_v63 = vld [vmem:[%s8885_s1 + $0x368] sm:$0xff] }
  0x4d   : > { %5130 = vmatprep.mubr.msk.f32.mxu0 %vm6712_vm0, %v6713_v11 }
  0x4f   : > { %4511 = vmatmul.mubr.f32.gmra.mrb[20].mxu1 %v276_v0  ;;  %v293_v0 = vld [vmem:[%s6895_s10 + $0xde] sm:$0xff] }
  0x50   : > { %5131 = vmatmul.mubr.f32.gmra.mrb[20].mxu0 %v1612_v1  ;;  %4513 = vmatprep.mubr.msk.f32.mxu1 %vm6712_vm0, %v6713_v11  ;;  %v7236_v1 = vld [vmem:[%s6895_s10 + $0x49] sm:$0xff] }
  0x51   : > { %5133 = vmatprep.mubr.msk.f32.mxu0 %vm6712_vm0, %v6713_v11 }
  0x53   : > { %4514 = vmatmul.mubr.f32.gmra.mrb[22].mxu1 %v277_v2  ;;  %v6006_v2 = vpack.c.bf16 %v3898_v63, %v3897_v62  ;;  %v3828_v62 = vld [vmem:[%s8885_s1 + $0x138] sm:$0xff] }
  0x54   : > { %5134 = vmatmul.mubr.f32.gmra.mrb[22].mxu0 %v1613_v4  ;;  %4516 = vmatprep.mubr.msk.f32.mxu1 %vm6712_vm0, %v6713_v11  ;;  %v3899_v4 = vld [vmem:[%s8885_s1 + $0x370] sm:$0xff]  ;;  %v212_v63 = vld [vmem:[%s6895_s10 + $0x1d] sm:$0xff] }
  0x55   : > { %5136 = vmatprep.mubr.msk.f32.mxu0 %vm6712_vm0, %v6713_v11 }
  0x57   : > { %4517 = vmatmul.mubr.f32.gmra.mrb[24].mxu1 %v278_v5  ;;  %v3900_v5 = vld [vmem:[%s8885_s1 + $0x378] sm:$0xff] }
  0x58   : > { %5137 = vmatmul.mubr.f32.gmra.mrb[24].mxu0 %v1614_v6  ;;  %4519 = vmatprep.mubr.msk.f32.mxu1 %vm6712_vm0, %v6713_v11  ;;  %v294_v6 = vld [vmem:[%s6895_s10 + $0xe6] sm:$0xff] }
  0x59   : > { %5139 = vmatprep.mubr.msk.f32.mxu0 %vm6712_vm0, %v6713_v11 }
  0x5b   : > { %4520 = vmatmul.mubr.f32.gmra.mrb[26].mxu1 %v279_v7  ;;  %v7252_v7 = vld [vmem:[%s6895_s10 + $0x51] sm:$0xff] }
  0x5c   : > { %5140 = vmatmul.mubr.f32.gmra.mrb[26].mxu0 %v1615_v9  ;;  %4522 = vmatprep.mubr.msk.f32.mxu1 %vm6712_vm0, %v6713_v11  ;;  %v6009_v9 = vpack.c.bf16 %v3900_v5, %v3899_v4  ;;  %v3829_v4 = vld [vmem:[%s8885_s1 + $0x140] sm:$0xff]  ;;  %v3830_v5 = vld [vmem:[%s8885_s1 + $0x148] sm:$0xff] }
  0x5d   : > { %5142 = vmatprep.mubr.msk.f32.mxu0 %vm6712_vm0, %v6713_v11 }
  0x5f   : > { %4523 = vmatmul.mubr.f32.gmra.mrb[28].mxu1 %v280_v10  ;;  %v295_v10 = vld [vmem:[%s6895_s10 + $0xee] sm:$0xff] }
  0x60   : > { %5143 = vmatmul.mubr.f32.gmra.mrb[28].mxu0 %v1616_v12  ;;  %4525 = vmatprep.mubr.msk.f32.mxu1 %vm6712_vm0, %v6713_v11  ;;  %v7262_v12 = vld [vmem:[%s6895_s10 + $0x59] sm:$0xff] }
  0x61   : > { %5145 = vmatprep.mubr.msk.f32.mxu0 %vm6712_vm0, %v6713_v11 }
  0x63   : > { %4526 = vmatmul.mubr.f32.gmra.mrb[30].mxu1 %v281_v14  ;;  %v296_v14 = vld [vmem:[%s6895_s10 + $0xf6] sm:$0xff] }
  0x64   : > { %5146 = vmatmul.mubr.f32.gmra.mrb[30].mxu0 %v1617_v15  ;;  %4528 = vmatprep.mubr.msk.f32.mxu1 %vm6712_vm0, %v6713_v11  ;;  %v7272_v15 = vld [vmem:[%s6895_s10 + $0x61] sm:$0xff] }
  0x65   : > { %5148 = vmatprep.mubr.msk.f32.mxu0 %vm6712_vm0, %v6713_v11 }
  0x67   : > { %4529 = vmatmul.mubr.f32.gmra.mrb[32].mxu1 %v282_v16  ;;  %v297_v16 = vld [vmem:[%s6895_s10 + $0xfe] sm:$0xff] }
  0x68   : > { %5149 = vmatmul.mubr.f32.gmra.mrb[32].mxu0 %v1618_v17  ;;  %4531 = vmatprep.mubr.msk.f32.mxu1 %vm6712_vm0, %v6713_v11  ;;  %v7281_v17 = vld [vmem:[%s6895_s10 + $0x69] sm:$0xff] }
  0x69   : > { %5151 = vmatprep.mubr.msk.f32.mxu0 %vm6712_vm0, %v6713_v11 }
  0x6b   : > { %4532 = vmatmul.mubr.f32.gmra.mrb[34].mxu1 %v283_v18  ;;  %v298_v18 = vld [vmem:[%s6895_s10 + $0x106] sm:$0xff] }
  0x6c   : > { %5152 = vmatmul.mubr.f32.gmra.mrb[34].mxu0 %v1619_v20  ;;  %4534 = vmatprep.mubr.msk.f32.mxu1 %vm6712_vm0, %v6713_v11  ;;  %v7290_v20 = vld [vmem:[%s6895_s10 + $0x71] sm:$0xff] }
  0x6d   : > { %5154 = vmatprep.mubr.msk.f32.mxu0 %vm6712_vm0, %v6713_v11 }
  0x6f   : > { %4535 = vmatmul.mubr.f32.gmra.mrb[36].mxu1 %v284_v21  ;;  %v299_v21 = vld [vmem:[%s6895_s10 + $0x10e] sm:$0xff] }
  0x70   : > { %5155 = vmatmul.mubr.f32.gmra.mrb[36].mxu0 %v1620_v22  ;;  %4537 = vmatprep.mubr.msk.f32.mxu1 %vm6712_vm0, %v6713_v11  ;;  %v7299_v22 = vld [vmem:[%s6895_s10 + $0x79] sm:$0xff] }
  0x71   : > { %5157 = vmatprep.mubr.msk.f32.mxu0 %vm6712_vm0, %v6713_v11 }
  0x73   : > { %4538 = vmatmul.mubr.f32.gmra.mrb[38].mxu1 %v285_v23  ;;  %v300_v23 = vld [vmem:[%s6895_s10 + $0x116] sm:$0xff] }
  0x74   : > { %5158 = vmatmul.mubr.f32.gmra.mrb[38].mxu0 %v1621_v24  ;;  %4540 = vmatprep.mubr.msk.f32.mxu1 %vm6712_vm0, %v6713_v11  ;;  %v7308_v24 = vld [vmem:[%s6895_s10 + $0x81] sm:$0xff] }
  0x75   : > { %5160 = vmatprep.mubr.msk.f32.mxu0 %vm6712_vm0, %v6713_v11 }
  0x77   : > { %4541 = vmatmul.mubr.f32.gmra.mrb[40].mxu1 %v286_v26  ;;  %v301_v26 = vld [vmem:[%s6895_s10 + $0x11e] sm:$0xff] }
  0x78   : > { %5161 = vmatmul.mubr.f32.gmra.mrb[40].mxu0 %v1622_v27  ;;  %4543 = vmatprep.mubr.msk.f32.mxu1 %vm6712_vm0, %v6713_v11  ;;  %v7317_v27 = vld [vmem:[%s6895_s10 + $0x89] sm:$0xff] }
  0x79   : > { %5255 = vmatprep.mubr.msk.f32.mxu0 %vm6712_vm0, %v6713_v11 }
  0x7b   : > { %4544 = vmatmul.mubr.f32.gmra.mrb[42].mxu1 %v287_v30  ;;  %v303_v30 = vld [vmem:[%s6895_s10 + $0x12e] sm:$0xff] }
  0x7c   : > { %5256 = vmatmul.mubr.f32.vlgmr.msra.gmra.mrb[0].mxu0 %v1971_v32  ;;  %4546 = vmatprep.mubr.msk.f32.mxu1 %vm6712_vm0, %v6713_v11  ;;  %v7335_v32 = vld [vmem:[%s6895_s10 + $0x99] sm:$0xff] }
  0x7d   : > { %5989 = vmatpush3.bf16.msra.mxu0 %v5988_v33  ;;  %5258 = vmatprep.mubr.msk.f32.mxu0 %vm6712_vm0, %v6713_v11  ;;  %v304_v33 = vld [vmem:[%s6895_s10 + $0x136] sm:$0xff] }
  0x7e   : > { %5990 = vmatprep.subr.bf16.mxu0 %v6711_v3 }
  0x7f   : > { %4547 = vmatmul.mubr.f32.gmra.mrb[44].mxu1 %v288_v36  ;;  %v7353_v36 = vld [vmem:[%s6895_s10 + $0xa9] sm:$0xff] }
  0x80   : > { %5259 = vmatmul.mubr.f32.gmra.mrb[2].mxu0 %v1972_v38  ;;  %4549 = vmatprep.mubr.msk.f32.mxu1 %vm6712_vm0, %v6713_v11  ;;  %v306_v38 = vld [vmem:[%s6895_s10 + $0x146] sm:$0xff] }
  0x81   : > { %5261 = vmatprep.mubr.msk.f32.mxu0 %vm6712_vm0, %v6713_v11  ;;  %5992 = vmatpush3.bf16.msra.mxu0 %v5991_v39  ;;  %v7362_v39 = vld [vmem:[%s6895_s10 + $0xb1] sm:$0xff] }
  0x82   : > { %5993 = vmatprep.subr.bf16.mxu0 %v6711_v3 }
  0x83   : > { %4550 = vmatmul.mubr.f32.gmra.mrb[46].mxu1 %v289_v42  ;;  %v209_v42 = vld [vmem:[%s6895_s10 + $0x5] sm:$0xff] }
  0x84   : > { %5262 = vmatmul.mubr.f32.gmra.mrb[4].mxu0 %v7172_v44  ;;  %4552 = vmatprep.mubr.msk.f32.mxu1 %vm6712_vm0, %v6713_v11 }
  0x85   : > { %5264 = vmatprep.mubr.msk.f32.mxu0 %vm6712_vm0, %v6713_v11  ;;  %5995 = vmatpush3.bf16.msra.mxu0 %v5994_v45  ;;  %v7377_v45 = vld [vmem:[%s6895_s10 + $0xb9] sm:$0xff] }
  0x86   : > { %5996 = vmatprep.subr.bf16.mxu0 %v6711_v3 }
  0x87   : > { %4553 = vmatmul.mubr.f32.gmra.mrb[48].mxu1 %v290_v48  ;;  %v3824_v48 = vld [vmem:[%s8885_s1 + $0x118] sm:$0xff] }
  0x88   : > { %5265 = vmatmul.mubr.f32.gmra.mrb[6].mxu0 %v7188_v50  ;;  %4555 = vmatprep.mubr.msk.f32.mxu1 %vm6712_vm0, %v6713_v11  ;;  %v5895_v53 = vpack.c.bf16 %v3824_v48, %v3823_v47  ;;  %v217_v47 = vld [vmem:[%s6895_s10 + $0x45] sm:$0xff]  ;;  %v7498_v48 = vld [vmem:[%s6895_s10 + $0xf9] sm:$0xff] }
  0x89   : > { %5267 = vmatprep.mubr.msk.f32.mxu0 %vm6712_vm0, %v6713_v11  ;;  %5998 = vmatpush3.bf16.msra.mxu0 %v5997_v51  ;;  %v210_v51 = vld [vmem:[%s6895_s10 + $0xd] sm:$0xff] }
  0x8a   : > { %5999 = vmatprep.subr.bf16.mxu0 %v6711_v3 }
  0x8b   : > { %4556 = vmatmul.mubr.f32.gmra.mrb[50].mxu1 %v291_v54  ;;  %v3825_v54 = vld [vmem:[%s8885_s1 + $0x120] sm:$0xff] }
  0x8c   : > { %5268 = vmatmul.mubr.f32.gmra.mrb[8].mxu0 %v7204_v55  ;;  %4558 = vmatprep.mubr.msk.f32.mxu1 %vm6712_vm0, %v6713_v11 }
  0x8d   : > { %5270 = vmatprep.mubr.msk.f32.mxu0 %vm6712_vm0, %v6713_v11  ;;  %6001 = vmatpush3.bf16.msra.mxu0 %v6000_v56  ;;  %v3826_v56 = vld [vmem:[%s8885_s1 + $0x128] sm:$0xff] }
  0x8e   : > { %6002 = vmatprep.subr.bf16.mxu0 %v6711_v3 }
  0x8f   : > { %4559 = vmatmul.mubr.f32.gmra.mrb[52].mxu1 %v292_v59  ;;  %v5898_v59 = vpack.c.bf16 %v3826_v56, %v3825_v54  ;;  %v219_v54 = vld [vmem:[%s6895_s10 + $0x55] sm:$0xff]  ;;  %v7517_v56 = vld [vmem:[%s6895_s10 + $0x109] sm:$0xff] }
  0x90   : > { %5271 = vmatmul.mubr.f32.gmra.mrb[10].mxu0 %v7220_v60  ;;  %4561 = vmatprep.mubr.msk.f32.mxu1 %vm6712_vm0, %v6713_v11 }
  0x91   : > { %5273 = vmatprep.mubr.msk.f32.mxu0 %vm6712_vm0, %v6713_v11  ;;  %6004 = vmatpush3.bf16.msra.mxu0 %v6003_v61  ;;  %v3827_v61 = vld [vmem:[%s8885_s1 + $0x130] sm:$0xff] }
  0x92   : > { %6005 = vmatprep.subr.bf16.mxu0 %v6711_v3 }
  0x93   : > { %4562 = vmatmul.mubr.f32.gmra.mrb[54].mxu1 %v293_v0  ;;  %v7424_v0 = vld [vmem:[%s6895_s10 + $0xd1] sm:$0xff] }
  0x94   : > { %5274 = vmatmul.mubr.f32.gmra.mrb[12].mxu0 %v7236_v1  ;;  %4564 = vmatprep.mubr.msk.f32.mxu1 %vm6712_vm0, %v6713_v11 }
  0x95   : > { %5276 = vmatprep.mubr.msk.f32.mxu0 %vm6712_vm0, %v6713_v11  ;;  %6007 = vmatpush3.bf16.msra.mxu0 %v6006_v2  ;;  %v5901_v2 = vpack.c.bf16 %v3828_v62, %v3827_v61  ;;  %v221_v61 = vld [vmem:[%s6895_s10 + $0x65] sm:$0xff]  ;;  %v7535_v62 = vld [vmem:[%s6895_s10 + $0x119] sm:$0xff] }
  0x96   : > { %6008 = vmatprep.subr.bf16.mxu0 %v6711_v3 }
  0x97   : > { %4565 = vmatmul.mubr.f32.gmra.mrb[56].mxu1 %v294_v6  ;;  %v213_v6 = vld [vmem:[%s6895_s10 + $0x25] sm:$0xff] }
  0x98   : > { %5277 = vmatmul.mubr.f32.gmra.mrb[14].mxu0 %v7252_v7  ;;  %4567 = vmatprep.mubr.msk.f32.mxu1 %vm6712_vm0, %v6713_v11 }
  0x99   : > { %5279 = vmatprep.mubr.msk.f32.mxu0 %vm6712_vm0, %v6713_v11  ;;  %6010 = vmatpush3.bf16.msra.mxu0 %v6009_v9  ;;  %v7440_v9 = vld [vmem:[%s6895_s10 + $0xd9] sm:$0xff] }
  0x9a   : > { %6011 = vmatprep.subr.bf16.mxu0 %v6711_v3 }
  0x9b   : > { %4568 = vmatmul.mubr.f32.gmra.mrb[58].mxu1 %v295_v10  ;;  %v5904_v10 = vpack.c.bf16 %v3830_v5, %v3829_v4  ;;  %v223_v4 = vld [vmem:[%s6895_s10 + $0x75] sm:$0xff]  ;;  %v7553_v5 = vld [vmem:[%s6895_s10 + $0x129] sm:$0xff] }
  0x9c   : > { %5280 = vmatmul.mubr.f32.gmra.mrb[16].mxu0 %v7262_v12  ;;  %4570 = vmatprep.mubr.msk.f32.mxu1 %vm6712_vm0, %v6713_v11 }
  0x9d   : > { %5282 = vmatprep.mubr.msk.f32.mxu0 %vm6712_vm0, %v6713_v11 }
  0x9f   : > { %4571 = vmatmul.mubr.f32.gmra.mrb[60].mxu1 %v296_v14  ;;  %v3831_v14 = vld [vmem:[%s8885_s1 + $0x150] sm:$0xff] }
  0xa0   : > { %5283 = vmatmul.mubr.f32.gmra.mrb[18].mxu0 %v7272_v15  ;;  %4573 = vmatprep.mubr.msk.f32.mxu1 %vm6712_vm0, %v6713_v11 }
  0xa1   : > { %5285 = vmatprep.mubr.msk.f32.mxu0 %vm6712_vm0, %v6713_v11 }
  0xa3   : > { %4574 = vmatmul.mubr.f32.gmra.mrb[62].mxu1 %v297_v16  ;;  %v3832_v16 = vld [vmem:[%s8885_s1 + $0x158] sm:$0xff] }
  0xa4   : > { %5286 = vmatmul.mubr.f32.gmra.mrb[20].mxu0 %v7281_v17  ;;  %4576 = vmatprep.mubr.msk.f32.mxu1 %vm6712_vm0, %v6713_v11 }
  0xa5   : > { %5288 = vmatprep.mubr.msk.f32.mxu0 %vm6712_vm0, %v6713_v11 }
  0xa7   : > { %4577 = vmatmul.mubr.f32.gmra.mrb[64].mxu1 %v298_v18  ;;  %v214_v18 = vld [vmem:[%s6895_s10 + $0x2d] sm:$0xff] }
  0xa8   : > { %5289 = vmatmul.mubr.f32.gmra.mrb[22].mxu0 %v7290_v20  ;;  %4579 = vmatprep.mubr.msk.f32.mxu1 %vm6712_vm0, %v6713_v11 }
  0xa9   : > { %5291 = vmatprep.mubr.msk.f32.mxu0 %vm6712_vm0, %v6713_v11 }
  0xab   : > { %4580 = vmatmul.mubr.f32.gmra.mrb[66].mxu1 %v299_v21  ;;  %v7456_v21 = vld [vmem:[%s6895_s10 + $0xe1] sm:$0xff] }
  0xac   : > { %5292 = vmatmul.mubr.f32.gmra.mrb[24].mxu0 %v7299_v22  ;;  %4582 = vmatprep.mubr.msk.f32.mxu1 %vm6712_vm0, %v6713_v11 }
  0xad   : > { %5294 = vmatprep.mubr.msk.f32.mxu0 %vm6712_vm0, %v6713_v11 }
  0xaf   : > { %4583 = vmatmul.mubr.f32.gmra.mrb[68].mxu1 %v300_v23  ;;  %v5907_v23 = vpack.c.bf16 %v3832_v16, %v3831_v14  ;;  %v225_v14 = vld [vmem:[%s6895_s10 + $0x85] sm:$0xff]  ;;  %v7571_v16 = vld [vmem:[%s6895_s10 + $0x139] sm:$0xff] }
  0xb0   : > { %5295 = vmatmul.mubr.f32.gmra.mrb[26].mxu0 %v7308_v24  ;;  %4585 = vmatprep.mubr.msk.f32.mxu1 %vm6712_vm0, %v6713_v11 }
  0xb1   : > { %5297 = vmatprep.mubr.msk.f32.mxu0 %vm6712_vm0, %v6713_v11 }
  0xb3   : > { %4586 = vmatmul.mubr.f32.gmra.mrb[70].mxu1 %v301_v26  ;;  %v3833_v26 = vld [vmem:[%s8885_s1 + $0x160] sm:$0xff] }
  0xb4   : > { %5298 = vmatmul.mubr.f32.gmra.mrb[28].mxu0 %v7317_v27  ;;  %4588 = vmatprep.mubr.msk.f32.mxu1 %vm6712_vm0, %v6713_v11 }
  0xb5   : > { %5300 = vmatprep.mubr.msk.f32.mxu0 %vm6712_vm0, %v6713_v11 }
  0xb7   : > { %4589 = vmatmul.mubr.f32.gmra.mrb[72].mxu1 %v302_v28  ;;  %v3834_v28 = vld [vmem:[%s8885_s1 + $0x168] sm:$0xff] }
  0xb8   : > { %5301 = vmatmul.mubr.f32.gmra.mrb[30].mxu0 %v7326_v29  ;;  %4591 = vmatprep.mubr.msk.f32.mxu1 %vm6712_vm0, %v6713_v11 }
  0xb9   : > { %5303 = vmatprep.mubr.msk.f32.mxu0 %vm6712_vm0, %v6713_v11 }
  0xbb   : > { %4592 = vmatmul.mubr.f32.gmra.mrb[74].mxu1 %v303_v30  ;;  %v215_v30 = vld [vmem:[%s6895_s10 + $0x35] sm:$0xff] }
  0xbc   : > { %5304 = vmatmul.mubr.f32.gmra.mrb[32].mxu0 %v7335_v32  ;;  %4594 = vmatprep.mubr.msk.f32.mxu1 %vm6712_vm0, %v6713_v11 }
  0xbd   : > { %5306 = vmatprep.mubr.msk.f32.mxu0 %vm6712_vm0, %v6713_v11 }
  0xbf   : > { %4595 = vmatmul.mubr.f32.gmra.mrb[76].mxu1 %v304_v33  ;;  %v7472_v33 = vld [vmem:[%s6895_s10 + $0xe9] sm:$0xff] }
  0xc0   : > { %5307 = vmatmul.mubr.f32.gmra.mrb[34].mxu0 %v7344_v34  ;;  %4597 = vmatprep.mubr.msk.f32.mxu1 %vm6712_vm0, %v6713_v11 }
  0xc1   : > { %5309 = vmatprep.mubr.msk.f32.mxu0 %vm6712_vm0, %v6713_v11 }
  0xc3   : > { %4598 = vmatmul.mubr.f32.gmra.mrb[78].mxu1 %v305_v35  ;;  %v5910_v35 = vpack.c.bf16 %v3834_v28, %v3833_v26  ;;  %v227_v26 = vld [vmem:[%s6895_s10 + $0x95] sm:$0xff]  ;;  %v7589_v28 = vld [vmem:[%s6895_s10 + $0x149] sm:$0xff] }
  0xc4   : > { %5310 = vmatmul.mubr.f32.gmra.mrb[36].mxu0 %v7353_v36  ;;  %4600 = vmatprep.mubr.msk.f32.mxu1 %vm6712_vm0, %v6713_v11 }
  0xc5   : > { %5312 = vmatprep.mubr.msk.f32.mxu0 %vm6712_vm0, %v6713_v11 }
  0xc7   : > { %4601 = vmatmul.mubr.f32.gmra.mrb[80].mxu1 %v306_v38  ;;  %v3835_v38 = vld [vmem:[%s8885_s1 + $0x170] sm:$0xff] }
  0xc8   : > { %5313 = vmatmul.mubr.f32.gmra.mrb[38].mxu0 %v7362_v39  ;;  %4635 = vmatprep.mubr.msk.f32.mxu1 %vm6712_vm0, %v6713_v11 }
  0xc9   : > { %5315 = vmatprep.mubr.msk.f32.mxu0 %vm6712_vm0, %v6713_v11 }
  0xcb   : > { %4636 = vmatmul.mubr.f32.vlgmr.msra.gmra.mrb[0].mxu1 %v209_v42  ;;  %v7488_v42 = vld [vmem:[%s6895_s10 + $0xf1] sm:$0xff] }
  0xcc   : > { %5316 = vmatmul.mubr.f32.gmra.mrb[40].mxu0 %v7377_v45  ;;  %4638 = vmatprep.mubr.msk.f32.mxu1 %vm6712_vm0, %v6713_v11 }
  0xcd   : > { %5318 = vmatprep.mubr.msk.f32.mxu0 %vm6712_vm0, %v6713_v11  ;;  %5893 = vmatpush3.bf16.msra.mxu1 %v5892_v46  ;;  %v5913_v46 = vpack.c.bf16 %v3836_v40, %v3835_v38  ;;  %v229_v38 = vld [vmem:[%s6895_s10 + $0xa5] sm:$0xff]  ;;  %v7607_v40 = vld [vmem:[%s6895_s10 + $0x159] sm:$0xff] }
  0xce   : > { %5894 = vmatprep.subr.bf16.mxu1 %v6711_v3 }
  0xcf   : > { %4639 = vmatmul.mubr.f32.gmra.mrb[2].mxu1 %v210_v51  ;;  %v218_v51 = vld [vmem:[%s6895_s10 + $0x4d] sm:$0xff] }
  0xd0   : > { %5319 = vmatmul.mubr.f32.gmra.mrb[42].mxu0 %v7392_v52  ;;  %4641 = vmatprep.mubr.msk.f32.mxu1 %vm6712_vm0, %v6713_v11 }
  0xd1   : > { %5321 = vmatprep.mubr.msk.f32.mxu0 %vm6712_vm0, %v6713_v11  ;;  %5896 = vmatpush3.bf16.msra.mxu1 %v5895_v53  ;;  %v7508_v53 = vld [vmem:[%s6895_s10 + $0x101] sm:$0xff] }
  0xd2   : > { %5897 = vmatprep.subr.bf16.mxu1 %v6711_v3 }
  0xd3   : > { %4642 = vmatmul.mubr.f32.gmra.mrb[4].mxu1 %v211_v57  ;;  %v220_v57 = vld [vmem:[%s6895_s10 + $0x5d] sm:$0xff] }
  0xd4   : > { %5322 = vmatmul.mubr.f32.gmra.mrb[44].mxu0 %v7408_v58  ;;  %4644 = vmatprep.mubr.msk.f32.mxu1 %vm6712_vm0, %v6713_v11 }
  0xd5   : > { %5324 = vmatprep.mubr.msk.f32.mxu0 %vm6712_vm0, %v6713_v11  ;;  %5899 = vmatpush3.bf16.msra.mxu1 %v5898_v59  ;;  %v7526_v59 = vld [vmem:[%s6895_s10 + $0x111] sm:$0xff] }
  0xd6   : > { %5900 = vmatprep.subr.bf16.mxu1 %v6711_v3 }
  0xd7   : > { %4645 = vmatmul.mubr.f32.gmra.mrb[6].mxu1 %v212_v63  ;;  %v222_v63 = vld [vmem:[%s6895_s10 + $0x6d] sm:$0xff] }
  0xd8   : > { %5325 = vmatmul.mubr.f32.gmra.mrb[46].mxu0 %v7424_v0  ;;  %4647 = vmatprep.mubr.msk.f32.mxu1 %vm6712_vm0, %v6713_v11 }
  0xd9   : > { %5327 = vmatprep.mubr.msk.f32.mxu0 %vm6712_vm0, %v6713_v11  ;;  %5902 = vmatpush3.bf16.msra.mxu1 %v5901_v2  ;;  %v7544_v2 = vld [vmem:[%s6895_s10 + $0x121] sm:$0xff] }
  0xda   : > { %5903 = vmatprep.subr.bf16.mxu1 %v6711_v3 }
  0xdb   : > { %4648 = vmatmul.mubr.f32.gmra.mrb[8].mxu1 %v213_v6  ;;  %v224_v6 = vld [vmem:[%s6895_s10 + $0x7d] sm:$0xff] }
  0xdc   : > { %5328 = vmatmul.mubr.f32.gmra.mrb[48].mxu0 %v7440_v9  ;;  %4650 = vmatprep.mubr.msk.f32.mxu1 %vm6712_vm0, %v6713_v11 }
  0xdd   : > { %5330 = vmatprep.mubr.msk.f32.mxu0 %vm6712_vm0, %v6713_v11  ;;  %5905 = vmatpush3.bf16.msra.mxu1 %v5904_v10  ;;  %v7562_v10 = vld [vmem:[%s6895_s10 + $0x131] sm:$0xff] }
  0xde   : > { %5906 = vmatprep.subr.bf16.mxu1 %v6711_v3 }
  0xdf   : > { %4651 = vmatmul.mubr.f32.gmra.mrb[10].mxu1 %v214_v18  ;;  %v226_v18 = vld [vmem:[%s6895_s10 + $0x8d] sm:$0xff] }
  0xe0   : > { %5331 = vmatmul.mubr.f32.gmra.mrb[50].mxu0 %v7456_v21  ;;  %4653 = vmatprep.mubr.msk.f32.mxu1 %vm6712_vm0, %v6713_v11 }
  0xe1   : > { %5333 = vmatprep.mubr.msk.f32.mxu0 %vm6712_vm0, %v6713_v11  ;;  %5908 = vmatpush3.bf16.msra.mxu1 %v5907_v23  ;;  %v7580_v23 = vld [vmem:[%s6895_s10 + $0x141] sm:$0xff] }
  0xe2   : > { %5909 = vmatprep.subr.bf16.mxu1 %v6711_v3 }
  0xe3   : > { %4654 = vmatmul.mubr.f32.gmra.mrb[12].mxu1 %v215_v30  ;;  %v228_v30 = vld [vmem:[%s6895_s10 + $0x9d] sm:$0xff] }
  0xe4   : > { %5334 = vmatmul.mubr.f32.gmra.mrb[52].mxu0 %v7472_v33  ;;  %4656 = vmatprep.mubr.msk.f32.mxu1 %vm6712_vm0, %v6713_v11 }
  0xe5   : > { %5336 = vmatprep.mubr.msk.f32.mxu0 %vm6712_vm0, %v6713_v11  ;;  %5911 = vmatpush3.bf16.msra.mxu1 %v5910_v35  ;;  %v7598_v35 = vld [vmem:[%s6895_s10 + $0x151] sm:$0xff] }
  0xe6   : > { %5912 = vmatprep.subr.bf16.mxu1 %v6711_v3 }
  0xe7   : > { %4657 = vmatmul.mubr.f32.gmra.mrb[14].mxu1 %v216_v41  ;;  %v3901_v41 = vld [vmem:[%s8885_s1 + $0x380] sm:$0xff] }
  0xe8   : > { %5337 = vmatmul.mubr.f32.gmra.mrb[54].mxu0 %v7488_v42  ;;  %4659 = vmatprep.mubr.msk.f32.mxu1 %vm6712_vm0, %v6713_v11 }
  0xe9   : > { %5339 = vmatprep.mubr.msk.f32.mxu0 %vm6712_vm0, %v6713_v11  ;;  %5914 = vmatpush3.bf16.msra.mxu1 %v5913_v46  ;;  %v3902_v46 = vld [vmem:[%s8885_s1 + $0x388] sm:$0xff] }
  0xea   : > { %5915 = vmatprep.subr.bf16.mxu1 %v6711_v3 }
  0xeb   : > { %4660 = vmatmul.mubr.f32.gmra.mrb[16].mxu1 %v217_v47  ;;  %v230_v47 = vld [vmem:[%s6895_s10 + $0xad] sm:$0xff] }
  0xec   : > { %5340 = vmatmul.mubr.f32.gmra.mrb[56].mxu0 %v7498_v48  ;;  %4662 = vmatprep.mubr.msk.f32.mxu1 %vm6712_vm0, %v6713_v11 }
  0xed   : > { %5342 = vmatprep.mubr.msk.f32.mxu0 %vm6712_vm0, %v6713_v11 }
  0xef   : > { %4663 = vmatmul.mubr.f32.gmra.mrb[18].mxu1 %v218_v51  ;;  %v6012_v51 = vpack.c.bf16 %v3902_v46, %v3901_v41  ;;  %v234_v41 = vld [vmem:[%s6895_s10 + $0xcd] sm:$0xff] }
  0xf0   : > { %5343 = vmatmul.mubr.f32.gmra.mrb[58].mxu0 %v7508_v53  ;;  %4665 = vmatprep.mubr.msk.f32.mxu1 %vm6712_vm0, %v6713_v11 }
  0xf1   : > { %5345 = vmatprep.mubr.msk.f32.mxu0 %vm6712_vm0, %v6713_v11 }
  0xf3   : > { %4666 = vmatmul.mubr.f32.gmra.mrb[20].mxu1 %v219_v54  ;;  %v3903_v54 = vld [vmem:[%s8885_s1 + $0x390] sm:$0xff] }
  0xf4   : > { %5346 = vmatmul.mubr.f32.gmra.mrb[60].mxu0 %v7517_v56  ;;  %4668 = vmatprep.mubr.msk.f32.mxu1 %vm6712_vm0, %v6713_v11 }
  0xf5   : > { %5348 = vmatprep.mubr.msk.f32.mxu0 %vm6712_vm0, %v6713_v11 }
  0xf7   : > { %4669 = vmatmul.mubr.f32.gmra.mrb[22].mxu1 %v220_v57  ;;  %v3904_v57 = vld [vmem:[%s8885_s1 + $0x398] sm:$0xff] }
  0xf8   : > { %5349 = vmatmul.mubr.f32.gmra.mrb[62].mxu0 %v7526_v59  ;;  %4671 = vmatprep.mubr.msk.f32.mxu1 %vm6712_vm0, %v6713_v11 }
  0xf9   : > { %5351 = vmatprep.mubr.msk.f32.mxu0 %vm6712_vm0, %v6713_v11 }
  0xfb   : > { %4672 = vmatmul.mubr.f32.gmra.mrb[24].mxu1 %v221_v61  ;;  %v231_v61 = vld [vmem:[%s6895_s10 + $0xb5] sm:$0xff] }
  0xfc   : > { %5352 = vmatmul.mubr.f32.gmra.mrb[64].mxu0 %v7535_v62  ;;  %4674 = vmatprep.mubr.msk.f32.mxu1 %vm6712_vm0, %v6713_v11 }
  0xfd   : > { %5354 = vmatprep.mubr.msk.f32.mxu0 %vm6712_vm0, %v6713_v11 }
  0xff   : > { %4675 = vmatmul.mubr.f32.gmra.mrb[26].mxu1 %v222_v63  ;;  %v6015_v63 = vpack.c.bf16 %v3904_v57, %v3903_v54  ;;  %v3913_v57 = vld [vmem:[%s8885_s1 + $0x3e0] sm:$0xff] }
 0x100   : > { %5355 = vmatmul.mubr.f32.gmra.mrb[66].mxu0 %v7544_v2  ;;  %4677 = vmatprep.mubr.msk.f32.mxu1 %vm6712_vm0, %v6713_v11 }
 0x101   : > { %5357 = vmatprep.mubr.msk.f32.mxu0 %vm6712_vm0, %v6713_v11 }
 0x103   : > { %4678 = vmatmul.mubr.f32.gmra.mrb[28].mxu1 %v223_v4  ;;  %v3905_v4 = vld [vmem:[%s8885_s1 + $0x3a0] sm:$0xff] }
 0x104   : > { %5358 = vmatmul.mubr.f32.gmra.mrb[68].mxu0 %v7553_v5  ;;  %4680 = vmatprep.mubr.msk.f32.mxu1 %vm6712_vm0, %v6713_v11 }
 0x105   : > { %5360 = vmatprep.mubr.msk.f32.mxu0 %vm6712_vm0, %v6713_v11 }
 0x107   : > { %4681 = vmatmul.mubr.f32.gmra.mrb[30].mxu1 %v224_v6  ;;  %v232_v6 = vld [vmem:[%s6895_s10 + $0xbd] sm:$0xff] }
 0x108   : > { %5361 = vmatmul.mubr.f32.gmra.mrb[70].mxu0 %v7562_v10  ;;  %4683 = vmatprep.mubr.msk.f32.mxu1 %vm6712_vm0, %v6713_v11 }
 0x109   : > { %5363 = vmatprep.mubr.msk.f32.mxu0 %vm6712_vm0, %v6713_v11 }
 0x10b   : > { %4684 = vmatmul.mubr.f32.gmra.mrb[32].mxu1 %v225_v14 }
 0x10c   : > { %5364 = vmatmul.mubr.f32.gmra.mrb[72].mxu0 %v7571_v16  ;;  %4686 = vmatprep.mubr.msk.f32.mxu1 %vm6712_vm0, %v6713_v11 }
 0x10d   : > { %5366 = vmatprep.mubr.msk.f32.mxu0 %vm6712_vm0, %v6713_v11 }
 0x10f   : > { %4687 = vmatmul.mubr.f32.gmra.mrb[34].mxu1 %v226_v18  ;;  %v3907_v18 = vld [vmem:[%s8885_s1 + $0x3b0] sm:$0xff] }
 0x110   : > { %5367 = vmatmul.mubr.f32.gmra.mrb[74].mxu0 %v7580_v23  ;;  %4689 = vmatprep.mubr.msk.f32.mxu1 %vm6712_vm0, %v6713_v11 }
 0x111   : > { %5369 = vmatprep.mubr.msk.f32.mxu0 %vm6712_vm0, %v6713_v11 }
 0x113   : > { %4690 = vmatmul.mubr.f32.gmra.mrb[36].mxu1 %v227_v26  ;;  %v233_v26 = vld [vmem:[%s6895_s10 + $0xc5] sm:$0xff] }
 0x114   : > { %5370 = vmatmul.mubr.f32.gmra.mrb[76].mxu0 %v7589_v28  ;;  %4692 = vmatprep.mubr.msk.f32.mxu1 %vm6712_vm0, %v6713_v11 }
 0x115   : > { %5372 = vmatprep.mubr.msk.f32.mxu0 %vm6712_vm0, %v6713_v11 }
 0x117   : > { %4693 = vmatmul.mubr.f32.gmra.mrb[38].mxu1 %v228_v30 }
 0x118   : > { %5373 = vmatmul.mubr.f32.gmra.mrb[78].mxu0 %v7598_v35  ;;  %4695 = vmatprep.mubr.msk.f32.mxu1 %vm6712_vm0, %v6713_v11 }
 0x119   : > { %5375 = vmatprep.mubr.msk.f32.mxu0 %vm6712_vm0, %v6713_v11 }
 0x11b   : > { %4696 = vmatmul.mubr.f32.gmra.mrb[40].mxu1 %v229_v38  ;;  %v3909_v38 = vld [vmem:[%s8885_s1 + $0x3c0] sm:$0xff] }
 0x11c   : > { %5376 = vmatmul.mubr.f32.gmra.mrb[80].mxu0 %v7607_v40  ;;  %4698 = vmatprep.mubr.msk.f32.mxu1 %vm6712_vm0, %v6713_v11 }
 0x11d   : > { %5410 = vmatprep.mubr.msk.f32.mxu0 %vm6712_vm0, %v6713_v11 }
 0x11f   : > { %4699 = vmatmul.mubr.f32.gmra.mrb[42].mxu1 %v230_v47  ;;  %v3911_v47 = vld [vmem:[%s8885_s1 + $0x3d0] sm:$0xff] }
 0x120   : > { %5411 = vmatmul.mubr.f32.vlgmr.msra.gmra.mrb[0].mxu0 %v7172_v44  ;;  %4701 = vmatprep.mubr.msk.f32.mxu1 %vm6712_vm0, %v6713_v11  ;;  %v3906_v44 = vld [vmem:[%s8885_s1 + $0x3a8] sm:$0xff] }
 0x121   : > { %6013 = vmatpush3.bf16.msra.mxu0 %v6012_v51  ;;  %5413 = vmatprep.mubr.msk.f32.mxu0 %vm6712_vm0, %v6713_v11  ;;  %v6018_v14 = vpack.c.bf16 %v3906_v44, %v3905_v4  ;;  %v235_v51 = vld [vmem:[%s6895_s10 + $0xd5] sm:$0xff]  ;;  %v237_v44 = vld [vmem:[%s6895_s10 + $0xe5] sm:$0xff] }
 0x122   : > { %6014 = vmatprep.subr.bf16.mxu0 %v6711_v3  ;;  %v3915_v4 = vld [vmem:[%s8885_s1 + $0x3f0] sm:$0xff] }
 0x123   : > { %4702 = vmatmul.mubr.f32.gmra.mrb[44].mxu1 %v231_v61  ;;  %v236_v61 = vld [vmem:[%s6895_s10 + $0xdd] sm:$0xff] }
 0x124   : > { %5414 = vmatmul.mubr.f32.gmra.mrb[2].mxu0 %v7188_v50  ;;  %4704 = vmatprep.mubr.msk.f32.mxu1 %vm6712_vm0, %v6713_v11  ;;  %v3908_v50 = vld [vmem:[%s8885_s1 + $0x3b8] sm:$0xff] }
 0x125   : > { %5416 = vmatprep.mubr.msk.f32.mxu0 %vm6712_vm0, %v6713_v11  ;;  %6016 = vmatpush3.bf16.msra.mxu0 %v6015_v63  ;;  %v6021_v30 = vpack.c.bf16 %v3908_v50, %v3907_v18  ;;  %v3838_v18 = vld [vmem:[%s8885_s1 + $0x188] sm:$0xff] }
 0x126   : > { %6017 = vmatprep.subr.bf16.mxu0 %v6711_v3 }
 0x127   : > { %4705 = vmatmul.mubr.f32.gmra.mrb[46].mxu1 %v232_v6 }
 0x128   : > { %5417 = vmatmul.mubr.f32.gmra.mrb[4].mxu0 %v7204_v55  ;;  %4707 = vmatprep.mubr.msk.f32.mxu1 %vm6712_vm0, %v6713_v11  ;;  %v3910_v55 = vld [vmem:[%s8885_s1 + $0x3c8] sm:$0xff] }
 0x129   : > { %5419 = vmatprep.mubr.msk.f32.mxu0 %vm6712_vm0, %v6713_v11  ;;  %6019 = vmatpush3.bf16.msra.mxu0 %v6018_v14  ;;  %v6024_v46 = vpack.c.bf16 %v3910_v55, %v3909_v38  ;;  %v239_v14 = vld [vmem:[%s6895_s10 + $0xf5] sm:$0xff]  ;;  %v3841_v55 = vld [vmem:[%s8885_s1 + $0x1a0] sm:$0xff] }
 0x12a   : > { %6020 = vmatprep.subr.bf16.mxu0 %v6711_v3 }
 0x12b   : > { %4708 = vmatmul.mubr.f32.gmra.mrb[48].mxu1 %v233_v26  ;;  %v3839_v26 = vld [vmem:[%s8885_s1 + $0x190] sm:$0xff] }
 0x12c   : > { %5420 = vmatmul.mubr.f32.gmra.mrb[6].mxu0 %v7220_v60  ;;  %4710 = vmatprep.mubr.msk.f32.mxu1 %vm6712_vm0, %v6713_v11  ;;  %v3912_v60 = vld [vmem:[%s8885_s1 + $0x3d8] sm:$0xff] }
 0x12d   : > { %5422 = vmatprep.mubr.msk.f32.mxu0 %vm6712_vm0, %v6713_v11  ;;  %6022 = vmatpush3.bf16.msra.mxu0 %v6021_v30  ;;  %v6027_v54 = vpack.c.bf16 %v3912_v60, %v3911_v47  ;;  %v3840_v30 = vld [vmem:[%s8885_s1 + $0x198] sm:$0xff]  ;;  %v3843_v47 = vld [vmem:[%s8885_s1 + $0x1b0] sm:$0xff] }
 0x12e   : > { %6023 = vmatprep.subr.bf16.mxu0 %v6711_v3  ;;  %v5919_v38 = vpack.c.bf16 %v3840_v30, %v3839_v26  ;;  %v7836_v60 = vld [vmem:[%s6895_s10 + $0x1f] sm:$0xff]  ;;  %v3922_v26 = vld [vmem:[%s8885_s1 + $0x428] sm:$0xff] }
 0x12f   : > { %4711 = vmatmul.mubr.f32.gmra.mrb[50].mxu1 %v234_v41  ;;  %v7820_v41 = vld [vmem:[%s6895_s10 + $0x17] sm:$0xff]  ;;  %v8065_v30 = vld [vmem:[%s6895_s10 + $0xbf] sm:$0xff] }
 0x130   : > { %5423 = vmatmul.mubr.f32.gmra.mrb[8].mxu0 %v7236_v1  ;;  %4713 = vmatprep.mubr.msk.f32.mxu1 %vm6712_vm0, %v6713_v11  ;;  %v3914_v1 = vld [vmem:[%s8885_s1 + $0x3e8] sm:$0xff] }
 0x131   : > { %5425 = vmatprep.mubr.msk.f32.mxu0 %vm6712_vm0, %v6713_v11  ;;  %6025 = vmatpush3.bf16.msra.mxu0 %v6024_v46  ;;  %v6030_v63 = vpack.c.bf16 %v3914_v1, %v3913_v57  ;;  %v7852_v57 = vld [vmem:[%s6895_s10 + $0x27] sm:$0xff] }
 0x132   : > { %6026 = vmatprep.subr.bf16.mxu0 %v6711_v3 }
 0x133   : > { %4714 = vmatmul.mubr.f32.gmra.mrb[52].mxu1 %v235_v51 }
 0x134   : > { %5426 = vmatmul.mubr.f32.gmra.mrb[10].mxu0 %v7252_v7  ;;  %4716 = vmatprep.mubr.msk.f32.mxu1 %vm6712_vm0, %v6713_v11  ;;  %v3916_v7 = vld [vmem:[%s8885_s1 + $0x3f8] sm:$0xff] }
 0x135   : > { %5428 = vmatprep.mubr.msk.f32.mxu0 %vm6712_vm0, %v6713_v11  ;;  %6028 = vmatpush3.bf16.msra.mxu0 %v6027_v54  ;;  %v6033_v6 = vpack.c.bf16 %v3916_v7, %v3915_v4  ;;  %v3845_v54 = vld [vmem:[%s8885_s1 + $0x1c0] sm:$0xff] }
 0x136   : > { %6029 = vmatprep.subr.bf16.mxu0 %v6711_v3  ;;  %v3849_v7 = vld [vmem:[%s8885_s1 + $0x1e0] sm:$0xff] }
 0x137   : > { %4717 = vmatmul.mubr.f32.gmra.mrb[54].mxu1 %v236_v61  ;;  %v3847_v61 = vld [vmem:[%s8885_s1 + $0x1d0] sm:$0xff] }
 0x138   : > { %5429 = vmatmul.mubr.f32.gmra.mrb[12].mxu0 %v7262_v12  ;;  %4719 = vmatprep.mubr.msk.f32.mxu1 %vm6712_vm0, %v6713_v11  ;;  %v238_v12 = vld [vmem:[%s6895_s10 + $0xed] sm:$0xff] }
 0x139   : > { %5431 = vmatprep.mubr.msk.f32.mxu0 %vm6712_vm0, %v6713_v11  ;;  %6031 = vmatpush3.bf16.msra.mxu0 %v6030_v63  ;;  %v7868_v63 = vld [vmem:[%s6895_s10 + $0x2f] sm:$0xff] }
 0x13a   : > { %6032 = vmatprep.subr.bf16.mxu0 %v6711_v3 }
 0x13b   : > { %4720 = vmatmul.mubr.f32.gmra.mrb[56].mxu1 %v237_v44  ;;  %v7884_v44 = vld [vmem:[%s6895_s10 + $0x37] sm:$0xff] }
 0x13c   : > { %5432 = vmatmul.mubr.f32.gmra.mrb[14].mxu0 %v7272_v15  ;;  %4722 = vmatprep.mubr.msk.f32.mxu1 %vm6712_vm0, %v6713_v11  ;;  %v240_v15 = vld [vmem:[%s6895_s10 + $0xfd] sm:$0xff] }
 0x13d   : > { %5434 = vmatprep.mubr.msk.f32.mxu0 %vm6712_vm0, %v6713_v11  ;;  %6034 = vmatpush3.bf16.msra.mxu0 %v6033_v6 }
 0x13e   : > { %6035 = vmatprep.subr.bf16.mxu0 %v6711_v3 }
 0x13f   : > { %4723 = vmatmul.mubr.f32.gmra.mrb[58].mxu1 %v238_v12  ;;  %v3851_v12 = vld [vmem:[%s8885_s1 + $0x1f0] sm:$0xff] }
 0x140   : > { %5435 = vmatmul.mubr.f32.gmra.mrb[16].mxu0 %v7281_v17  ;;  %4725 = vmatprep.mubr.msk.f32.mxu1 %vm6712_vm0, %v6713_v11  ;;  %v241_v17 = vld [vmem:[%s6895_s10 + $0x105] sm:$0xff] }
 0x141   : > { %5437 = vmatprep.mubr.msk.f32.mxu0 %vm6712_vm0, %v6713_v11 }
 0x143   : > { %4726 = vmatmul.mubr.f32.gmra.mrb[60].mxu1 %v239_v14  ;;  %v7900_v14 = vld [vmem:[%s6895_s10 + $0x3f] sm:$0xff] }
 0x144   : > { %5438 = vmatmul.mubr.f32.gmra.mrb[18].mxu0 %v7290_v20  ;;  %4728 = vmatprep.mubr.msk.f32.mxu1 %vm6712_vm0, %v6713_v11  ;;  %v242_v20 = vld [vmem:[%s6895_s10 + $0x10d] sm:$0xff] }
 0x145   : > { %5440 = vmatprep.mubr.msk.f32.mxu0 %vm6712_vm0, %v6713_v11 }
 0x147   : > { %4729 = vmatmul.mubr.f32.gmra.mrb[62].mxu1 %v240_v15 }
 0x148   : > { %5441 = vmatmul.mubr.f32.gmra.mrb[20].mxu0 %v7299_v22  ;;  %4731 = vmatprep.mubr.msk.f32.mxu1 %vm6712_vm0, %v6713_v11  ;;  %v243_v22 = vld [vmem:[%s6895_s10 + $0x115] sm:$0xff] }
 0x149   : > { %5443 = vmatprep.mubr.msk.f32.mxu0 %vm6712_vm0, %v6713_v11 }
 0x14b   : > { %4732 = vmatmul.mubr.f32.gmra.mrb[64].mxu1 %v241_v17  ;;  %v7929_v17 = vld [vmem:[%s6895_s10 + $0x57] sm:$0xff] }
 0x14c   : > { %5444 = vmatmul.mubr.f32.gmra.mrb[22].mxu0 %v7308_v24  ;;  %4734 = vmatprep.mubr.msk.f32.mxu1 %vm6712_vm0, %v6713_v11  ;;  %v244_v24 = vld [vmem:[%s6895_s10 + $0x11d] sm:$0xff] }
 0x14d   : > { %5446 = vmatprep.mubr.msk.f32.mxu0 %vm6712_vm0, %v6713_v11 }
 0x14f   : > { %4735 = vmatmul.mubr.f32.gmra.mrb[66].mxu1 %v242_v20  ;;  %v8019_v20 = vld [vmem:[%s6895_s10 + $0xa7] sm:$0xff] }
 0x150   : > { %5447 = vmatmul.mubr.f32.gmra.mrb[24].mxu0 %v7317_v27  ;;  %4737 = vmatprep.mubr.msk.f32.mxu1 %vm6712_vm0, %v6713_v11  ;;  %v245_v27 = vld [vmem:[%s6895_s10 + $0x125] sm:$0xff] }
 0x151   : > { %5449 = vmatprep.mubr.msk.f32.mxu0 %vm6712_vm0, %v6713_v11 }
 0x153   : > { %4738 = vmatmul.mubr.f32.gmra.mrb[68].mxu1 %v243_v22  ;;  %v3917_v22 = vld [vmem:[%s8885_s1 + $0x400] sm:$0xff] }
 0x154   : > { %5450 = vmatmul.mubr.f32.gmra.mrb[26].mxu0 %v7326_v29  ;;  %4740 = vmatprep.mubr.msk.f32.mxu1 %vm6712_vm0, %v6713_v11  ;;  %v246_v29 = vld [vmem:[%s6895_s10 + $0x12d] sm:$0xff] }
 0x155   : > { %5452 = vmatprep.mubr.msk.f32.mxu0 %vm6712_vm0, %v6713_v11 }
 0x157   : > { %4741 = vmatmul.mubr.f32.gmra.mrb[70].mxu1 %v244_v24  ;;  %v3918_v24 = vld [vmem:[%s8885_s1 + $0x408] sm:$0xff] }
 0x158   : > { %5453 = vmatmul.mubr.f32.gmra.mrb[28].mxu0 %v7335_v32  ;;  %4743 = vmatprep.mubr.msk.f32.mxu1 %vm6712_vm0, %v6713_v11  ;;  %v247_v32 = vld [vmem:[%s6895_s10 + $0x135] sm:$0xff] }
 0x159   : > { %5455 = vmatprep.mubr.msk.f32.mxu0 %vm6712_vm0, %v6713_v11 }
 0x15b   : > { %4744 = vmatmul.mubr.f32.gmra.mrb[72].mxu1 %v245_v27  ;;  %v8034_v27 = vld [vmem:[%s6895_s10 + $0xaf] sm:$0xff] }
 0x15c   : > { %5456 = vmatmul.mubr.f32.gmra.mrb[30].mxu0 %v7344_v34  ;;  %4746 = vmatprep.mubr.msk.f32.mxu1 %vm6712_vm0, %v6713_v11  ;;  %v248_v34 = vld [vmem:[%s6895_s10 + $0x13d] sm:$0xff] }
 0x15d   : > { %5458 = vmatprep.mubr.msk.f32.mxu0 %vm6712_vm0, %v6713_v11 }
 0x15f   : > { %4747 = vmatmul.mubr.f32.gmra.mrb[74].mxu1 %v246_v29  ;;  %v2709_v29 = vld [vmem:[%s6895_s10 + $0x2a] sm:$0xff] }
 0x160   : > { %5459 = vmatmul.mubr.f32.gmra.mrb[32].mxu0 %v7353_v36  ;;  %4749 = vmatprep.mubr.msk.f32.mxu1 %vm6712_vm0, %v6713_v11  ;;  %v249_v36 = vld [vmem:[%s6895_s10 + $0x145] sm:$0xff] }
 0x161   : > { %5461 = vmatprep.mubr.msk.f32.mxu0 %vm6712_vm0, %v6713_v11 }
 0x163   : > { %4750 = vmatmul.mubr.f32.gmra.mrb[76].mxu1 %v247_v32  ;;  %v6036_v32 = vpack.c.bf16 %v3918_v24, %v3917_v22  ;;  %v3931_v22 = vld [vmem:[%s8885_s1 + $0x470] sm:$0xff]  ;;  %v3932_v24 = vld [vmem:[%s8885_s1 + $0x478] sm:$0xff] }
 0x164   : > { %5462 = vmatmul.mubr.f32.gmra.mrb[34].mxu0 %v7362_v39  ;;  %4752 = vmatprep.mubr.msk.f32.mxu1 %vm6712_vm0, %v6713_v11  ;;  %v3837_v39 = vld [vmem:[%s8885_s1 + $0x180] sm:$0xff] }
 0x165   : > { %5464 = vmatprep.mubr.msk.f32.mxu0 %vm6712_vm0, %v6713_v11  ;;  %v5916_v50 = vpack.c.bf16 %v3838_v18, %v3837_v39  ;;  %v8049_v39 = vld [vmem:[%s6895_s10 + $0xb7] sm:$0xff] }
 0x166   : > { %v2710_v18 = vld [vmem:[%s6895_s10 + $0x32] sm:$0xff] }
 0x167   : > { %4753 = vmatmul.mubr.f32.gmra.mrb[78].mxu1 %v248_v34  ;;  %v3919_v34 = vld [vmem:[%s8885_s1 + $0x410] sm:$0xff] }
 0x168   : > { %5465 = vmatmul.mubr.f32.gmra.mrb[36].mxu0 %v7377_v45  ;;  %4755 = vmatprep.mubr.msk.f32.mxu1 %vm6712_vm0, %v6713_v11  ;;  %v864_v45 = vld [vmem:[%s6895_s10 + $0x7] sm:$0xff] }
 0x169   : > { %5467 = vmatprep.mubr.msk.f32.mxu0 %vm6712_vm0, %v6713_v11 }
 0x16b   : > { %4756 = vmatmul.mubr.f32.gmra.mrb[80].mxu1 %v249_v36  ;;  %v3920_v36 = vld [vmem:[%s8885_s1 + $0x418] sm:$0xff] }
 0x16c   : > { %5468 = vmatmul.mubr.f32.gmra.mrb[38].mxu0 %v7392_v52  ;;  %4790 = vmatprep.mubr.msk.f32.mxu1 %vm6712_vm0, %v6713_v11  ;;  %v865_v52 = vld [vmem:[%s6895_s10 + $0xf] sm:$0xff] }
 0x16d   : > { %5470 = vmatprep.mubr.msk.f32.mxu0 %vm6712_vm0, %v6713_v11 }
 0x16f   : > { %4791 = vmatmul.mubr.f32.vlgmr.msra.gmra.mrb[0].mxu1 %v864_v45  ;;  %v6039_v45 = vpack.c.bf16 %v3920_v36, %v3919_v34  ;;  %v6057_v34 = vpack.c.bf16 %v3932_v24, %v3931_v22  ;;  %v8155_v36 = vld [vmem:[%s6895_s10 + $0xef] sm:$0xff]  ;;  %v2728_v22 = vld [vmem:[%s6895_s10 + $0xc2] sm:$0xff] }
 0x170   : > { %5471 = vmatmul.mubr.f32.gmra.mrb[40].mxu0 %v7408_v58  ;;  %4793 = vmatprep.mubr.msk.f32.mxu1 %vm6712_vm0, %v6713_v11  ;;  %v3842_v58 = vld [vmem:[%s8885_s1 + $0x1a8] sm:$0xff] }
 0x171   : > { %5473 = vmatprep.mubr.msk.f32.mxu0 %vm6712_vm0, %v6713_v11  ;;  %5917 = vmatpush3.bf16.msra.mxu1 %v5916_v50  ;;  %v5922_v46 = vpack.c.bf16 %v3842_v58, %v3841_v55  ;;  %v3921_v50 = vld [vmem:[%s8885_s1 + $0x420] sm:$0xff]  ;;  %v3923_v55 = vld [vmem:[%s8885_s1 + $0x430] sm:$0xff]  ;;  %v3924_v58 = vld [vmem:[%s8885_s1 + $0x438] sm:$0xff] }
 0x172   : > { %5918 = vmatprep.subr.bf16.mxu1 %v6711_v3  ;;  %v2729_v24 = vld [vmem:[%s6895_s10 + $0xca] sm:$0xff] }
 0x173   : > { %4794 = vmatmul.mubr.f32.gmra.mrb[2].mxu1 %v865_v52  ;;  %v2711_v52 = vld [vmem:[%s6895_s10 + $0x3a] sm:$0xff] }
 0x174   : > { %5474 = vmatmul.mubr.f32.gmra.mrb[42].mxu0 %v7424_v0  ;;  %4796 = vmatprep.mubr.msk.f32.mxu1 %vm6712_vm0, %v6713_v11  ;;  %v3844_v0 = vld [vmem:[%s8885_s1 + $0x1b8] sm:$0xff] }
 0x175   : > { %5476 = vmatprep.mubr.msk.f32.mxu0 %vm6712_vm0, %v6713_v11  ;;  %5920 = vmatpush3.bf16.msra.mxu1 %v5919_v38  ;;  %v5925_v51 = vpack.c.bf16 %v3844_v0, %v3843_v47  ;;  %v6042_v38 = vpack.c.bf16 %v3922_v26, %v3921_v50  ;;  %v2712_v47 = vld [vmem:[%s6895_s10 + $0x42] sm:$0xff]  ;;  %v6045_v0 = vpack.c.bf16 %v3924_v58, %v3923_v55  ;;  %v2718_v50 = vld [vmem:[%s6895_s10 + $0x72] sm:$0xff] }
 0x176   : > { %5921 = vmatprep.subr.bf16.mxu1 %v6711_v3  ;;  %v8173_v26 = vld [vmem:[%s6895_s10 + $0xff] sm:$0xff]  ;;  %v8191_v58 = vld [vmem:[%s6895_s10 + $0x10f] sm:$0xff] }
 0x177   : > { %4797 = vmatmul.mubr.f32.gmra.mrb[4].mxu1 %v7820_v41  ;;  %v2720_v55 = vld [vmem:[%s6895_s10 + $0x82] sm:$0xff] }
 0x178   : > { %5477 = vmatmul.mubr.f32.gmra.mrb[44].mxu0 %v7440_v9  ;;  %4799 = vmatprep.mubr.msk.f32.mxu1 %vm6712_vm0, %v6713_v11  ;;  %v3846_v9 = vld [vmem:[%s8885_s1 + $0x1c8] sm:$0xff] }
 0x179   : > { %5479 = vmatprep.mubr.msk.f32.mxu0 %vm6712_vm0, %v6713_v11  ;;  %5923 = vmatpush3.bf16.msra.mxu1 %v5922_v46  ;;  %v5928_v1 = vpack.c.bf16 %v3846_v9, %v3845_v54  ;;  %v8081_v46 = vld [vmem:[%s6895_s10 + $0xc7] sm:$0xff]  ;;  %v8097_v9 = vld [vmem:[%s6895_s10 + $0xcf] sm:$0xff] }
 0x17a   : > { %5924 = vmatprep.subr.bf16.mxu1 %v6711_v3  ;;  %v3926_v54 = vld [vmem:[%s8885_s1 + $0x448] sm:$0xff] }
 0x17b   : > { %4800 = vmatmul.mubr.f32.gmra.mrb[6].mxu1 %v7836_v60 }
 0x17c   : > { %5480 = vmatmul.mubr.f32.gmra.mrb[46].mxu0 %v7456_v21  ;;  %4802 = vmatprep.mubr.msk.f32.mxu1 %vm6712_vm0, %v6713_v11  ;;  %v3848_v21 = vld [vmem:[%s8885_s1 + $0x1d8] sm:$0xff] }
 0x17d   : > { %5482 = vmatprep.mubr.msk.f32.mxu0 %vm6712_vm0, %v6713_v11  ;;  %5926 = vmatpush3.bf16.msra.mxu1 %v5925_v51  ;;  %v5931_v4 = vpack.c.bf16 %v3848_v21, %v3847_v61  ;;  %v3925_v51 = vld [vmem:[%s8885_s1 + $0x440] sm:$0xff]  ;;  %v3927_v21 = vld [vmem:[%s8885_s1 + $0x450] sm:$0xff] }
 0x17e   : > { %5927 = vmatprep.subr.bf16.mxu1 %v6711_v3  ;;  %v6048_v61 = vpack.c.bf16 %v3926_v54, %v3925_v51  ;;  %v2722_v51 = vld [vmem:[%s6895_s10 + $0x92] sm:$0xff]  ;;  %v8209_v54 = vld [vmem:[%s6895_s10 + $0x11f] sm:$0xff] }
 0x17f   : > { %4803 = vmatmul.mubr.f32.gmra.mrb[8].mxu1 %v7852_v57 }
 0x180   : > { %5483 = vmatmul.mubr.f32.gmra.mrb[48].mxu0 %v7472_v33  ;;  %4805 = vmatprep.mubr.msk.f32.mxu1 %vm6712_vm0, %v6713_v11  ;;  %v3850_v33 = vld [vmem:[%s8885_s1 + $0x1e8] sm:$0xff] }
 0x181   : > { %5485 = vmatprep.mubr.msk.f32.mxu0 %vm6712_vm0, %v6713_v11  ;;  %5929 = vmatpush3.bf16.msra.mxu1 %v5928_v1  ;;  %v5934_v6 = vpack.c.bf16 %v3850_v33, %v3849_v7  ;;  %v2713_v1 = vld [vmem:[%s6895_s10 + $0x4a] sm:$0xff]  ;;  %v8113_v7 = vld [vmem:[%s6895_s10 + $0xd7] sm:$0xff] }
 0x182   : > { %5930 = vmatprep.subr.bf16.mxu1 %v6711_v3  ;;  %v2714_v33 = vld [vmem:[%s6895_s10 + $0x52] sm:$0xff] }
 0x183   : > { %4806 = vmatmul.mubr.f32.gmra.mrb[10].mxu1 %v7868_v63 }
 0x184   : > { %5486 = vmatmul.mubr.f32.gmra.mrb[50].mxu0 %v7488_v42  ;;  %4808 = vmatprep.mubr.msk.f32.mxu1 %vm6712_vm0, %v6713_v11  ;;  %v3852_v42 = vld [vmem:[%s8885_s1 + $0x1f8] sm:$0xff] }
 0x185   : > { %5488 = vmatprep.mubr.msk.f32.mxu0 %vm6712_vm0, %v6713_v11  ;;  %5932 = vmatpush3.bf16.msra.mxu1 %v5931_v4  ;;  %v5937_v15 = vpack.c.bf16 %v3852_v42, %v3851_v12  ;;  %v3928_v4 = vld [vmem:[%s8885_s1 + $0x458] sm:$0xff]  ;;  %v3929_v12 = vld [vmem:[%s8885_s1 + $0x460] sm:$0xff]  ;;  %v3930_v42 = vld [vmem:[%s8885_s1 + $0x468] sm:$0xff] }
 0x186   : > { %5933 = vmatprep.subr.bf16.mxu1 %v6711_v3 }
 0x187   : > { %4809 = vmatmul.mubr.f32.gmra.mrb[12].mxu1 %v7884_v44 }
 0x188   : > { %5489 = vmatmul.mubr.f32.gmra.mrb[52].mxu0 %v7498_v48  ;;  %4811 = vmatprep.mubr.msk.f32.mxu1 %vm6712_vm0, %v6713_v11  ;;  %v7910_v48 = vld [vmem:[%s6895_s10 + $0x47] sm:$0xff] }
 0x189   : > { %5491 = vmatprep.mubr.msk.f32.mxu0 %vm6712_vm0, %v6713_v11  ;;  %5935 = vmatpush3.bf16.msra.mxu1 %v5934_v6  ;;  %v6051_v6 = vpack.c.bf16 %v3928_v4, %v3927_v21  ;;  %v2724_v21 = vld [vmem:[%s6895_s10 + $0xa2] sm:$0xff]  ;;  %v8227_v4 = vld [vmem:[%s6895_s10 + $0x12f] sm:$0xff] }
 0x18a   : > { %5936 = vmatprep.subr.bf16.mxu1 %v6711_v3 }
 0x18b   : > { %4812 = vmatmul.mubr.f32.gmra.mrb[14].mxu1 %v7900_v14 }
 0x18c   : > { %5492 = vmatmul.mubr.f32.gmra.mrb[54].mxu0 %v7508_v53  ;;  %4814 = vmatprep.mubr.msk.f32.mxu1 %vm6712_vm0, %v6713_v11  ;;  %v7920_v53 = vld [vmem:[%s6895_s10 + $0x4f] sm:$0xff] }
 0x18d   : > { %5494 = vmatprep.mubr.msk.f32.mxu0 %vm6712_vm0, %v6713_v11  ;;  %5938 = vmatpush3.bf16.msra.mxu1 %v5937_v15  ;;  %v8129_v15 = vld [vmem:[%s6895_s10 + $0xdf] sm:$0xff] }
 0x18e   : > { %6059 = vmatprep.subr.bf16.mxu1 %v6711_v3 }
 0x18f   : > { %4815 = vmatmul.mubr.f32.gmra.mrb[16].mxu1 %v7910_v48 }
 0x190   : > { %5495 = vmatmul.mubr.f32.gmra.mrb[56].mxu0 %v7517_v56  ;;  %4817 = vmatprep.mubr.msk.f32.mxu1 %vm6712_vm0, %v6713_v11  ;;  %v7938_v56 = vld [vmem:[%s6895_s10 + $0x5f] sm:$0xff] }
 0x191   : > { %5497 = vmatprep.mubr.msk.f32.mxu0 %vm6712_vm0, %v6713_v11 }
 0x193   : > { %4818 = vmatmul.mubr.f32.gmra.mrb[18].mxu1 %v7920_v53 }
 0x194   : > { %5498 = vmatmul.mubr.f32.gmra.mrb[58].mxu0 %v7526_v59  ;;  %4820 = vmatprep.mubr.msk.f32.mxu1 %vm6712_vm0, %v6713_v11  ;;  %v7947_v59 = vld [vmem:[%s6895_s10 + $0x67] sm:$0xff] }
 0x195   : > { %5500 = vmatprep.mubr.msk.f32.mxu0 %vm6712_vm0, %v6713_v11 }
 0x197   : > { %4821 = vmatmul.mubr.f32.gmra.mrb[20].mxu1 %v7929_v17 }
 0x198   : > { %5501 = vmatmul.mubr.f32.gmra.mrb[60].mxu0 %v7535_v62  ;;  %4823 = vmatprep.mubr.msk.f32.mxu1 %vm6712_vm0, %v6713_v11  ;;  %v7956_v62 = vld [vmem:[%s6895_s10 + $0x6f] sm:$0xff] }
 0x199   : > { %5503 = vmatprep.mubr.msk.f32.mxu0 %vm6712_vm0, %v6713_v11 }
 0x19b   : > { %4824 = vmatmul.mubr.f32.gmra.mrb[22].mxu1 %v7938_v56 }
 0x19c   : > { %5504 = vmatmul.mubr.f32.gmra.mrb[62].mxu0 %v7544_v2  ;;  %4826 = vmatprep.mubr.msk.f32.mxu1 %vm6712_vm0, %v6713_v11  ;;  %v7965_v2 = vld [vmem:[%s6895_s10 + $0x77] sm:$0xff] }
 0x19d   : > { %5506 = vmatprep.mubr.msk.f32.mxu0 %vm6712_vm0, %v6713_v11 }
 0x19f   : > { %4827 = vmatmul.mubr.f32.gmra.mrb[24].mxu1 %v7947_v59 }
 0x1a0   : > { %5507 = vmatmul.mubr.f32.gmra.mrb[64].mxu0 %v7553_v5  ;;  %4829 = vmatprep.mubr.msk.f32.mxu1 %vm6712_vm0, %v6713_v11  ;;  %v7974_v5 = vld [vmem:[%s6895_s10 + $0x7f] sm:$0xff] }
 0x1a1   : > { %5509 = vmatprep.mubr.msk.f32.mxu0 %vm6712_vm0, %v6713_v11 }
 0x1a3   : > { %4830 = vmatmul.mubr.f32.gmra.mrb[26].mxu1 %v7956_v62 }
 0x1a4   : > { %5510 = vmatmul.mubr.f32.gmra.mrb[66].mxu0 %v7562_v10  ;;  %4832 = vmatprep.mubr.msk.f32.mxu1 %vm6712_vm0, %v6713_v11  ;;  %v7983_v10 = vld [vmem:[%s6895_s10 + $0x87] sm:$0xff] }
 0x1a5   : > { %5512 = vmatprep.mubr.msk.f32.mxu0 %vm6712_vm0, %v6713_v11 }
 0x1a7   : > { %4833 = vmatmul.mubr.f32.gmra.mrb[28].mxu1 %v7965_v2 }
 0x1a8   : > { %5513 = vmatmul.mubr.f32.gmra.mrb[68].mxu0 %v7571_v16  ;;  %4835 = vmatprep.mubr.msk.f32.mxu1 %vm6712_vm0, %v6713_v11  ;;  %v7992_v16 = vld [vmem:[%s6895_s10 + $0x8f] sm:$0xff] }
 0x1a9   : > { %5515 = vmatprep.mubr.msk.f32.mxu0 %vm6712_vm0, %v6713_v11 }
 0x1ab   : > { %4836 = vmatmul.mubr.f32.gmra.mrb[30].mxu1 %v7974_v5 }
 0x1ac   : > { %5516 = vmatmul.mubr.f32.gmra.mrb[70].mxu0 %v7580_v23  ;;  %4838 = vmatprep.mubr.msk.f32.mxu1 %vm6712_vm0, %v6713_v11  ;;  %v8001_v23 = vld [vmem:[%s6895_s10 + $0x97] sm:$0xff] }
 0x1ad   : > { %5518 = vmatprep.mubr.msk.f32.mxu0 %vm6712_vm0, %v6713_v11 }
 0x1af   : > { %4839 = vmatmul.mubr.f32.gmra.mrb[32].mxu1 %v7983_v10 }
 0x1b0   : > { %5519 = vmatmul.mubr.f32.gmra.mrb[72].mxu0 %v7589_v28  ;;  %4841 = vmatprep.mubr.msk.f32.mxu1 %vm6712_vm0, %v6713_v11  ;;  %v8010_v28 = vld [vmem:[%s6895_s10 + $0x9f] sm:$0xff] }
 0x1b1   : > { %5521 = vmatprep.mubr.msk.f32.mxu0 %vm6712_vm0, %v6713_v11 }
 0x1b3   : > { %4842 = vmatmul.mubr.f32.gmra.mrb[34].mxu1 %v7992_v16 }
 0x1b4   : > { %5522 = vmatmul.mubr.f32.gmra.mrb[74].mxu0 %v7598_v35  ;;  %4844 = vmatprep.mubr.msk.f32.mxu1 %vm6712_vm0, %v6713_v11  ;;  %v2379_v35 = vld [vmem:[%s6895_s10 + $0x161] sm:$0xff] }
 0x1b5   : > { %5524 = vmatprep.mubr.msk.f32.mxu0 %vm6712_vm0, %v6713_v11 }
 0x1b7   : > { %4845 = vmatmul.mubr.f32.gmra.mrb[36].mxu1 %v8001_v23 }
 0x1b8   : > { %5525 = vmatmul.mubr.f32.gmra.mrb[76].mxu0 %v7607_v40  ;;  %4847 = vmatprep.mubr.msk.f32.mxu1 %vm6712_vm0, %v6713_v11  ;;  %v2380_v40 = vld [vmem:[%s6895_s10 + $0x169] sm:$0xff] }
 0x1b9   : > { %5527 = vmatprep.mubr.msk.f32.mxu0 %vm6712_vm0, %v6713_v11 }
 0x1bb   : > { %4848 = vmatmul.mubr.f32.gmra.mrb[38].mxu1 %v8010_v28 }
 0x1bc   : > { %5528 = vmatmul.mubr.f32.gmra.mrb[78].mxu0 %v2379_v35  ;;  %4850 = vmatprep.mubr.msk.f32.mxu1 %vm6712_vm0, %v6713_v11  ;;  %v2715_v35 = vld [vmem:[%s6895_s10 + $0x5a] sm:$0xff] }
 0x1bd   : > { %5530 = vmatprep.mubr.msk.f32.mxu0 %vm6712_vm0, %v6713_v11 }
 0x1bf   : > { %4851 = vmatmul.mubr.f32.gmra.mrb[40].mxu1 %v8019_v20 }
 0x1c0   : > { %5531 = vmatmul.mubr.f32.gmra.mrb[80].mxu0 %v2380_v40  ;;  %4853 = vmatprep.mubr.msk.f32.mxu1 %vm6712_vm0, %v6713_v11  ;;  %v6054_v40 = vpack.c.bf16 %v3930_v42, %v3929_v12  ;;  %v2726_v12 = vld [vmem:[%s6895_s10 + $0xb2] sm:$0xff]  ;;  %v8245_v42 = vld [vmem:[%s6895_s10 + $0x13f] sm:$0xff] }
 0x1c1   : > { %5565 = vmatprep.mubr.msk.f32.mxu0 %vm6712_vm0, %v6713_v11 }
 0x1c3   : > { %4854 = vmatmul.mubr.f32.gmra.mrb[42].mxu1 %v8034_v27 }
 0x1c4   : > { %5566 = vmatmul.mubr.f32.vlgmr.msra.gmra.mrb[0].mxu0 %v2709_v29  ;;  %4856 = vmatprep.mubr.msk.f32.mxu1 %vm6712_vm0, %v6713_v11  ;;  %v8145_v29 = vld [vmem:[%s6895_s10 + $0xe7] sm:$0xff] }
 0x1c5   : > { %6037 = vmatpush3.bf16.msra.mxu0 %v6036_v32  ;;  %5568 = vmatprep.mubr.msk.f32.mxu0 %vm6712_vm0, %v6713_v11  ;;  %v2716_v32 = vld [vmem:[%s6895_s10 + $0x62] sm:$0xff] }
 0x1c6   : > { %6038 = vmatprep.subr.bf16.mxu0 %v6711_v3 }
 0x1c7   : > { %4857 = vmatmul.mubr.f32.gmra.mrb[44].mxu1 %v8049_v39 }
 0x1c8   : > { %5569 = vmatmul.mubr.f32.gmra.mrb[2].mxu0 %v2710_v18  ;;  %4859 = vmatprep.mubr.msk.f32.mxu1 %vm6712_vm0, %v6713_v11  ;;  %v2717_v18 = vld [vmem:[%s6895_s10 + $0x6a] sm:$0xff] }
 0x1c9   : > { %5571 = vmatprep.mubr.msk.f32.mxu0 %vm6712_vm0, %v6713_v11  ;;  %6040 = vmatpush3.bf16.msra.mxu0 %v6039_v45  ;;  %v8164_v45 = vld [vmem:[%s6895_s10 + $0xf7] sm:$0xff] }
 0x1ca   : > { %6041 = vmatprep.subr.bf16.mxu0 %v6711_v3 }
 0x1cb   : > { %4860 = vmatmul.mubr.f32.gmra.mrb[46].mxu1 %v8065_v30 }
 0x1cc   : > { %5572 = vmatmul.mubr.f32.gmra.mrb[4].mxu0 %v2711_v52  ;;  %4862 = vmatprep.mubr.msk.f32.mxu1 %vm6712_vm0, %v6713_v11  ;;  %v2719_v52 = vld [vmem:[%s6895_s10 + $0x7a] sm:$0xff] }
 0x1cd   : > { %5574 = vmatprep.mubr.msk.f32.mxu0 %vm6712_vm0, %v6713_v11  ;;  %6043 = vmatpush3.bf16.msra.mxu0 %v6042_v38  ;;  %v8182_v38 = vld [vmem:[%s6895_s10 + $0x107] sm:$0xff] }
 0x1ce   : > { %6044 = vmatprep.subr.bf16.mxu0 %v6711_v3 }
 0x1cf   : > { %4863 = vmatmul.mubr.f32.gmra.mrb[48].mxu1 %v8081_v46 }
 0x1d0   : > { %5575 = vmatmul.mubr.f32.gmra.mrb[6].mxu0 %v2712_v47  ;;  %4865 = vmatprep.mubr.msk.f32.mxu1 %vm6712_vm0, %v6713_v11  ;;  %v2721_v47 = vld [vmem:[%s6895_s10 + $0x8a] sm:$0xff] }
 0x1d1   : > { %5577 = vmatprep.mubr.msk.f32.mxu0 %vm6712_vm0, %v6713_v11  ;;  %6046 = vmatpush3.bf16.msra.mxu0 %v6045_v0  ;;  %v8200_v0 = vld [vmem:[%s6895_s10 + $0x117] sm:$0xff] }
 0x1d2   : > { %6047 = vmatprep.subr.bf16.mxu0 %v6711_v3 }
 0x1d3   : > { %4866 = vmatmul.mubr.f32.gmra.mrb[50].mxu1 %v8097_v9 }
 0x1d4   : > { %5578 = vmatmul.mubr.f32.gmra.mrb[8].mxu0 %v2713_v1  ;;  %4868 = vmatprep.mubr.msk.f32.mxu1 %vm6712_vm0, %v6713_v11  ;;  %v2723_v1 = vld [vmem:[%s6895_s10 + $0x9a] sm:$0xff] }
 0x1d5   : > { %5580 = vmatprep.mubr.msk.f32.mxu0 %vm6712_vm0, %v6713_v11  ;;  %6049 = vmatpush3.bf16.msra.mxu0 %v6048_v61  ;;  %v8218_v61 = vld [vmem:[%s6895_s10 + $0x127] sm:$0xff] }
 0x1d6   : > { %6050 = vmatprep.subr.bf16.mxu0 %v6711_v3 }
 0x1d7   : > { %4869 = vmatmul.mubr.f32.gmra.mrb[52].mxu1 %v8113_v7 }
 0x1d8   : > { %5581 = vmatmul.mubr.f32.gmra.mrb[10].mxu0 %v2714_v33  ;;  %4871 = vmatprep.mubr.msk.f32.mxu1 %vm6712_vm0, %v6713_v11  ;;  %v2725_v33 = vld [vmem:[%s6895_s10 + $0xaa] sm:$0xff] }
 0x1d9   : > { %5583 = vmatprep.mubr.msk.f32.mxu0 %vm6712_vm0, %v6713_v11  ;;  %6052 = vmatpush3.bf16.msra.mxu0 %v6051_v6  ;;  %v8236_v6 = vld [vmem:[%s6895_s10 + $0x137] sm:$0xff] }
 0x1da   : > { %6053 = vmatprep.subr.bf16.mxu0 %v6711_v3 }
 0x1db   : > { %4872 = vmatmul.mubr.f32.gmra.mrb[54].mxu1 %v8129_v15 }
 0x1dc   : > { %5584 = vmatmul.mubr.f32.gmra.mrb[12].mxu0 %v2715_v35  ;;  %4874 = vmatprep.mubr.msk.f32.mxu1 %vm6712_vm0, %v6713_v11  ;;  %v2727_v35 = vld [vmem:[%s6895_s10 + $0xba] sm:$0xff] }
 0x1dd   : > { %5586 = vmatprep.mubr.msk.f32.mxu0 %vm6712_vm0, %v6713_v11  ;;  %6055 = vmatpush3.bf16.msra.mxu0 %v6054_v40  ;;  %v8254_v40 = vld [vmem:[%s6895_s10 + $0x147] sm:$0xff] }
 0x1de   : > { %6056 = vmatprep.subr.bf16.mxu0 %v6711_v3 }
 0x1df   : > { %4875 = vmatmul.mubr.f32.gmra.mrb[56].mxu1 %v8145_v29 }
 0x1e0   : > { %5587 = vmatmul.mubr.f32.gmra.mrb[14].mxu0 %v2716_v32  ;;  %4877 = vmatprep.mubr.msk.f32.mxu1 %vm6712_vm0, %v6713_v11  ;;  %v2730_v32 = vld [vmem:[%s6895_s10 + $0xd2] sm:$0xff] }
 0x1e1   : > { %5589 = vmatprep.mubr.msk.f32.mxu0 %vm6712_vm0, %v6713_v11  ;;  %6058 = vmatpush3.bf16.msra.mxu0 %v6057_v34  ;;  %v3095_v34 = vld [vmem:[%s6895_s10 + $0xb3] sm:$0xff] }
 0x1e3   : > { %4878 = vmatmul.mubr.f32.gmra.mrb[58].mxu1 %v8155_v36 }
 0x1e4   : > { %5590 = vmatmul.mubr.f32.gmra.mrb[16].mxu0 %v2717_v18  ;;  %4880 = vmatprep.mubr.msk.f32.mxu1 %vm6712_vm0, %v6713_v11  ;;  %v3096_v18 = vld [vmem:[%s6895_s10 + $0xbb] sm:$0xff] }
 0x1e5   : > { %5592 = vmatprep.mubr.msk.f32.mxu0 %vm6712_vm0, %v6713_v11 }
 0x1e7   : > { %4881 = vmatmul.mubr.f32.gmra.mrb[60].mxu1 %v8164_v45 }
 0x1e8   : > { %5593 = vmatmul.mubr.f32.gmra.mrb[18].mxu0 %v2718_v50  ;;  %4883 = vmatprep.mubr.msk.f32.mxu1 %vm6712_vm0, %v6713_v11  ;;  %v3097_v50 = vld [vmem:[%s6895_s10 + $0xc3] sm:$0xff] }
 0x1e9   : > { %5595 = vmatprep.mubr.msk.f32.mxu0 %vm6712_vm0, %v6713_v11 }
 0x1eb   : > { %4884 = vmatmul.mubr.f32.gmra.mrb[62].mxu1 %v8173_v26 }
 0x1ec   : > { %5596 = vmatmul.mubr.f32.gmra.mrb[20].mxu0 %v2719_v52  ;;  %4886 = vmatprep.mubr.msk.f32.mxu1 %vm6712_vm0, %v6713_v11  ;;  %v3098_v52 = vld [vmem:[%s6895_s10 + $0xcb] sm:$0xff] }
 0x1ed   : > { %5598 = vmatprep.mubr.msk.f32.mxu0 %vm6712_vm0, %v6713_v11 }
 0x1ef   : > { %4887 = vmatmul.mubr.f32.gmra.mrb[64].mxu1 %v8182_v38 }
 0x1f0   : > { %5599 = vmatmul.mubr.f32.gmra.mrb[22].mxu0 %v2720_v55  ;;  %4889 = vmatprep.mubr.msk.f32.mxu1 %vm6712_vm0, %v6713_v11  ;;  %v3099_v55 = vld [vmem:[%s6895_s10 + $0xd3] sm:$0xff] }
 0x1f1   : > { %5601 = vmatprep.mubr.msk.f32.mxu0 %vm6712_vm0, %v6713_v11 }
 0x1f3   : > { %4890 = vmatmul.mubr.f32.gmra.mrb[66].mxu1 %v8191_v58 }
 0x1f4   : > { %5602 = vmatmul.mubr.f32.gmra.mrb[24].mxu0 %v2721_v47  ;;  %4892 = vmatprep.mubr.msk.f32.mxu1 %vm6712_vm0, %v6713_v11  ;;  %v3100_v47 = vld [vmem:[%s6895_s10 + $0xdb] sm:$0xff] }
 0x1f5   : > { %5604 = vmatprep.mubr.msk.f32.mxu0 %vm6712_vm0, %v6713_v11 }
 0x1f7   : > { %4893 = vmatmul.mubr.f32.gmra.mrb[68].mxu1 %v8200_v0 }
 0x1f8   : > { %5605 = vmatmul.mubr.f32.gmra.mrb[26].mxu0 %v2722_v51  ;;  %4895 = vmatprep.mubr.msk.f32.mxu1 %vm6712_vm0, %v6713_v11  ;;  %v3101_v51 = vld [vmem:[%s6895_s10 + $0xe3] sm:$0xff] }
 0x1f9   : > { %5607 = vmatprep.mubr.msk.f32.mxu0 %vm6712_vm0, %v6713_v11 }
 0x1fb   : > { %4896 = vmatmul.mubr.f32.gmra.mrb[70].mxu1 %v8209_v54 }
 0x1fc   : > { %5608 = vmatmul.mubr.f32.gmra.mrb[28].mxu0 %v2723_v1  ;;  %4898 = vmatprep.mubr.msk.f32.mxu1 %vm6712_vm0, %v6713_v11  ;;  %v3102_v1 = vld [vmem:[%s6895_s10 + $0xeb] sm:$0xff] }
 0x1fd   : > { %5610 = vmatprep.mubr.msk.f32.mxu0 %vm6712_vm0, %v6713_v11 }
 0x1ff   : > { %4899 = vmatmul.mubr.f32.gmra.mrb[72].mxu1 %v8218_v61 }
 0x200   : > { %5611 = vmatmul.mubr.f32.gmra.mrb[30].mxu0 %v2724_v21  ;;  %4901 = vmatprep.mubr.msk.f32.mxu1 %vm6712_vm0, %v6713_v11  ;;  %v3103_v21 = vld [vmem:[%s6895_s10 + $0xf3] sm:$0xff] }
 0x201   : > { %5613 = vmatprep.mubr.msk.f32.mxu0 %vm6712_vm0, %v6713_v11 }
 0x203   : > { %4902 = vmatmul.mubr.f32.gmra.mrb[74].mxu1 %v8227_v4 }
 0x204   : > { %5614 = vmatmul.mubr.f32.gmra.mrb[32].mxu0 %v2725_v33  ;;  %4904 = vmatprep.mubr.msk.f32.mxu1 %vm6712_vm0, %v6713_v11  ;;  %v3104_v33 = vld [vmem:[%s6895_s10 + $0xfb] sm:$0xff] }
 0x205   : > { %5616 = vmatprep.mubr.msk.f32.mxu0 %vm6712_vm0, %v6713_v11 }
 0x207   : > { %4905 = vmatmul.mubr.f32.gmra.mrb[76].mxu1 %v8236_v6 }
 0x208   : > { %5617 = vmatmul.mubr.f32.gmra.mrb[34].mxu0 %v2726_v12  ;;  %4907 = vmatprep.mubr.msk.f32.mxu1 %vm6712_vm0, %v6713_v11  ;;  %v3105_v12 = vld [vmem:[%s6895_s10 + $0x103] sm:$0xff] }
 0x209   : > { %5619 = vmatprep.mubr.msk.f32.mxu0 %vm6712_vm0, %v6713_v11 }
 0x20b   : > { %4908 = vmatmul.mubr.f32.gmra.mrb[78].mxu1 %v8245_v42 }
 0x20c   : > { %5620 = vmatmul.mubr.f32.gmra.mrb[36].mxu0 %v2727_v35  ;;  %4910 = vmatprep.mubr.msk.f32.mxu1 %vm6712_vm0, %v6713_v11  ;;  %v3106_v35 = vld [vmem:[%s6895_s10 + $0x10b] sm:$0xff] }
 0x20d   : > { %5622 = vmatprep.mubr.msk.f32.mxu0 %vm6712_vm0, %v6713_v11 }
 0x20f   : > { %4911 = vmatmul.mubr.f32.gmra.mrb[80].mxu1 %v8254_v40 }
 0x210   : > { %5623 = vmatmul.mubr.f32.gmra.mrb[38].mxu0 %v2728_v22  ;;  %4945 = vmatprep.mubr.msk.f32.mxu1 %vm6712_vm0, %v6713_v11  ;;  %v3107_v22 = vld [vmem:[%s6895_s10 + $0x113] sm:$0xff] }
 0x211   : > { %5625 = vmatprep.mubr.msk.f32.mxu0 %vm6712_vm0, %v6713_v11 }
 0x213   : > { %4946 = vmatmul.mubr.f32.vlgmr.msra.gmra.mrb[0].mxu1 %v7820_v41  ;;  %v2731_v41 = vld [vmem:[%s6895_s10 + $0xda] sm:$0xff] }
 0x214   : > { %5626 = vmatmul.mubr.f32.gmra.mrb[40].mxu0 %v2729_v24  ;;  %4948 = vmatprep.mubr.msk.f32.mxu1 %vm6712_vm0, %v6713_v11  ;;  %v1633_v24 = vld [vmem:[%s6895_s10 + $0x110] sm:$0xff] }
 0x215   : > { %5628 = vmatprep.mubr.msk.f32.mxu0 %vm6712_vm0, %v6713_v11  ;;  %6067 = vmatpush3.bf16.msra.mxu1 %v6767_v8  ;;  %v2732_v8 = vld [vmem:[%s6895_s10 + $0xe2] sm:$0xff] }
 0x216   : > { %6060 = vmatprep.subr.bf16.mxu1 %v6711_v3 }
 0x217   : > { %4949 = vmatmul.mubr.f32.gmra.mrb[2].mxu1 %v7836_v60  ;;  %v2741_v60 = vld [vmem:[%s6895_s10 + $0x12a] sm:$0xff] }
 0x218   : > { %5629 = vmatmul.mubr.f32.gmra.mrb[42].mxu0 %v2730_v32  ;;  %4951 = vmatprep.mubr.msk.f32.mxu1 %vm6712_vm0, %v6713_v11  ;;  %v3108_v32 = vld [vmem:[%s6895_s10 + $0x11b] sm:$0xff] }
 0x219   : > { %5631 = vmatprep.mubr.msk.f32.mxu0 %vm6712_vm0, %v6713_v11  ;;  %6068 = vmatpush3.bf16.msra.mxu1 %v6781_v13  ;;  %v2733_v13 = vld [vmem:[%s6895_s10 + $0xea] sm:$0xff] }
 0x21a   : > { %6061 = vmatprep.subr.bf16.mxu1 %v6711_v3 }
 0x21b   : > { %4952 = vmatmul.mubr.f32.gmra.mrb[4].mxu1 %v7852_v57  ;;  %v2742_v57 = vld [vmem:[%s6895_s10 + $0x132] sm:$0xff] }
 0x21c   : > { %5632 = vmatmul.mubr.f32.gmra.mrb[44].mxu0 %v2731_v41  ;;  %4954 = vmatprep.mubr.msk.f32.mxu1 %vm6712_vm0, %v6713_v11  ;;  %v1634_v41 = vld [vmem:[%s6895_s10 + $0x118] sm:$0xff] }
 0x21d   : > { %5634 = vmatprep.mubr.msk.f32.mxu0 %vm6712_vm0, %v6713_v11  ;;  %6069 = vmatpush3.bf16.msra.mxu1 %v6798_v19  ;;  %v2734_v19 = vld [vmem:[%s6895_s10 + $0xf2] sm:$0xff] }
 0x21e   : > { %6062 = vmatprep.subr.bf16.mxu1 %v6711_v3 }
 0x21f   : > { %4955 = vmatmul.mubr.f32.gmra.mrb[6].mxu1 %v7868_v63  ;;  %v2743_v63 = vld [vmem:[%s6895_s10 + $0x13a] sm:$0xff] }
 0x220   : > { %5635 = vmatmul.mubr.f32.gmra.mrb[46].mxu0 %v2732_v8  ;;  %4957 = vmatprep.mubr.msk.f32.mxu1 %vm6712_vm0, %v6713_v11  ;;  %v3109_v8 = vld [vmem:[%s6895_s10 + $0x123] sm:$0xff] }
 0x221   : > { %5637 = vmatprep.mubr.msk.f32.mxu0 %vm6712_vm0, %v6713_v11  ;;  %6070 = vmatpush3.bf16.msra.mxu1 %v6815_v25  ;;  %v2735_v25 = vld [vmem:[%s6895_s10 + $0xfa] sm:$0xff] }
 0x222   : > { %6063 = vmatprep.subr.bf16.mxu1 %v6711_v3 }
 0x223   : > { %4958 = vmatmul.mubr.f32.gmra.mrb[8].mxu1 %v7884_v44  ;;  %v2744_v44 = vld [vmem:[%s6895_s10 + $0x142] sm:$0xff] }
 0x224   : > { %5638 = vmatmul.mubr.f32.gmra.mrb[48].mxu0 %v2733_v13  ;;  %4960 = vmatprep.mubr.msk.f32.mxu1 %vm6712_vm0, %v6713_v11  ;;  %v1635_v13 = vld [vmem:[%s6895_s10 + $0x120] sm:$0xff] }
 0x225   : > { %5640 = vmatprep.mubr.msk.f32.mxu0 %vm6712_vm0, %v6713_v11  ;;  %6071 = vmatpush3.bf16.msra.mxu1 %v6832_v31  ;;  %v2736_v31 = vld [vmem:[%s6895_s10 + $0x102] sm:$0xff] }
 0x226   : > { %6064 = vmatprep.subr.bf16.mxu1 %v6711_v3 }
 0x227   : > { %4961 = vmatmul.mubr.f32.gmra.mrb[10].mxu1 %v7900_v14  ;;  %v2745_v14 = vld [vmem:[%s6895_s10 + $0x14a] sm:$0xff] }
 0x228   : > { %5641 = vmatmul.mubr.f32.gmra.mrb[50].mxu0 %v2734_v19  ;;  %4963 = vmatprep.mubr.msk.f32.mxu1 %vm6712_vm0, %v6713_v11  ;;  %v3110_v19 = vld [vmem:[%s6895_s10 + $0x12b] sm:$0xff] }
 0x229   : > { %5643 = vmatprep.mubr.msk.f32.mxu0 %vm6712_vm0, %v6713_v11  ;;  %6072 = vmatpush3.bf16.msra.mxu1 %v6851_v37  ;;  %v2737_v37 = vld [vmem:[%s6895_s10 + $0x10a] sm:$0xff] }
 0x22a   : > { %6065 = vmatprep.subr.bf16.mxu1 %v6711_v3 }
 0x22b   : > { %4964 = vmatmul.mubr.f32.gmra.mrb[12].mxu1 %v7910_v48  ;;  %v2746_v48 = vld [vmem:[%s6895_s10 + $0x152] sm:$0xff] }
 0x22c   : > { %5644 = vmatmul.mubr.f32.gmra.mrb[52].mxu0 %v2735_v25  ;;  %4966 = vmatprep.mubr.msk.f32.mxu1 %vm6712_vm0, %v6713_v11 }
 0x22d   : > { %5646 = vmatprep.mubr.msk.f32.mxu0 %vm6712_vm0, %v6713_v11  ;;  %6073 = vmatpush3.bf16.msra.mxu1 %v6872_v43  ;;  %v2739_v43 = vld [vmem:[%s6895_s10 + $0x11a] sm:$0xff] }
 0x22e   : > { %6066 = vmatprep.subr.bf16.mxu1 %v6711_v3  ;;  %v2738_v3 = vld [vmem:[%s6895_s10 + $0x112] sm:$0xff] }
 0x22f   : > { %4967 = vmatmul.mubr.f32.gmra.mrb[14].mxu1 %v7920_v53  ;;  %v2747_v53 = vld [vmem:[%s6895_s10 + $0x15a] sm:$0xff] }
 0x230   : > { %5647 = vmatmul.mubr.f32.gmra.mrb[54].mxu0 %v2736_v31  ;;  %4969 = vmatprep.mubr.msk.f32.mxu1 %vm6712_vm0, %v6713_v11 }
 0x231   : > { %5649 = vmatprep.mubr.msk.f32.mxu0 %vm6712_vm0, %v6713_v11  ;;  %6074 = vmatpush3.bf16.msra.mxu1 %v6890_v49  ;;  %v2740_v49 = vld [vmem:[%s6895_s10 + $0x122] sm:$0xff] }
 0x233   : > { %4970 = vmatmul.mubr.f32.gmra.mrb[16].mxu1 %v7929_v17  ;;  %v2748_v17 = vld [vmem:[%s6895_s10 + $0x162] sm:$0xff] }
 0x234   : > { %5650 = vmatmul.mubr.f32.gmra.mrb[56].mxu0 %v2737_v37  ;;  %4972 = vmatprep.mubr.msk.f32.mxu1 %vm6712_vm0, %v6713_v11  ;;  %v1636_v37 = vld [vmem:[%s6895_s10 + $0x128] sm:$0xff] }
 0x235   : > { %5652 = vmatprep.mubr.msk.f32.mxu0 %vm6712_vm0, %v6713_v11 }
 0x237   : > { %4973 = vmatmul.mubr.f32.gmra.mrb[18].mxu1 %v7938_v56  ;;  %v2749_v56 = vld [vmem:[%s6895_s10 + $0x16a] sm:$0xff] }
 0x238   : > { %5653 = vmatmul.mubr.f32.gmra.mrb[58].mxu0 %v2738_v3  ;;  %4975 = vmatprep.mubr.msk.f32.mxu1 %vm6712_vm0, %v6713_v11  ;;  %v3111_v3 = vld [vmem:[%s6895_s10 + $0x133] sm:$0xff] }
 0x239   : > { %5655 = vmatprep.mubr.msk.f32.mxu0 %vm6712_vm0, %v6713_v11 }
 0x23b   : > { %4976 = vmatmul.mubr.f32.gmra.mrb[20].mxu1 %v7947_v59  ;;  %v3078_v59 = vld [vmem:[%s6895_s10 + $0x2b] sm:$0xff] }
 0x23c   : > { %5656 = vmatmul.mubr.f32.gmra.mrb[60].mxu0 %v2739_v43  ;;  %4978 = vmatprep.mubr.msk.f32.mxu1 %vm6712_vm0, %v6713_v11 }
 0x23d   : > { %5658 = vmatprep.mubr.msk.f32.mxu0 %vm6712_vm0, %v6713_v11 }
 0x23f   : > { %4979 = vmatmul.mubr.f32.gmra.mrb[22].mxu1 %v7956_v62  ;;  %v3079_v62 = vld [vmem:[%s6895_s10 + $0x33] sm:$0xff] }
 0x240   : > { %5659 = vmatmul.mubr.f32.gmra.mrb[62].mxu0 %v2740_v49  ;;  %4981 = vmatprep.mubr.msk.f32.mxu1 %vm6712_vm0, %v6713_v11 }
 0x241   : > { %5661 = vmatprep.mubr.msk.f32.mxu0 %vm6712_vm0, %v6713_v11 }
 0x243   : > { %4982 = vmatmul.mubr.f32.gmra.mrb[24].mxu1 %v7965_v2  ;;  %v3080_v2 = vld [vmem:[%s6895_s10 + $0x3b] sm:$0xff] }
 0x244   : > { %5662 = vmatmul.mubr.f32.gmra.mrb[64].mxu0 %v2741_v60  ;;  %4984 = vmatprep.mubr.msk.f32.mxu1 %vm6712_vm0, %v6713_v11  ;;  %v1637_v60 = vld [vmem:[%s6895_s10 + $0x130] sm:$0xff] }
 0x245   : > { %5664 = vmatprep.mubr.msk.f32.mxu0 %vm6712_vm0, %v6713_v11 }
 0x247   : > { %4985 = vmatmul.mubr.f32.gmra.mrb[26].mxu1 %v7974_v5  ;;  %v3081_v5 = vld [vmem:[%s6895_s10 + $0x43] sm:$0xff] }
 0x248   : > { %5665 = vmatmul.mubr.f32.gmra.mrb[66].mxu0 %v2742_v57  ;;  %4987 = vmatprep.mubr.msk.f32.mxu1 %vm6712_vm0, %v6713_v11  ;;  %v3112_v57 = vld [vmem:[%s6895_s10 + $0x13b] sm:$0xff] }
 0x249   : > { %5667 = vmatprep.mubr.msk.f32.mxu0 %vm6712_vm0, %v6713_v11 }
 0x24b   : > { %4988 = vmatmul.mubr.f32.gmra.mrb[28].mxu1 %v7983_v10  ;;  %v3082_v10 = vld [vmem:[%s6895_s10 + $0x4b] sm:$0xff] }
 0x24c   : > { %5668 = vmatmul.mubr.f32.gmra.mrb[68].mxu0 %v2743_v63  ;;  %4990 = vmatprep.mubr.msk.f32.mxu1 %vm6712_vm0, %v6713_v11 }
 0x24d   : > { %5670 = vmatprep.mubr.msk.f32.mxu0 %vm6712_vm0, %v6713_v11 }
 0x24f   : > { %4991 = vmatmul.mubr.f32.gmra.mrb[30].mxu1 %v7992_v16  ;;  %v3083_v16 = vld [vmem:[%s6895_s10 + $0x53] sm:$0xff] }
 0x250   : > { %5671 = vmatmul.mubr.f32.gmra.mrb[70].mxu0 %v2744_v44  ;;  %4993 = vmatprep.mubr.msk.f32.mxu1 %vm6712_vm0, %v6713_v11 }
 0x251   : > { %5673 = vmatprep.mubr.msk.f32.mxu0 %vm6712_vm0, %v6713_v11 }
 0x253   : > { %4994 = vmatmul.mubr.f32.gmra.mrb[32].mxu1 %v8001_v23  ;;  %v3084_v23 = vld [vmem:[%s6895_s10 + $0x5b] sm:$0xff] }
 0x254   : > { %5674 = vmatmul.mubr.f32.gmra.mrb[72].mxu0 %v2745_v14  ;;  %4996 = vmatprep.mubr.msk.f32.mxu1 %vm6712_vm0, %v6713_v11  ;;  %v1638_v14 = vld [vmem:[%s6895_s10 + $0x138] sm:$0xff] }
 0x255   : > { %5676 = vmatprep.mubr.msk.f32.mxu0 %vm6712_vm0, %v6713_v11 }
 0x257   : > { %4997 = vmatmul.mubr.f32.gmra.mrb[34].mxu1 %v8010_v28  ;;  %v3085_v28 = vld [vmem:[%s6895_s10 + $0x63] sm:$0xff] }
 0x258   : > { %5677 = vmatmul.mubr.f32.gmra.mrb[74].mxu0 %v2746_v48  ;;  %4999 = vmatprep.mubr.msk.f32.mxu1 %vm6712_vm0, %v6713_v11  ;;  %v3113_v48 = vld [vmem:[%s6895_s10 + $0x143] sm:$0xff] }
 0x259   : > { %5679 = vmatprep.mubr.msk.f32.mxu0 %vm6712_vm0, %v6713_v11 }
 0x25b   : > { %5000 = vmatmul.mubr.f32.gmra.mrb[36].mxu1 %v8019_v20  ;;  %v3086_v20 = vld [vmem:[%s6895_s10 + $0x6b] sm:$0xff] }
 0x25c   : > { %5680 = vmatmul.mubr.f32.gmra.mrb[76].mxu0 %v2747_v53  ;;  %5002 = vmatprep.mubr.msk.f32.mxu1 %vm6712_vm0, %v6713_v11 }
 0x25d   : > { %5682 = vmatprep.mubr.msk.f32.mxu0 %vm6712_vm0, %v6713_v11 }
 0x25f   : > { %5003 = vmatmul.mubr.f32.gmra.mrb[38].mxu1 %v8034_v27  ;;  %v3087_v27 = vld [vmem:[%s6895_s10 + $0x73] sm:$0xff] }
 0x260   : > { %5683 = vmatmul.mubr.f32.gmra.mrb[78].mxu0 %v2748_v17  ;;  %5005 = vmatprep.mubr.msk.f32.mxu1 %vm6712_vm0, %v6713_v11 }
 0x261   : > { %5685 = vmatprep.mubr.msk.f32.mxu0 %vm6712_vm0, %v6713_v11 }
 0x263   : > { %5006 = vmatmul.mubr.f32.gmra.mrb[40].mxu1 %v8049_v39  ;;  %v3088_v39 = vld [vmem:[%s6895_s10 + $0x7b] sm:$0xff] }
 0x264   : > { %5686 = vmatmul.mubr.f32.gmra.mrb[80].mxu0 %v2749_v56  ;;  %5008 = vmatprep.mubr.msk.f32.mxu1 %vm6712_vm0, %v6713_v11  ;;  %v1639_v56 = vld [vmem:[%s6895_s10 + $0x140] sm:$0xff] }
 0x265   : > { %5720 = vmatprep.mubr.msk.f32.mxu0 %vm6712_vm0, %v6713_v11 }
 0x267   : > { %5009 = vmatmul.mubr.f32.gmra.mrb[42].mxu1 %v8065_v30  ;;  %v3089_v30 = vld [vmem:[%s6895_s10 + $0x83] sm:$0xff] }
 0x268   : > { %5721 = vmatmul.mubr.f32.vlgmr.msra.gmra.mrb[0].mxu0 %v3078_v59  ;;  %5011 = vmatprep.mubr.msk.f32.mxu1 %vm6712_vm0, %v6713_v11  ;;  %v3114_v59 = vld [vmem:[%s6895_s10 + $0x14b] sm:$0xff] }
 0x269   : > { %5723 = vmatprep.mubr.msk.f32.mxu0 %vm6712_vm0, %v6713_v11 }
 0x26b   : > { %5012 = vmatmul.mubr.f32.gmra.mrb[44].mxu1 %v8081_v46  ;;  %v3090_v46 = vld [vmem:[%s6895_s10 + $0x8b] sm:$0xff] }
 0x26c   : > { %5724 = vmatmul.mubr.f32.gmra.mrb[2].mxu0 %v3079_v62  ;;  %5014 = vmatprep.mubr.msk.f32.mxu1 %vm6712_vm0, %v6713_v11 }
 0x26d   : > { %5726 = vmatprep.mubr.msk.f32.mxu0 %vm6712_vm0, %v6713_v11 }
 0x26f   : > { %5015 = vmatmul.mubr.f32.gmra.mrb[46].mxu1 %v8097_v9  ;;  %v3091_v9 = vld [vmem:[%s6895_s10 + $0x93] sm:$0xff] }
 0x270   : > { %5727 = vmatmul.mubr.f32.gmra.mrb[4].mxu0 %v3080_v2  ;;  %5017 = vmatprep.mubr.msk.f32.mxu1 %vm6712_vm0, %v6713_v11 }
 0x271   : > { %5729 = vmatprep.mubr.msk.f32.mxu0 %vm6712_vm0, %v6713_v11 }
 0x273   : > { %5018 = vmatmul.mubr.f32.gmra.mrb[48].mxu1 %v8113_v7  ;;  %v3092_v7 = vld [vmem:[%s6895_s10 + $0x9b] sm:$0xff] }
 0x274   : > { %5730 = vmatmul.mubr.f32.gmra.mrb[6].mxu0 %v3081_v5  ;;  %5020 = vmatprep.mubr.msk.f32.mxu1 %vm6712_vm0, %v6713_v11  ;;  %v1640_v5 = vld [vmem:[%s6895_s10 + $0x148] sm:$0xff] }
 0x275   : > { %5732 = vmatprep.mubr.msk.f32.mxu0 %vm6712_vm0, %v6713_v11 }
 0x277   : > { %5021 = vmatmul.mubr.f32.gmra.mrb[50].mxu1 %v8129_v15  ;;  %v3093_v15 = vld [vmem:[%s6895_s10 + $0xa3] sm:$0xff] }
 0x278   : > { %5733 = vmatmul.mubr.f32.gmra.mrb[8].mxu0 %v3082_v10  ;;  %5023 = vmatprep.mubr.msk.f32.mxu1 %vm6712_vm0, %v6713_v11  ;;  %v3115_v10 = vld [vmem:[%s6895_s10 + $0x153] sm:$0xff] }
 0x279   : > { %5735 = vmatprep.mubr.msk.f32.mxu0 %vm6712_vm0, %v6713_v11 }
 0x27b   : > { %5024 = vmatmul.mubr.f32.gmra.mrb[52].mxu1 %v8145_v29  ;;  %v3094_v29 = vld [vmem:[%s6895_s10 + $0xab] sm:$0xff] }
 0x27c   : > { %5736 = vmatmul.mubr.f32.gmra.mrb[10].mxu0 %v3083_v16  ;;  %5026 = vmatprep.mubr.msk.f32.mxu1 %vm6712_vm0, %v6713_v11 }
 0x27d   : > { %5738 = vmatprep.mubr.msk.f32.mxu0 %vm6712_vm0, %v6713_v11 }
 0x27f   : > { %5027 = vmatmul.mubr.f32.gmra.mrb[54].mxu1 %v8155_v36  ;;  %v1272_v36 = vld [vmem:[%s6895_s10 + $0x14f] sm:$0xff] }
 0x280   : > { %5739 = vmatmul.mubr.f32.gmra.mrb[12].mxu0 %v3084_v23  ;;  %5029 = vmatprep.mubr.msk.f32.mxu1 %vm6712_vm0, %v6713_v11 }
 0x281   : > { %5741 = vmatprep.mubr.msk.f32.mxu0 %vm6712_vm0, %v6713_v11 }
 0x283   : > { %5030 = vmatmul.mubr.f32.gmra.mrb[56].mxu1 %v8164_v45  ;;  %v1273_v45 = vld [vmem:[%s6895_s10 + $0x157] sm:$0xff] }
 0x284   : > { %5742 = vmatmul.mubr.f32.gmra.mrb[14].mxu0 %v3085_v28  ;;  %5032 = vmatprep.mubr.msk.f32.mxu1 %vm6712_vm0, %v6713_v11  ;;  %v1641_v28 = vld [vmem:[%s6895_s10 + $0x150] sm:$0xff] }
 0x285   : > { %5744 = vmatprep.mubr.msk.f32.mxu0 %vm6712_vm0, %v6713_v11 }
 0x287   : > { %5033 = vmatmul.mubr.f32.gmra.mrb[58].mxu1 %v8173_v26  ;;  %v1623_v26 = vld [vmem:[%s6895_s10 + $0xc0] sm:$0xff] }
 0x288   : > { %5745 = vmatmul.mubr.f32.gmra.mrb[16].mxu0 %v3086_v20  ;;  %5035 = vmatprep.mubr.msk.f32.mxu1 %vm6712_vm0, %v6713_v11  ;;  %v3116_v20 = vld [vmem:[%s6895_s10 + $0x15b] sm:$0xff] }
 0x289   : > { %5747 = vmatprep.mubr.msk.f32.mxu0 %vm6712_vm0, %v6713_v11 }
 0x28b   : > { %5036 = vmatmul.mubr.f32.gmra.mrb[60].mxu1 %v8182_v38  ;;  %v1624_v38 = vld [vmem:[%s6895_s10 + $0xc8] sm:$0xff] }
 0x28c   : > { %5748 = vmatmul.mubr.f32.gmra.mrb[18].mxu0 %v3087_v27  ;;  %5038 = vmatprep.mubr.msk.f32.mxu1 %vm6712_vm0, %v6713_v11 }
 0x28d   : > { %5750 = vmatprep.mubr.msk.f32.mxu0 %vm6712_vm0, %v6713_v11 }
 0x28f   : > { %5039 = vmatmul.mubr.f32.gmra.mrb[62].mxu1 %v8191_v58  ;;  %v1625_v58 = vld [vmem:[%s6895_s10 + $0xd0] sm:$0xff] }
 0x290   : > { %5751 = vmatmul.mubr.f32.gmra.mrb[20].mxu0 %v3088_v39  ;;  %5041 = vmatprep.mubr.msk.f32.mxu1 %vm6712_vm0, %v6713_v11 }
 0x291   : > { %5753 = vmatprep.mubr.msk.f32.mxu0 %vm6712_vm0, %v6713_v11 }
 0x293   : > { %5042 = vmatmul.mubr.f32.gmra.mrb[64].mxu1 %v8200_v0  ;;  %v1626_v0 = vld [vmem:[%s6895_s10 + $0xd8] sm:$0xff] }
 0x294   : > { %5754 = vmatmul.mubr.f32.gmra.mrb[22].mxu0 %v3089_v30  ;;  %5044 = vmatprep.mubr.msk.f32.mxu1 %vm6712_vm0, %v6713_v11  ;;  %v1642_v30 = vld [vmem:[%s6895_s10 + $0x158] sm:$0xff] }
 0x295   : > { %5756 = vmatprep.mubr.msk.f32.mxu0 %vm6712_vm0, %v6713_v11 }
 0x297   : > { %5045 = vmatmul.mubr.f32.gmra.mrb[66].mxu1 %v8209_v54  ;;  %v1627_v54 = vld [vmem:[%s6895_s10 + $0xe0] sm:$0xff] }
 0x298   : > { %5757 = vmatmul.mubr.f32.gmra.mrb[24].mxu0 %v3090_v46  ;;  %5047 = vmatprep.mubr.msk.f32.mxu1 %vm6712_vm0, %v6713_v11  ;;  %v3117_v46 = vld [vmem:[%s6895_s10 + $0x163] sm:$0xff] }
 0x299   : > { %5759 = vmatprep.mubr.msk.f32.mxu0 %vm6712_vm0, %v6713_v11 }
 0x29b   : > { %5048 = vmatmul.mubr.f32.gmra.mrb[68].mxu1 %v8218_v61  ;;  %v1628_v61 = vld [vmem:[%s6895_s10 + $0xe8] sm:$0xff] }
 0x29c   : > { %5760 = vmatmul.mubr.f32.gmra.mrb[26].mxu0 %v3091_v9  ;;  %5050 = vmatprep.mubr.msk.f32.mxu1 %vm6712_vm0, %v6713_v11 }
 0x29d   : > { %5762 = vmatprep.mubr.msk.f32.mxu0 %vm6712_vm0, %v6713_v11 }
 0x29f   : > { %5051 = vmatmul.mubr.f32.gmra.mrb[70].mxu1 %v8227_v4  ;;  %v1629_v4 = vld [vmem:[%s6895_s10 + $0xf0] sm:$0xff] }
 0x2a0   : > { %5763 = vmatmul.mubr.f32.gmra.mrb[28].mxu0 %v3092_v7  ;;  %5053 = vmatprep.mubr.msk.f32.mxu1 %vm6712_vm0, %v6713_v11 }
 0x2a1   : > { %5765 = vmatprep.mubr.msk.f32.mxu0 %vm6712_vm0, %v6713_v11 }
 0x2a3   : > { %5054 = vmatmul.mubr.f32.gmra.mrb[72].mxu1 %v8236_v6  ;;  %v1630_v6 = vld [vmem:[%s6895_s10 + $0xf8] sm:$0xff] }
 0x2a4   : > { %5766 = vmatmul.mubr.f32.gmra.mrb[30].mxu0 %v3093_v15  ;;  %5056 = vmatprep.mubr.msk.f32.mxu1 %vm6712_vm0, %v6713_v11  ;;  %v3118_v15 = vld [vmem:[%s6895_s10 + $0x16b] sm:$0xff] }
 0x2a5   : > { %5768 = vmatprep.mubr.msk.f32.mxu0 %vm6712_vm0, %v6713_v11 }
 0x2a7   : > { %5057 = vmatmul.mubr.f32.gmra.mrb[74].mxu1 %v8245_v42  ;;  %v1631_v42 = vld [vmem:[%s6895_s10 + $0x100] sm:$0xff] }
 0x2a8   : > { %5769 = vmatmul.mubr.f32.gmra.mrb[32].mxu0 %v3094_v29  ;;  %5059 = vmatprep.mubr.msk.f32.mxu1 %vm6712_vm0, %v6713_v11 }
 0x2a9   : > { %5771 = vmatprep.mubr.msk.f32.mxu0 %vm6712_vm0, %v6713_v11 }
 0x2ab   : > { %5060 = vmatmul.mubr.f32.gmra.mrb[76].mxu1 %v8254_v40  ;;  %v1632_v40 = vld [vmem:[%s6895_s10 + $0x108] sm:$0xff]  ;;  %s6691_s10 = smul.u32 328, %s8890_s16 }
 0x2ac   : > { %5772 = vmatmul.mubr.f32.gmra.mrb[34].mxu0 %v3095_v34  ;;  %5062 = vmatprep.mubr.msk.f32.mxu1 %vm6712_vm0, %v6713_v11 }
 0x2ad   : > { %5774 = vmatprep.mubr.msk.f32.mxu0 %vm6712_vm0, %v6713_v11  ;;  %s8690_s6 = scalar_lea.vmem %s8887_s3, %s6691_s10 }
 0x2af   : > { %5063 = vmatmul.mubr.f32.gmra.mrb[78].mxu1 %v1272_v36 }
 0x2b0   : > { %5775 = vmatmul.mubr.f32.gmra.mrb[36].mxu0 %v3096_v18  ;;  %5065 = vmatprep.mubr.msk.f32.mxu1 %vm6712_vm0, %v6713_v11 }
 0x2b1   : > { %5777 = vmatprep.mubr.msk.f32.mxu0 %vm6712_vm0, %v6713_v11 }
 0x2b3   : > { %5066 = vmatmul.mubr.f32.gmra.mrb[80].mxu1 %v1273_v45 }
 0x2b4   : > { %5778 = vmatmul.mubr.f32.gmra.mrb[38].mxu0 %v3097_v50  ;;  %5163 = vmatprep.mubr.msk.f32.mxu1 %vm6712_vm0, %v6713_v11 }
 0x2b5   : > { %5780 = vmatprep.mubr.msk.f32.mxu0 %vm6712_vm0, %v6713_v11 }
 0x2b7   : > { %5164 = vmatmul.mubr.f32.vlgmr.msra.gmra.mrb[42].mxu1 %v1623_v26 }
 0x2b8   : > { %5781 = vmatmul.mubr.f32.gmra.mrb[40].mxu0 %v3098_v52  ;;  %5166 = vmatprep.mubr.msk.f32.mxu1 %vm6712_vm0, %v6713_v11 }
 0x2b9   : > { %5783 = vmatprep.mubr.msk.f32.mxu0 %vm6712_vm0, %v6713_v11 }
 0x2bb   : > { %5167 = vmatmul.mubr.f32.gmra.mrb[44].mxu1 %v1624_v38 }
 0x2bc   : > { %5784 = vmatmul.mubr.f32.gmra.mrb[42].mxu0 %v3099_v55  ;;  %5169 = vmatprep.mubr.msk.f32.mxu1 %vm6712_vm0, %v6713_v11 }
 0x2bd   : > { %5786 = vmatprep.mubr.msk.f32.mxu0 %vm6712_vm0, %v6713_v11 }
 0x2bf   : > { %5170 = vmatmul.mubr.f32.gmra.mrb[46].mxu1 %v1625_v58 }
 0x2c0   : > { %5787 = vmatmul.mubr.f32.gmra.mrb[44].mxu0 %v3100_v47  ;;  %5172 = vmatprep.mubr.msk.f32.mxu1 %vm6712_vm0, %v6713_v11 }
 0x2c1   : > { %5789 = vmatprep.mubr.msk.f32.mxu0 %vm6712_vm0, %v6713_v11 }
 0x2c3   : > { %5173 = vmatmul.mubr.f32.gmra.mrb[48].mxu1 %v1626_v0 }
 0x2c4   : > { %5790 = vmatmul.mubr.f32.gmra.mrb[46].mxu0 %v3101_v51  ;;  %5175 = vmatprep.mubr.msk.f32.mxu1 %vm6712_vm0, %v6713_v11 }
 0x2c5   : > { %5792 = vmatprep.mubr.msk.f32.mxu0 %vm6712_vm0, %v6713_v11 }
 0x2c7   : > { %5176 = vmatmul.mubr.f32.gmra.mrb[50].mxu1 %v1627_v54 }
 0x2c8   : > { %5793 = vmatmul.mubr.f32.gmra.mrb[48].mxu0 %v3102_v1  ;;  %5178 = vmatprep.mubr.msk.f32.mxu1 %vm6712_vm0, %v6713_v11 }
 0x2c9   : > { %5795 = vmatprep.mubr.msk.f32.mxu0 %vm6712_vm0, %v6713_v11 }
 0x2cb   : > { %5179 = vmatmul.mubr.f32.gmra.mrb[52].mxu1 %v1628_v61 }
 0x2cc   : > { %5796 = vmatmul.mubr.f32.gmra.mrb[50].mxu0 %v3103_v21  ;;  %5181 = vmatprep.mubr.msk.f32.mxu1 %vm6712_vm0, %v6713_v11 }
 0x2cd   : > { %5798 = vmatprep.mubr.msk.f32.mxu0 %vm6712_vm0, %v6713_v11 }
 0x2cf   : > { %5182 = vmatmul.mubr.f32.gmra.mrb[54].mxu1 %v1629_v4 }
 0x2d0   : > { %5799 = vmatmul.mubr.f32.gmra.mrb[52].mxu0 %v3104_v33  ;;  %5184 = vmatprep.mubr.msk.f32.mxu1 %vm6712_vm0, %v6713_v11 }
 0x2d1   : > { %5801 = vmatprep.mubr.msk.f32.mxu0 %vm6712_vm0, %v6713_v11 }
 0x2d3   : > { %5185 = vmatmul.mubr.f32.gmra.mrb[56].mxu1 %v1630_v6 }
 0x2d4   : > { %5802 = vmatmul.mubr.f32.gmra.mrb[54].mxu0 %v3105_v12  ;;  %5187 = vmatprep.mubr.msk.f32.mxu1 %vm6712_vm0, %v6713_v11 }
 0x2d5   : > { %5804 = vmatprep.mubr.msk.f32.mxu0 %vm6712_vm0, %v6713_v11 }
 0x2d7   : > { %5188 = vmatmul.mubr.f32.gmra.mrb[58].mxu1 %v1631_v42 }
 0x2d8   : > { %5805 = vmatmul.mubr.f32.gmra.mrb[56].mxu0 %v3106_v35  ;;  %5190 = vmatprep.mubr.msk.f32.mxu1 %vm6712_vm0, %v6713_v11 }
 0x2d9   : > { %5807 = vmatprep.mubr.msk.f32.mxu0 %vm6712_vm0, %v6713_v11 }
 0x2db   : > { %5191 = vmatmul.mubr.f32.gmra.mrb[60].mxu1 %v1632_v40 }
 0x2dc   : > { %5808 = vmatmul.mubr.f32.gmra.mrb[58].mxu0 %v3107_v22  ;;  %5193 = vmatprep.mubr.msk.f32.mxu1 %vm6712_vm0, %v6713_v11 }
 0x2dd   : > { %5810 = vmatprep.mubr.msk.f32.mxu0 %vm6712_vm0, %v6713_v11 }
 0x2df   : > { %5194 = vmatmul.mubr.f32.gmra.mrb[62].mxu1 %v1633_v24 }
 0x2e0   : > { %5811 = vmatmul.mubr.f32.gmra.mrb[60].mxu0 %v3108_v32  ;;  %5196 = vmatprep.mubr.msk.f32.mxu1 %vm6712_vm0, %v6713_v11 }
 0x2e1   : > { %5813 = vmatprep.mubr.msk.f32.mxu0 %vm6712_vm0, %v6713_v11 }
 0x2e3   : > { %5197 = vmatmul.mubr.f32.gmra.mrb[64].mxu1 %v1634_v41  ;;  %v3488_v41 = vld [vmem:[%s8886_s2] sm:$0xff] }
 0x2e4   : > { %5814 = vmatmul.mubr.f32.gmra.mrb[62].mxu0 %v3109_v8  ;;  %5199 = vmatprep.mubr.msk.f32.mxu1 %vm6712_vm0, %v6713_v11 }
 0x2e5   : > { %5816 = vmatprep.mubr.msk.f32.mxu0 %vm6712_vm0, %v6713_v11 }
 0x2e6   : > { %v8599_v25 = vpop.f32.mrb[0].mxu1 }
 0x2e7   : > { %v4947_v31 = vpop.f32.mrb[1].mxu1  ;;  %5200 = vmatmul.mubr.f32.gmra.mrb[66].mxu1 %v1635_v13  ;;  %v3489_v13 = vld [vmem:[%s8886_s2 + $0x8] sm:$0xff] }
 0x2e8   : > { %5817 = vmatmul.mubr.f32.gmra.mrb[64].mxu0 %v3110_v19  ;;  %5202 = vmatprep.mubr.msk.f32.mxu1 %vm6712_vm0, %v6713_v11 }
 0x2e9   : > { %5819 = vmatprep.mubr.msk.f32.mxu0 %vm6712_vm0, %v6713_v11 }
 0x2ea   : > { %v8607_v43 = vpop.f32.mrb[2].mxu1 }
 0x2eb   : > { %v4950_v49 = vpop.f32.mrb[3].mxu1  ;;  %5203 = vmatmul.mubr.f32.gmra.mrb[68].mxu1 %v1636_v37 }
 0x2ec   : > { %5820 = vmatmul.mubr.f32.gmra.mrb[66].mxu0 %v3111_v3  ;;  %5205 = vmatprep.mubr.msk.f32.mxu1 %vm6712_vm0, %v6713_v11 }
 0x2ed   : > { %5822 = vmatprep.mubr.msk.f32.mxu0 %vm6712_vm0, %v6713_v11 }
 0x2ee   : > { %v8615_v63 = vpop.f32.mrb[4].mxu1 }
 0x2ef   : > { %v4953_v44 = vpop.f32.mrb[5].mxu1  ;;  %5206 = vmatmul.mubr.f32.gmra.mrb[70].mxu1 %v1637_v60 }
 0x2f0   : > { %5823 = vmatmul.mubr.f32.gmra.mrb[68].mxu0 %v3112_v57  ;;  %5208 = vmatprep.mubr.msk.f32.mxu1 %vm6712_vm0, %v6713_v11 }
 0x2f1   : > { %5825 = vmatprep.mubr.msk.f32.mxu0 %vm6712_vm0, %v6713_v11 }
 0x2f2   : > { %v8623_v53 = vpop.f32.mrb[6].mxu1 }
 0x2f3   : > { %v4956_v17 = vpop.f32.mrb[7].mxu1  ;;  %5209 = vmatmul.mubr.f32.gmra.mrb[72].mxu1 %v1638_v14 }
 0x2f4   : > { %5826 = vmatmul.mubr.f32.gmra.mrb[70].mxu0 %v3113_v48  ;;  %5211 = vmatprep.mubr.msk.f32.mxu1 %vm6712_vm0, %v6713_v11 }
 0x2f5   : > { %5828 = vmatprep.mubr.msk.f32.mxu0 %vm6712_vm0, %v6713_v11 }
 0x2f6   : > { %v8631_v62 = vpop.f32.mrb[8].mxu1 }
 0x2f7   : > { %v4959_v2 = vpop.f32.mrb[9].mxu1  ;;  %5212 = vmatmul.mubr.f32.gmra.mrb[74].mxu1 %v1639_v56 }
 0x2f8   : > { %5829 = vmatmul.mubr.f32.gmra.mrb[72].mxu0 %v3114_v59  ;;  %5214 = vmatprep.mubr.msk.f32.mxu1 %vm6712_vm0, %v6713_v11 }
 0x2f9   : > { %5831 = vmatprep.mubr.msk.f32.mxu0 %vm6712_vm0, %v6713_v11 }
 0x2fa   : > { %v8639_v16 = vpop.f32.mrb[10].mxu1 }
 0x2fb   : > { %v4962_v23 = vpop.f32.mrb[11].mxu1  ;;  %5215 = vmatmul.mubr.f32.gmra.mrb[76].mxu1 %v1640_v5 }
 0x2fc   : > { %5832 = vmatmul.mubr.f32.gmra.mrb[74].mxu0 %v3115_v10  ;;  %5217 = vmatprep.mubr.msk.f32.mxu1 %vm6712_vm0, %v6713_v11 }
 0x2fd   : > { %5834 = vmatprep.mubr.msk.f32.mxu0 %vm6712_vm0, %v6713_v11 }
 0x2fe   : > { %v8647_v27 = vpop.f32.mrb[12].mxu1 }
 0x2ff   : > { %v4965_v39 = vpop.f32.mrb[13].mxu1  ;;  %5218 = vmatmul.mubr.f32.gmra.mrb[78].mxu1 %v1641_v28 }
 0x300   : > { %5835 = vmatmul.mubr.f32.gmra.mrb[76].mxu0 %v3116_v20  ;;  %5220 = vmatprep.mubr.msk.f32.mxu1 %vm6712_vm0, %v6713_v11 }
 0x301   : > { %5837 = vmatprep.mubr.msk.f32.mxu0 %vm6712_vm0, %v6713_v11 }
 0x302   : > { %v8655_v9 = vpop.f32.mrb[14].mxu1 }
 0x303   : > { %v4968_v7 = vpop.f32.mrb[15].mxu1  ;;  %5221 = vmatmul.mubr.f32.gmra.mrb[80].mxu1 %v1642_v30 }
 0x304   : > { %5838 = vmatmul.mubr.f32.gmra.mrb[78].mxu0 %v3117_v46 }
 0x305   : > { %5840 = vmatprep.mubr.msk.f32.mxu0 %vm6712_vm0, %v6713_v11 }
 0x306   : > { %v8660_v29 = vpop.f32.mrb[16].mxu1 }
 0x307   : > { %v4971_v34 = vpop.f32.mrb[17].mxu1 }
 0x308   : > { %5841 = vmatmul.mubr.f32.gmra.mrb[80].mxu0 %v3118_v15 }
 0x30a   : > { %v8662_v36 = vpop.f32.mrb[18].mxu1 }
 0x30b   : > { %v4974_v18 = vpop.f32.mrb[19].mxu1 }
 0x30e   : > { %v8664_v45 = vpop.f32.mrb[20].mxu1 }
 0x30f   : > { %v4977_v50 = vpop.f32.mrb[21].mxu1 }
 0x312   : > { %v8666_v26 = vpop.f32.mrb[22].mxu1 }
 0x313   : > { %v4980_v52 = vpop.f32.mrb[23].mxu1 }
 0x316   : > { %v8668_v38 = vpop.f32.mrb[24].mxu1 }
 0x317   : > { %v4983_v55 = vpop.f32.mrb[25].mxu1 }
 0x31a   : > { %v8670_v58 = vpop.f32.mrb[26].mxu1 }
 0x31b   : > { %v4986_v11 = vpop.f32.mrb[27].mxu1 }
 0x31e   : > { %v8672_v47 = vpop.f32.mrb[28].mxu1 }
 0x31f   : > { %v4989_v0 = vpop.f32.mrb[29].mxu1 }
 0x322   : > { %v8674_v51 = vpop.f32.mrb[30].mxu1 }
 0x323   : > { %v4992_v54 = vpop.f32.mrb[31].mxu1 }
 0x326   : > { %v8676_v1 = vpop.f32.mrb[32].mxu1 }
 0x327   : > { %v4995_v61 = vpop.f32.mrb[33].mxu1 }
 0x32a   : > { %v8678_v21 = vpop.f32.mrb[34].mxu1 }
 0x32b   : > { %v4998_v4 = vpop.f32.mrb[35].mxu1 }
 0x32e   : > { %v8680_v33 = vpop.f32.mrb[36].mxu1 }
 0x32f   : > { %v5001_v6 = vpop.f32.mrb[37].mxu1 }
 0x332   : > { %v8682_v12 = vpop.f32.mrb[38].mxu1 }
 0x333   : > { %v5004_v42 = vpop.f32.mrb[39].mxu1 }
 0x336   : > { %v8684_v35 = vpop.f32.mrb[40].mxu1 }
 0x337   : > { %v5007_v40 = vpop.f32.mrb[41].mxu1 }
 0x33b   : > { %v3202_v22 = vpop.f32.mrb[0].mxu0 }
 0x33c   : > { %v6075_v24 = vadd.f32 %v3202_v22, %v8599_v25  ;;  %v5722_v32 = vpop.f32.mrb[1].mxu0  ;;  %v3490_v25 = vld [vmem:[%s8886_s2 + $0x10] sm:$0xff] }
 0x33e   : > { %3447 = vst [vmem:[%s8690_s6] sm:$0xff] %v6075_v24  ;;  %v3529_v19 = vmul.f32 %v6075_v24, %v3488_v41 }
 0x33f   : > { %v3207_v8 = vpop.f32.mrb[2].mxu0 }
 0x340   : > { %v6076_v31 = vadd.f32 %v3207_v8, %v8607_v43  ;;  %v5725_v37 = vpop.f32.mrb[3].mxu0  ;;  %v3616_v60 = vmul.f32 %v3529_v19, %v3529_v19  ;;  %v3491_v43 = vld [vmem:[%s8886_s2 + $0x18] sm:$0xff] }
 0x342   : > { %3448 = vst [vmem:[%s8690_s6 + $0x8] sm:$0xff] %v6076_v31  ;;  %v3530_v3 = vmul.f32 %v6076_v31, %v3489_v13 }
 0x343   : > { %v3212_v49 = vpop.f32.mrb[4].mxu0 }
 0x344   : > { %v3570_v57 = vadd.f32 %v3530_v3, %v3529_v19  ;;  %v3617_v44 = vmul.f32 %v3530_v3, %v3530_v3  ;;  %v6077_v14 = vadd.f32 %v3212_v49, %v8615_v63  ;;  %v5728_v48 = vpop.f32.mrb[5].mxu0  ;;  %v3492_v63 = vld [vmem:[%s8886_s2 + $0x20] sm:$0xff] }
 0x346   : > { %v3657_v17 = vadd.f32 %v3617_v44, %v3616_v60  ;;  %3449 = vst [vmem:[%s8690_s6 + $0x10] sm:$0xff] %v6077_v14  ;;  %v3531_v56 = vmul.f32 %v6077_v14, %v3490_v25 }
 0x347   : > { %v3217_v59 = vpop.f32.mrb[6].mxu0 }
 0x348   : > { %v3571_v2 = vadd.f32 %v3570_v57, %v3531_v56  ;;  %v3618_v5 = vmul.f32 %v3531_v56, %v3531_v56  ;;  %v6078_v10 = vadd.f32 %v3217_v59, %v8623_v53  ;;  %v5731_v23 = vpop.f32.mrb[7].mxu0  ;;  %v3493_v53 = vld [vmem:[%s8886_s2 + $0x28] sm:$0xff] }
 0x34a   : > { %v3658_v28 = vadd.f32 %v3657_v17, %v3618_v5  ;;  %3450 = vst [vmem:[%s8690_s6 + $0x18] sm:$0xff] %v6078_v10  ;;  %v3532_v20 = vmul.f32 %v6078_v10, %v3491_v43 }
 0x34b   : > { %v3222_v39 = vpop.f32.mrb[8].mxu0 }
 0x34c   : > { %v3572_v30 = vadd.f32 %v3571_v2, %v3532_v20  ;;  %v3619_v46 = vmul.f32 %v3532_v20, %v3532_v20  ;;  %v6079_v7 = vadd.f32 %v3222_v39, %v8631_v62  ;;  %v5734_v15 = vpop.f32.mrb[9].mxu0  ;;  %v3494_v62 = vld [vmem:[%s8886_s2 + $0x30] sm:$0xff] }
 0x34e   : > { %v3659_v34 = vadd.f32 %v3658_v28, %v3619_v46  ;;  %3451 = vst [vmem:[%s8690_s6 + $0x20] sm:$0xff] %v6079_v7  ;;  %v3533_v18 = vmul.f32 %v6079_v7, %v3492_v63 }
 0x34f   : > { %v3227_v50 = vpop.f32.mrb[10].mxu0 }
 0x350   : > { %v3573_v52 = vadd.f32 %v3572_v30, %v3533_v18  ;;  %v3620_v55 = vmul.f32 %v3533_v18, %v3533_v18  ;;  %v6080_v11 = vadd.f32 %v3227_v50, %v8639_v16  ;;  %v5737_v0 = vpop.f32.mrb[11].mxu0  ;;  %v3495_v16 = vld [vmem:[%s8886_s2 + $0x38] sm:$0xff] }
 0x352   : > { %v3660_v54 = vadd.f32 %v3659_v34, %v3620_v55  ;;  %3452 = vst [vmem:[%s8690_s6 + $0x28] sm:$0xff] %v6080_v11  ;;  %v3534_v61 = vmul.f32 %v6080_v11, %v3493_v53 }
 0x353   : > { %v3232_v4 = vpop.f32.mrb[12].mxu0 }
 0x354   : > { %v3574_v6 = vadd.f32 %v3573_v52, %v3534_v61  ;;  %v3621_v42 = vmul.f32 %v3534_v61, %v3534_v61  ;;  %v6081_v40 = vadd.f32 %v3232_v4, %v8647_v27  ;;  %v5740_v22 = vpop.f32.mrb[13].mxu0  ;;  %v3496_v27 = vld [vmem:[%s8886_s2 + $0x40] sm:$0xff] }
 0x356   : > { %v3661_v24 = vadd.f32 %v3660_v54, %v3621_v42  ;;  %3453 = vst [vmem:[%s8690_s6 + $0x30] sm:$0xff] %v6081_v40  ;;  %v3535_v32 = vmul.f32 %v6081_v40, %v3494_v62 }
 0x357   : > { %v3237_v41 = vpop.f32.mrb[14].mxu0 }
 0x358   : > { %v3575_v8 = vadd.f32 %v3574_v6, %v3535_v32  ;;  %v3622_v13 = vmul.f32 %v3535_v32, %v3535_v32  ;;  %v6082_v19 = vadd.f32 %v3237_v41, %v8655_v9  ;;  %v5743_v31 = vpop.f32.mrb[15].mxu0  ;;  %v3497_v9 = vld [vmem:[%s8886_s2 + $0x48] sm:$0xff] }
 0x35a   : > { %v3662_v37 = vadd.f32 %v3661_v24, %v3622_v13  ;;  %3454 = vst [vmem:[%s8690_s6 + $0x38] sm:$0xff] %v6082_v19  ;;  %v3536_v3 = vmul.f32 %v6082_v19, %v3495_v16 }
 0x35b   : > { %v3242_v49 = vpop.f32.mrb[16].mxu0 }
 0x35c   : > { %v3576_v25 = vadd.f32 %v3575_v8, %v3536_v3  ;;  %v3623_v60 = vmul.f32 %v3536_v3, %v3536_v3  ;;  %v6083_v57 = vadd.f32 %v3242_v49, %v8660_v29  ;;  %v5746_v44 = vpop.f32.mrb[17].mxu0  ;;  %v3498_v29 = vld [vmem:[%s8886_s2 + $0x50] sm:$0xff] }
 0x35e   : > { %v3663_v14 = vadd.f32 %v3662_v37, %v3623_v60  ;;  %3455 = vst [vmem:[%s8690_s6 + $0x40] sm:$0xff] %v6083_v57  ;;  %v3537_v48 = vmul.f32 %v6083_v57, %v3496_v27 }
 0x35f   : > { %v3247_v17 = vpop.f32.mrb[18].mxu0 }
 0x360   : > { %v3577_v56 = vadd.f32 %v3576_v25, %v3537_v48  ;;  %v3624_v59 = vmul.f32 %v3537_v48, %v3537_v48  ;;  %v6084_v43 = vadd.f32 %v3247_v17, %v8662_v36  ;;  %v5749_v2 = vpop.f32.mrb[19].mxu0  ;;  %v3499_v36 = vld [vmem:[%s8886_s2 + $0x58] sm:$0xff] }
 0x362   : > { %v3664_v5 = vadd.f32 %v3663_v14, %v3624_v59  ;;  %3456 = vst [vmem:[%s8690_s6 + $0x48] sm:$0xff] %v6084_v43  ;;  %v3538_v10 = vmul.f32 %v6084_v43, %v3497_v9 }
 0x363   : > { %v3252_v23 = vpop.f32.mrb[20].mxu0 }
 0x364   : > { %v3578_v28 = vadd.f32 %v3577_v56, %v3538_v10  ;;  %v3625_v20 = vmul.f32 %v3538_v10, %v3538_v10  ;;  %v6085_v39 = vadd.f32 %v3252_v23, %v8664_v45  ;;  %v5752_v63 = vpop.f32.mrb[21].mxu0  ;;  %v3500_v45 = vld [vmem:[%s8886_s2 + $0x60] sm:$0xff] }
 0x366   : > { %v3665_v30 = vadd.f32 %v3664_v5, %v3625_v20  ;;  %3457 = vst [vmem:[%s8690_s6 + $0x50] sm:$0xff] %v6085_v39  ;;  %v3539_v46 = vmul.f32 %v6085_v39, %v3498_v29 }
 0x367   : > { %v3257_v7 = vpop.f32.mrb[22].mxu0 }
 0x368   : > { %v3579_v15 = vadd.f32 %v3578_v28, %v3539_v46  ;;  %v3626_v34 = vmul.f32 %v3539_v46, %v3539_v46  ;;  %v6086_v18 = vadd.f32 %v3257_v7, %v8666_v26  ;;  %v5755_v50 = vpop.f32.mrb[23].mxu0  ;;  %v3501_v26 = vld [vmem:[%s8886_s2 + $0x68] sm:$0xff] }
 0x36a   : > { %v3666_v53 = vadd.f32 %v3665_v30, %v3626_v34  ;;  %3458 = vst [vmem:[%s8690_s6 + $0x58] sm:$0xff] %v6086_v18  ;;  %v3540_v52 = vmul.f32 %v6086_v18, %v3499_v36 }
 0x36b   : > { %v3262_v55 = vpop.f32.mrb[24].mxu0 }
 0x36c   : > { %v3580_v11 = vadd.f32 %v3579_v15, %v3540_v52  ;;  %v3627_v0 = vmul.f32 %v3540_v52, %v3540_v52  ;;  %v6087_v54 = vadd.f32 %v3262_v55, %v8668_v38  ;;  %v5758_v61 = vpop.f32.mrb[25].mxu0  ;;  %v3502_v38 = vld [vmem:[%s8886_s2 + $0x70] sm:$0xff] }
 0x36e   : > { %v3667_v4 = vadd.f32 %v3666_v53, %v3627_v0  ;;  %3459 = vst [vmem:[%s8690_s6 + $0x60] sm:$0xff] %v6087_v54  ;;  %v3541_v62 = vmul.f32 %v6087_v54, %v3500_v45  ;;  %v3508_v54 = vld [vmem:[%s8886_s2 + $0xa0] sm:$0xff] }
 0x36f   : > { %v3267_v6 = vpop.f32.mrb[26].mxu0 }
 0x370   : > { %v3581_v42 = vadd.f32 %v3580_v11, %v3541_v62  ;;  %v3628_v40 = vmul.f32 %v3541_v62, %v3541_v62  ;;  %v6088_v22 = vadd.f32 %v3267_v6, %v8670_v58  ;;  %v5761_v24 = vpop.f32.mrb[27].mxu0  ;;  %v3503_v58 = vld [vmem:[%s8886_s2 + $0x78] sm:$0xff] }
 0x371   : > { %v3509_v24 = vld [vmem:[%s8886_s2 + $0xa8] sm:$0xff] }
 0x372   : > { %v3668_v32 = vadd.f32 %v3667_v4, %v3628_v40  ;;  %3460 = vst [vmem:[%s8690_s6 + $0x68] sm:$0xff] %v6088_v22  ;;  %v3542_v41 = vmul.f32 %v6088_v22, %v3501_v26 }
 0x373   : > { %v3272_v16 = vpop.f32.mrb[28].mxu0 }
 0x374   : > { %v3582_v8 = vadd.f32 %v3581_v42, %v3542_v41  ;;  %v3629_v13 = vmul.f32 %v3542_v41, %v3542_v41  ;;  %v6089_v19 = vadd.f32 %v3272_v16, %v8672_v47  ;;  %v5764_v31 = vpop.f32.mrb[29].mxu0  ;;  %v3504_v47 = vld [vmem:[%s8886_s2 + $0x80] sm:$0xff] }
 0x376   : > { %v3669_v37 = vadd.f32 %v3668_v32, %v3629_v13  ;;  %3461 = vst [vmem:[%s8690_s6 + $0x70] sm:$0xff] %v6089_v19  ;;  %v3543_v3 = vmul.f32 %v6089_v19, %v3502_v38 }
 0x377   : > { %v3277_v49 = vpop.f32.mrb[30].mxu0 }
 0x378   : > { %v3583_v27 = vadd.f32 %v3582_v8, %v3543_v3  ;;  %v3630_v25 = vmul.f32 %v3543_v3, %v3543_v3  ;;  %v6090_v60 = vadd.f32 %v3277_v49, %v8674_v51  ;;  %v5767_v57 = vpop.f32.mrb[31].mxu0  ;;  %v3505_v51 = vld [vmem:[%s8886_s2 + $0x88] sm:$0xff] }
 0x37a   : > { %v3670_v44 = vadd.f32 %v3669_v37, %v3630_v25  ;;  %3462 = vst [vmem:[%s8690_s6 + $0x78] sm:$0xff] %v6090_v60  ;;  %v3544_v14 = vmul.f32 %v6090_v60, %v3503_v58  ;;  %v3510_v37 = vld [vmem:[%s8886_s2 + $0xb0] sm:$0xff] }
 0x37b   : > { %v3282_v48 = vpop.f32.mrb[32].mxu0 }
 0x37c   : > { %v3584_v17 = vadd.f32 %v3583_v27, %v3544_v14  ;;  %v3631_v9 = vmul.f32 %v3544_v14, %v3544_v14  ;;  %v6091_v56 = vadd.f32 %v3282_v48, %v8676_v1  ;;  %v5770_v59 = vpop.f32.mrb[33].mxu0  ;;  %v3506_v1 = vld [vmem:[%s8886_s2 + $0x90] sm:$0xff]  ;;  %v3511_v48 = vld [vmem:[%s8886_s2 + $0xb8] sm:$0xff] }
 0x37e   : > { %v3671_v43 = vadd.f32 %v3670_v44, %v3631_v9  ;;  %3463 = vst [vmem:[%s8690_s6 + $0x80] sm:$0xff] %v6091_v56  ;;  %v3545_v2 = vmul.f32 %v6091_v56, %v3504_v47 }
 0x37f   : > { %v3287_v5 = vpop.f32.mrb[34].mxu0 }
 0x380   : > { %v3585_v10 = vadd.f32 %v3584_v17, %v3545_v2  ;;  %v3632_v23 = vmul.f32 %v3545_v2, %v3545_v2  ;;  %v6092_v29 = vadd.f32 %v3287_v5, %v8678_v21  ;;  %v5773_v28 = vpop.f32.mrb[35].mxu0  ;;  %v3507_v21 = vld [vmem:[%s8886_s2 + $0x98] sm:$0xff] }
 0x382   : > { %v3672_v20 = vadd.f32 %v3671_v43, %v3632_v23  ;;  %3464 = vst [vmem:[%s8690_s6 + $0x88] sm:$0xff] %v6092_v29  ;;  %v3546_v39 = vmul.f32 %v6092_v29, %v3505_v51 }
 0x383   : > { %v3292_v63 = vpop.f32.mrb[36].mxu0 }
 0x384   : > { %v3586_v30 = vadd.f32 %v3585_v10, %v3546_v39  ;;  %v3633_v46 = vmul.f32 %v3546_v39, %v3546_v39  ;;  %v6093_v7 = vadd.f32 %v3292_v63, %v8680_v33  ;;  %v5776_v36 = vpop.f32.mrb[37].mxu0  ;;  %v3512_v10 = vld [vmem:[%s8886_s2 + $0xc0] sm:$0xff] }
 0x386   : > { %v3673_v15 = vadd.f32 %v3672_v20, %v3633_v46  ;;  %3465 = vst [vmem:[%s8690_s6 + $0x90] sm:$0xff] %v6093_v7  ;;  %v3547_v34 = vmul.f32 %v6093_v7, %v3506_v1  ;;  %v3513_v7 = vld [vmem:[%s8886_s2 + $0xc8] sm:$0xff] }
 0x387   : > { %v3297_v18 = vpop.f32.mrb[38].mxu0 }
 0x388   : > { %v3587_v50 = vadd.f32 %v3586_v30, %v3547_v34  ;;  %v3634_v53 = vmul.f32 %v3547_v34, %v3547_v34  ;;  %v6094_v52 = vadd.f32 %v3297_v18, %v8682_v12  ;;  %v5779_v55 = vpop.f32.mrb[39].mxu0 }
 0x38a   : > { %v3674_v45 = vadd.f32 %v3673_v15, %v3634_v53  ;;  %3466 = vst [vmem:[%s8690_s6 + $0x98] sm:$0xff] %v6094_v52  ;;  %v3548_v11 = vmul.f32 %v6094_v52, %v3507_v21  ;;  %v1831_v0 = vpop.f32.mrb[42].mxu1 }
 0x38b   : > { %v3302_v33 = vpop.f32.mrb[40].mxu0  ;;  %v5165_v61 = vpop.f32.mrb[43].mxu1 }
 0x38c   : > { %v3588_v4 = vadd.f32 %v3587_v50, %v3548_v11  ;;  %v3635_v62 = vmul.f32 %v3548_v11, %v3548_v11  ;;  %v6095_v6 = vadd.f32 %v3302_v33, %v8684_v35  ;;  %v5782_v26 = vpop.f32.mrb[41].mxu0 }
 0x38e   : > { %v3675_v42 = vadd.f32 %v3674_v45, %v3635_v62  ;;  %3467 = vst [vmem:[%s8690_s6 + $0xa0] sm:$0xff] %v6095_v6  ;;  %v3549_v12 = vmul.f32 %v6095_v6, %v3508_v54  ;;  %v1836_v40 = vpop.f32.mrb[44].mxu1  ;;  %v3514_v45 = vld [vmem:[%s8886_s2 + $0xd0] sm:$0xff] }
 0x38f   : > { %v3307_v22 = vpop.f32.mrb[42].mxu0  ;;  %v5168_v32 = vpop.f32.mrb[45].mxu1 }
 0x390   : > { %v3589_v41 = vadd.f32 %v3588_v4, %v3549_v12  ;;  %v3636_v16 = vmul.f32 %v3549_v12, %v3549_v12  ;;  %v6096_v38 = vadd.f32 %v3307_v22, %v1831_v0  ;;  %v5785_v8 = vpop.f32.mrb[43].mxu0 }
 0x392   : > { %v3676_v13 = vadd.f32 %v3675_v42, %v3636_v16  ;;  %3468 = vst [vmem:[%s8690_s6 + $0xa8] sm:$0xff] %v6096_v38  ;;  %v3550_v19 = vmul.f32 %v6096_v38, %v3509_v24  ;;  %v1841_v35 = vpop.f32.mrb[46].mxu1  ;;  %v3515_v42 = vld [vmem:[%s8886_s2 + $0xd8] sm:$0xff] }
 0x393   : > { %v3312_v31 = vpop.f32.mrb[44].mxu0  ;;  %v5171_v3 = vpop.f32.mrb[47].mxu1 }
 0x394   : > { %v3590_v49 = vadd.f32 %v3589_v41, %v3550_v19  ;;  %v3637_v58 = vmul.f32 %v3550_v19, %v3550_v19  ;;  %v6097_v27 = vadd.f32 %v3312_v31, %v1836_v40  ;;  %v5788_v25 = vpop.f32.mrb[45].mxu0 }
 0x396   : > { %v3677_v60 = vadd.f32 %v3676_v13, %v3637_v58  ;;  %3469 = vst [vmem:[%s8690_s6 + $0xb0] sm:$0xff] %v6097_v27  ;;  %v3551_v57 = vmul.f32 %v6097_v27, %v3510_v37  ;;  %v1846_v44 = vpop.f32.mrb[48].mxu1  ;;  %v3516_v13 = vld [vmem:[%s8886_s2 + $0xe0] sm:$0xff] }
 0x397   : > { %v3317_v14 = vpop.f32.mrb[46].mxu0  ;;  %v5174_v47 = vpop.f32.mrb[49].mxu1 }
 0x398   : > { %v3591_v17 = vadd.f32 %v3590_v49, %v3551_v57  ;;  %v3638_v9 = vmul.f32 %v3551_v57, %v3551_v57  ;;  %v6098_v56 = vadd.f32 %v3317_v14, %v1841_v35  ;;  %v5791_v59 = vpop.f32.mrb[47].mxu0 }
 0x39a   : > { %v3678_v43 = vadd.f32 %v3677_v60, %v3638_v9  ;;  %3470 = vst [vmem:[%s8690_s6 + $0xb8] sm:$0xff] %v6098_v56  ;;  %v3552_v2 = vmul.f32 %v6098_v56, %v3511_v48  ;;  %v1851_v5 = vpop.f32.mrb[50].mxu1  ;;  %v3517_v60 = vld [vmem:[%s8886_s2 + $0xe8] sm:$0xff] }
 0x39b   : > { %v3322_v51 = vpop.f32.mrb[48].mxu0  ;;  %v5177_v23 = vpop.f32.mrb[51].mxu1 }
 0x39c   : > { %v3592_v29 = vadd.f32 %v3591_v17, %v3552_v2  ;;  %v3639_v28 = vmul.f32 %v3552_v2, %v3552_v2  ;;  %v6099_v20 = vadd.f32 %v3322_v51, %v1846_v44  ;;  %v5794_v39 = vpop.f32.mrb[49].mxu0 }
 0x39e   : > { %v3679_v63 = vadd.f32 %v3678_v43, %v3639_v28  ;;  %3471 = vst [vmem:[%s8690_s6 + $0xc0] sm:$0xff] %v6099_v20  ;;  %v3553_v1 = vmul.f32 %v6099_v20, %v3512_v10  ;;  %v1856_v30 = vpop.f32.mrb[52].mxu1  ;;  %v3518_v43 = vld [vmem:[%s8886_s2 + $0xf0] sm:$0xff] }
 0x39f   : > { %v3327_v46 = vpop.f32.mrb[50].mxu0  ;;  %v5180_v36 = vpop.f32.mrb[53].mxu1 }
 0x3a0   : > { %v3593_v15 = vadd.f32 %v3592_v29, %v3553_v1  ;;  %v3640_v34 = vmul.f32 %v3553_v1, %v3553_v1  ;;  %v6100_v18 = vadd.f32 %v3327_v46, %v1851_v5  ;;  %v5797_v21 = vpop.f32.mrb[51].mxu0 }
 0x3a2   : > { %v3680_v50 = vadd.f32 %v3679_v63, %v3640_v34  ;;  %3472 = vst [vmem:[%s8690_s6 + $0xc8] sm:$0xff] %v6100_v18  ;;  %v3554_v53 = vmul.f32 %v6100_v18, %v3513_v7  ;;  %v1861_v52 = vpop.f32.mrb[54].mxu1  ;;  %v3519_v63 = vld [vmem:[%s8886_s2 + $0xf8] sm:$0xff] }
 0x3a3   : > { %v3332_v55 = vpop.f32.mrb[52].mxu0  ;;  %v5183_v11 = vpop.f32.mrb[55].mxu1 }
 0x3a4   : > { %v3594_v0 = vadd.f32 %v3593_v15, %v3554_v53  ;;  %v3641_v33 = vmul.f32 %v3554_v53, %v3554_v53  ;;  %v6101_v54 = vadd.f32 %v3332_v55, %v1856_v30  ;;  %v5800_v61 = vpop.f32.mrb[53].mxu0 }
 0x3a6   : > { %v3681_v4 = vadd.f32 %v3680_v50, %v3641_v33  ;;  %3473 = vst [vmem:[%s8690_s6 + $0xd0] sm:$0xff] %v6101_v54  ;;  %v3555_v62 = vmul.f32 %v6101_v54, %v3514_v45  ;;  %v1866_v6 = vpop.f32.mrb[56].mxu1  ;;  %v3520_v50 = vld [vmem:[%s8886_s2 + $0x100] sm:$0xff] }
 0x3a7   : > { %v3337_v26 = vpop.f32.mrb[54].mxu0  ;;  %v5186_v12 = vpop.f32.mrb[57].mxu1 }
 0x3a8   : > { %v3595_v40 = vadd.f32 %v3594_v0, %v3555_v62  ;;  %v3642_v22 = vmul.f32 %v3555_v62, %v3555_v62  ;;  %v6102_v24 = vadd.f32 %v3337_v26, %v1861_v52  ;;  %v5803_v32 = vpop.f32.mrb[55].mxu0 }
 0x3aa   : > { %v3682_v41 = vadd.f32 %v3681_v4, %v3642_v22  ;;  %3474 = vst [vmem:[%s8690_s6 + $0xd8] sm:$0xff] %v6102_v24  ;;  %v3556_v16 = vmul.f32 %v6102_v24, %v3515_v42  ;;  %v1871_v38 = vpop.f32.mrb[58].mxu1  ;;  %v3521_v4 = vld [vmem:[%s8886_s2 + $0x108] sm:$0xff] }
 0x3ab   : > { %v3342_v8 = vpop.f32.mrb[56].mxu0  ;;  %v5189_v19 = vpop.f32.mrb[59].mxu1 }
 0x3ac   : > { %v3596_v35 = vadd.f32 %v3595_v40, %v3556_v16  ;;  %v3643_v31 = vmul.f32 %v3556_v16, %v3556_v16  ;;  %v6103_v37 = vadd.f32 %v3342_v8, %v1866_v6  ;;  %v5806_v3 = vpop.f32.mrb[57].mxu0 }
 0x3ae   : > { %v3683_v49 = vadd.f32 %v3682_v41, %v3643_v31  ;;  %3475 = vst [vmem:[%s8690_s6 + $0xe0] sm:$0xff] %v6103_v37  ;;  %v3557_v58 = vmul.f32 %v6103_v37, %v3516_v13  ;;  %v1876_v27 = vpop.f32.mrb[60].mxu1  ;;  %v3522_v41 = vld [vmem:[%s8886_s2 + $0x110] sm:$0xff] }
 0x3af   : > { %v3347_v25 = vpop.f32.mrb[58].mxu0  ;;  %v5192_v57 = vpop.f32.mrb[61].mxu1 }
 0x3b0   : > { %v3597_v44 = vadd.f32 %v3596_v35, %v3557_v58  ;;  %v3644_v14 = vmul.f32 %v3557_v58, %v3557_v58  ;;  %v6104_v48 = vadd.f32 %v3347_v25, %v1871_v38  ;;  %v5809_v47 = vpop.f32.mrb[59].mxu0 }
 0x3b2   : > { %v3684_v17 = vadd.f32 %v3683_v49, %v3644_v14  ;;  %3476 = vst [vmem:[%s8690_s6 + $0xe8] sm:$0xff] %v6104_v48  ;;  %v3558_v9 = vmul.f32 %v6104_v48, %v3517_v60  ;;  %v1881_v56 = vpop.f32.mrb[62].mxu1  ;;  %v3523_v49 = vld [vmem:[%s8886_s2 + $0x118] sm:$0xff] }
 0x3b3   : > { %v3352_v59 = vpop.f32.mrb[60].mxu0  ;;  %v5195_v2 = vpop.f32.mrb[63].mxu1 }
 0x3b4   : > { %v3598_v5 = vadd.f32 %v3597_v44, %v3558_v9  ;;  %v3645_v51 = vmul.f32 %v3558_v9, %v3558_v9  ;;  %v6105_v10 = vadd.f32 %v3352_v59, %v1876_v27  ;;  %v5812_v23 = vpop.f32.mrb[61].mxu0 }
 0x3b6   : > { %v3685_v29 = vadd.f32 %v3684_v17, %v3645_v51  ;;  %3477 = vst [vmem:[%s8690_s6 + $0xf0] sm:$0xff] %v6105_v10  ;;  %v3559_v28 = vmul.f32 %v6105_v10, %v3518_v43  ;;  %v1886_v20 = vpop.f32.mrb[64].mxu1  ;;  %v3524_v17 = vld [vmem:[%s8886_s2 + $0x120] sm:$0xff] }
 0x3b7   : > { %v3357_v39 = vpop.f32.mrb[62].mxu0  ;;  %v5198_v1 = vpop.f32.mrb[65].mxu1 }
 0x3b8   : > { %v3599_v30 = vadd.f32 %v3598_v5, %v3559_v28  ;;  %v3646_v46 = vmul.f32 %v3559_v28, %v3559_v28  ;;  %v6106_v7 = vadd.f32 %v3357_v39, %v1881_v56  ;;  %v5815_v36 = vpop.f32.mrb[63].mxu0 }
 0x3ba   : > { %v3686_v15 = vadd.f32 %v3685_v29, %v3646_v46  ;;  %3478 = vst [vmem:[%s8690_s6 + $0xf8] sm:$0xff] %v6106_v7  ;;  %v3560_v34 = vmul.f32 %v6106_v7, %v3519_v63  ;;  %v1891_v18 = vpop.f32.mrb[66].mxu1  ;;  %v3525_v29 = vld [vmem:[%s8886_s2 + $0x128] sm:$0xff] }
 0x3bb   : > { %v3362_v21 = vpop.f32.mrb[64].mxu0  ;;  %v5201_v53 = vpop.f32.mrb[67].mxu1 }
 0x3bc   : > { %v3600_v52 = vadd.f32 %v3599_v30, %v3560_v34  ;;  %v3647_v55 = vmul.f32 %v3560_v34, %v3560_v34  ;;  %v6107_v45 = vadd.f32 %v3362_v21, %v1886_v20  ;;  %v5818_v11 = vpop.f32.mrb[65].mxu0 }
 0x3be   : > { %v3687_v0 = vadd.f32 %v3686_v15, %v3647_v55  ;;  %3479 = vst [vmem:[%s8690_s6 + $0x100] sm:$0xff] %v6107_v45  ;;  %v3561_v33 = vmul.f32 %v6107_v45, %v3520_v50  ;;  %v1896_v54 = vpop.f32.mrb[68].mxu1  ;;  %v3526_v15 = vld [vmem:[%s8886_s2 + $0x130] sm:$0xff] }
 0x3bf   : > { %v3367_v61 = vpop.f32.mrb[66].mxu0  ;;  %v5204_v62 = vpop.f32.mrb[69].mxu1 }
 0x3c0   : > { %v3601_v6 = vadd.f32 %v3600_v52, %v3561_v33  ;;  %v3648_v26 = vmul.f32 %v3561_v33, %v3561_v33  ;;  %v6108_v42 = vadd.f32 %v3367_v61, %v1891_v18  ;;  %v5821_v12 = vpop.f32.mrb[67].mxu0 }
 0x3c1   : > { %v3528_v12 = vld [vmem:[%s8886_s2 + $0x140] sm:$0xff] }
 0x3c2   : > { %v3688_v40 = vadd.f32 %v3687_v0, %v3648_v26  ;;  %3480 = vst [vmem:[%s8690_s6 + $0x108] sm:$0xff] %v6108_v42  ;;  %v3562_v22 = vmul.f32 %v6108_v42, %v3521_v4  ;;  %v1901_v24 = vpop.f32.mrb[70].mxu1  ;;  %v3527_v0 = vld [vmem:[%s8886_s2 + $0x138] sm:$0xff] }
 0x3c3   : > { %v3372_v32 = vpop.f32.mrb[68].mxu0  ;;  %v5207_v16 = vpop.f32.mrb[71].mxu1 }
 0x3c4   : > { %v3602_v38 = vadd.f32 %v3601_v6, %v3562_v22  ;;  %v3649_v8 = vmul.f32 %v3562_v22, %v3562_v22  ;;  %v6109_v13 = vadd.f32 %v3372_v32, %v1896_v54  ;;  %v5824_v19 = vpop.f32.mrb[69].mxu0 }
 0x3c6   : > { %v3689_v35 = vadd.f32 %v3688_v40, %v3649_v8  ;;  %3481 = vst [vmem:[%s8690_s6 + $0x110] sm:$0xff] %v6109_v13  ;;  %v3563_v31 = vmul.f32 %v6109_v13, %v3522_v41  ;;  %v1906_v37 = vpop.f32.mrb[72].mxu1 }
 0x3c7   : > { %v3377_v3 = vpop.f32.mrb[70].mxu0  ;;  %v5210_v58 = vpop.f32.mrb[73].mxu1 }
 0x3c8   : > { %v3603_v27 = vadd.f32 %v3602_v38, %v3563_v31  ;;  %v3650_v25 = vmul.f32 %v3563_v31, %v3563_v31  ;;  %v6110_v60 = vadd.f32 %v3377_v3, %v1901_v24  ;;  %v5827_v57 = vpop.f32.mrb[71].mxu0 }
 0x3ca   : > { %v3690_v44 = vadd.f32 %v3689_v35, %v3650_v25  ;;  %3482 = vst [vmem:[%s8690_s6 + $0x118] sm:$0xff] %v6110_v60  ;;  %v3564_v14 = vmul.f32 %v6110_v60, %v3523_v49  ;;  %v1911_v48 = vpop.f32.mrb[74].mxu1 }
 0x3cb   : > { %v3382_v47 = vpop.f32.mrb[72].mxu0  ;;  %v5213_v9 = vpop.f32.mrb[75].mxu1 }
 0x3cc   : > { %v3604_v56 = vadd.f32 %v3603_v27, %v3564_v14  ;;  %v3651_v59 = vmul.f32 %v3564_v14, %v3564_v14  ;;  %v6111_v43 = vadd.f32 %v3382_v47, %v1906_v37  ;;  %v5830_v2 = vpop.f32.mrb[73].mxu0  ;;  %v3703_v37 = vlaneseq }
 0x3ce   : > { %v3691_v5 = vadd.f32 %v3690_v44, %v3651_v59  ;;  %3483 = vst [vmem:[%s8690_s6 + $0x120] sm:$0xff] %v6111_v43  ;;  %v3565_v51 = vmul.f32 %v6111_v43, %v3524_v17  ;;  %v1916_v10 = vpop.f32.mrb[76].mxu1  ;;  %v3704_v25 = vshrl.u32 %v3703_v37, 7 }
 0x3cf   : > { %v3387_v23 = vpop.f32.mrb[74].mxu0  ;;  %v5216_v28 = vpop.f32.mrb[77].mxu1 }
 0x3d0   : > { %v3605_v20 = vadd.f32 %v3604_v56, %v3565_v51  ;;  %v3652_v39 = vmul.f32 %v3565_v51, %v3565_v51  ;;  %v6112_v63 = vadd.f32 %v3387_v23, %v1911_v48  ;;  %v5833_v1 = vpop.f32.mrb[75].mxu0  ;;  %vm3705_vm1 = vcmp.eq.s32.totalorder %v3704_v25, 0 }
 0x3d1   : > { %vm3707_vm2 = vcmp.eq.s32.totalorder %v3704_v25, 1 }
 0x3d2   : > { %v3692_v30 = vadd.f32 %v3691_v5, %v3652_v39  ;;  %3484 = vst [vmem:[%s8690_s6 + $0x128] sm:$0xff] %v6112_v63  ;;  %v3566_v46 = vmul.f32 %v6112_v63, %v3525_v29  ;;  %v1921_v7 = vpop.f32.mrb[78].mxu1 }
 0x3d3   : > { %v3392_v36 = vpop.f32.mrb[76].mxu0  ;;  %v5219_v34 = vpop.f32.mrb[79].mxu1 }
 0x3d4   : > { %v3606_v18 = vadd.f32 %v3605_v20, %v3566_v46  ;;  %v3653_v21 = vmul.f32 %v3566_v46, %v3566_v46  ;;  %v6113_v50 = vadd.f32 %v3392_v36, %v1916_v10  ;;  %v5836_v53 = vpop.f32.mrb[77].mxu0 }
 0x3d6   : > { %v3693_v52 = vadd.f32 %v3692_v30, %v3653_v21  ;;  %3485 = vst [vmem:[%s8690_s6 + $0x130] sm:$0xff] %v6113_v50  ;;  %v3567_v55 = vmul.f32 %v6113_v50, %v3526_v15  ;;  %v1926_v45 = vpop.f32.mrb[80].mxu1 }
 0x3d7   : > { %v3397_v11 = vpop.f32.mrb[78].mxu0  ;;  %v5222_v33 = vpop.f32.mrb[81].mxu1 }
 0x3d8   : > { %v3607_v54 = vadd.f32 %v3606_v18, %v3567_v55  ;;  %v3654_v61 = vmul.f32 %v3567_v55, %v3567_v55  ;;  %v6114_v4 = vadd.f32 %v3397_v11, %v1921_v7  ;;  %v5839_v62 = vpop.f32.mrb[79].mxu0 }
 0x3da   : > { %v3694_v6 = vadd.f32 %v3693_v52, %v3654_v61  ;;  %3486 = vst [vmem:[%s8690_s6 + $0x138] sm:$0xff] %v6114_v4  ;;  %v3568_v26 = vmul.f32 %v6114_v4, %v3527_v0 }
 0x3db   : > { %v3402_v42 = vpop.f32.mrb[80].mxu0 }
 0x3dc   : > { %v3608_v40 = vadd.f32 %v3607_v54, %v3568_v26  ;;  %v3655_v22 = vmul.f32 %v3568_v26, %v3568_v26  ;;  %v6115_v24 = vadd.f32 %v3402_v42, %v1926_v45  ;;  %v5842_v32 = vpop.f32.mrb[81].mxu0 }
 0x3de   : > { %v3695_v41 = vadd.f32 %v3694_v6, %v3655_v22  ;;  %3487 = vst [vmem:[%s8690_s6 + $0x140] sm:$0xff] %v6115_v24  ;;  %v3569_v16 = vmul.f32 %v6115_v24, %v3528_v12 }
 0x3e0   : > { %v3609_v38 = vadd.f32 %v3608_v40, %v3569_v16  ;;  %v3656_v8 = vmul.f32 %v3569_v16, %v3569_v16 }
 0x3e2   : > { %v3610_v13 = vrot.slane %v3609_v38, 4  ;;  %v3696_v19 = vadd.f32 %v3695_v41, %v3656_v8 }
 0x3e4   : > { %v3611_v35 = vadd.f32 %v3610_v13, %v3609_v38  ;;  %v3697_v31 = vrot.slane %v3696_v19, 4 }
 0x3e6   : > { %v3612_v3 = vrot.slane %v3611_v35, 2  ;;  %v3698_v49 = vadd.f32 %v3697_v31, %v3696_v19 }
 0x3e8   : > { %v3613_v58 = vadd.f32 %v3612_v3, %v3611_v35  ;;  %v3699_v27 = vrot.slane %v3698_v49, 2 }
 0x3ea   : > { %v3614_v60 = vrot.slane %v3613_v58, 1  ;;  %v3700_v57 = vadd.f32 %v3699_v27, %v3698_v49 }
 0x3ec   : > { %v3615_v44 = vadd.f32 %v3614_v60, %v3613_v58  ;;  %v3701_v14 = vrot.slane %v3700_v57, 1 }
 0x3ee   : > { %v3702_v48 = vadd.f32 %v3701_v14, %v3700_v57  ;;  %v3706_v47 = vsel %vm3705_vm1, %v3615_v44, 0.0 }
 0x3f0   : > { %v3708_v17 = vsel %vm3707_vm2, %v3702_v48, 0.0 }
 0x3f1   : > { %v3709_v9 = vadd.f32 %v3708_v17, %v3706_v47 }
 0x3f3   : > { %3710 = vst [vmem:[%s208_s25] sm:$0xff] %v3709_v9 }
 0x3f4 PF: > { %s15_s15 = sadd.s32 1, %s6709_s15  }
 0x3f5   : > { %p12_p4 = scmp.ge.s32.totalorder %s15_s15, 4  }
 0x3f7   :  { %14 = sbr.rel (!%p12_p4) target bundleno = 1 (0x1), region = 82 }

// kernel: _encoder_forward_impl.6
= control target key start
LH: loop header
LB: loop body
LE: loop exit
PB: predicated region body
PF: predicated region fallthrough
CT: control target
= control target key end

     0   :  { %s7325_s15 = smov 0   ;;  %s9331_s0 = inlined_call_operand.vmem [shape: f32[2,376,8], index: 0, kind: input, shape index: {}]   ;;  %s9332_s1 = inlined_call_operand.vmem [shape: f32[9,8,128], index: 1, kind: input, shape index: {}]   ;;  %s9333_s2 = inlined_call_operand.vmem [shape: f32[328,128], index: 2, kind: input, shape index: {}]   ;;  %s9334_s3 = inlined_call_operand.vmem [shape: f32[2,328,128], index: 3, kind: output, shape index: {0}]   ;;  %s9335_s4 = inlined_call_operand.vmem [shape: f32[2,8,128], index: 4, kind: output, shape index: {1}]  }
   0x1 LB: > { %s4770_s16 = sadd.s32 4294967295, %s7296_s15   ;;  %p4774_p0 = scmp.ge.s32.totalorder %s7296_s15, 1  ;;  %s7296_s15 = sphi %s7325_s15, %s15_s15  }
   0x2   : > { %p165_p1 = scmp.lt.s32.totalorder %s7296_s15, 3 }
   0x4   : > { %p166_p2 = pnand %p4774_p0, %p165_p1 }
   0x5   : > { %v4945_v0 = vld [vmem:[%s9332_s1 + $0x20] sm:$0xff] (!%p166_p2)  ;;  %v4778_v1 = vld [vmem:[%s9332_s1 + $0x8] sm:$0xff] (!%p166_p2)  ;;  %p195_p3 = scmp.lt.s32.totalorder (!%p166_p2), %s4770_s16, 1  ;;  %v7298_v2 = vmov (!%p166_p2), 0.0   ;;  %vm7299_vm0 = vmmov (!%p166_p2), 0   ;;  %vm294_vm1 = vcmask (!%p166_p2), 64512  }
   0x6   : > { %169 = sbr.rel (%p166_p2) target bundleno = 990 (0x3de), region = 32  ;;  %6035 = vmatprep.subr.mxu0 (!%p166_p2), %v7298_v2  ;;  %5535 = vmatprep.subr.mxu1 (!%p166_p2), %v7298_v2  ;;  %v4987_v3 = vld [vmem:[%s9332_s1 + $0x28] sm:$0xff] (!%p166_p2)  ;;  %v250_v6 = vld [vmem:[%s9332_s1] sm:$0xff] (!%p166_p2)  ;;  %v5029_v49 = vld [vmem:[%s9332_s1 + $0x30] sm:$0xff] (!%p166_p2) }
   0x7   : > { %6036 = vmatpush3.msra.mxu0 (!%p166_p2), %v4945_v0  ;;  %5536 = vmatpush3.msra.mxu1 (!%p166_p2), %v4778_v1 }
   0x8   : > { %5537 = vmatprep.mubr.msk.f32.mxu1 (!%p166_p2), %vm7299_vm0, %v7298_v2  ;;  %6037 = vmatprep.mubr.msk.f32.mxu0 (!%p166_p2), %vm7299_vm0, %v7298_v2 }
   0x9   : > { %6160 = vmatprep.subr.mxu0 (!%p166_p2), %v7298_v2  ;;  %5660 = vmatprep.subr.mxu1 (!%p166_p2), %v7298_v2 }
   0xd   : > { %s9337_s16 = smov (!%p195_p3, %s4770_s16), 1 }
   0xe   : > { %s7277_s21 = smul.u32 376, %s9337_s16  ;;  %s4777_s8 = sshll.u32 %s9337_s16, 3 }
   0xf   : > { %s7278_s17 = smul.u32 328, %s9337_s16  ;;  %s208_s10 = scalar_lea.vmem %s9335_s4, %s4777_s8 }
  0x10   : > { %s7353_s24 = scalar_lea.vmem %s9331_s0, %s7277_s21 }
  0x11   : > { %v251_v4 = vld [vmem:[%s7353_s24 + $0x6] sm:$0xff]  ;;  %v2035_v5 = vld [vmem:[%s7353_s24 + $0x18] sm:$0xff]  ;;  %v252_v7 = vld [vmem:[%s7353_s24 + $0xe] sm:$0xff]  ;;  %s9137_s20 = scalar_lea.vmem %s9334_s3, %s7278_s17 }
  0x12   : > { %5538 = vmatmul.mubr.msk.f32.vlgmr.msra.gmra.mrb[0].mxu1 %vm294_vm1, %v251_v4  ;;  %6038 = vmatmul.mubr.msk.f32.vlgmr.msra.gmra.mrb[0].mxu0 %vm294_vm1, %v2035_v5  ;;  %v2036_v8 = vld [vmem:[%s7353_s24 + $0x20] sm:$0xff]  ;;  %v253_v9 = vld [vmem:[%s7353_s24 + $0x16] sm:$0xff]  ;;  %v2037_v10 = vld [vmem:[%s7353_s24 + $0x28] sm:$0xff] }
  0x13   : > { %6161 = vmatpush3.msra.mxu0 %v4987_v3  ;;  %5540 = vmatprep.mubr.msk.f32.mxu1 %vm7299_vm0, %v7298_v2  ;;  %v254_v11 = vld [vmem:[%s7353_s24 + $0x1e] sm:$0xff]  ;;  %v2038_v12 = vld [vmem:[%s7353_s24 + $0x30] sm:$0xff]  ;;  %v255_v13 = vld [vmem:[%s7353_s24 + $0x26] sm:$0xff] }
  0x14   : > { %6040 = vmatprep.mubr.msk.f32.mxu0 %vm7299_vm0, %v7298_v2  ;;  %5661 = vmatpush3.msra.mxu1 %v250_v6  ;;  %v2039_v14 = vld [vmem:[%s7353_s24 + $0x38] sm:$0xff]  ;;  %v256_v15 = vld [vmem:[%s7353_s24 + $0x2e] sm:$0xff]  ;;  %v2040_v16 = vld [vmem:[%s7353_s24 + $0x40] sm:$0xff] }
  0x15   : > { %6285 = vmatprep.subr.mxu0 %v7298_v2  ;;  %5785 = vmatprep.subr.mxu1 %v7298_v2  ;;  %v257_v17 = vld [vmem:[%s7353_s24 + $0x36] sm:$0xff]  ;;  %v2041_v18 = vld [vmem:[%s7353_s24 + $0x48] sm:$0xff]  ;;  %v258_v19 = vld [vmem:[%s7353_s24 + $0x3e] sm:$0xff] }
  0x16   : > { %5541 = vmatmul.mubr.msk.f32.gmra.mrb[2].mxu1 %vm294_vm1, %v252_v7  ;;  %6041 = vmatmul.mubr.msk.f32.gmra.mrb[2].mxu0 %vm294_vm1, %v2036_v8  ;;  %v2042_v20 = vld [vmem:[%s7353_s24 + $0x50] sm:$0xff]  ;;  %v259_v21 = vld [vmem:[%s7353_s24 + $0x46] sm:$0xff]  ;;  %v2043_v22 = vld [vmem:[%s7353_s24 + $0x58] sm:$0xff] }
  0x17   : > { %5543 = vmatprep.mubr.msk.f32.mxu1 %vm7299_vm0, %v7298_v2  ;;  %6043 = vmatprep.mubr.msk.f32.mxu0 %vm7299_vm0, %v7298_v2  ;;  %v260_v23 = vld [vmem:[%s7353_s24 + $0x4e] sm:$0xff]  ;;  %v2044_v24 = vld [vmem:[%s7353_s24 + $0x60] sm:$0xff]  ;;  %v261_v25 = vld [vmem:[%s7353_s24 + $0x56] sm:$0xff] }
  0x18   : > { %v2045_v26 = vld [vmem:[%s7353_s24 + $0x68] sm:$0xff]  ;;  %v262_v27 = vld [vmem:[%s7353_s24 + $0x5e] sm:$0xff]  ;;  %v2046_v28 = vld [vmem:[%s7353_s24 + $0x70] sm:$0xff] }
  0x19   : > { %v263_v29 = vld [vmem:[%s7353_s24 + $0x66] sm:$0xff]  ;;  %v2047_v30 = vld [vmem:[%s7353_s24 + $0x78] sm:$0xff]  ;;  %v264_v31 = vld [vmem:[%s7353_s24 + $0x6e] sm:$0xff] }
  0x1a   : > { %5544 = vmatmul.mubr.msk.f32.gmra.mrb[4].mxu1 %vm294_vm1, %v253_v9  ;;  %6044 = vmatmul.mubr.msk.f32.gmra.mrb[4].mxu0 %vm294_vm1, %v2037_v10  ;;  %v2048_v32 = vld [vmem:[%s7353_s24 + $0x80] sm:$0xff]  ;;  %v265_v33 = vld [vmem:[%s7353_s24 + $0x76] sm:$0xff]  ;;  %v2049_v34 = vld [vmem:[%s7353_s24 + $0x88] sm:$0xff] }
  0x1b   : > { %5546 = vmatprep.mubr.msk.f32.mxu1 %vm7299_vm0, %v7298_v2  ;;  %6046 = vmatprep.mubr.msk.f32.mxu0 %vm7299_vm0, %v7298_v2  ;;  %v266_v35 = vld [vmem:[%s7353_s24 + $0x7e] sm:$0xff]  ;;  %v2050_v36 = vld [vmem:[%s7353_s24 + $0x90] sm:$0xff]  ;;  %v267_v37 = vld [vmem:[%s7353_s24 + $0x86] sm:$0xff] }
  0x1c   : > { %v2051_v38 = vld [vmem:[%s7353_s24 + $0x98] sm:$0xff]  ;;  %v268_v39 = vld [vmem:[%s7353_s24 + $0x8e] sm:$0xff]  ;;  %v2052_v40 = vld [vmem:[%s7353_s24 + $0xa0] sm:$0xff] }
  0x1d   : > { %v269_v41 = vld [vmem:[%s7353_s24 + $0x96] sm:$0xff]  ;;  %v2053_v42 = vld [vmem:[%s7353_s24 + $0xa8] sm:$0xff]  ;;  %v270_v43 = vld [vmem:[%s7353_s24 + $0x9e] sm:$0xff] }
  0x1e   : > { %5547 = vmatmul.mubr.msk.f32.gmra.mrb[6].mxu1 %vm294_vm1, %v254_v11  ;;  %6047 = vmatmul.mubr.msk.f32.gmra.mrb[6].mxu0 %vm294_vm1, %v2038_v12  ;;  %v2054_v44 = vld [vmem:[%s7353_s24 + $0xb0] sm:$0xff]  ;;  %v271_v45 = vld [vmem:[%s7353_s24 + $0xa6] sm:$0xff]  ;;  %v2055_v46 = vld [vmem:[%s7353_s24 + $0xb8] sm:$0xff] }
  0x1f   : > { %5549 = vmatprep.mubr.msk.f32.mxu1 %vm7299_vm0, %v7298_v2  ;;  %6049 = vmatprep.mubr.msk.f32.mxu0 %vm7299_vm0, %v7298_v2  ;;  %v272_v47 = vld [vmem:[%s7353_s24 + $0xae] sm:$0xff]  ;;  %v2512_v48 = vld [vmem:[%s7353_s24 + $0x19] sm:$0xff]  ;;  %v2513_v51 = vld [vmem:[%s7353_s24 + $0x21] sm:$0xff] }
  0x20   : > { %v273_v50 = vld [vmem:[%s7353_s24 + $0xb6] sm:$0xff]  ;;  %v274_v52 = vld [vmem:[%s7353_s24 + $0xbe] sm:$0xff]  ;;  %v7553_v53 = vld [vmem:[%s7353_s24 + $0x29] sm:$0xff] }
  0x21   : > { %v275_v54 = vld [vmem:[%s7353_s24 + $0xc6] sm:$0xff]  ;;  %v7564_v55 = vld [vmem:[%s7353_s24 + $0x31] sm:$0xff]  ;;  %v7575_v57 = vld [vmem:[%s7353_s24 + $0x39] sm:$0xff] }
  0x22   : > { %5550 = vmatmul.mubr.msk.f32.gmra.mrb[8].mxu1 %vm294_vm1, %v255_v13  ;;  %6050 = vmatmul.mubr.msk.f32.gmra.mrb[8].mxu0 %vm294_vm1, %v2039_v14  ;;  %v276_v56 = vld [vmem:[%s7353_s24 + $0xce] sm:$0xff]  ;;  %v277_v58 = vld [vmem:[%s7353_s24 + $0xd6] sm:$0xff]  ;;  %v7586_v59 = vld [vmem:[%s7353_s24 + $0x41] sm:$0xff] }
  0x23   : > { %5552 = vmatprep.mubr.msk.f32.mxu1 %vm7299_vm0, %v7298_v2  ;;  %6052 = vmatprep.mubr.msk.f32.mxu0 %vm7299_vm0, %v7298_v2  ;;  %v278_v60 = vld [vmem:[%s7353_s24 + $0xde] sm:$0xff]  ;;  %v7597_v61 = vld [vmem:[%s7353_s24 + $0x49] sm:$0xff]  ;;  %v7608_v63 = vld [vmem:[%s7353_s24 + $0x51] sm:$0xff] }
  0x24   : > { %v279_v62 = vld [vmem:[%s7353_s24 + $0xe6] sm:$0xff]  ;;  %v280_v0 = vld [vmem:[%s7353_s24 + $0xee] sm:$0xff]  ;;  %v7619_v1 = vld [vmem:[%s7353_s24 + $0x59] sm:$0xff] }
  0x25   : > { %v281_v3 = vld [vmem:[%s7353_s24 + $0xf6] sm:$0xff]  ;;  %v7630_v4 = vld [vmem:[%s7353_s24 + $0x61] sm:$0xff]  ;;  %v7641_v6 = vld [vmem:[%s7353_s24 + $0x69] sm:$0xff] }
  0x26   : > { %5553 = vmatmul.mubr.msk.f32.gmra.mrb[10].mxu1 %vm294_vm1, %v256_v15  ;;  %6053 = vmatmul.mubr.msk.f32.gmra.mrb[10].mxu0 %vm294_vm1, %v2040_v16  ;;  %v282_v5 = vld [vmem:[%s7353_s24 + $0xfe] sm:$0xff]  ;;  %v283_v7 = vld [vmem:[%s7353_s24 + $0x106] sm:$0xff]  ;;  %v7652_v8 = vld [vmem:[%s7353_s24 + $0x71] sm:$0xff] }
  0x27   : > { %5555 = vmatprep.mubr.msk.f32.mxu1 %vm7299_vm0, %v7298_v2  ;;  %6055 = vmatprep.mubr.msk.f32.mxu0 %vm7299_vm0, %v7298_v2  ;;  %v284_v9 = vld [vmem:[%s7353_s24 + $0x10e] sm:$0xff]  ;;  %v7663_v10 = vld [vmem:[%s7353_s24 + $0x79] sm:$0xff]  ;;  %v7674_v12 = vld [vmem:[%s7353_s24 + $0x81] sm:$0xff] }
  0x28   : > { %v285_v11 = vld [vmem:[%s7353_s24 + $0x116] sm:$0xff]  ;;  %v286_v13 = vld [vmem:[%s7353_s24 + $0x11e] sm:$0xff]  ;;  %v7685_v14 = vld [vmem:[%s7353_s24 + $0x89] sm:$0xff] }
  0x29   : > { %v287_v15 = vld [vmem:[%s7353_s24 + $0x126] sm:$0xff]  ;;  %v7696_v16 = vld [vmem:[%s7353_s24 + $0x91] sm:$0xff] }
  0x2a   : > { %5556 = vmatmul.mubr.msk.f32.gmra.mrb[12].mxu1 %vm294_vm1, %v257_v17  ;;  %6056 = vmatmul.mubr.msk.f32.gmra.mrb[12].mxu0 %vm294_vm1, %v2041_v18  ;;  %v288_v17 = vld [vmem:[%s7353_s24 + $0x12e] sm:$0xff]  ;;  %v7707_v18 = vld [vmem:[%s7353_s24 + $0x99] sm:$0xff] }
  0x2b   : > { %5558 = vmatprep.mubr.msk.f32.mxu1 %vm7299_vm0, %v7298_v2  ;;  %6058 = vmatprep.mubr.msk.f32.mxu0 %vm7299_vm0, %v7298_v2 }
  0x2e   : > { %5559 = vmatmul.mubr.msk.f32.gmra.mrb[14].mxu1 %vm294_vm1, %v258_v19  ;;  %6059 = vmatmul.mubr.msk.f32.gmra.mrb[14].mxu0 %vm294_vm1, %v2042_v20  ;;  %v289_v19 = vld [vmem:[%s7353_s24 + $0x136] sm:$0xff]  ;;  %v7718_v20 = vld [vmem:[%s7353_s24 + $0xa1] sm:$0xff] }
  0x2f   : > { %5561 = vmatprep.mubr.msk.f32.mxu1 %vm7299_vm0, %v7298_v2  ;;  %6061 = vmatprep.mubr.msk.f32.mxu0 %vm7299_vm0, %v7298_v2 }
  0x32   : > { %5562 = vmatmul.mubr.msk.f32.gmra.mrb[16].mxu1 %vm294_vm1, %v259_v21  ;;  %6062 = vmatmul.mubr.msk.f32.gmra.mrb[16].mxu0 %vm294_vm1, %v2043_v22  ;;  %v290_v21 = vld [vmem:[%s7353_s24 + $0x13e] sm:$0xff]  ;;  %v7729_v22 = vld [vmem:[%s7353_s24 + $0xa9] sm:$0xff] }
  0x33   : > { %5564 = vmatprep.mubr.msk.f32.mxu1 %vm7299_vm0, %v7298_v2  ;;  %6064 = vmatprep.mubr.msk.f32.mxu0 %vm7299_vm0, %v7298_v2 }
  0x36   : > { %5565 = vmatmul.mubr.msk.f32.gmra.mrb[18].mxu1 %vm294_vm1, %v260_v23  ;;  %6065 = vmatmul.mubr.msk.f32.gmra.mrb[18].mxu0 %vm294_vm1, %v2044_v24  ;;  %v291_v23 = vld [vmem:[%s7353_s24 + $0x146] sm:$0xff]  ;;  %v7740_v24 = vld [vmem:[%s7353_s24 + $0xb1] sm:$0xff] }
  0x37   : > { %5567 = vmatprep.mubr.msk.f32.mxu1 %vm7299_vm0, %v7298_v2  ;;  %6067 = vmatprep.mubr.msk.f32.mxu0 %vm7299_vm0, %v7298_v2 }
  0x3a   : > { %5568 = vmatmul.mubr.msk.f32.gmra.mrb[20].mxu1 %vm294_vm1, %v261_v25  ;;  %6068 = vmatmul.mubr.msk.f32.gmra.mrb[20].mxu0 %vm294_vm1, %v2045_v26  ;;  %v209_v25 = vld [vmem:[%s7353_s24 + $0x5] sm:$0xff]  ;;  %v7751_v26 = vld [vmem:[%s7353_s24 + $0xb9] sm:$0xff] }
  0x3b   : > { %5570 = vmatprep.mubr.msk.f32.mxu1 %vm7299_vm0, %v7298_v2  ;;  %6070 = vmatprep.mubr.msk.f32.mxu0 %vm7299_vm0, %v7298_v2 }
  0x3e   : > { %5571 = vmatmul.mubr.msk.f32.gmra.mrb[22].mxu1 %vm294_vm1, %v262_v27  ;;  %6071 = vmatmul.mubr.msk.f32.gmra.mrb[22].mxu0 %vm294_vm1, %v2046_v28  ;;  %v4861_v27 = vld [vmem:[%s9332_s1 + $0x10] sm:$0xff] }
  0x3f   : > { %5573 = vmatprep.mubr.msk.f32.mxu1 %vm7299_vm0, %v7298_v2  ;;  %6073 = vmatprep.mubr.msk.f32.mxu0 %vm7299_vm0, %v7298_v2  ;;  %v210_v28 = vld [vmem:[%s7353_s24 + $0xd] sm:$0xff] }
  0x42   : > { %5574 = vmatmul.mubr.msk.f32.gmra.mrb[24].mxu1 %vm294_vm1, %v263_v29  ;;  %6074 = vmatmul.mubr.msk.f32.gmra.mrb[24].mxu0 %vm294_vm1, %v2047_v30  ;;  %v7765_v29 = vld [vmem:[%s7353_s24 + $0xc1] sm:$0xff]  ;;  %v211_v30 = vld [vmem:[%s7353_s24 + $0x15] sm:$0xff] }
  0x43   : > { %5576 = vmatprep.mubr.msk.f32.mxu1 %vm7299_vm0, %v7298_v2  ;;  %6076 = vmatprep.mubr.msk.f32.mxu0 %vm7299_vm0, %v7298_v2 }
  0x46   : > { %5577 = vmatmul.mubr.msk.f32.gmra.mrb[26].mxu1 %vm294_vm1, %v264_v31  ;;  %6077 = vmatmul.mubr.msk.f32.gmra.mrb[26].mxu0 %vm294_vm1, %v2048_v32  ;;  %v7777_v31 = vld [vmem:[%s7353_s24 + $0xc9] sm:$0xff]  ;;  %v212_v32 = vld [vmem:[%s7353_s24 + $0x1d] sm:$0xff] }
  0x47   : > { %5579 = vmatprep.mubr.msk.f32.mxu1 %vm7299_vm0, %v7298_v2  ;;  %6079 = vmatprep.mubr.msk.f32.mxu0 %vm7299_vm0, %v7298_v2 }
  0x4a   : > { %5580 = vmatmul.mubr.msk.f32.gmra.mrb[28].mxu1 %vm294_vm1, %v265_v33  ;;  %6080 = vmatmul.mubr.msk.f32.gmra.mrb[28].mxu0 %vm294_vm1, %v2049_v34  ;;  %v7788_v33 = vld [vmem:[%s7353_s24 + $0xd1] sm:$0xff]  ;;  %v213_v34 = vld [vmem:[%s7353_s24 + $0x25] sm:$0xff] }
  0x4b   : > { %5582 = vmatprep.mubr.msk.f32.mxu1 %vm7299_vm0, %v7298_v2  ;;  %6082 = vmatprep.mubr.msk.f32.mxu0 %vm7299_vm0, %v7298_v2 }
  0x4e   : > { %5583 = vmatmul.mubr.msk.f32.gmra.mrb[30].mxu1 %vm294_vm1, %v266_v35  ;;  %6083 = vmatmul.mubr.msk.f32.gmra.mrb[30].mxu0 %vm294_vm1, %v2050_v36  ;;  %v7799_v35 = vld [vmem:[%s7353_s24 + $0xd9] sm:$0xff]  ;;  %v214_v36 = vld [vmem:[%s7353_s24 + $0x2d] sm:$0xff] }
  0x4f   : > { %5585 = vmatprep.mubr.msk.f32.mxu1 %vm7299_vm0, %v7298_v2  ;;  %6085 = vmatprep.mubr.msk.f32.mxu0 %vm7299_vm0, %v7298_v2 }
  0x52   : > { %5586 = vmatmul.mubr.msk.f32.gmra.mrb[32].mxu1 %vm294_vm1, %v267_v37  ;;  %6086 = vmatmul.mubr.msk.f32.gmra.mrb[32].mxu0 %vm294_vm1, %v2051_v38  ;;  %v7810_v37 = vld [vmem:[%s7353_s24 + $0xe1] sm:$0xff]  ;;  %v215_v38 = vld [vmem:[%s7353_s24 + $0x35] sm:$0xff] }
  0x53   : > { %5588 = vmatprep.mubr.msk.f32.mxu1 %vm7299_vm0, %v7298_v2  ;;  %6088 = vmatprep.mubr.msk.f32.mxu0 %vm7299_vm0, %v7298_v2 }
  0x56   : > { %5589 = vmatmul.mubr.msk.f32.gmra.mrb[34].mxu1 %vm294_vm1, %v268_v39  ;;  %6089 = vmatmul.mubr.msk.f32.gmra.mrb[34].mxu0 %vm294_vm1, %v2052_v40  ;;  %v7821_v39 = vld [vmem:[%s7353_s24 + $0xe9] sm:$0xff]  ;;  %v216_v40 = vld [vmem:[%s7353_s24 + $0x3d] sm:$0xff] }
  0x57   : > { %5591 = vmatprep.mubr.msk.f32.mxu1 %vm7299_vm0, %v7298_v2  ;;  %6091 = vmatprep.mubr.msk.f32.mxu0 %vm7299_vm0, %v7298_v2 }
  0x5a   : > { %5592 = vmatmul.mubr.msk.f32.gmra.mrb[36].mxu1 %vm294_vm1, %v269_v41  ;;  %6092 = vmatmul.mubr.msk.f32.gmra.mrb[36].mxu0 %vm294_vm1, %v2053_v42  ;;  %v7832_v41 = vld [vmem:[%s7353_s24 + $0xf1] sm:$0xff]  ;;  %v217_v42 = vld [vmem:[%s7353_s24 + $0x45] sm:$0xff] }
  0x5b   : > { %5594 = vmatprep.mubr.msk.f32.mxu1 %vm7299_vm0, %v7298_v2  ;;  %6094 = vmatprep.mubr.msk.f32.mxu0 %vm7299_vm0, %v7298_v2 }
  0x5e   : > { %5595 = vmatmul.mubr.msk.f32.gmra.mrb[38].mxu1 %vm294_vm1, %v270_v43  ;;  %6095 = vmatmul.mubr.msk.f32.gmra.mrb[38].mxu0 %vm294_vm1, %v2054_v44  ;;  %v7843_v43 = vld [vmem:[%s7353_s24 + $0xf9] sm:$0xff]  ;;  %v218_v44 = vld [vmem:[%s7353_s24 + $0x4d] sm:$0xff] }
  0x5f   : > { %5597 = vmatprep.mubr.msk.f32.mxu1 %vm7299_vm0, %v7298_v2  ;;  %6097 = vmatprep.mubr.msk.f32.mxu0 %vm7299_vm0, %v7298_v2 }
  0x62   : > { %5598 = vmatmul.mubr.msk.f32.gmra.mrb[40].mxu1 %vm294_vm1, %v271_v45  ;;  %6098 = vmatmul.mubr.msk.f32.gmra.mrb[40].mxu0 %vm294_vm1, %v2055_v46  ;;  %v7854_v45 = vld [vmem:[%s7353_s24 + $0x101] sm:$0xff]  ;;  %v219_v46 = vld [vmem:[%s7353_s24 + $0x55] sm:$0xff] }
  0x63   : > { %5600 = vmatprep.mubr.msk.f32.mxu1 %vm7299_vm0, %v7298_v2  ;;  %6162 = vmatprep.mubr.msk.f32.mxu0 %vm7299_vm0, %v7298_v2 }
  0x66   : > { %5601 = vmatmul.mubr.msk.f32.gmra.mrb[42].mxu1 %vm294_vm1, %v272_v47  ;;  %6163 = vmatmul.mubr.msk.f32.vlgmr.msra.gmra.mrb[0].mxu0 %vm294_vm1, %v2512_v48  ;;  %v7865_v47 = vld [vmem:[%s7353_s24 + $0x109] sm:$0xff]  ;;  %v220_v48 = vld [vmem:[%s7353_s24 + $0x5d] sm:$0xff] }
  0x67   : > { %6286 = vmatpush3.msra.mxu0 %v5029_v49  ;;  %5603 = vmatprep.mubr.msk.f32.mxu1 %vm7299_vm0, %v7298_v2  ;;  %v7876_v49 = vld [vmem:[%s7353_s24 + $0x111] sm:$0xff] }
  0x68   : > { %6165 = vmatprep.mubr.msk.f32.mxu0 %vm7299_vm0, %v7298_v2  ;;  %6410 = vmatprep.subr.mxu0 %v7298_v2 }
  0x6a   : > { %5604 = vmatmul.mubr.msk.f32.gmra.mrb[44].mxu1 %vm294_vm1, %v273_v50  ;;  %6166 = vmatmul.mubr.msk.f32.gmra.mrb[2].mxu0 %vm294_vm1, %v2513_v51  ;;  %v221_v50 = vld [vmem:[%s7353_s24 + $0x65] sm:$0xff]  ;;  %v7887_v51 = vld [vmem:[%s7353_s24 + $0x119] sm:$0xff] }
  0x6b   : > { %5606 = vmatprep.mubr.msk.f32.mxu1 %vm7299_vm0, %v7298_v2  ;;  %6168 = vmatprep.mubr.msk.f32.mxu0 %vm7299_vm0, %v7298_v2 }
  0x6e   : > { %5607 = vmatmul.mubr.msk.f32.gmra.mrb[46].mxu1 %vm294_vm1, %v274_v52  ;;  %6169 = vmatmul.mubr.msk.f32.gmra.mrb[4].mxu0 %vm294_vm1, %v7553_v53  ;;  %v222_v52 = vld [vmem:[%s7353_s24 + $0x6d] sm:$0xff] }
  0x6f   : > { %5609 = vmatprep.mubr.msk.f32.mxu1 %vm7299_vm0, %v7298_v2  ;;  %6171 = vmatprep.mubr.msk.f32.mxu0 %vm7299_vm0, %v7298_v2 }
  0x72   : > { %5610 = vmatmul.mubr.msk.f32.gmra.mrb[48].mxu1 %vm294_vm1, %v275_v54  ;;  %6172 = vmatmul.mubr.msk.f32.gmra.mrb[6].mxu0 %vm294_vm1, %v7564_v55  ;;  %v7898_v54 = vld [vmem:[%s7353_s24 + $0x121] sm:$0xff] }
  0x73   : > { %5612 = vmatprep.mubr.msk.f32.mxu1 %vm7299_vm0, %v7298_v2  ;;  %6174 = vmatprep.mubr.msk.f32.mxu0 %vm7299_vm0, %v7298_v2 }
  0x76   : > { %5613 = vmatmul.mubr.msk.f32.gmra.mrb[50].mxu1 %vm294_vm1, %v276_v56  ;;  %6175 = vmatmul.mubr.msk.f32.gmra.mrb[8].mxu0 %vm294_vm1, %v7575_v57  ;;  %v223_v56 = vld [vmem:[%s7353_s24 + $0x75] sm:$0xff] }
  0x77   : > { %5615 = vmatprep.mubr.msk.f32.mxu1 %vm7299_vm0, %v7298_v2  ;;  %6177 = vmatprep.mubr.msk.f32.mxu0 %vm7299_vm0, %v7298_v2 }
  0x7a   : > { %5616 = vmatmul.mubr.msk.f32.gmra.mrb[52].mxu1 %vm294_vm1, %v277_v58  ;;  %6178 = vmatmul.mubr.msk.f32.gmra.mrb[10].mxu0 %vm294_vm1, %v7586_v59  ;;  %v7909_v58 = vld [vmem:[%s7353_s24 + $0x129] sm:$0xff] }
  0x7b   : > { %5618 = vmatprep.mubr.msk.f32.mxu1 %vm7299_vm0, %v7298_v2  ;;  %6180 = vmatprep.mubr.msk.f32.mxu0 %vm7299_vm0, %v7298_v2 }
  0x7e   : > { %5619 = vmatmul.mubr.msk.f32.gmra.mrb[54].mxu1 %vm294_vm1, %v278_v60  ;;  %6181 = vmatmul.mubr.msk.f32.gmra.mrb[12].mxu0 %vm294_vm1, %v7597_v61  ;;  %v224_v60 = vld [vmem:[%s7353_s24 + $0x7d] sm:$0xff] }
  0x7f   : > { %5621 = vmatprep.mubr.msk.f32.mxu1 %vm7299_vm0, %v7298_v2  ;;  %6183 = vmatprep.mubr.msk.f32.mxu0 %vm7299_vm0, %v7298_v2 }
  0x82   : > { %5622 = vmatmul.mubr.msk.f32.gmra.mrb[56].mxu1 %vm294_vm1, %v279_v62  ;;  %6184 = vmatmul.mubr.msk.f32.gmra.mrb[14].mxu0 %vm294_vm1, %v7608_v63  ;;  %v7920_v62 = vld [vmem:[%s7353_s24 + $0x131] sm:$0xff] }
  0x83   : > { %5624 = vmatprep.mubr.msk.f32.mxu1 %vm7299_vm0, %v7298_v2  ;;  %6186 = vmatprep.mubr.msk.f32.mxu0 %vm7299_vm0, %v7298_v2 }
  0x86   : > { %5625 = vmatmul.mubr.msk.f32.gmra.mrb[58].mxu1 %vm294_vm1, %v280_v0  ;;  %6187 = vmatmul.mubr.msk.f32.gmra.mrb[16].mxu0 %vm294_vm1, %v7619_v1  ;;  %v225_v0 = vld [vmem:[%s7353_s24 + $0x85] sm:$0xff] }
  0x87   : > { %5627 = vmatprep.mubr.msk.f32.mxu1 %vm7299_vm0, %v7298_v2  ;;  %6189 = vmatprep.mubr.msk.f32.mxu0 %vm7299_vm0, %v7298_v2 }
  0x8a   : > { %5628 = vmatmul.mubr.msk.f32.gmra.mrb[60].mxu1 %vm294_vm1, %v281_v3  ;;  %6190 = vmatmul.mubr.msk.f32.gmra.mrb[18].mxu0 %vm294_vm1, %v7630_v4  ;;  %v7931_v3 = vld [vmem:[%s7353_s24 + $0x139] sm:$0xff] }
  0x8b   : > { %5630 = vmatprep.mubr.msk.f32.mxu1 %vm7299_vm0, %v7298_v2  ;;  %6192 = vmatprep.mubr.msk.f32.mxu0 %vm7299_vm0, %v7298_v2 }
  0x8e   : > { %5631 = vmatmul.mubr.msk.f32.gmra.mrb[62].mxu1 %vm294_vm1, %v282_v5  ;;  %6193 = vmatmul.mubr.msk.f32.gmra.mrb[20].mxu0 %vm294_vm1, %v7641_v6  ;;  %v226_v5 = vld [vmem:[%s7353_s24 + $0x8d] sm:$0xff] }
  0x8f   : > { %5633 = vmatprep.mubr.msk.f32.mxu1 %vm7299_vm0, %v7298_v2  ;;  %6195 = vmatprep.mubr.msk.f32.mxu0 %vm7299_vm0, %v7298_v2 }
  0x92   : > { %5634 = vmatmul.mubr.msk.f32.gmra.mrb[64].mxu1 %vm294_vm1, %v283_v7  ;;  %6196 = vmatmul.mubr.msk.f32.gmra.mrb[22].mxu0 %vm294_vm1, %v7652_v8  ;;  %v7942_v7 = vld [vmem:[%s7353_s24 + $0x141] sm:$0xff] }
  0x93   : > { %5636 = vmatprep.mubr.msk.f32.mxu1 %vm7299_vm0, %v7298_v2  ;;  %6198 = vmatprep.mubr.msk.f32.mxu0 %vm7299_vm0, %v7298_v2 }
  0x96   : > { %5637 = vmatmul.mubr.msk.f32.gmra.mrb[66].mxu1 %vm294_vm1, %v284_v9  ;;  %6199 = vmatmul.mubr.msk.f32.gmra.mrb[24].mxu0 %vm294_vm1, %v7663_v10  ;;  %v227_v9 = vld [vmem:[%s7353_s24 + $0x95] sm:$0xff] }
  0x97   : > { %5639 = vmatprep.mubr.msk.f32.mxu1 %vm7299_vm0, %v7298_v2  ;;  %6201 = vmatprep.mubr.msk.f32.mxu0 %vm7299_vm0, %v7298_v2 }
  0x9a   : > { %5640 = vmatmul.mubr.msk.f32.gmra.mrb[68].mxu1 %vm294_vm1, %v285_v11  ;;  %6202 = vmatmul.mubr.msk.f32.gmra.mrb[26].mxu0 %vm294_vm1, %v7674_v12  ;;  %v7953_v11 = vld [vmem:[%s7353_s24 + $0x149] sm:$0xff] }
  0x9b   : > { %5642 = vmatprep.mubr.msk.f32.mxu1 %vm7299_vm0, %v7298_v2  ;;  %6204 = vmatprep.mubr.msk.f32.mxu0 %vm7299_vm0, %v7298_v2 }
  0x9e   : > { %5643 = vmatmul.mubr.msk.f32.gmra.mrb[70].mxu1 %vm294_vm1, %v286_v13  ;;  %6205 = vmatmul.mubr.msk.f32.gmra.mrb[28].mxu0 %vm294_vm1, %v7685_v14  ;;  %v228_v13 = vld [vmem:[%s7353_s24 + $0x9d] sm:$0xff] }
  0x9f   : > { %5645 = vmatprep.mubr.msk.f32.mxu1 %vm7299_vm0, %v7298_v2  ;;  %6207 = vmatprep.mubr.msk.f32.mxu0 %vm7299_vm0, %v7298_v2 }
  0xa2   : > { %5646 = vmatmul.mubr.msk.f32.gmra.mrb[72].mxu1 %vm294_vm1, %v287_v15  ;;  %6208 = vmatmul.mubr.msk.f32.gmra.mrb[30].mxu0 %vm294_vm1, %v7696_v16  ;;  %v7964_v15 = vld [vmem:[%s7353_s24 + $0x151] sm:$0xff] }
  0xa3   : > { %5648 = vmatprep.mubr.msk.f32.mxu1 %vm7299_vm0, %v7298_v2  ;;  %6210 = vmatprep.mubr.msk.f32.mxu0 %vm7299_vm0, %v7298_v2 }
  0xa6   : > { %5649 = vmatmul.mubr.msk.f32.gmra.mrb[74].mxu1 %vm294_vm1, %v288_v17  ;;  %6211 = vmatmul.mubr.msk.f32.gmra.mrb[32].mxu0 %vm294_vm1, %v7707_v18  ;;  %v229_v17 = vld [vmem:[%s7353_s24 + $0xa5] sm:$0xff] }
  0xa7   : > { %5651 = vmatprep.mubr.msk.f32.mxu1 %vm7299_vm0, %v7298_v2  ;;  %6213 = vmatprep.mubr.msk.f32.mxu0 %vm7299_vm0, %v7298_v2 }
  0xaa   : > { %5652 = vmatmul.mubr.msk.f32.gmra.mrb[76].mxu1 %vm294_vm1, %v289_v19  ;;  %6214 = vmatmul.mubr.msk.f32.gmra.mrb[34].mxu0 %vm294_vm1, %v7718_v20  ;;  %v7975_v19 = vld [vmem:[%s7353_s24 + $0x159] sm:$0xff] }
  0xab   : > { %5654 = vmatprep.mubr.msk.f32.mxu1 %vm7299_vm0, %v7298_v2  ;;  %6216 = vmatprep.mubr.msk.f32.mxu0 %vm7299_vm0, %v7298_v2 }
  0xae   : > { %5655 = vmatmul.mubr.msk.f32.gmra.mrb[78].mxu1 %vm294_vm1, %v290_v21  ;;  %6217 = vmatmul.mubr.msk.f32.gmra.mrb[36].mxu0 %vm294_vm1, %v7729_v22  ;;  %v230_v21 = vld [vmem:[%s7353_s24 + $0xad] sm:$0xff] }
  0xaf   : > { %5657 = vmatprep.mubr.msk.f32.mxu1 %vm7299_vm0, %v7298_v2  ;;  %6219 = vmatprep.mubr.msk.f32.mxu0 %vm7299_vm0, %v7298_v2 }
  0xb2   : > { %5658 = vmatmul.mubr.msk.f32.gmra.mrb[80].mxu1 %vm294_vm1, %v291_v23  ;;  %6220 = vmatmul.mubr.msk.f32.gmra.mrb[38].mxu0 %vm294_vm1, %v7740_v24  ;;  %v5071_v23 = vld [vmem:[%s9332_s1 + $0x38] sm:$0xff] }
  0xb3   : > { %5662 = vmatprep.mubr.msk.f32.mxu1 %vm7299_vm0, %v7298_v2  ;;  %6222 = vmatprep.mubr.msk.f32.mxu0 %vm7299_vm0, %v7298_v2 }
  0xb6   : > { %5663 = vmatmul.mubr.msk.f32.vlgmr.msra.gmra.mrb[0].mxu1 %vm294_vm1, %v209_v25  ;;  %6223 = vmatmul.mubr.msk.f32.gmra.mrb[40].mxu0 %vm294_vm1, %v7751_v26  ;;  %v231_v25 = vld [vmem:[%s7353_s24 + $0xb5] sm:$0xff] }
  0xb7   : > { %5665 = vmatprep.mubr.msk.f32.mxu1 %vm7299_vm0, %v7298_v2  ;;  %6225 = vmatprep.mubr.msk.f32.mxu0 %vm7299_vm0, %v7298_v2 }
  0xb8   : > { %5786 = vmatpush3.msra.mxu1 %v4861_v27  ;;  %v4903_v27 = vld [vmem:[%s9332_s1 + $0x18] sm:$0xff] }
  0xb9   : > { %5910 = vmatprep.subr.mxu1 %v7298_v2 }
  0xba   : > { %5666 = vmatmul.mubr.msk.f32.gmra.mrb[2].mxu1 %vm294_vm1, %v210_v28  ;;  %6226 = vmatmul.mubr.msk.f32.gmra.mrb[42].mxu0 %vm294_vm1, %v7765_v29  ;;  %v1082_v28 = vld [vmem:[%s7353_s24 + $0xf] sm:$0xff] }
  0xbb   : > { %5668 = vmatprep.mubr.msk.f32.mxu1 %vm7299_vm0, %v7298_v2  ;;  %6228 = vmatprep.mubr.msk.f32.mxu0 %vm7299_vm0, %v7298_v2 }
  0xbe   : > { %5669 = vmatmul.mubr.msk.f32.gmra.mrb[4].mxu1 %vm294_vm1, %v211_v30  ;;  %6229 = vmatmul.mubr.msk.f32.gmra.mrb[44].mxu0 %vm294_vm1, %v7777_v31  ;;  %v8180_v30 = vld [vmem:[%s7353_s24 + $0x1f] sm:$0xff] }
  0xbf   : > { %5671 = vmatprep.mubr.msk.f32.mxu1 %vm7299_vm0, %v7298_v2  ;;  %6231 = vmatprep.mubr.msk.f32.mxu0 %vm7299_vm0, %v7298_v2 }
  0xc2   : > { %5672 = vmatmul.mubr.msk.f32.gmra.mrb[6].mxu1 %vm294_vm1, %v212_v32  ;;  %6232 = vmatmul.mubr.msk.f32.gmra.mrb[46].mxu0 %vm294_vm1, %v7788_v33  ;;  %v8202_v32 = vld [vmem:[%s7353_s24 + $0x2f] sm:$0xff] }
  0xc3   : > { %5674 = vmatprep.mubr.msk.f32.mxu1 %vm7299_vm0, %v7298_v2  ;;  %6234 = vmatprep.mubr.msk.f32.mxu0 %vm7299_vm0, %v7298_v2 }
  0xc6   : > { %5675 = vmatmul.mubr.msk.f32.gmra.mrb[8].mxu1 %vm294_vm1, %v213_v34  ;;  %6235 = vmatmul.mubr.msk.f32.gmra.mrb[48].mxu0 %vm294_vm1, %v7799_v35  ;;  %v8224_v34 = vld [vmem:[%s7353_s24 + $0x3f] sm:$0xff] }
  0xc7   : > { %5677 = vmatprep.mubr.msk.f32.mxu1 %vm7299_vm0, %v7298_v2  ;;  %6237 = vmatprep.mubr.msk.f32.mxu0 %vm7299_vm0, %v7298_v2 }
  0xca   : > { %5678 = vmatmul.mubr.msk.f32.gmra.mrb[10].mxu1 %vm294_vm1, %v214_v36  ;;  %6238 = vmatmul.mubr.msk.f32.gmra.mrb[50].mxu0 %vm294_vm1, %v7810_v37  ;;  %v8246_v36 = vld [vmem:[%s7353_s24 + $0x4f] sm:$0xff] }
  0xcb   : > { %5680 = vmatprep.mubr.msk.f32.mxu1 %vm7299_vm0, %v7298_v2  ;;  %6240 = vmatprep.mubr.msk.f32.mxu0 %vm7299_vm0, %v7298_v2 }
  0xce   : > { %5681 = vmatmul.mubr.msk.f32.gmra.mrb[12].mxu1 %vm294_vm1, %v215_v38  ;;  %6241 = vmatmul.mubr.msk.f32.gmra.mrb[52].mxu0 %vm294_vm1, %v7821_v39  ;;  %v8268_v38 = vld [vmem:[%s7353_s24 + $0x5f] sm:$0xff] }
  0xcf   : > { %5683 = vmatprep.mubr.msk.f32.mxu1 %vm7299_vm0, %v7298_v2  ;;  %6243 = vmatprep.mubr.msk.f32.mxu0 %vm7299_vm0, %v7298_v2 }
  0xd2   : > { %5684 = vmatmul.mubr.msk.f32.gmra.mrb[14].mxu1 %vm294_vm1, %v216_v40  ;;  %6244 = vmatmul.mubr.msk.f32.gmra.mrb[54].mxu0 %vm294_vm1, %v7832_v41  ;;  %v8290_v40 = vld [vmem:[%s7353_s24 + $0x6f] sm:$0xff] }
  0xd3   : > { %5686 = vmatprep.mubr.msk.f32.mxu1 %vm7299_vm0, %v7298_v2  ;;  %6246 = vmatprep.mubr.msk.f32.mxu0 %vm7299_vm0, %v7298_v2 }
  0xd6   : > { %5687 = vmatmul.mubr.msk.f32.gmra.mrb[16].mxu1 %vm294_vm1, %v217_v42  ;;  %6247 = vmatmul.mubr.msk.f32.gmra.mrb[56].mxu0 %vm294_vm1, %v7843_v43  ;;  %v8312_v42 = vld [vmem:[%s7353_s24 + $0x7f] sm:$0xff] }
  0xd7   : > { %5689 = vmatprep.mubr.msk.f32.mxu1 %vm7299_vm0, %v7298_v2  ;;  %6249 = vmatprep.mubr.msk.f32.mxu0 %vm7299_vm0, %v7298_v2 }
  0xda   : > { %5690 = vmatmul.mubr.msk.f32.gmra.mrb[18].mxu1 %vm294_vm1, %v218_v44  ;;  %6250 = vmatmul.mubr.msk.f32.gmra.mrb[58].mxu0 %vm294_vm1, %v7854_v45  ;;  %v8334_v44 = vld [vmem:[%s7353_s24 + $0x8f] sm:$0xff] }
  0xdb   : > { %5692 = vmatprep.mubr.msk.f32.mxu1 %vm7299_vm0, %v7298_v2  ;;  %6252 = vmatprep.mubr.msk.f32.mxu0 %vm7299_vm0, %v7298_v2 }
  0xde   : > { %5693 = vmatmul.mubr.msk.f32.gmra.mrb[20].mxu1 %vm294_vm1, %v219_v46  ;;  %6253 = vmatmul.mubr.msk.f32.gmra.mrb[60].mxu0 %vm294_vm1, %v7865_v47  ;;  %v8356_v46 = vld [vmem:[%s7353_s24 + $0x9f] sm:$0xff] }
  0xdf   : > { %5695 = vmatprep.mubr.msk.f32.mxu1 %vm7299_vm0, %v7298_v2  ;;  %6255 = vmatprep.mubr.msk.f32.mxu0 %vm7299_vm0, %v7298_v2 }
  0xe2   : > { %5696 = vmatmul.mubr.msk.f32.gmra.mrb[22].mxu1 %vm294_vm1, %v220_v48  ;;  %6256 = vmatmul.mubr.msk.f32.gmra.mrb[62].mxu0 %vm294_vm1, %v7876_v49  ;;  %v8367_v48 = vld [vmem:[%s7353_s24 + $0xa7] sm:$0xff] }
  0xe3   : > { %5698 = vmatprep.mubr.msk.f32.mxu1 %vm7299_vm0, %v7298_v2  ;;  %6258 = vmatprep.mubr.msk.f32.mxu0 %vm7299_vm0, %v7298_v2 }
  0xe6   : > { %5699 = vmatmul.mubr.msk.f32.gmra.mrb[24].mxu1 %vm294_vm1, %v221_v50  ;;  %6259 = vmatmul.mubr.msk.f32.gmra.mrb[64].mxu0 %vm294_vm1, %v7887_v51  ;;  %v8378_v50 = vld [vmem:[%s7353_s24 + $0xaf] sm:$0xff] }
  0xe7   : > { %5701 = vmatprep.mubr.msk.f32.mxu1 %vm7299_vm0, %v7298_v2  ;;  %6261 = vmatprep.mubr.msk.f32.mxu0 %vm7299_vm0, %v7298_v2 }
  0xea   : > { %5702 = vmatmul.mubr.msk.f32.gmra.mrb[26].mxu1 %vm294_vm1, %v222_v52  ;;  %6262 = vmatmul.mubr.msk.f32.gmra.mrb[66].mxu0 %vm294_vm1, %v7898_v54  ;;  %v5113_v52 = vld [vmem:[%s9332_s1 + $0x40] sm:$0xff] }
  0xeb   : > { %5704 = vmatprep.mubr.msk.f32.mxu1 %vm7299_vm0, %v7298_v2  ;;  %6264 = vmatprep.mubr.msk.f32.mxu0 %vm7299_vm0, %v7298_v2 }
  0xee   : > { %5705 = vmatmul.mubr.msk.f32.gmra.mrb[28].mxu1 %vm294_vm1, %v223_v56  ;;  %6265 = vmatmul.mubr.msk.f32.gmra.mrb[68].mxu0 %vm294_vm1, %v7909_v58  ;;  %v3467_v56 = vld [vmem:[%s7353_s24 + $0x32] sm:$0xff] }
  0xef   : > { %5707 = vmatprep.mubr.msk.f32.mxu1 %vm7299_vm0, %v7298_v2  ;;  %6267 = vmatprep.mubr.msk.f32.mxu0 %vm7299_vm0, %v7298_v2 }
  0xf2   : > { %5708 = vmatmul.mubr.msk.f32.gmra.mrb[30].mxu1 %vm294_vm1, %v224_v60  ;;  %6268 = vmatmul.mubr.msk.f32.gmra.mrb[70].mxu0 %vm294_vm1, %v7920_v62  ;;  %v3468_v60 = vld [vmem:[%s7353_s24 + $0x3a] sm:$0xff] }
  0xf3   : > { %5710 = vmatprep.mubr.msk.f32.mxu1 %vm7299_vm0, %v7298_v2  ;;  %6270 = vmatprep.mubr.msk.f32.mxu0 %vm7299_vm0, %v7298_v2 }
  0xf6   : > { %5711 = vmatmul.mubr.msk.f32.gmra.mrb[32].mxu1 %vm294_vm1, %v225_v0  ;;  %6271 = vmatmul.mubr.msk.f32.gmra.mrb[72].mxu0 %vm294_vm1, %v7931_v3  ;;  %v3469_v0 = vld [vmem:[%s7353_s24 + $0x42] sm:$0xff] }
  0xf7   : > { %5713 = vmatprep.mubr.msk.f32.mxu1 %vm7299_vm0, %v7298_v2  ;;  %6273 = vmatprep.mubr.msk.f32.mxu0 %vm7299_vm0, %v7298_v2 }
  0xfa   : > { %5714 = vmatmul.mubr.msk.f32.gmra.mrb[34].mxu1 %vm294_vm1, %v226_v5  ;;  %6274 = vmatmul.mubr.msk.f32.gmra.mrb[74].mxu0 %vm294_vm1, %v7942_v7  ;;  %v3470_v5 = vld [vmem:[%s7353_s24 + $0x4a] sm:$0xff] }
  0xfb   : > { %5716 = vmatprep.mubr.msk.f32.mxu1 %vm7299_vm0, %v7298_v2  ;;  %6276 = vmatprep.mubr.msk.f32.mxu0 %vm7299_vm0, %v7298_v2 }
  0xfe   : > { %5717 = vmatmul.mubr.msk.f32.gmra.mrb[36].mxu1 %vm294_vm1, %v227_v9  ;;  %6277 = vmatmul.mubr.msk.f32.gmra.mrb[76].mxu0 %vm294_vm1, %v7953_v11  ;;  %v3471_v9 = vld [vmem:[%s7353_s24 + $0x52] sm:$0xff] }
  0xff   : > { %5719 = vmatprep.mubr.msk.f32.mxu1 %vm7299_vm0, %v7298_v2  ;;  %6279 = vmatprep.mubr.msk.f32.mxu0 %vm7299_vm0, %v7298_v2 }
 0x102   : > { %5720 = vmatmul.mubr.msk.f32.gmra.mrb[38].mxu1 %vm294_vm1, %v228_v13  ;;  %6280 = vmatmul.mubr.msk.f32.gmra.mrb[78].mxu0 %vm294_vm1, %v7964_v15  ;;  %v3472_v13 = vld [vmem:[%s7353_s24 + $0x5a] sm:$0xff] }
 0x103   : > { %5722 = vmatprep.mubr.msk.f32.mxu1 %vm7299_vm0, %v7298_v2  ;;  %6282 = vmatprep.mubr.msk.f32.mxu0 %vm7299_vm0, %v7298_v2 }
 0x106   : > { %5723 = vmatmul.mubr.msk.f32.gmra.mrb[40].mxu1 %vm294_vm1, %v229_v17  ;;  %6283 = vmatmul.mubr.msk.f32.gmra.mrb[80].mxu0 %vm294_vm1, %v7975_v19  ;;  %v3473_v17 = vld [vmem:[%s7353_s24 + $0x62] sm:$0xff] }
 0x107   : > { %5725 = vmatprep.mubr.msk.f32.mxu1 %vm7299_vm0, %v7298_v2  ;;  %6287 = vmatprep.mubr.msk.f32.mxu0 %vm7299_vm0, %v7298_v2 }
 0x10a   : > { %5726 = vmatmul.mubr.msk.f32.gmra.mrb[42].mxu1 %vm294_vm1, %v230_v21  ;;  %6288 = vmatmul.mubr.msk.f32.vlgmr.msra.gmra.mrb[0].mxu0 %vm294_vm1, %v7553_v53  ;;  %v232_v53 = vld [vmem:[%s7353_s24 + $0xbd] sm:$0xff]  ;;  %v3474_v21 = vld [vmem:[%s7353_s24 + $0x6a] sm:$0xff] }
 0x10b   : > { %6411 = vmatpush3.msra.mxu0 %v5071_v23  ;;  %5728 = vmatprep.mubr.msk.f32.mxu1 %vm7299_vm0, %v7298_v2  ;;  %v8480_v23 = vld [vmem:[%s7353_s24 + $0xf7] sm:$0xff] }
 0x10c   : > { %6290 = vmatprep.mubr.msk.f32.mxu0 %vm7299_vm0, %v7298_v2  ;;  %6535 = vmatprep.subr.mxu0 %v7298_v2 }
 0x10e   : > { %5729 = vmatmul.mubr.msk.f32.gmra.mrb[44].mxu1 %vm294_vm1, %v231_v25  ;;  %6291 = vmatmul.mubr.msk.f32.gmra.mrb[2].mxu0 %vm294_vm1, %v7564_v55  ;;  %v233_v55 = vld [vmem:[%s7353_s24 + $0xc5] sm:$0xff]  ;;  %v3475_v25 = vld [vmem:[%s7353_s24 + $0x72] sm:$0xff] }
 0x10f   : > { %5731 = vmatprep.mubr.msk.f32.mxu1 %vm7299_vm0, %v7298_v2  ;;  %6293 = vmatprep.mubr.msk.f32.mxu0 %vm7299_vm0, %v7298_v2 }
 0x112   : > { %5732 = vmatmul.mubr.msk.f32.gmra.mrb[46].mxu1 %vm294_vm1, %v232_v53  ;;  %6294 = vmatmul.mubr.msk.f32.gmra.mrb[4].mxu0 %vm294_vm1, %v7575_v57  ;;  %v234_v57 = vld [vmem:[%s7353_s24 + $0xcd] sm:$0xff]  ;;  %v8491_v53 = vld [vmem:[%s7353_s24 + $0xff] sm:$0xff] }
 0x113   : > { %5734 = vmatprep.mubr.msk.f32.mxu1 %vm7299_vm0, %v7298_v2  ;;  %6296 = vmatprep.mubr.msk.f32.mxu0 %vm7299_vm0, %v7298_v2 }
 0x116   : > { %5735 = vmatmul.mubr.msk.f32.gmra.mrb[48].mxu1 %vm294_vm1, %v233_v55  ;;  %6297 = vmatmul.mubr.msk.f32.gmra.mrb[6].mxu0 %vm294_vm1, %v7586_v59  ;;  %v235_v59 = vld [vmem:[%s7353_s24 + $0xd5] sm:$0xff] }
 0x117   : > { %5737 = vmatprep.mubr.msk.f32.mxu1 %vm7299_vm0, %v7298_v2  ;;  %6299 = vmatprep.mubr.msk.f32.mxu0 %vm7299_vm0, %v7298_v2  ;;  %v3476_v55 = vld [vmem:[%s7353_s24 + $0x7a] sm:$0xff] }
 0x11a   : > { %5738 = vmatmul.mubr.msk.f32.gmra.mrb[50].mxu1 %vm294_vm1, %v234_v57  ;;  %6300 = vmatmul.mubr.msk.f32.gmra.mrb[8].mxu0 %vm294_vm1, %v7597_v61  ;;  %v236_v61 = vld [vmem:[%s7353_s24 + $0xdd] sm:$0xff]  ;;  %v8502_v57 = vld [vmem:[%s7353_s24 + $0x107] sm:$0xff] }
 0x11b   : > { %5740 = vmatprep.mubr.msk.f32.mxu1 %vm7299_vm0, %v7298_v2  ;;  %6302 = vmatprep.mubr.msk.f32.mxu0 %vm7299_vm0, %v7298_v2 }
 0x11e   : > { %5741 = vmatmul.mubr.msk.f32.gmra.mrb[52].mxu1 %vm294_vm1, %v235_v59  ;;  %6303 = vmatmul.mubr.msk.f32.gmra.mrb[10].mxu0 %vm294_vm1, %v7608_v63  ;;  %v237_v63 = vld [vmem:[%s7353_s24 + $0xe5] sm:$0xff] }
 0x11f   : > { %5743 = vmatprep.mubr.msk.f32.mxu1 %vm7299_vm0, %v7298_v2  ;;  %6305 = vmatprep.mubr.msk.f32.mxu0 %vm7299_vm0, %v7298_v2  ;;  %v3477_v59 = vld [vmem:[%s7353_s24 + $0x82] sm:$0xff] }
 0x122   : > { %5744 = vmatmul.mubr.msk.f32.gmra.mrb[54].mxu1 %vm294_vm1, %v236_v61  ;;  %6306 = vmatmul.mubr.msk.f32.gmra.mrb[12].mxu0 %vm294_vm1, %v7619_v1  ;;  %v238_v1 = vld [vmem:[%s7353_s24 + $0xed] sm:$0xff] }
 0x123   : > { %5746 = vmatprep.mubr.msk.f32.mxu1 %vm7299_vm0, %v7298_v2  ;;  %6308 = vmatprep.mubr.msk.f32.mxu0 %vm7299_vm0, %v7298_v2  ;;  %v8513_v61 = vld [vmem:[%s7353_s24 + $0x10f] sm:$0xff] }
 0x126   : > { %5747 = vmatmul.mubr.msk.f32.gmra.mrb[56].mxu1 %vm294_vm1, %v237_v63  ;;  %6309 = vmatmul.mubr.msk.f32.gmra.mrb[14].mxu0 %vm294_vm1, %v7630_v4  ;;  %v239_v4 = vld [vmem:[%s7353_s24 + $0xf5] sm:$0xff]  ;;  %v3478_v63 = vld [vmem:[%s7353_s24 + $0x8a] sm:$0xff] }
 0x127   : > { %5749 = vmatprep.mubr.msk.f32.mxu1 %vm7299_vm0, %v7298_v2  ;;  %6311 = vmatprep.mubr.msk.f32.mxu0 %vm7299_vm0, %v7298_v2 }
 0x12a   : > { %5750 = vmatmul.mubr.msk.f32.gmra.mrb[58].mxu1 %vm294_vm1, %v238_v1  ;;  %6312 = vmatmul.mubr.msk.f32.gmra.mrb[16].mxu0 %vm294_vm1, %v7641_v6  ;;  %v240_v6 = vld [vmem:[%s7353_s24 + $0xfd] sm:$0xff] }
 0x12b   : > { %5752 = vmatprep.mubr.msk.f32.mxu1 %vm7299_vm0, %v7298_v2  ;;  %6314 = vmatprep.mubr.msk.f32.mxu0 %vm7299_vm0, %v7298_v2  ;;  %v8524_v1 = vld [vmem:[%s7353_s24 + $0x117] sm:$0xff] }
 0x12e   : > { %5753 = vmatmul.mubr.msk.f32.gmra.mrb[60].mxu1 %vm294_vm1, %v239_v4  ;;  %6315 = vmatmul.mubr.msk.f32.gmra.mrb[18].mxu0 %vm294_vm1, %v7652_v8  ;;  %v241_v8 = vld [vmem:[%s7353_s24 + $0x105] sm:$0xff]  ;;  %v3479_v4 = vld [vmem:[%s7353_s24 + $0x92] sm:$0xff] }
 0x12f   : > { %5755 = vmatprep.mubr.msk.f32.mxu1 %vm7299_vm0, %v7298_v2  ;;  %6317 = vmatprep.mubr.msk.f32.mxu0 %vm7299_vm0, %v7298_v2 }
 0x132   : > { %5756 = vmatmul.mubr.msk.f32.gmra.mrb[62].mxu1 %vm294_vm1, %v240_v6  ;;  %6318 = vmatmul.mubr.msk.f32.gmra.mrb[20].mxu0 %vm294_vm1, %v7663_v10  ;;  %v242_v10 = vld [vmem:[%s7353_s24 + $0x10d] sm:$0xff]  ;;  %v8535_v6 = vld [vmem:[%s7353_s24 + $0x11f] sm:$0xff] }
 0x133   : > { %5758 = vmatprep.mubr.msk.f32.mxu1 %vm7299_vm0, %v7298_v2  ;;  %6320 = vmatprep.mubr.msk.f32.mxu0 %vm7299_vm0, %v7298_v2 }
 0x136   : > { %5759 = vmatmul.mubr.msk.f32.gmra.mrb[64].mxu1 %vm294_vm1, %v241_v8  ;;  %6321 = vmatmul.mubr.msk.f32.gmra.mrb[22].mxu0 %vm294_vm1, %v7674_v12  ;;  %v243_v12 = vld [vmem:[%s7353_s24 + $0x115] sm:$0xff] }
 0x137   : > { %5761 = vmatprep.mubr.msk.f32.mxu1 %vm7299_vm0, %v7298_v2  ;;  %6323 = vmatprep.mubr.msk.f32.mxu0 %vm7299_vm0, %v7298_v2  ;;  %v3480_v8 = vld [vmem:[%s7353_s24 + $0x9a] sm:$0xff] }
 0x13a   : > { %5762 = vmatmul.mubr.msk.f32.gmra.mrb[66].mxu1 %vm294_vm1, %v242_v10  ;;  %6324 = vmatmul.mubr.msk.f32.gmra.mrb[24].mxu0 %vm294_vm1, %v7685_v14  ;;  %v244_v14 = vld [vmem:[%s7353_s24 + $0x11d] sm:$0xff]  ;;  %v8546_v10 = vld [vmem:[%s7353_s24 + $0x127] sm:$0xff] }
 0x13b   : > { %5764 = vmatprep.mubr.msk.f32.mxu1 %vm7299_vm0, %v7298_v2  ;;  %6326 = vmatprep.mubr.msk.f32.mxu0 %vm7299_vm0, %v7298_v2 }
 0x13e   : > { %5765 = vmatmul.mubr.msk.f32.gmra.mrb[68].mxu1 %vm294_vm1, %v243_v12  ;;  %6327 = vmatmul.mubr.msk.f32.gmra.mrb[26].mxu0 %vm294_vm1, %v7696_v16  ;;  %v245_v16 = vld [vmem:[%s7353_s24 + $0x125] sm:$0xff] }
 0x13f   : > { %5767 = vmatprep.mubr.msk.f32.mxu1 %vm7299_vm0, %v7298_v2  ;;  %6329 = vmatprep.mubr.msk.f32.mxu0 %vm7299_vm0, %v7298_v2  ;;  %v3481_v12 = vld [vmem:[%s7353_s24 + $0xa2] sm:$0xff] }
 0x142   : > { %5768 = vmatmul.mubr.msk.f32.gmra.mrb[70].mxu1 %vm294_vm1, %v244_v14  ;;  %6330 = vmatmul.mubr.msk.f32.gmra.mrb[28].mxu0 %vm294_vm1, %v7707_v18  ;;  %v246_v18 = vld [vmem:[%s7353_s24 + $0x12d] sm:$0xff] }
 0x143   : > { %5770 = vmatprep.mubr.msk.f32.mxu1 %vm7299_vm0, %v7298_v2  ;;  %6332 = vmatprep.mubr.msk.f32.mxu0 %vm7299_vm0, %v7298_v2  ;;  %v8557_v14 = vld [vmem:[%s7353_s24 + $0x12f] sm:$0xff] }
 0x146   : > { %5771 = vmatmul.mubr.msk.f32.gmra.mrb[72].mxu1 %vm294_vm1, %v245_v16  ;;  %6333 = vmatmul.mubr.msk.f32.gmra.mrb[30].mxu0 %vm294_vm1, %v7718_v20  ;;  %v247_v20 = vld [vmem:[%s7353_s24 + $0x135] sm:$0xff]  ;;  %v3482_v16 = vld [vmem:[%s7353_s24 + $0xaa] sm:$0xff] }
 0x147   : > { %5773 = vmatprep.mubr.msk.f32.mxu1 %vm7299_vm0, %v7298_v2  ;;  %6335 = vmatprep.mubr.msk.f32.mxu0 %vm7299_vm0, %v7298_v2 }
 0x14a   : > { %5774 = vmatmul.mubr.msk.f32.gmra.mrb[74].mxu1 %vm294_vm1, %v246_v18  ;;  %6336 = vmatmul.mubr.msk.f32.gmra.mrb[32].mxu0 %vm294_vm1, %v7729_v22  ;;  %v248_v22 = vld [vmem:[%s7353_s24 + $0x13d] sm:$0xff] }
 0x14b   : > { %5776 = vmatprep.mubr.msk.f32.mxu1 %vm7299_vm0, %v7298_v2  ;;  %6338 = vmatprep.mubr.msk.f32.mxu0 %vm7299_vm0, %v7298_v2  ;;  %v8568_v18 = vld [vmem:[%s7353_s24 + $0x137] sm:$0xff] }
 0x14e   : > { %5777 = vmatmul.mubr.msk.f32.gmra.mrb[76].mxu1 %vm294_vm1, %v247_v20  ;;  %6339 = vmatmul.mubr.msk.f32.gmra.mrb[34].mxu0 %vm294_vm1, %v7740_v24  ;;  %v249_v24 = vld [vmem:[%s7353_s24 + $0x145] sm:$0xff]  ;;  %v3483_v20 = vld [vmem:[%s7353_s24 + $0xb2] sm:$0xff] }
 0x14f   : > { %5779 = vmatprep.mubr.msk.f32.mxu1 %vm7299_vm0, %v7298_v2  ;;  %6341 = vmatprep.mubr.msk.f32.mxu0 %vm7299_vm0, %v7298_v2 }
 0x152   : > { %5780 = vmatmul.mubr.msk.f32.gmra.mrb[78].mxu1 %vm294_vm1, %v248_v22  ;;  %6342 = vmatmul.mubr.msk.f32.gmra.mrb[36].mxu0 %vm294_vm1, %v7751_v26  ;;  %v1081_v26 = vld [vmem:[%s7353_s24 + $0x7] sm:$0xff]  ;;  %v8579_v22 = vld [vmem:[%s7353_s24 + $0x13f] sm:$0xff] }
 0x153   : > { %5782 = vmatprep.mubr.msk.f32.mxu1 %vm7299_vm0, %v7298_v2  ;;  %6344 = vmatprep.mubr.msk.f32.mxu0 %vm7299_vm0, %v7298_v2 }
 0x156   : > { %5783 = vmatmul.mubr.msk.f32.gmra.mrb[80].mxu1 %vm294_vm1, %v249_v24  ;;  %6345 = vmatmul.mubr.msk.f32.gmra.mrb[38].mxu0 %vm294_vm1, %v7765_v29  ;;  %v8169_v29 = vld [vmem:[%s7353_s24 + $0x17] sm:$0xff] }
 0x157   : > { %5787 = vmatprep.mubr.msk.f32.mxu1 %vm7299_vm0, %v7298_v2  ;;  %6347 = vmatprep.mubr.msk.f32.mxu0 %vm7299_vm0, %v7298_v2  ;;  %v3484_v24 = vld [vmem:[%s7353_s24 + $0xba] sm:$0xff] }
 0x15a   : > { %5788 = vmatmul.mubr.msk.f32.vlgmr.msra.gmra.mrb[0].mxu1 %vm294_vm1, %v1081_v26  ;;  %6348 = vmatmul.mubr.msk.f32.gmra.mrb[40].mxu0 %vm294_vm1, %v7777_v31  ;;  %v8191_v31 = vld [vmem:[%s7353_s24 + $0x27] sm:$0xff] }
 0x15b   : > { %5790 = vmatprep.mubr.msk.f32.mxu1 %vm7299_vm0, %v7298_v2  ;;  %6350 = vmatprep.mubr.msk.f32.mxu0 %vm7299_vm0, %v7298_v2  ;;  %v8590_v26 = vld [vmem:[%s7353_s24 + $0x147] sm:$0xff] }
 0x15c   : > { %5911 = vmatpush3.msra.mxu1 %v4903_v27  ;;  %v3485_v27 = vld [vmem:[%s7353_s24 + $0xc2] sm:$0xff] }
 0x15d   : > { %6660 = vmatprep.subr.mxu1 %v7298_v2 }
 0x15e   : > { %5791 = vmatmul.mubr.msk.f32.gmra.mrb[2].mxu1 %vm294_vm1, %v1082_v28  ;;  %6351 = vmatmul.mubr.msk.f32.gmra.mrb[42].mxu0 %vm294_vm1, %v7788_v33  ;;  %v8213_v33 = vld [vmem:[%s7353_s24 + $0x37] sm:$0xff]  ;;  %v3486_v28 = vld [vmem:[%s7353_s24 + $0xca] sm:$0xff] }
 0x15f   : > { %5793 = vmatprep.mubr.msk.f32.mxu1 %vm7299_vm0, %v7298_v2  ;;  %6353 = vmatprep.mubr.msk.f32.mxu0 %vm7299_vm0, %v7298_v2 }
 0x162   : > { %5794 = vmatmul.mubr.msk.f32.gmra.mrb[4].mxu1 %vm294_vm1, %v8169_v29  ;;  %6354 = vmatmul.mubr.msk.f32.gmra.mrb[44].mxu0 %vm294_vm1, %v7799_v35  ;;  %v8235_v35 = vld [vmem:[%s7353_s24 + $0x47] sm:$0xff] }
 0x163   : > { %5796 = vmatprep.mubr.msk.f32.mxu1 %vm7299_vm0, %v7298_v2  ;;  %6356 = vmatprep.mubr.msk.f32.mxu0 %vm7299_vm0, %v7298_v2 }
 0x166   : > { %5797 = vmatmul.mubr.msk.f32.gmra.mrb[6].mxu1 %vm294_vm1, %v8180_v30  ;;  %6357 = vmatmul.mubr.msk.f32.gmra.mrb[46].mxu0 %vm294_vm1, %v7810_v37  ;;  %v8257_v37 = vld [vmem:[%s7353_s24 + $0x57] sm:$0xff] }
 0x167   : > { %5799 = vmatprep.mubr.msk.f32.mxu1 %vm7299_vm0, %v7298_v2  ;;  %6359 = vmatprep.mubr.msk.f32.mxu0 %vm7299_vm0, %v7298_v2 }
 0x16a   : > { %5800 = vmatmul.mubr.msk.f32.gmra.mrb[8].mxu1 %vm294_vm1, %v8191_v31  ;;  %6360 = vmatmul.mubr.msk.f32.gmra.mrb[48].mxu0 %vm294_vm1, %v7821_v39  ;;  %v8279_v39 = vld [vmem:[%s7353_s24 + $0x67] sm:$0xff] }
 0x16b   : > { %5802 = vmatprep.mubr.msk.f32.mxu1 %vm7299_vm0, %v7298_v2  ;;  %6362 = vmatprep.mubr.msk.f32.mxu0 %vm7299_vm0, %v7298_v2 }
 0x16e   : > { %5803 = vmatmul.mubr.msk.f32.gmra.mrb[10].mxu1 %vm294_vm1, %v8202_v32  ;;  %6363 = vmatmul.mubr.msk.f32.gmra.mrb[50].mxu0 %vm294_vm1, %v7832_v41  ;;  %v8301_v41 = vld [vmem:[%s7353_s24 + $0x77] sm:$0xff] }
 0x16f   : > { %5805 = vmatprep.mubr.msk.f32.mxu1 %vm7299_vm0, %v7298_v2  ;;  %6365 = vmatprep.mubr.msk.f32.mxu0 %vm7299_vm0, %v7298_v2 }
 0x172   : > { %5806 = vmatmul.mubr.msk.f32.gmra.mrb[12].mxu1 %vm294_vm1, %v8213_v33  ;;  %6366 = vmatmul.mubr.msk.f32.gmra.mrb[52].mxu0 %vm294_vm1, %v7843_v43  ;;  %v8323_v43 = vld [vmem:[%s7353_s24 + $0x87] sm:$0xff] }
 0x173   : > { %5808 = vmatprep.mubr.msk.f32.mxu1 %vm7299_vm0, %v7298_v2  ;;  %6368 = vmatprep.mubr.msk.f32.mxu0 %vm7299_vm0, %v7298_v2 }
 0x176   : > { %5809 = vmatmul.mubr.msk.f32.gmra.mrb[14].mxu1 %vm294_vm1, %v8224_v34  ;;  %6369 = vmatmul.mubr.msk.f32.gmra.mrb[54].mxu0 %vm294_vm1, %v7854_v45  ;;  %v8345_v45 = vld [vmem:[%s7353_s24 + $0x97] sm:$0xff] }
 0x177   : > { %5811 = vmatprep.mubr.msk.f32.mxu1 %vm7299_vm0, %v7298_v2  ;;  %6371 = vmatprep.mubr.msk.f32.mxu0 %vm7299_vm0, %v7298_v2 }
 0x17a   : > { %5812 = vmatmul.mubr.msk.f32.gmra.mrb[16].mxu1 %vm294_vm1, %v8235_v35  ;;  %6372 = vmatmul.mubr.msk.f32.gmra.mrb[56].mxu0 %vm294_vm1, %v7865_v47  ;;  %v3028_v47 = vld [vmem:[%s7353_s24 + $0x161] sm:$0xff] }
 0x17b   : > { %5814 = vmatprep.mubr.msk.f32.mxu1 %vm7299_vm0, %v7298_v2  ;;  %6374 = vmatprep.mubr.msk.f32.mxu0 %vm7299_vm0, %v7298_v2 }
 0x17e   : > { %5815 = vmatmul.mubr.msk.f32.gmra.mrb[18].mxu1 %vm294_vm1, %v8246_v36  ;;  %6375 = vmatmul.mubr.msk.f32.gmra.mrb[58].mxu0 %vm294_vm1, %v7876_v49  ;;  %v3029_v49 = vld [vmem:[%s7353_s24 + $0x169] sm:$0xff] }
 0x17f   : > { %5817 = vmatprep.mubr.msk.f32.mxu1 %vm7299_vm0, %v7298_v2  ;;  %6377 = vmatprep.mubr.msk.f32.mxu0 %vm7299_vm0, %v7298_v2 }
 0x182   : > { %5818 = vmatmul.mubr.msk.f32.gmra.mrb[20].mxu1 %vm294_vm1, %v8257_v37  ;;  %6378 = vmatmul.mubr.msk.f32.gmra.mrb[60].mxu0 %vm294_vm1, %v7887_v51  ;;  %v3466_v51 = vld [vmem:[%s7353_s24 + $0x2a] sm:$0xff] }
 0x183   : > { %5820 = vmatprep.mubr.msk.f32.mxu1 %vm7299_vm0, %v7298_v2  ;;  %6380 = vmatprep.mubr.msk.f32.mxu0 %vm7299_vm0, %v7298_v2 }
 0x186   : > { %5821 = vmatmul.mubr.msk.f32.gmra.mrb[22].mxu1 %vm294_vm1, %v8268_v38  ;;  %6381 = vmatmul.mubr.msk.f32.gmra.mrb[62].mxu0 %vm294_vm1, %v7898_v54  ;;  %v8390_v54 = vld [vmem:[%s7353_s24 + $0xb7] sm:$0xff] }
 0x187   : > { %5823 = vmatprep.mubr.msk.f32.mxu1 %vm7299_vm0, %v7298_v2  ;;  %6383 = vmatprep.mubr.msk.f32.mxu0 %vm7299_vm0, %v7298_v2 }
 0x18a   : > { %5824 = vmatmul.mubr.msk.f32.gmra.mrb[24].mxu1 %vm294_vm1, %v8279_v39  ;;  %6384 = vmatmul.mubr.msk.f32.gmra.mrb[64].mxu0 %vm294_vm1, %v7909_v58  ;;  %v8403_v58 = vld [vmem:[%s7353_s24 + $0xbf] sm:$0xff] }
 0x18b   : > { %5826 = vmatprep.mubr.msk.f32.mxu1 %vm7299_vm0, %v7298_v2  ;;  %6386 = vmatprep.mubr.msk.f32.mxu0 %vm7299_vm0, %v7298_v2 }
 0x18e   : > { %5827 = vmatmul.mubr.msk.f32.gmra.mrb[26].mxu1 %vm294_vm1, %v8290_v40  ;;  %6387 = vmatmul.mubr.msk.f32.gmra.mrb[66].mxu0 %vm294_vm1, %v7920_v62  ;;  %v8414_v62 = vld [vmem:[%s7353_s24 + $0xc7] sm:$0xff] }
 0x18f   : > { %5829 = vmatprep.mubr.msk.f32.mxu1 %vm7299_vm0, %v7298_v2  ;;  %6389 = vmatprep.mubr.msk.f32.mxu0 %vm7299_vm0, %v7298_v2 }
 0x192   : > { %5830 = vmatmul.mubr.msk.f32.gmra.mrb[28].mxu1 %vm294_vm1, %v8301_v41  ;;  %6390 = vmatmul.mubr.msk.f32.gmra.mrb[68].mxu0 %vm294_vm1, %v7931_v3  ;;  %v8425_v3 = vld [vmem:[%s7353_s24 + $0xcf] sm:$0xff] }
 0x193   : > { %5832 = vmatprep.mubr.msk.f32.mxu1 %vm7299_vm0, %v7298_v2  ;;  %6392 = vmatprep.mubr.msk.f32.mxu0 %vm7299_vm0, %v7298_v2 }
 0x196   : > { %5833 = vmatmul.mubr.msk.f32.gmra.mrb[30].mxu1 %vm294_vm1, %v8312_v42  ;;  %6393 = vmatmul.mubr.msk.f32.gmra.mrb[70].mxu0 %vm294_vm1, %v7942_v7  ;;  %v8436_v7 = vld [vmem:[%s7353_s24 + $0xd7] sm:$0xff] }
 0x197   : > { %5835 = vmatprep.mubr.msk.f32.mxu1 %vm7299_vm0, %v7298_v2  ;;  %6395 = vmatprep.mubr.msk.f32.mxu0 %vm7299_vm0, %v7298_v2 }
 0x19a   : > { %5836 = vmatmul.mubr.msk.f32.gmra.mrb[32].mxu1 %vm294_vm1, %v8323_v43  ;;  %6396 = vmatmul.mubr.msk.f32.gmra.mrb[72].mxu0 %vm294_vm1, %v7953_v11  ;;  %v8447_v11 = vld [vmem:[%s7353_s24 + $0xdf] sm:$0xff] }
 0x19b   : > { %5838 = vmatprep.mubr.msk.f32.mxu1 %vm7299_vm0, %v7298_v2  ;;  %6398 = vmatprep.mubr.msk.f32.mxu0 %vm7299_vm0, %v7298_v2 }
 0x19e   : > { %5839 = vmatmul.mubr.msk.f32.gmra.mrb[34].mxu1 %vm294_vm1, %v8334_v44  ;;  %6399 = vmatmul.mubr.msk.f32.gmra.mrb[74].mxu0 %vm294_vm1, %v7964_v15  ;;  %v8458_v15 = vld [vmem:[%s7353_s24 + $0xe7] sm:$0xff] }
 0x19f   : > { %5841 = vmatprep.mubr.msk.f32.mxu1 %vm7299_vm0, %v7298_v2  ;;  %6401 = vmatprep.mubr.msk.f32.mxu0 %vm7299_vm0, %v7298_v2 }
 0x1a2   : > { %5842 = vmatmul.mubr.msk.f32.gmra.mrb[36].mxu1 %vm294_vm1, %v8345_v45  ;;  %6402 = vmatmul.mubr.msk.f32.gmra.mrb[76].mxu0 %vm294_vm1, %v7975_v19  ;;  %v8469_v19 = vld [vmem:[%s7353_s24 + $0xef] sm:$0xff] }
 0x1a3   : > { %5844 = vmatprep.mubr.msk.f32.mxu1 %vm7299_vm0, %v7298_v2  ;;  %6404 = vmatprep.mubr.msk.f32.mxu0 %vm7299_vm0, %v7298_v2 }
 0x1a6   : > { %5845 = vmatmul.mubr.msk.f32.gmra.mrb[38].mxu1 %vm294_vm1, %v8356_v46  ;;  %6405 = vmatmul.mubr.msk.f32.gmra.mrb[78].mxu0 %vm294_vm1, %v3028_v47  ;;  %v3487_v47 = vld [vmem:[%s7353_s24 + $0xd2] sm:$0xff] }
 0x1a7   : > { %5847 = vmatprep.mubr.msk.f32.mxu1 %vm7299_vm0, %v7298_v2  ;;  %6407 = vmatprep.mubr.msk.f32.mxu0 %vm7299_vm0, %v7298_v2 }
 0x1aa   : > { %5848 = vmatmul.mubr.msk.f32.gmra.mrb[40].mxu1 %vm294_vm1, %v8367_v48  ;;  %6408 = vmatmul.mubr.msk.f32.gmra.mrb[80].mxu0 %vm294_vm1, %v3029_v49  ;;  %v7289_v49 = vld [vmem:[%s9332_s1 + $0x20] sm:$0xff] }
 0x1ab   : > { %5850 = vmatprep.mubr.msk.f32.mxu1 %vm7299_vm0, %v7298_v2  ;;  %6412 = vmatprep.mubr.msk.f32.mxu0 %vm7299_vm0, %v7298_v2 }
 0x1ae   : > { %5851 = vmatmul.mubr.msk.f32.gmra.mrb[42].mxu1 %vm294_vm1, %v8378_v50  ;;  %6413 = vmatmul.mubr.msk.f32.vlgmr.msra.gmra.mrb[0].mxu0 %vm294_vm1, %v3466_v51  ;;  %v3944_v51 = vld [vmem:[%s7353_s24 + $0x33] sm:$0xff] }
 0x1af   : > { %6536 = vmatpush3.msra.mxu0 %v5113_v52  ;;  %5853 = vmatprep.mubr.msk.f32.mxu1 %vm7299_vm0, %v7298_v2  ;;  %v3945_v52 = vld [vmem:[%s7353_s24 + $0x3b] sm:$0xff] }
 0x1b0   : > { %6415 = vmatprep.mubr.msk.f32.mxu0 %vm7299_vm0, %v7298_v2 }
 0x1b2   : > { %5854 = vmatmul.mubr.msk.f32.gmra.mrb[44].mxu1 %vm294_vm1, %v8390_v54  ;;  %6416 = vmatmul.mubr.msk.f32.gmra.mrb[2].mxu0 %vm294_vm1, %v3467_v56  ;;  %v3947_v56 = vld [vmem:[%s7353_s24 + $0x4b] sm:$0xff] }
 0x1b3   : > { %5856 = vmatprep.mubr.msk.f32.mxu1 %vm7299_vm0, %v7298_v2  ;;  %6418 = vmatprep.mubr.msk.f32.mxu0 %vm7299_vm0, %v7298_v2 }
 0x1b6   : > { %5857 = vmatmul.mubr.msk.f32.gmra.mrb[46].mxu1 %vm294_vm1, %v8403_v58  ;;  %6419 = vmatmul.mubr.msk.f32.gmra.mrb[4].mxu0 %vm294_vm1, %v3468_v60  ;;  %v3949_v60 = vld [vmem:[%s7353_s24 + $0x5b] sm:$0xff] }
 0x1b7   : > { %5859 = vmatprep.mubr.msk.f32.mxu1 %vm7299_vm0, %v7298_v2  ;;  %6421 = vmatprep.mubr.msk.f32.mxu0 %vm7299_vm0, %v7298_v2 }
 0x1ba   : > { %5860 = vmatmul.mubr.msk.f32.gmra.mrb[48].mxu1 %vm294_vm1, %v8414_v62  ;;  %6422 = vmatmul.mubr.msk.f32.gmra.mrb[6].mxu0 %vm294_vm1, %v3469_v0  ;;  %v3951_v0 = vld [vmem:[%s7353_s24 + $0x6b] sm:$0xff] }
 0x1bb   : > { %5862 = vmatprep.mubr.msk.f32.mxu1 %vm7299_vm0, %v7298_v2  ;;  %6424 = vmatprep.mubr.msk.f32.mxu0 %vm7299_vm0, %v7298_v2 }
 0x1be   : > { %5863 = vmatmul.mubr.msk.f32.gmra.mrb[50].mxu1 %vm294_vm1, %v8425_v3  ;;  %6425 = vmatmul.mubr.msk.f32.gmra.mrb[8].mxu0 %vm294_vm1, %v3470_v5  ;;  %v3953_v5 = vld [vmem:[%s7353_s24 + $0x7b] sm:$0xff] }
 0x1bf   : > { %5865 = vmatprep.mubr.msk.f32.mxu1 %vm7299_vm0, %v7298_v2  ;;  %6427 = vmatprep.mubr.msk.f32.mxu0 %vm7299_vm0, %v7298_v2 }
 0x1c2   : > { %5866 = vmatmul.mubr.msk.f32.gmra.mrb[52].mxu1 %vm294_vm1, %v8436_v7  ;;  %6428 = vmatmul.mubr.msk.f32.gmra.mrb[10].mxu0 %vm294_vm1, %v3471_v9  ;;  %v3955_v9 = vld [vmem:[%s7353_s24 + $0x8b] sm:$0xff] }
 0x1c3   : > { %5868 = vmatprep.mubr.msk.f32.mxu1 %vm7299_vm0, %v7298_v2  ;;  %6430 = vmatprep.mubr.msk.f32.mxu0 %vm7299_vm0, %v7298_v2 }
 0x1c6   : > { %5869 = vmatmul.mubr.msk.f32.gmra.mrb[54].mxu1 %vm294_vm1, %v8447_v11  ;;  %6431 = vmatmul.mubr.msk.f32.gmra.mrb[12].mxu0 %vm294_vm1, %v3472_v13  ;;  %v3957_v13 = vld [vmem:[%s7353_s24 + $0x9b] sm:$0xff] }
 0x1c7   : > { %5871 = vmatprep.mubr.msk.f32.mxu1 %vm7299_vm0, %v7298_v2  ;;  %6433 = vmatprep.mubr.msk.f32.mxu0 %vm7299_vm0, %v7298_v2 }
 0x1ca   : > { %5872 = vmatmul.mubr.msk.f32.gmra.mrb[56].mxu1 %vm294_vm1, %v8458_v15  ;;  %6434 = vmatmul.mubr.msk.f32.gmra.mrb[14].mxu0 %vm294_vm1, %v3473_v17  ;;  %v3959_v17 = vld [vmem:[%s7353_s24 + $0xab] sm:$0xff] }
 0x1cb   : > { %5874 = vmatprep.mubr.msk.f32.mxu1 %vm7299_vm0, %v7298_v2  ;;  %6436 = vmatprep.mubr.msk.f32.mxu0 %vm7299_vm0, %v7298_v2 }
 0x1ce   : > { %5875 = vmatmul.mubr.msk.f32.gmra.mrb[58].mxu1 %vm294_vm1, %v8469_v19  ;;  %6437 = vmatmul.mubr.msk.f32.gmra.mrb[16].mxu0 %vm294_vm1, %v3474_v21  ;;  %v1597_v21 = vld [vmem:[%s7353_s24 + $0x14f] sm:$0xff] }
 0x1cf   : > { %5877 = vmatprep.mubr.msk.f32.mxu1 %vm7299_vm0, %v7298_v2  ;;  %6439 = vmatprep.mubr.msk.f32.mxu0 %vm7299_vm0, %v7298_v2 }
 0x1d2   : > { %5878 = vmatmul.mubr.msk.f32.gmra.mrb[60].mxu1 %vm294_vm1, %v8480_v23  ;;  %6440 = vmatmul.mubr.msk.f32.gmra.mrb[18].mxu0 %vm294_vm1, %v3475_v25  ;;  %v1598_v25 = vld [vmem:[%s7353_s24 + $0x157] sm:$0xff] }
 0x1d3   : > { %5880 = vmatprep.mubr.msk.f32.mxu1 %vm7299_vm0, %v7298_v2  ;;  %6442 = vmatprep.mubr.msk.f32.mxu0 %vm7299_vm0, %v7298_v2 }
 0x1d6   : > { %5881 = vmatmul.mubr.msk.f32.gmra.mrb[62].mxu1 %vm294_vm1, %v8491_v53  ;;  %6443 = vmatmul.mubr.msk.f32.gmra.mrb[20].mxu0 %vm294_vm1, %v3476_v55  ;;  %v2056_v55 = vld [vmem:[%s7353_s24 + $0xc0] sm:$0xff] }
 0x1d7   : > { %5883 = vmatprep.mubr.msk.f32.mxu1 %vm7299_vm0, %v7298_v2  ;;  %6445 = vmatprep.mubr.msk.f32.mxu0 %vm7299_vm0, %v7298_v2 }
 0x1da   : > { %5884 = vmatmul.mubr.msk.f32.gmra.mrb[64].mxu1 %vm294_vm1, %v8502_v57  ;;  %6446 = vmatmul.mubr.msk.f32.gmra.mrb[22].mxu0 %vm294_vm1, %v3477_v59  ;;  %v2057_v59 = vld [vmem:[%s7353_s24 + $0xc8] sm:$0xff] }
 0x1db   : > { %5886 = vmatprep.mubr.msk.f32.mxu1 %vm7299_vm0, %v7298_v2  ;;  %6448 = vmatprep.mubr.msk.f32.mxu0 %vm7299_vm0, %v7298_v2 }
 0x1de   : > { %5887 = vmatmul.mubr.msk.f32.gmra.mrb[66].mxu1 %vm294_vm1, %v8513_v61  ;;  %6449 = vmatmul.mubr.msk.f32.gmra.mrb[24].mxu0 %vm294_vm1, %v3478_v63  ;;  %v2058_v63 = vld [vmem:[%s7353_s24 + $0xd0] sm:$0xff] }
 0x1df   : > { %5889 = vmatprep.mubr.msk.f32.mxu1 %vm7299_vm0, %v7298_v2  ;;  %6451 = vmatprep.mubr.msk.f32.mxu0 %vm7299_vm0, %v7298_v2 }
 0x1e2   : > { %5890 = vmatmul.mubr.msk.f32.gmra.mrb[68].mxu1 %vm294_vm1, %v8524_v1  ;;  %6452 = vmatmul.mubr.msk.f32.gmra.mrb[26].mxu0 %vm294_vm1, %v3479_v4  ;;  %v2059_v4 = vld [vmem:[%s7353_s24 + $0xd8] sm:$0xff] }
 0x1e3   : > { %5892 = vmatprep.mubr.msk.f32.mxu1 %vm7299_vm0, %v7298_v2  ;;  %6454 = vmatprep.mubr.msk.f32.mxu0 %vm7299_vm0, %v7298_v2 }
 0x1e6   : > { %5893 = vmatmul.mubr.msk.f32.gmra.mrb[70].mxu1 %vm294_vm1, %v8535_v6  ;;  %6455 = vmatmul.mubr.msk.f32.gmra.mrb[28].mxu0 %vm294_vm1, %v3480_v8  ;;  %v2060_v8 = vld [vmem:[%s7353_s24 + $0xe0] sm:$0xff] }
 0x1e7   : > { %5895 = vmatprep.mubr.msk.f32.mxu1 %vm7299_vm0, %v7298_v2  ;;  %6457 = vmatprep.mubr.msk.f32.mxu0 %vm7299_vm0, %v7298_v2 }
 0x1ea   : > { %5896 = vmatmul.mubr.msk.f32.gmra.mrb[72].mxu1 %vm294_vm1, %v8546_v10  ;;  %6458 = vmatmul.mubr.msk.f32.gmra.mrb[30].mxu0 %vm294_vm1, %v3481_v12  ;;  %v2061_v12 = vld [vmem:[%s7353_s24 + $0xe8] sm:$0xff] }
 0x1eb   : > { %5898 = vmatprep.mubr.msk.f32.mxu1 %vm7299_vm0, %v7298_v2  ;;  %6460 = vmatprep.mubr.msk.f32.mxu0 %vm7299_vm0, %v7298_v2 }
 0x1ee   : > { %5899 = vmatmul.mubr.msk.f32.gmra.mrb[74].mxu1 %vm294_vm1, %v8557_v14  ;;  %6461 = vmatmul.mubr.msk.f32.gmra.mrb[32].mxu0 %vm294_vm1, %v3482_v16  ;;  %v2062_v16 = vld [vmem:[%s7353_s24 + $0xf0] sm:$0xff] }
 0x1ef   : > { %5901 = vmatprep.mubr.msk.f32.mxu1 %vm7299_vm0, %v7298_v2  ;;  %6463 = vmatprep.mubr.msk.f32.mxu0 %vm7299_vm0, %v7298_v2 }
 0x1f2   : > { %5902 = vmatmul.mubr.msk.f32.gmra.mrb[76].mxu1 %vm294_vm1, %v8568_v18  ;;  %6464 = vmatmul.mubr.msk.f32.gmra.mrb[34].mxu0 %vm294_vm1, %v3483_v20  ;;  %v2063_v20 = vld [vmem:[%s7353_s24 + $0xf8] sm:$0xff] }
 0x1f3   : > { %5904 = vmatprep.mubr.msk.f32.mxu1 %vm7299_vm0, %v7298_v2  ;;  %6466 = vmatprep.mubr.msk.f32.mxu0 %vm7299_vm0, %v7298_v2 }
 0x1f6   : > { %5905 = vmatmul.mubr.msk.f32.gmra.mrb[78].mxu1 %vm294_vm1, %v8579_v22  ;;  %6467 = vmatmul.mubr.msk.f32.gmra.mrb[36].mxu0 %vm294_vm1, %v3484_v24  ;;  %v2064_v24 = vld [vmem:[%s7353_s24 + $0x100] sm:$0xff] }
 0x1f7   : > { %5907 = vmatprep.mubr.msk.f32.mxu1 %vm7299_vm0, %v7298_v2  ;;  %6469 = vmatprep.mubr.msk.f32.mxu0 %vm7299_vm0, %v7298_v2 }
 0x1fa   : > { %5908 = vmatmul.mubr.msk.f32.gmra.mrb[80].mxu1 %vm294_vm1, %v8590_v26  ;;  %6470 = vmatmul.mubr.msk.f32.gmra.mrb[38].mxu0 %vm294_vm1, %v3485_v27  ;;  %v2065_v27 = vld [vmem:[%s7353_s24 + $0x108] sm:$0xff] }
 0x1fb   : > { %5912 = vmatprep.mubr.msk.f32.mxu1 %vm7299_vm0, %v7298_v2  ;;  %6472 = vmatprep.mubr.msk.f32.mxu0 %vm7299_vm0, %v7298_v2 }
 0x1fe   : > { %5913 = vmatmul.mubr.msk.f32.vlgmr.msra.gmra.mrb[0].mxu1 %vm294_vm1, %v8169_v29  ;;  %6473 = vmatmul.mubr.msk.f32.gmra.mrb[40].mxu0 %vm294_vm1, %v3486_v28  ;;  %v3488_v29 = vld [vmem:[%s7353_s24 + $0xda] sm:$0xff] }
 0x1ff   : > { %5915 = vmatprep.mubr.msk.f32.mxu1 %vm7299_vm0, %v7298_v2  ;;  %6475 = vmatprep.mubr.msk.f32.mxu0 %vm7299_vm0, %v7298_v2  ;;  %v3972_v28 = vld [vmem:[%s7353_s24 + $0x113] sm:$0xff] }
 0x200   : > { %6661 = vmatpush3.msra.mxu1 %v7289_v49  ;;  %v3973_v49 = vld [vmem:[%s7353_s24 + $0x11b] sm:$0xff] }
 0x202   : > { %5916 = vmatmul.mubr.msk.f32.gmra.mrb[2].mxu1 %vm294_vm1, %v8180_v30  ;;  %6476 = vmatmul.mubr.msk.f32.gmra.mrb[42].mxu0 %vm294_vm1, %v3487_v47  ;;  %v3489_v30 = vld [vmem:[%s7353_s24 + $0xe2] sm:$0xff]  ;;  %v2066_v47 = vld [vmem:[%s7353_s24 + $0x110] sm:$0xff] }
 0x203   : > { %5918 = vmatprep.mubr.msk.f32.mxu1 %vm7299_vm0, %v7298_v2  ;;  %6478 = vmatprep.mubr.msk.f32.mxu0 %vm7299_vm0, %v7298_v2 }
 0x206   : > { %5919 = vmatmul.mubr.msk.f32.gmra.mrb[4].mxu1 %vm294_vm1, %v8191_v31  ;;  %6479 = vmatmul.mubr.msk.f32.gmra.mrb[44].mxu0 %vm294_vm1, %v3488_v29  ;;  %v3490_v31 = vld [vmem:[%s7353_s24 + $0xea] sm:$0xff]  ;;  %v2067_v29 = vld [vmem:[%s7353_s24 + $0x118] sm:$0xff] }
 0x207   : > { %5921 = vmatprep.mubr.msk.f32.mxu1 %vm7299_vm0, %v7298_v2  ;;  %6481 = vmatprep.mubr.msk.f32.mxu0 %vm7299_vm0, %v7298_v2 }
 0x20a   : > { %5922 = vmatmul.mubr.msk.f32.gmra.mrb[6].mxu1 %vm294_vm1, %v8202_v32  ;;  %6482 = vmatmul.mubr.msk.f32.gmra.mrb[46].mxu0 %vm294_vm1, %v3489_v30  ;;  %v3491_v32 = vld [vmem:[%s7353_s24 + $0xf2] sm:$0xff]  ;;  %v3974_v30 = vld [vmem:[%s7353_s24 + $0x123] sm:$0xff] }
 0x20b   : > { %5924 = vmatprep.mubr.msk.f32.mxu1 %vm7299_vm0, %v7298_v2  ;;  %6484 = vmatprep.mubr.msk.f32.mxu0 %vm7299_vm0, %v7298_v2 }
 0x20e   : > { %5925 = vmatmul.mubr.msk.f32.gmra.mrb[8].mxu1 %vm294_vm1, %v8213_v33  ;;  %6485 = vmatmul.mubr.msk.f32.gmra.mrb[48].mxu0 %vm294_vm1, %v3490_v31  ;;  %v3492_v33 = vld [vmem:[%s7353_s24 + $0xfa] sm:$0xff] }
 0x20f   : > { %5927 = vmatprep.mubr.msk.f32.mxu1 %vm7299_vm0, %v7298_v2  ;;  %6487 = vmatprep.mubr.msk.f32.mxu0 %vm7299_vm0, %v7298_v2  ;;  %v2068_v31 = vld [vmem:[%s7353_s24 + $0x120] sm:$0xff] }
 0x212   : > { %5928 = vmatmul.mubr.msk.f32.gmra.mrb[10].mxu1 %vm294_vm1, %v8224_v34  ;;  %6488 = vmatmul.mubr.msk.f32.gmra.mrb[50].mxu0 %vm294_vm1, %v3491_v32  ;;  %v3493_v34 = vld [vmem:[%s7353_s24 + $0x102] sm:$0xff]  ;;  %v3975_v32 = vld [vmem:[%s7353_s24 + $0x12b] sm:$0xff] }
 0x213   : > { %5930 = vmatprep.mubr.msk.f32.mxu1 %vm7299_vm0, %v7298_v2  ;;  %6490 = vmatprep.mubr.msk.f32.mxu0 %vm7299_vm0, %v7298_v2 }
 0x216   : > { %5931 = vmatmul.mubr.msk.f32.gmra.mrb[12].mxu1 %vm294_vm1, %v8235_v35  ;;  %6491 = vmatmul.mubr.msk.f32.gmra.mrb[52].mxu0 %vm294_vm1, %v3492_v33  ;;  %v3494_v35 = vld [vmem:[%s7353_s24 + $0x10a] sm:$0xff] }
 0x217   : > { %5933 = vmatprep.mubr.msk.f32.mxu1 %vm7299_vm0, %v7298_v2  ;;  %6493 = vmatprep.mubr.msk.f32.mxu0 %vm7299_vm0, %v7298_v2 }
 0x21a   : > { %5934 = vmatmul.mubr.msk.f32.gmra.mrb[14].mxu1 %vm294_vm1, %v8246_v36  ;;  %6494 = vmatmul.mubr.msk.f32.gmra.mrb[54].mxu0 %vm294_vm1, %v3493_v34  ;;  %v3495_v36 = vld [vmem:[%s7353_s24 + $0x112] sm:$0xff] }
 0x21b   : > { %5936 = vmatprep.mubr.msk.f32.mxu1 %vm7299_vm0, %v7298_v2  ;;  %6496 = vmatprep.mubr.msk.f32.mxu0 %vm7299_vm0, %v7298_v2 }
 0x21e   : > { %5937 = vmatmul.mubr.msk.f32.gmra.mrb[16].mxu1 %vm294_vm1, %v8257_v37  ;;  %6497 = vmatmul.mubr.msk.f32.gmra.mrb[56].mxu0 %vm294_vm1, %v3494_v35  ;;  %v3496_v37 = vld [vmem:[%s7353_s24 + $0x11a] sm:$0xff]  ;;  %v2069_v35 = vld [vmem:[%s7353_s24 + $0x128] sm:$0xff] }
 0x21f   : > { %5939 = vmatprep.mubr.msk.f32.mxu1 %vm7299_vm0, %v7298_v2  ;;  %6499 = vmatprep.mubr.msk.f32.mxu0 %vm7299_vm0, %v7298_v2 }
 0x222   : > { %5940 = vmatmul.mubr.msk.f32.gmra.mrb[18].mxu1 %vm294_vm1, %v8268_v38  ;;  %6500 = vmatmul.mubr.msk.f32.gmra.mrb[58].mxu0 %vm294_vm1, %v3495_v36  ;;  %v3497_v38 = vld [vmem:[%s7353_s24 + $0x122] sm:$0xff]  ;;  %v3976_v36 = vld [vmem:[%s7353_s24 + $0x133] sm:$0xff] }
 0x223   : > { %5942 = vmatprep.mubr.msk.f32.mxu1 %vm7299_vm0, %v7298_v2  ;;  %6502 = vmatprep.mubr.msk.f32.mxu0 %vm7299_vm0, %v7298_v2 }
 0x226   : > { %5943 = vmatmul.mubr.msk.f32.gmra.mrb[20].mxu1 %vm294_vm1, %v8279_v39  ;;  %6503 = vmatmul.mubr.msk.f32.gmra.mrb[60].mxu0 %vm294_vm1, %v3496_v37  ;;  %v3498_v39 = vld [vmem:[%s7353_s24 + $0x12a] sm:$0xff] }
 0x227   : > { %5945 = vmatprep.mubr.msk.f32.mxu1 %vm7299_vm0, %v7298_v2  ;;  %6505 = vmatprep.mubr.msk.f32.mxu0 %vm7299_vm0, %v7298_v2 }
 0x22a   : > { %5946 = vmatmul.mubr.msk.f32.gmra.mrb[22].mxu1 %vm294_vm1, %v8290_v40  ;;  %6506 = vmatmul.mubr.msk.f32.gmra.mrb[62].mxu0 %vm294_vm1, %v3497_v38  ;;  %v3499_v40 = vld [vmem:[%s7353_s24 + $0x132] sm:$0xff] }
 0x22b   : > { %5948 = vmatprep.mubr.msk.f32.mxu1 %vm7299_vm0, %v7298_v2  ;;  %6508 = vmatprep.mubr.msk.f32.mxu0 %vm7299_vm0, %v7298_v2 }
 0x22e   : > { %5949 = vmatmul.mubr.msk.f32.gmra.mrb[24].mxu1 %vm294_vm1, %v8301_v41  ;;  %6509 = vmatmul.mubr.msk.f32.gmra.mrb[64].mxu0 %vm294_vm1, %v3498_v39  ;;  %v3500_v41 = vld [vmem:[%s7353_s24 + $0x13a] sm:$0xff]  ;;  %v2070_v39 = vld [vmem:[%s7353_s24 + $0x130] sm:$0xff] }
 0x22f   : > { %5951 = vmatprep.mubr.msk.f32.mxu1 %vm7299_vm0, %v7298_v2  ;;  %6511 = vmatprep.mubr.msk.f32.mxu0 %vm7299_vm0, %v7298_v2 }
 0x232   : > { %5952 = vmatmul.mubr.msk.f32.gmra.mrb[26].mxu1 %vm294_vm1, %v8312_v42  ;;  %6512 = vmatmul.mubr.msk.f32.gmra.mrb[66].mxu0 %vm294_vm1, %v3499_v40  ;;  %v3501_v42 = vld [vmem:[%s7353_s24 + $0x142] sm:$0xff] }
 0x233   : > { %5954 = vmatprep.mubr.msk.f32.mxu1 %vm7299_vm0, %v7298_v2  ;;  %6514 = vmatprep.mubr.msk.f32.mxu0 %vm7299_vm0, %v7298_v2  ;;  %v3977_v40 = vld [vmem:[%s7353_s24 + $0x13b] sm:$0xff] }
 0x236   : > { %5955 = vmatmul.mubr.msk.f32.gmra.mrb[28].mxu1 %vm294_vm1, %v8323_v43  ;;  %6515 = vmatmul.mubr.msk.f32.gmra.mrb[68].mxu0 %vm294_vm1, %v3500_v41  ;;  %v3502_v43 = vld [vmem:[%s7353_s24 + $0x14a] sm:$0xff] }
 0x237   : > { %5957 = vmatprep.mubr.msk.f32.mxu1 %vm7299_vm0, %v7298_v2  ;;  %6517 = vmatprep.mubr.msk.f32.mxu0 %vm7299_vm0, %v7298_v2 }
 0x23a   : > { %5958 = vmatmul.mubr.msk.f32.gmra.mrb[30].mxu1 %vm294_vm1, %v8334_v44  ;;  %6518 = vmatmul.mubr.msk.f32.gmra.mrb[70].mxu0 %vm294_vm1, %v3501_v42  ;;  %v3503_v44 = vld [vmem:[%s7353_s24 + $0x152] sm:$0xff] }
 0x23b   : > { %5960 = vmatprep.mubr.msk.f32.mxu1 %vm7299_vm0, %v7298_v2  ;;  %6520 = vmatprep.mubr.msk.f32.mxu0 %vm7299_vm0, %v7298_v2 }
 0x23e   : > { %5961 = vmatmul.mubr.msk.f32.gmra.mrb[32].mxu1 %vm294_vm1, %v8345_v45  ;;  %6521 = vmatmul.mubr.msk.f32.gmra.mrb[72].mxu0 %vm294_vm1, %v3502_v43  ;;  %v3504_v45 = vld [vmem:[%s7353_s24 + $0x15a] sm:$0xff] }
 0x23f   : > { %5963 = vmatprep.mubr.msk.f32.mxu1 %vm7299_vm0, %v7298_v2  ;;  %6523 = vmatprep.mubr.msk.f32.mxu0 %vm7299_vm0, %v7298_v2  ;;  %v2071_v43 = vld [vmem:[%s7353_s24 + $0x138] sm:$0xff] }
 0x242   : > { %5964 = vmatmul.mubr.msk.f32.gmra.mrb[34].mxu1 %vm294_vm1, %v8356_v46  ;;  %6524 = vmatmul.mubr.msk.f32.gmra.mrb[74].mxu0 %vm294_vm1, %v3503_v44  ;;  %v3505_v46 = vld [vmem:[%s7353_s24 + $0x162] sm:$0xff] }
 0x243   : > { %5966 = vmatprep.mubr.msk.f32.mxu1 %vm7299_vm0, %v7298_v2  ;;  %6526 = vmatprep.mubr.msk.f32.mxu0 %vm7299_vm0, %v7298_v2  ;;  %v3978_v44 = vld [vmem:[%s7353_s24 + $0x143] sm:$0xff] }
 0x246   : > { %5967 = vmatmul.mubr.msk.f32.gmra.mrb[36].mxu1 %vm294_vm1, %v8367_v48  ;;  %6527 = vmatmul.mubr.msk.f32.gmra.mrb[76].mxu0 %vm294_vm1, %v3504_v45  ;;  %v3506_v48 = vld [vmem:[%s7353_s24 + $0x16a] sm:$0xff] }
 0x247   : > { %5969 = vmatprep.mubr.msk.f32.mxu1 %vm7299_vm0, %v7298_v2  ;;  %6529 = vmatprep.mubr.msk.f32.mxu0 %vm7299_vm0, %v7298_v2 }
 0x24a   : > { %5970 = vmatmul.mubr.msk.f32.gmra.mrb[38].mxu1 %vm294_vm1, %v8378_v50  ;;  %6530 = vmatmul.mubr.msk.f32.gmra.mrb[78].mxu0 %vm294_vm1, %v3505_v46  ;;  %v3943_v50 = vld [vmem:[%s7353_s24 + $0x2b] sm:$0xff] }
 0x24b   : > { %5972 = vmatprep.mubr.msk.f32.mxu1 %vm7299_vm0, %v7298_v2  ;;  %6532 = vmatprep.mubr.msk.f32.mxu0 %vm7299_vm0, %v7298_v2 }
 0x24e   : > { %5973 = vmatmul.mubr.msk.f32.gmra.mrb[40].mxu1 %vm294_vm1, %v8390_v54  ;;  %6533 = vmatmul.mubr.msk.f32.gmra.mrb[80].mxu0 %vm294_vm1, %v3506_v48  ;;  %v3946_v54 = vld [vmem:[%s7353_s24 + $0x43] sm:$0xff] }
 0x24f   : > { %5975 = vmatprep.mubr.msk.f32.mxu1 %vm7299_vm0, %v7298_v2  ;;  %6537 = vmatprep.mubr.msk.f32.mxu0 %vm7299_vm0, %v7298_v2  ;;  %v2072_v48 = vld [vmem:[%s7353_s24 + $0x140] sm:$0xff] }
 0x252   : > { %5976 = vmatmul.mubr.msk.f32.gmra.mrb[42].mxu1 %vm294_vm1, %v8403_v58  ;;  %6538 = vmatmul.mubr.msk.f32.vlgmr.msra.gmra.mrb[0].mxu0 %vm294_vm1, %v3943_v50  ;;  %v3948_v58 = vld [vmem:[%s7353_s24 + $0x53] sm:$0xff]  ;;  %v3979_v50 = vld [vmem:[%s7353_s24 + $0x14b] sm:$0xff] }
 0x253   : > { %5978 = vmatprep.mubr.msk.f32.mxu1 %vm7299_vm0, %v7298_v2  ;;  %6540 = vmatprep.mubr.msk.f32.mxu0 %vm7299_vm0, %v7298_v2 }
 0x256   : > { %5979 = vmatmul.mubr.msk.f32.gmra.mrb[44].mxu1 %vm294_vm1, %v8414_v62  ;;  %6541 = vmatmul.mubr.msk.f32.gmra.mrb[2].mxu0 %vm294_vm1, %v3944_v51  ;;  %v3950_v62 = vld [vmem:[%s7353_s24 + $0x63] sm:$0xff] }
 0x257   : > { %5981 = vmatprep.mubr.msk.f32.mxu1 %vm7299_vm0, %v7298_v2  ;;  %6543 = vmatprep.mubr.msk.f32.mxu0 %vm7299_vm0, %v7298_v2 }
 0x25a   : > { %5982 = vmatmul.mubr.msk.f32.gmra.mrb[46].mxu1 %vm294_vm1, %v8425_v3  ;;  %6544 = vmatmul.mubr.msk.f32.gmra.mrb[4].mxu0 %vm294_vm1, %v3945_v52  ;;  %v3952_v3 = vld [vmem:[%s7353_s24 + $0x73] sm:$0xff] }
 0x25b   : > { %5984 = vmatprep.mubr.msk.f32.mxu1 %vm7299_vm0, %v7298_v2  ;;  %6546 = vmatprep.mubr.msk.f32.mxu0 %vm7299_vm0, %v7298_v2 }
 0x25e   : > { %5985 = vmatmul.mubr.msk.f32.gmra.mrb[48].mxu1 %vm294_vm1, %v8436_v7  ;;  %6547 = vmatmul.mubr.msk.f32.gmra.mrb[6].mxu0 %vm294_vm1, %v3946_v54  ;;  %v3954_v7 = vld [vmem:[%s7353_s24 + $0x83] sm:$0xff] }
 0x25f   : > { %5987 = vmatprep.mubr.msk.f32.mxu1 %vm7299_vm0, %v7298_v2  ;;  %6549 = vmatprep.mubr.msk.f32.mxu0 %vm7299_vm0, %v7298_v2  ;;  %v2073_v54 = vld [vmem:[%s7353_s24 + $0x148] sm:$0xff] }
 0x262   : > { %5988 = vmatmul.mubr.msk.f32.gmra.mrb[50].mxu1 %vm294_vm1, %v8447_v11  ;;  %6550 = vmatmul.mubr.msk.f32.gmra.mrb[8].mxu0 %vm294_vm1, %v3947_v56  ;;  %v3956_v11 = vld [vmem:[%s7353_s24 + $0x93] sm:$0xff] }
 0x263   : > { %5990 = vmatprep.mubr.msk.f32.mxu1 %vm7299_vm0, %v7298_v2  ;;  %6552 = vmatprep.mubr.msk.f32.mxu0 %vm7299_vm0, %v7298_v2  ;;  %v3980_v56 = vld [vmem:[%s7353_s24 + $0x153] sm:$0xff] }
 0x266   : > { %5991 = vmatmul.mubr.msk.f32.gmra.mrb[52].mxu1 %vm294_vm1, %v8458_v15  ;;  %6553 = vmatmul.mubr.msk.f32.gmra.mrb[10].mxu0 %vm294_vm1, %v3948_v58  ;;  %v3958_v15 = vld [vmem:[%s7353_s24 + $0xa3] sm:$0xff] }
 0x267   : > { %5993 = vmatprep.mubr.msk.f32.mxu1 %vm7299_vm0, %v7298_v2  ;;  %6555 = vmatprep.mubr.msk.f32.mxu0 %vm7299_vm0, %v7298_v2 }
 0x26a   : > { %5994 = vmatmul.mubr.msk.f32.gmra.mrb[54].mxu1 %vm294_vm1, %v8469_v19  ;;  %6556 = vmatmul.mubr.msk.f32.gmra.mrb[12].mxu0 %vm294_vm1, %v3949_v60  ;;  %v3960_v19 = vld [vmem:[%s7353_s24 + $0xb3] sm:$0xff] }
 0x26b   : > { %5996 = vmatprep.mubr.msk.f32.mxu1 %vm7299_vm0, %v7298_v2  ;;  %6558 = vmatprep.mubr.msk.f32.mxu0 %vm7299_vm0, %v7298_v2 }
 0x26e   : > { %5997 = vmatmul.mubr.msk.f32.gmra.mrb[56].mxu1 %vm294_vm1, %v8480_v23  ;;  %6559 = vmatmul.mubr.msk.f32.gmra.mrb[14].mxu0 %vm294_vm1, %v3950_v62  ;;  %v3961_v23 = vld [vmem:[%s7353_s24 + $0xbb] sm:$0xff]  ;;  %v2074_v62 = vld [vmem:[%s7353_s24 + $0x150] sm:$0xff] }
 0x26f   : > { %5999 = vmatprep.mubr.msk.f32.mxu1 %vm7299_vm0, %v7298_v2  ;;  %6561 = vmatprep.mubr.msk.f32.mxu0 %vm7299_vm0, %v7298_v2 }
 0x272   : > { %6000 = vmatmul.mubr.msk.f32.gmra.mrb[58].mxu1 %vm294_vm1, %v8491_v53  ;;  %6562 = vmatmul.mubr.msk.f32.gmra.mrb[16].mxu0 %vm294_vm1, %v3951_v0  ;;  %v3962_v53 = vld [vmem:[%s7353_s24 + $0xc3] sm:$0xff]  ;;  %v3981_v0 = vld [vmem:[%s7353_s24 + $0x15b] sm:$0xff] }
 0x273   : > { %6002 = vmatprep.mubr.msk.f32.mxu1 %vm7299_vm0, %v7298_v2  ;;  %6564 = vmatprep.mubr.msk.f32.mxu0 %vm7299_vm0, %v7298_v2 }
 0x276   : > { %6003 = vmatmul.mubr.msk.f32.gmra.mrb[60].mxu1 %vm294_vm1, %v8502_v57  ;;  %6565 = vmatmul.mubr.msk.f32.gmra.mrb[18].mxu0 %vm294_vm1, %v3952_v3  ;;  %v3963_v57 = vld [vmem:[%s7353_s24 + $0xcb] sm:$0xff] }
 0x277   : > { %6005 = vmatprep.mubr.msk.f32.mxu1 %vm7299_vm0, %v7298_v2  ;;  %6567 = vmatprep.mubr.msk.f32.mxu0 %vm7299_vm0, %v7298_v2 }
 0x27a   : > { %6006 = vmatmul.mubr.msk.f32.gmra.mrb[62].mxu1 %vm294_vm1, %v8513_v61  ;;  %6568 = vmatmul.mubr.msk.f32.gmra.mrb[20].mxu0 %vm294_vm1, %v3953_v5  ;;  %v3964_v61 = vld [vmem:[%s7353_s24 + $0xd3] sm:$0xff] }
 0x27b   : > { %6008 = vmatprep.mubr.msk.f32.mxu1 %vm7299_vm0, %v7298_v2  ;;  %6570 = vmatprep.mubr.msk.f32.mxu0 %vm7299_vm0, %v7298_v2 }
 0x27e   : > { %6009 = vmatmul.mubr.msk.f32.gmra.mrb[64].mxu1 %vm294_vm1, %v8524_v1  ;;  %6571 = vmatmul.mubr.msk.f32.gmra.mrb[22].mxu0 %vm294_vm1, %v3954_v7  ;;  %v3965_v1 = vld [vmem:[%s7353_s24 + $0xdb] sm:$0xff] }
 0x27f   : > { %6011 = vmatprep.mubr.msk.f32.mxu1 %vm7299_vm0, %v7298_v2  ;;  %6573 = vmatprep.mubr.msk.f32.mxu0 %vm7299_vm0, %v7298_v2  ;;  %v2075_v7 = vld [vmem:[%s7353_s24 + $0x158] sm:$0xff] }
 0x282   : > { %6012 = vmatmul.mubr.msk.f32.gmra.mrb[66].mxu1 %vm294_vm1, %v8535_v6  ;;  %6574 = vmatmul.mubr.msk.f32.gmra.mrb[24].mxu0 %vm294_vm1, %v3955_v9  ;;  %v3966_v6 = vld [vmem:[%s7353_s24 + $0xe3] sm:$0xff] }
 0x283   : > { %6014 = vmatprep.mubr.msk.f32.mxu1 %vm7299_vm0, %v7298_v2  ;;  %6576 = vmatprep.mubr.msk.f32.mxu0 %vm7299_vm0, %v7298_v2  ;;  %v3982_v9 = vld [vmem:[%s7353_s24 + $0x163] sm:$0xff] }
 0x286   : > { %6015 = vmatmul.mubr.msk.f32.gmra.mrb[68].mxu1 %vm294_vm1, %v8546_v10  ;;  %6577 = vmatmul.mubr.msk.f32.gmra.mrb[26].mxu0 %vm294_vm1, %v3956_v11  ;;  %v3967_v10 = vld [vmem:[%s7353_s24 + $0xeb] sm:$0xff] }
 0x287   : > { %6017 = vmatprep.mubr.msk.f32.mxu1 %vm7299_vm0, %v7298_v2  ;;  %6579 = vmatprep.mubr.msk.f32.mxu0 %vm7299_vm0, %v7298_v2 }
 0x28a   : > { %6018 = vmatmul.mubr.msk.f32.gmra.mrb[70].mxu1 %vm294_vm1, %v8557_v14  ;;  %6580 = vmatmul.mubr.msk.f32.gmra.mrb[28].mxu0 %vm294_vm1, %v3957_v13  ;;  %v3968_v14 = vld [vmem:[%s7353_s24 + $0xf3] sm:$0xff] }
 0x28b   : > { %6020 = vmatprep.mubr.msk.f32.mxu1 %vm7299_vm0, %v7298_v2  ;;  %6582 = vmatprep.mubr.msk.f32.mxu0 %vm7299_vm0, %v7298_v2 }
 0x28e   : > { %6021 = vmatmul.mubr.msk.f32.gmra.mrb[72].mxu1 %vm294_vm1, %v8568_v18  ;;  %6583 = vmatmul.mubr.msk.f32.gmra.mrb[30].mxu0 %vm294_vm1, %v3958_v15  ;;  %v3969_v18 = vld [vmem:[%s7353_s24 + $0xfb] sm:$0xff]  ;;  %v3983_v15 = vld [vmem:[%s7353_s24 + $0x16b] sm:$0xff] }
 0x28f   : > { %6023 = vmatprep.mubr.msk.f32.mxu1 %vm7299_vm0, %v7298_v2  ;;  %6585 = vmatprep.mubr.msk.f32.mxu0 %vm7299_vm0, %v7298_v2 }
 0x292   : > { %6024 = vmatmul.mubr.msk.f32.gmra.mrb[74].mxu1 %vm294_vm1, %v8579_v22  ;;  %6586 = vmatmul.mubr.msk.f32.gmra.mrb[32].mxu0 %vm294_vm1, %v3959_v17  ;;  %v3970_v22 = vld [vmem:[%s7353_s24 + $0x103] sm:$0xff] }
 0x293   : > { %6026 = vmatprep.mubr.msk.f32.mxu1 %vm7299_vm0, %v7298_v2  ;;  %6588 = vmatprep.mubr.msk.f32.mxu0 %vm7299_vm0, %v7298_v2 }
 0x296   : > { %6027 = vmatmul.mubr.msk.f32.gmra.mrb[76].mxu1 %vm294_vm1, %v8590_v26  ;;  %6589 = vmatmul.mubr.msk.f32.gmra.mrb[34].mxu0 %vm294_vm1, %v3960_v19  ;;  %v3971_v26 = vld [vmem:[%s7353_s24 + $0x10b] sm:$0xff] }
 0x297   : > { %6029 = vmatprep.mubr.msk.f32.mxu1 %vm7299_vm0, %v7298_v2  ;;  %6591 = vmatprep.mubr.msk.f32.mxu0 %vm7299_vm0, %v7298_v2 }
 0x29a   : > { %6030 = vmatmul.mubr.msk.f32.gmra.mrb[78].mxu1 %vm294_vm1, %v1597_v21  ;;  %6592 = vmatmul.mubr.msk.f32.gmra.mrb[36].mxu0 %vm294_vm1, %v3961_v23 }
 0x29b   : > { %6032 = vmatprep.mubr.msk.f32.mxu1 %vm7299_vm0, %v7298_v2  ;;  %6594 = vmatprep.mubr.msk.f32.mxu0 %vm7299_vm0, %v7298_v2 }
 0x29e   : > { %6033 = vmatmul.mubr.msk.f32.gmra.mrb[80].mxu1 %vm294_vm1, %v1598_v25  ;;  %6595 = vmatmul.mubr.msk.f32.gmra.mrb[38].mxu0 %vm294_vm1, %v3962_v53 }
 0x29f   : > { %6100 = vmatprep.mubr.msk.f32.mxu1 %vm7299_vm0, %v7298_v2  ;;  %6597 = vmatprep.mubr.msk.f32.mxu0 %vm7299_vm0, %v7298_v2 }
 0x2a2   : > { %6101 = vmatmul.mubr.msk.f32.vlgmr.msra.gmra.mrb[42].mxu1 %vm294_vm1, %v2056_v55  ;;  %6598 = vmatmul.mubr.msk.f32.gmra.mrb[40].mxu0 %vm294_vm1, %v3963_v57 }
 0x2a3   : > { %6103 = vmatprep.mubr.msk.f32.mxu1 %vm7299_vm0, %v7298_v2  ;;  %6600 = vmatprep.mubr.msk.f32.mxu0 %vm7299_vm0, %v7298_v2 }
 0x2a6   : > { %6104 = vmatmul.mubr.msk.f32.gmra.mrb[44].mxu1 %vm294_vm1, %v2057_v59  ;;  %6601 = vmatmul.mubr.msk.f32.gmra.mrb[42].mxu0 %vm294_vm1, %v3964_v61 }
 0x2a7   : > { %6106 = vmatprep.mubr.msk.f32.mxu1 %vm7299_vm0, %v7298_v2  ;;  %6603 = vmatprep.mubr.msk.f32.mxu0 %vm7299_vm0, %v7298_v2 }
 0x2aa   : > { %6107 = vmatmul.mubr.msk.f32.gmra.mrb[46].mxu1 %vm294_vm1, %v2058_v63  ;;  %6604 = vmatmul.mubr.msk.f32.gmra.mrb[44].mxu0 %vm294_vm1, %v3965_v1 }
 0x2ab   : > { %6109 = vmatprep.mubr.msk.f32.mxu1 %vm7299_vm0, %v7298_v2  ;;  %6606 = vmatprep.mubr.msk.f32.mxu0 %vm7299_vm0, %v7298_v2 }
 0x2ae   : > { %6110 = vmatmul.mubr.msk.f32.gmra.mrb[48].mxu1 %vm294_vm1, %v2059_v4  ;;  %6607 = vmatmul.mubr.msk.f32.gmra.mrb[46].mxu0 %vm294_vm1, %v3966_v6 }
 0x2af   : > { %6112 = vmatprep.mubr.msk.f32.mxu1 %vm7299_vm0, %v7298_v2  ;;  %6609 = vmatprep.mubr.msk.f32.mxu0 %vm7299_vm0, %v7298_v2 }
 0x2b2   : > { %6113 = vmatmul.mubr.msk.f32.gmra.mrb[50].mxu1 %vm294_vm1, %v2060_v8  ;;  %6610 = vmatmul.mubr.msk.f32.gmra.mrb[48].mxu0 %vm294_vm1, %v3967_v10 }
 0x2b3   : > { %6115 = vmatprep.mubr.msk.f32.mxu1 %vm7299_vm0, %v7298_v2  ;;  %6612 = vmatprep.mubr.msk.f32.mxu0 %vm7299_vm0, %v7298_v2 }
 0x2b6   : > { %6116 = vmatmul.mubr.msk.f32.gmra.mrb[52].mxu1 %vm294_vm1, %v2061_v12  ;;  %6613 = vmatmul.mubr.msk.f32.gmra.mrb[50].mxu0 %vm294_vm1, %v3968_v14 }
 0x2b7   : > { %6118 = vmatprep.mubr.msk.f32.mxu1 %vm7299_vm0, %v7298_v2  ;;  %6615 = vmatprep.mubr.msk.f32.mxu0 %vm7299_vm0, %v7298_v2 }
 0x2ba   : > { %6119 = vmatmul.mubr.msk.f32.gmra.mrb[54].mxu1 %vm294_vm1, %v2062_v16  ;;  %6616 = vmatmul.mubr.msk.f32.gmra.mrb[52].mxu0 %vm294_vm1, %v3969_v18 }
 0x2bb   : > { %6121 = vmatprep.mubr.msk.f32.mxu1 %vm7299_vm0, %v7298_v2  ;;  %6618 = vmatprep.mubr.msk.f32.mxu0 %vm7299_vm0, %v7298_v2 }
 0x2be   : > { %6122 = vmatmul.mubr.msk.f32.gmra.mrb[56].mxu1 %vm294_vm1, %v2063_v20  ;;  %6619 = vmatmul.mubr.msk.f32.gmra.mrb[54].mxu0 %vm294_vm1, %v3970_v22 }
 0x2bf   : > { %6124 = vmatprep.mubr.msk.f32.mxu1 %vm7299_vm0, %v7298_v2  ;;  %6621 = vmatprep.mubr.msk.f32.mxu0 %vm7299_vm0, %v7298_v2 }
 0x2c2   : > { %6125 = vmatmul.mubr.msk.f32.gmra.mrb[58].mxu1 %vm294_vm1, %v2064_v24  ;;  %6622 = vmatmul.mubr.msk.f32.gmra.mrb[56].mxu0 %vm294_vm1, %v3971_v26 }
 0x2c3   : > { %6127 = vmatprep.mubr.msk.f32.mxu1 %vm7299_vm0, %v7298_v2  ;;  %6624 = vmatprep.mubr.msk.f32.mxu0 %vm7299_vm0, %v7298_v2 }
 0x2c6   : > { %6128 = vmatmul.mubr.msk.f32.gmra.mrb[60].mxu1 %vm294_vm1, %v2065_v27  ;;  %6625 = vmatmul.mubr.msk.f32.gmra.mrb[58].mxu0 %vm294_vm1, %v3972_v28 }
 0x2c7   : > { %6130 = vmatprep.mubr.msk.f32.mxu1 %vm7299_vm0, %v7298_v2  ;;  %6627 = vmatprep.mubr.msk.f32.mxu0 %vm7299_vm0, %v7298_v2 }
 0x2ca   : > { %6131 = vmatmul.mubr.msk.f32.gmra.mrb[62].mxu1 %vm294_vm1, %v2066_v47  ;;  %6628 = vmatmul.mubr.msk.f32.gmra.mrb[60].mxu0 %vm294_vm1, %v3973_v49 }
 0x2cb   : > { %6133 = vmatprep.mubr.msk.f32.mxu1 %vm7299_vm0, %v7298_v2  ;;  %6630 = vmatprep.mubr.msk.f32.mxu0 %vm7299_vm0, %v7298_v2 }
 0x2ce   : > { %6134 = vmatmul.mubr.msk.f32.gmra.mrb[64].mxu1 %vm294_vm1, %v2067_v29  ;;  %6631 = vmatmul.mubr.msk.f32.gmra.mrb[62].mxu0 %vm294_vm1, %v3974_v30  ;;  %v4461_v29 = vld [vmem:[%s9333_s2] sm:$0xff] }
 0x2cf   : > { %6136 = vmatprep.mubr.msk.f32.mxu1 %vm7299_vm0, %v7298_v2  ;;  %6633 = vmatprep.mubr.msk.f32.mxu0 %vm7299_vm0, %v7298_v2 }
 0x2d1   : > { %v9029_v33 = vpop.f32.mrb[0].mxu1 }
 0x2d2   : > { %v5914_v34 = vpop.f32.mrb[1].mxu1  ;;  %6137 = vmatmul.mubr.msk.f32.gmra.mrb[66].mxu1 %vm294_vm1, %v2068_v31  ;;  %6634 = vmatmul.mubr.msk.f32.gmra.mrb[64].mxu0 %vm294_vm1, %v3975_v32  ;;  %v4462_v31 = vld [vmem:[%s9333_s2 + $0x8] sm:$0xff] }
 0x2d3   : > { %6139 = vmatprep.mubr.msk.f32.mxu1 %vm7299_vm0, %v7298_v2  ;;  %6636 = vmatprep.mubr.msk.f32.mxu0 %vm7299_vm0, %v7298_v2 }
 0x2d5   : > { %v9039_v37 = vpop.f32.mrb[2].mxu1 }
 0x2d6   : > { %v5917_v38 = vpop.f32.mrb[3].mxu1  ;;  %6140 = vmatmul.mubr.msk.f32.gmra.mrb[68].mxu1 %vm294_vm1, %v2069_v35  ;;  %6637 = vmatmul.mubr.msk.f32.gmra.mrb[66].mxu0 %vm294_vm1, %v3976_v36 }
 0x2d7   : > { %6142 = vmatprep.mubr.msk.f32.mxu1 %vm7299_vm0, %v7298_v2  ;;  %6639 = vmatprep.mubr.msk.f32.mxu0 %vm7299_vm0, %v7298_v2 }
 0x2d9   : > { %v9049_v41 = vpop.f32.mrb[4].mxu1 }
 0x2da   : > { %v5920_v42 = vpop.f32.mrb[5].mxu1  ;;  %6143 = vmatmul.mubr.msk.f32.gmra.mrb[70].mxu1 %vm294_vm1, %v2070_v39  ;;  %6640 = vmatmul.mubr.msk.f32.gmra.mrb[68].mxu0 %vm294_vm1, %v3977_v40 }
 0x2db   : > { %6145 = vmatprep.mubr.msk.f32.mxu1 %vm7299_vm0, %v7298_v2  ;;  %6642 = vmatprep.mubr.msk.f32.mxu0 %vm7299_vm0, %v7298_v2 }
 0x2dd   : > { %v9059_v45 = vpop.f32.mrb[6].mxu1 }
 0x2de   : > { %v5923_v46 = vpop.f32.mrb[7].mxu1  ;;  %6146 = vmatmul.mubr.msk.f32.gmra.mrb[72].mxu1 %vm294_vm1, %v2071_v43  ;;  %6643 = vmatmul.mubr.msk.f32.gmra.mrb[70].mxu0 %vm294_vm1, %v3978_v44 }
 0x2df   : > { %6148 = vmatprep.mubr.msk.f32.mxu1 %vm7299_vm0, %v7298_v2  ;;  %6645 = vmatprep.mubr.msk.f32.mxu0 %vm7299_vm0, %v7298_v2 }
 0x2e1   : > { %v9069_v51 = vpop.f32.mrb[8].mxu1 }
 0x2e2   : > { %v5926_v52 = vpop.f32.mrb[9].mxu1  ;;  %6149 = vmatmul.mubr.msk.f32.gmra.mrb[74].mxu1 %vm294_vm1, %v2072_v48  ;;  %6646 = vmatmul.mubr.msk.f32.gmra.mrb[72].mxu0 %vm294_vm1, %v3979_v50 }
 0x2e3   : > { %6151 = vmatprep.mubr.msk.f32.mxu1 %vm7299_vm0, %v7298_v2  ;;  %6648 = vmatprep.mubr.msk.f32.mxu0 %vm7299_vm0, %v7298_v2 }
 0x2e5   : > { %v9079_v58 = vpop.f32.mrb[10].mxu1 }
 0x2e6   : > { %v5929_v60 = vpop.f32.mrb[11].mxu1  ;;  %6152 = vmatmul.mubr.msk.f32.gmra.mrb[76].mxu1 %vm294_vm1, %v2073_v54  ;;  %6649 = vmatmul.mubr.msk.f32.gmra.mrb[74].mxu0 %vm294_vm1, %v3980_v56 }
 0x2e7   : > { %6154 = vmatprep.mubr.msk.f32.mxu1 %vm7299_vm0, %v7298_v2  ;;  %6651 = vmatprep.mubr.msk.f32.mxu0 %vm7299_vm0, %v7298_v2 }
 0x2e9   : > { %v9089_v3 = vpop.f32.mrb[12].mxu1 }
 0x2ea   : > { %v5932_v5 = vpop.f32.mrb[13].mxu1  ;;  %6155 = vmatmul.mubr.msk.f32.gmra.mrb[78].mxu1 %vm294_vm1, %v2074_v62  ;;  %6652 = vmatmul.mubr.msk.f32.gmra.mrb[76].mxu0 %vm294_vm1, %v3981_v0 }
 0x2eb   : > { %6157 = vmatprep.mubr.msk.f32.mxu1 %vm7299_vm0, %v7298_v2  ;;  %6654 = vmatprep.mubr.msk.f32.mxu0 %vm7299_vm0, %v7298_v2 }
 0x2ed   : > { %v9099_v11 = vpop.f32.mrb[14].mxu1 }
 0x2ee   : > { %v5935_v13 = vpop.f32.mrb[15].mxu1  ;;  %6158 = vmatmul.mubr.msk.f32.gmra.mrb[80].mxu1 %vm294_vm1, %v2075_v7  ;;  %6655 = vmatmul.mubr.msk.f32.gmra.mrb[78].mxu0 %vm294_vm1, %v3982_v9 }
 0x2ef   : > { %6657 = vmatprep.mubr.msk.f32.mxu0 %vm7299_vm0, %v7298_v2 }
 0x2f1   : > { %v9106_v17 = vpop.f32.mrb[16].mxu1 }
 0x2f2   : > { %v5938_v19 = vpop.f32.mrb[17].mxu1  ;;  %6658 = vmatmul.mubr.msk.f32.gmra.mrb[80].mxu0 %vm294_vm1, %v3983_v15 }
 0x2f5   : > { %v9109_v21 = vpop.f32.mrb[18].mxu1 }
 0x2f6   : > { %v5941_v23 = vpop.f32.mrb[19].mxu1 }
 0x2f9   : > { %v9111_v25 = vpop.f32.mrb[20].mxu1 }
 0x2fa   : > { %v5944_v53 = vpop.f32.mrb[21].mxu1 }
 0x2fd   : > { %v9113_v55 = vpop.f32.mrb[22].mxu1 }
 0x2fe   : > { %v5947_v57 = vpop.f32.mrb[23].mxu1 }
 0x301   : > { %v9115_v59 = vpop.f32.mrb[24].mxu1 }
 0x302   : > { %v5950_v61 = vpop.f32.mrb[25].mxu1 }
 0x305   : > { %v9117_v2 = vpop.f32.mrb[26].mxu1 }
 0x306   : > { %v5953_v63 = vpop.f32.mrb[27].mxu1 }
 0x309   : > { %v9119_v1 = vpop.f32.mrb[28].mxu1 }
 0x30a   : > { %v5956_v4 = vpop.f32.mrb[29].mxu1 }
 0x30d   : > { %v9121_v6 = vpop.f32.mrb[30].mxu1 }
 0x30e   : > { %v5959_v8 = vpop.f32.mrb[31].mxu1 }
 0x311   : > { %v9123_v10 = vpop.f32.mrb[32].mxu1 }
 0x312   : > { %v5962_v12 = vpop.f32.mrb[33].mxu1 }
 0x315   : > { %v9125_v14 = vpop.f32.mrb[34].mxu1 }
 0x316   : > { %v5965_v16 = vpop.f32.mrb[35].mxu1 }
 0x319   : > { %v9127_v18 = vpop.f32.mrb[36].mxu1 }
 0x31a   : > { %v5968_v20 = vpop.f32.mrb[37].mxu1 }
 0x31d   : > { %v9129_v22 = vpop.f32.mrb[38].mxu1 }
 0x31e   : > { %v5971_v24 = vpop.f32.mrb[39].mxu1 }
 0x321   : > { %v9131_v26 = vpop.f32.mrb[40].mxu1 }
 0x322   : > { %v5974_v27 = vpop.f32.mrb[41].mxu1 }
 0x325   : > { %v4175_v28 = vpop.f32.mrb[0].mxu0 }
 0x326   : > { %v6662_v47 = vadd.f32 %v4175_v28, %v9029_v33  ;;  %v6539_v49 = vpop.f32.mrb[1].mxu0  ;;  %v4463_v33 = vld [vmem:[%s9333_s2 + $0x10] sm:$0xff] }
 0x328   : > { %4420 = vst [vmem:[%s9137_s20] sm:$0xff] %v6662_v47  ;;  %v4502_v32 = vmul.f32 %v6662_v47, %v4461_v29 }
 0x329   : > { %v4180_v30 = vpop.f32.mrb[2].mxu0 }
 0x32a   : > { %v6663_v34 = vadd.f32 %v4180_v30, %v9039_v37  ;;  %v6542_v35 = vpop.f32.mrb[3].mxu0  ;;  %v4589_v39 = vmul.f32 %v4502_v32, %v4502_v32  ;;  %v4464_v37 = vld [vmem:[%s9333_s2 + $0x18] sm:$0xff] }
 0x32c   : > { %4421 = vst [vmem:[%s9137_s20 + $0x8] sm:$0xff] %v6663_v34  ;;  %v4503_v36 = vmul.f32 %v6663_v34, %v4462_v31 }
 0x32d   : > { %v4185_v38 = vpop.f32.mrb[4].mxu0 }
 0x32e   : > { %v4543_v40 = vadd.f32 %v4503_v36, %v4502_v32  ;;  %v4590_v42 = vmul.f32 %v4503_v36, %v4503_v36  ;;  %v6664_v43 = vadd.f32 %v4185_v38, %v9049_v41  ;;  %v6545_v44 = vpop.f32.mrb[5].mxu0  ;;  %v4465_v41 = vld [vmem:[%s9333_s2 + $0x20] sm:$0xff] }
 0x330   : > { %v4630_v46 = vadd.f32 %v4590_v42, %v4589_v39  ;;  %4422 = vst [vmem:[%s9137_s20 + $0x10] sm:$0xff] %v6664_v43  ;;  %v4504_v48 = vmul.f32 %v6664_v43, %v4463_v33 }
 0x331   : > { %v4190_v50 = vpop.f32.mrb[6].mxu0 }
 0x332   : > { %v4544_v52 = vadd.f32 %v4543_v40, %v4504_v48  ;;  %v4591_v54 = vmul.f32 %v4504_v48, %v4504_v48  ;;  %v6665_v56 = vadd.f32 %v4190_v50, %v9059_v45  ;;  %v6548_v60 = vpop.f32.mrb[7].mxu0  ;;  %v4466_v45 = vld [vmem:[%s9333_s2 + $0x28] sm:$0xff] }
 0x334   : > { %v4631_v62 = vadd.f32 %v4630_v46, %v4591_v54  ;;  %4423 = vst [vmem:[%s9137_s20 + $0x18] sm:$0xff] %v6665_v56  ;;  %v4505_v0 = vmul.f32 %v6665_v56, %v4464_v37 }
 0x335   : > { %v4195_v5 = vpop.f32.mrb[8].mxu0 }
 0x336   : > { %v4545_v7 = vadd.f32 %v4544_v52, %v4505_v0  ;;  %v4592_v9 = vmul.f32 %v4505_v0, %v4505_v0  ;;  %v6666_v13 = vadd.f32 %v4195_v5, %v9069_v51  ;;  %v6551_v15 = vpop.f32.mrb[9].mxu0  ;;  %v4467_v51 = vld [vmem:[%s9333_s2 + $0x30] sm:$0xff] }
 0x338   : > { %v4632_v19 = vadd.f32 %v4631_v62, %v4592_v9  ;;  %4424 = vst [vmem:[%s9137_s20 + $0x20] sm:$0xff] %v6666_v13  ;;  %v4506_v23 = vmul.f32 %v6666_v13, %v4465_v41 }
 0x339   : > { %v4200_v53 = vpop.f32.mrb[10].mxu0 }
 0x33a   : > { %v4546_v57 = vadd.f32 %v4545_v7, %v4506_v23  ;;  %v4593_v61 = vmul.f32 %v4506_v23, %v4506_v23  ;;  %v6667_v63 = vadd.f32 %v4200_v53, %v9079_v58  ;;  %v6554_v4 = vpop.f32.mrb[11].mxu0  ;;  %v4468_v58 = vld [vmem:[%s9333_s2 + $0x38] sm:$0xff] }
 0x33c   : > { %v4633_v8 = vadd.f32 %v4632_v19, %v4593_v61  ;;  %4425 = vst [vmem:[%s9137_s20 + $0x28] sm:$0xff] %v6667_v63  ;;  %v4507_v12 = vmul.f32 %v6667_v63, %v4466_v45 }
 0x33d   : > { %v4205_v16 = vpop.f32.mrb[12].mxu0 }
 0x33e   : > { %v4547_v20 = vadd.f32 %v4546_v57, %v4507_v12  ;;  %v4594_v24 = vmul.f32 %v4507_v12, %v4507_v12  ;;  %v6668_v27 = vadd.f32 %v4205_v16, %v9089_v3  ;;  %v6557_v28 = vpop.f32.mrb[13].mxu0  ;;  %v4469_v3 = vld [vmem:[%s9333_s2 + $0x40] sm:$0xff] }
 0x340   : > { %v4634_v47 = vadd.f32 %v4633_v8, %v4594_v24  ;;  %4426 = vst [vmem:[%s9137_s20 + $0x30] sm:$0xff] %v6668_v27  ;;  %v4508_v49 = vmul.f32 %v6668_v27, %v4467_v51 }
 0x341   : > { %v4210_v29 = vpop.f32.mrb[14].mxu0 }
 0x342   : > { %v4548_v30 = vadd.f32 %v4547_v20, %v4508_v49  ;;  %v4595_v31 = vmul.f32 %v4508_v49, %v4508_v49  ;;  %v6669_v32 = vadd.f32 %v4210_v29, %v9099_v11  ;;  %v6560_v34 = vpop.f32.mrb[15].mxu0  ;;  %v4470_v11 = vld [vmem:[%s9333_s2 + $0x48] sm:$0xff] }
 0x344   : > { %v4635_v35 = vadd.f32 %v4634_v47, %v4595_v31  ;;  %4427 = vst [vmem:[%s9137_s20 + $0x38] sm:$0xff] %v6669_v32  ;;  %v4509_v36 = vmul.f32 %v6669_v32, %v4468_v58 }
 0x345   : > { %v4215_v38 = vpop.f32.mrb[16].mxu0 }
 0x346   : > { %v4549_v33 = vadd.f32 %v4548_v30, %v4509_v36  ;;  %v4596_v39 = vmul.f32 %v4509_v36, %v4509_v36  ;;  %v6670_v40 = vadd.f32 %v4215_v38, %v9106_v17  ;;  %v6563_v42 = vpop.f32.mrb[17].mxu0  ;;  %v4471_v17 = vld [vmem:[%s9333_s2 + $0x50] sm:$0xff] }
 0x348   : > { %v4636_v43 = vadd.f32 %v4635_v35, %v4596_v39  ;;  %4428 = vst [vmem:[%s9137_s20 + $0x40] sm:$0xff] %v6670_v40  ;;  %v4510_v44 = vmul.f32 %v6670_v40, %v4469_v3 }
 0x349   : > { %v4220_v46 = vpop.f32.mrb[18].mxu0 }
 0x34a   : > { %v4550_v48 = vadd.f32 %v4549_v33, %v4510_v44  ;;  %v4597_v50 = vmul.f32 %v4510_v44, %v4510_v44  ;;  %v6671_v37 = vadd.f32 %v4220_v46, %v9109_v21  ;;  %v6566_v52 = vpop.f32.mrb[19].mxu0  ;;  %v4472_v21 = vld [vmem:[%s9333_s2 + $0x58] sm:$0xff] }
 0x34c   : > { %v4637_v54 = vadd.f32 %v4636_v43, %v4597_v50  ;;  %4429 = vst [vmem:[%s9137_s20 + $0x48] sm:$0xff] %v6671_v37  ;;  %v4511_v56 = vmul.f32 %v6671_v37, %v4470_v11 }
 0x34d   : > { %v4225_v60 = vpop.f32.mrb[20].mxu0 }
 0x34e   : > { %v4551_v62 = vadd.f32 %v4550_v48, %v4511_v56  ;;  %v4598_v0 = vmul.f32 %v4511_v56, %v4511_v56  ;;  %v6672_v5 = vadd.f32 %v4225_v60, %v9111_v25  ;;  %v6569_v41 = vpop.f32.mrb[21].mxu0  ;;  %v4473_v25 = vld [vmem:[%s9333_s2 + $0x60] sm:$0xff] }
 0x350   : > { %v4638_v7 = vadd.f32 %v4637_v54, %v4598_v0  ;;  %4430 = vst [vmem:[%s9137_s20 + $0x50] sm:$0xff] %v6672_v5  ;;  %v4512_v9 = vmul.f32 %v6672_v5, %v4471_v17 }
 0x351   : > { %v4230_v13 = vpop.f32.mrb[22].mxu0 }
 0x352   : > { %v4552_v15 = vadd.f32 %v4551_v62, %v4512_v9  ;;  %v4599_v19 = vmul.f32 %v4512_v9, %v4512_v9  ;;  %v6673_v23 = vadd.f32 %v4230_v13, %v9113_v55  ;;  %v6572_v53 = vpop.f32.mrb[23].mxu0  ;;  %v4474_v55 = vld [vmem:[%s9333_s2 + $0x68] sm:$0xff] }
 0x354   : > { %v4639_v45 = vadd.f32 %v4638_v7, %v4599_v19  ;;  %4431 = vst [vmem:[%s9137_s20 + $0x58] sm:$0xff] %v6673_v23  ;;  %v4513_v57 = vmul.f32 %v6673_v23, %v4472_v21 }
 0x355   : > { %v4235_v61 = vpop.f32.mrb[24].mxu0 }
 0x356   : > { %v4553_v63 = vadd.f32 %v4552_v15, %v4513_v57  ;;  %v4600_v4 = vmul.f32 %v4513_v57, %v4513_v57  ;;  %v6674_v8 = vadd.f32 %v4235_v61, %v9115_v59  ;;  %v6575_v12 = vpop.f32.mrb[25].mxu0  ;;  %v4475_v59 = vld [vmem:[%s9333_s2 + $0x70] sm:$0xff] }
 0x358   : > { %v4640_v16 = vadd.f32 %v4639_v45, %v4600_v4  ;;  %4432 = vst [vmem:[%s9137_s20 + $0x60] sm:$0xff] %v6674_v8  ;;  %v4514_v51 = vmul.f32 %v6674_v8, %v4473_v25  ;;  %v4481_v8 = vld [vmem:[%s9333_s2 + $0xa0] sm:$0xff] }
 0x359   : > { %v4240_v20 = vpop.f32.mrb[26].mxu0 }
 0x35a   : > { %v4554_v24 = vadd.f32 %v4553_v63, %v4514_v51  ;;  %v4601_v27 = vmul.f32 %v4514_v51, %v4514_v51  ;;  %v6675_v28 = vadd.f32 %v4240_v20, %v9117_v2  ;;  %v6578_v47 = vpop.f32.mrb[27].mxu0  ;;  %v4476_v2 = vld [vmem:[%s9333_s2 + $0x78] sm:$0xff] }
 0x35b   : > { %v4482_v47 = vld [vmem:[%s9333_s2 + $0xa8] sm:$0xff] }
 0x35c   : > { %v4641_v49 = vadd.f32 %v4640_v16, %v4601_v27  ;;  %4433 = vst [vmem:[%s9137_s20 + $0x68] sm:$0xff] %v6675_v28  ;;  %v4515_v29 = vmul.f32 %v6675_v28, %v4474_v55 }
 0x35d   : > { %v4245_v58 = vpop.f32.mrb[28].mxu0 }
 0x35e   : > { %v4555_v30 = vadd.f32 %v4554_v24, %v4515_v29  ;;  %v4602_v31 = vmul.f32 %v4515_v29, %v4515_v29  ;;  %v6676_v32 = vadd.f32 %v4245_v58, %v9119_v1  ;;  %v6581_v34 = vpop.f32.mrb[29].mxu0  ;;  %v4477_v1 = vld [vmem:[%s9333_s2 + $0x80] sm:$0xff] }
 0x360   : > { %v4642_v35 = vadd.f32 %v4641_v49, %v4602_v31  ;;  %4434 = vst [vmem:[%s9137_s20 + $0x70] sm:$0xff] %v6676_v32  ;;  %v4516_v36 = vmul.f32 %v6676_v32, %v4475_v59 }
 0x361   : > { %v4250_v38 = vpop.f32.mrb[30].mxu0 }
 0x362   : > { %v4556_v3 = vadd.f32 %v4555_v30, %v4516_v36  ;;  %v4603_v33 = vmul.f32 %v4516_v36, %v4516_v36  ;;  %v6677_v39 = vadd.f32 %v4250_v38, %v9121_v6  ;;  %v6584_v40 = vpop.f32.mrb[31].mxu0  ;;  %v4478_v6 = vld [vmem:[%s9333_s2 + $0x88] sm:$0xff] }
 0x364   : > { %v4643_v42 = vadd.f32 %v4642_v35, %v4603_v33  ;;  %4435 = vst [vmem:[%s9137_s20 + $0x78] sm:$0xff] %v6677_v39  ;;  %v4517_v43 = vmul.f32 %v6677_v39, %v4476_v2  ;;  %v4483_v35 = vld [vmem:[%s9333_s2 + $0xb0] sm:$0xff] }
 0x365   : > { %v4255_v44 = vpop.f32.mrb[32].mxu0 }
 0x366   : > { %v4557_v46 = vadd.f32 %v4556_v3, %v4517_v43  ;;  %v4604_v11 = vmul.f32 %v4517_v43, %v4517_v43  ;;  %v6678_v48 = vadd.f32 %v4255_v44, %v9123_v10  ;;  %v6587_v50 = vpop.f32.mrb[33].mxu0  ;;  %v4479_v10 = vld [vmem:[%s9333_s2 + $0x90] sm:$0xff]  ;;  %v4484_v44 = vld [vmem:[%s9333_s2 + $0xb8] sm:$0xff] }
 0x368   : > { %v4644_v37 = vadd.f32 %v4643_v42, %v4604_v11  ;;  %4436 = vst [vmem:[%s9137_s20 + $0x80] sm:$0xff] %v6678_v48  ;;  %v4518_v52 = vmul.f32 %v6678_v48, %v4477_v1 }
 0x369   : > { %v4260_v54 = vpop.f32.mrb[34].mxu0 }
 0x36a   : > { %v4558_v56 = vadd.f32 %v4557_v46, %v4518_v52  ;;  %v4605_v60 = vmul.f32 %v4518_v52, %v4518_v52  ;;  %v6679_v17 = vadd.f32 %v4260_v54, %v9125_v14  ;;  %v6590_v62 = vpop.f32.mrb[35].mxu0  ;;  %v4480_v14 = vld [vmem:[%s9333_s2 + $0x98] sm:$0xff] }
 0x36c   : > { %v4645_v0 = vadd.f32 %v4644_v37, %v4605_v60  ;;  %4437 = vst [vmem:[%s9137_s20 + $0x88] sm:$0xff] %v6679_v17  ;;  %v4519_v5 = vmul.f32 %v6679_v17, %v4478_v6 }
 0x36d   : > { %v4265_v41 = vpop.f32.mrb[36].mxu0 }
 0x36e   : > { %v4559_v7 = vadd.f32 %v4558_v56, %v4519_v5  ;;  %v4606_v9 = vmul.f32 %v4519_v5, %v4519_v5  ;;  %v6680_v13 = vadd.f32 %v4265_v41, %v9127_v18  ;;  %v6593_v21 = vpop.f32.mrb[37].mxu0  ;;  %v4485_v56 = vld [vmem:[%s9333_s2 + $0xc0] sm:$0xff] }
 0x370   : > { %v4646_v15 = vadd.f32 %v4645_v0, %v4606_v9  ;;  %4438 = vst [vmem:[%s9137_s20 + $0x90] sm:$0xff] %v6680_v13  ;;  %v4520_v19 = vmul.f32 %v6680_v13, %v4479_v10  ;;  %v4486_v13 = vld [vmem:[%s9333_s2 + $0xc8] sm:$0xff] }
 0x371   : > { %v4270_v23 = vpop.f32.mrb[38].mxu0 }
 0x372   : > { %v4560_v53 = vadd.f32 %v4559_v7, %v4520_v19  ;;  %v4607_v45 = vmul.f32 %v4520_v19, %v4520_v19  ;;  %v6681_v57 = vadd.f32 %v4270_v23, %v9129_v22  ;;  %v6596_v61 = vpop.f32.mrb[39].mxu0 }
 0x374   : > { %v4647_v25 = vadd.f32 %v4646_v15, %v4607_v45  ;;  %4439 = vst [vmem:[%s9137_s20 + $0x98] sm:$0xff] %v6681_v57  ;;  %v4521_v63 = vmul.f32 %v6681_v57, %v4480_v14 }
 0x375   : > { %v2372_v4 = vpop.f32.mrb[42].mxu1  ;;  %v4275_v18 = vpop.f32.mrb[40].mxu0 }
 0x376   : > { %v4561_v12 = vadd.f32 %v4560_v53, %v4521_v63  ;;  %v4608_v16 = vmul.f32 %v4521_v63, %v4521_v63  ;;  %v6682_v51 = vadd.f32 %v4275_v18, %v9131_v26  ;;  %v6102_v20 = vpop.f32.mrb[43].mxu1  ;;  %v6599_v55 = vpop.f32.mrb[41].mxu0 }
 0x378   : > { %v4648_v24 = vadd.f32 %v4647_v25, %v4608_v16  ;;  %4440 = vst [vmem:[%s9137_s20 + $0xa0] sm:$0xff] %v6682_v51  ;;  %v4522_v22 = vmul.f32 %v6682_v51, %v4481_v8  ;;  %v4487_v25 = vld [vmem:[%s9333_s2 + $0xd0] sm:$0xff] }
 0x379   : > { %v2377_v27 = vpop.f32.mrb[44].mxu1  ;;  %v4280_v28 = vpop.f32.mrb[42].mxu0 }
 0x37a   : > { %v4562_v49 = vadd.f32 %v4561_v12, %v4522_v22  ;;  %v4609_v29 = vmul.f32 %v4522_v22, %v4522_v22  ;;  %v6683_v58 = vadd.f32 %v4280_v28, %v2372_v4  ;;  %v6105_v59 = vpop.f32.mrb[45].mxu1  ;;  %v6602_v30 = vpop.f32.mrb[43].mxu0 }
 0x37c   : > { %v4649_v31 = vadd.f32 %v4648_v24, %v4609_v29  ;;  %4441 = vst [vmem:[%s9137_s20 + $0xa8] sm:$0xff] %v6683_v58  ;;  %v4523_v26 = vmul.f32 %v6683_v58, %v4482_v47  ;;  %v4488_v24 = vld [vmem:[%s9333_s2 + $0xd8] sm:$0xff] }
 0x37d   : > { %v2382_v32 = vpop.f32.mrb[46].mxu1  ;;  %v4285_v34 = vpop.f32.mrb[44].mxu0 }
 0x37e   : > { %v4563_v36 = vadd.f32 %v4562_v49, %v4523_v26  ;;  %v4610_v38 = vmul.f32 %v4523_v26, %v4523_v26  ;;  %v6684_v2 = vadd.f32 %v4285_v34, %v2377_v27  ;;  %v6108_v3 = vpop.f32.mrb[47].mxu1  ;;  %v6605_v33 = vpop.f32.mrb[45].mxu0 }
 0x380   : > { %v4650_v39 = vadd.f32 %v4649_v31, %v4610_v38  ;;  %4442 = vst [vmem:[%s9137_s20 + $0xb0] sm:$0xff] %v6684_v2  ;;  %v4524_v40 = vmul.f32 %v6684_v2, %v4483_v35  ;;  %v4489_v31 = vld [vmem:[%s9333_s2 + $0xe0] sm:$0xff] }
 0x381   : > { %v2387_v42 = vpop.f32.mrb[48].mxu1  ;;  %v4290_v43 = vpop.f32.mrb[46].mxu0 }
 0x382   : > { %v4564_v1 = vadd.f32 %v4563_v36, %v4524_v40  ;;  %v4611_v46 = vmul.f32 %v4524_v40, %v4524_v40  ;;  %v6685_v11 = vadd.f32 %v4290_v43, %v2382_v32  ;;  %v6111_v48 = vpop.f32.mrb[49].mxu1  ;;  %v6608_v50 = vpop.f32.mrb[47].mxu0 }
 0x384   : > { %v4651_v37 = vadd.f32 %v4650_v39, %v4611_v46  ;;  %4443 = vst [vmem:[%s9137_s20 + $0xb8] sm:$0xff] %v6685_v11  ;;  %v4525_v52 = vmul.f32 %v6685_v11, %v4484_v44  ;;  %v4490_v39 = vld [vmem:[%s9333_s2 + $0xe8] sm:$0xff] }
 0x385   : > { %v2392_v54 = vpop.f32.mrb[50].mxu1  ;;  %v4295_v6 = vpop.f32.mrb[48].mxu0 }
 0x386   : > { %v4565_v60 = vadd.f32 %v4564_v1, %v4525_v52  ;;  %v4612_v17 = vmul.f32 %v4525_v52, %v4525_v52  ;;  %v6686_v62 = vadd.f32 %v4295_v6, %v2387_v42  ;;  %v6114_v0 = vpop.f32.mrb[51].mxu1  ;;  %v6611_v5 = vpop.f32.mrb[49].mxu0 }
 0x388   : > { %v4652_v41 = vadd.f32 %v4651_v37, %v4612_v17  ;;  %4444 = vst [vmem:[%s9137_s20 + $0xc0] sm:$0xff] %v6686_v62  ;;  %v4526_v10 = vmul.f32 %v6686_v62, %v4485_v56  ;;  %v4491_v37 = vld [vmem:[%s9333_s2 + $0xf0] sm:$0xff] }
 0x389   : > { %v2397_v7 = vpop.f32.mrb[52].mxu1  ;;  %v4300_v9 = vpop.f32.mrb[50].mxu0 }
 0x38a   : > { %v4566_v21 = vadd.f32 %v4565_v60, %v4526_v10  ;;  %v4613_v15 = vmul.f32 %v4526_v10, %v4526_v10  ;;  %v6687_v19 = vadd.f32 %v4300_v9, %v2392_v54  ;;  %v6117_v23 = vpop.f32.mrb[53].mxu1  ;;  %v6614_v14 = vpop.f32.mrb[51].mxu0 }
 0x38c   : > { %v4653_v53 = vadd.f32 %v4652_v41, %v4613_v15  ;;  %4445 = vst [vmem:[%s9137_s20 + $0xc8] sm:$0xff] %v6687_v19  ;;  %v4527_v45 = vmul.f32 %v6687_v19, %v4486_v13  ;;  %v4492_v41 = vld [vmem:[%s9333_s2 + $0xf8] sm:$0xff] }
 0x38d   : > { %v2402_v57 = vpop.f32.mrb[54].mxu1  ;;  %v4305_v61 = vpop.f32.mrb[52].mxu0 }
 0x38e   : > { %v4567_v63 = vadd.f32 %v4566_v21, %v4527_v45  ;;  %v4614_v4 = vmul.f32 %v4527_v45, %v4527_v45  ;;  %v6688_v18 = vadd.f32 %v4305_v61, %v2397_v7  ;;  %v6120_v8 = vpop.f32.mrb[55].mxu1  ;;  %v6617_v12 = vpop.f32.mrb[53].mxu0 }
 0x390   : > { %v4654_v16 = vadd.f32 %v4653_v53, %v4614_v4  ;;  %4446 = vst [vmem:[%s9137_s20 + $0xd0] sm:$0xff] %v6688_v18  ;;  %v4528_v51 = vmul.f32 %v6688_v18, %v4487_v25  ;;  %v4493_v53 = vld [vmem:[%s9333_s2 + $0x100] sm:$0xff] }
 0x391   : > { %v2407_v20 = vpop.f32.mrb[56].mxu1  ;;  %v4310_v55 = vpop.f32.mrb[54].mxu0 }
 0x392   : > { %v4568_v22 = vadd.f32 %v4567_v63, %v4528_v51  ;;  %v4615_v27 = vmul.f32 %v4528_v51, %v4528_v51  ;;  %v6689_v28 = vadd.f32 %v4310_v55, %v2402_v57  ;;  %v6123_v47 = vpop.f32.mrb[57].mxu1  ;;  %v6620_v49 = vpop.f32.mrb[55].mxu0 }
 0x394   : > { %v4655_v29 = vadd.f32 %v4654_v16, %v4615_v27  ;;  %4447 = vst [vmem:[%s9137_s20 + $0xd8] sm:$0xff] %v6689_v28  ;;  %v4529_v58 = vmul.f32 %v6689_v28, %v4488_v24  ;;  %v4494_v16 = vld [vmem:[%s9333_s2 + $0x108] sm:$0xff] }
 0x395   : > { %v2412_v59 = vpop.f32.mrb[58].mxu1  ;;  %v4315_v30 = vpop.f32.mrb[56].mxu0 }
 0x396   : > { %v4569_v26 = vadd.f32 %v4568_v22, %v4529_v58  ;;  %v4616_v32 = vmul.f32 %v4529_v58, %v4529_v58  ;;  %v6690_v34 = vadd.f32 %v4315_v30, %v2407_v20  ;;  %v6126_v35 = vpop.f32.mrb[59].mxu1  ;;  %v6623_v36 = vpop.f32.mrb[57].mxu0 }
 0x398   : > { %v4656_v38 = vadd.f32 %v4655_v29, %v4616_v32  ;;  %4448 = vst [vmem:[%s9137_s20 + $0xe0] sm:$0xff] %v6690_v34  ;;  %v4530_v2 = vmul.f32 %v6690_v34, %v4489_v31  ;;  %v4495_v29 = vld [vmem:[%s9333_s2 + $0x110] sm:$0xff] }
 0x399   : > { %v2417_v3 = vpop.f32.mrb[60].mxu1  ;;  %v4320_v33 = vpop.f32.mrb[58].mxu0 }
 0x39a   : > { %v4570_v40 = vadd.f32 %v4569_v26, %v4530_v2  ;;  %v4617_v42 = vmul.f32 %v4530_v2, %v4530_v2  ;;  %v6691_v43 = vadd.f32 %v4320_v33, %v2412_v59  ;;  %v6129_v44 = vpop.f32.mrb[61].mxu1  ;;  %v6626_v1 = vpop.f32.mrb[59].mxu0 }
 0x39c   : > { %v4657_v46 = vadd.f32 %v4656_v38, %v4617_v42  ;;  %4449 = vst [vmem:[%s9137_s20 + $0xe8] sm:$0xff] %v6691_v43  ;;  %v4531_v11 = vmul.f32 %v6691_v43, %v4490_v39  ;;  %v4496_v38 = vld [vmem:[%s9333_s2 + $0x118] sm:$0xff] }
 0x39d   : > { %v2422_v48 = vpop.f32.mrb[62].mxu1  ;;  %v4325_v50 = vpop.f32.mrb[60].mxu0 }
 0x39e   : > { %v4571_v52 = vadd.f32 %v4570_v40, %v4531_v11  ;;  %v4618_v54 = vmul.f32 %v4531_v11, %v4531_v11  ;;  %v6692_v6 = vadd.f32 %v4325_v50, %v2417_v3  ;;  %v6132_v56 = vpop.f32.mrb[63].mxu1  ;;  %v6629_v60 = vpop.f32.mrb[61].mxu0 }
 0x3a0   : > { %v4658_v17 = vadd.f32 %v4657_v46, %v4618_v54  ;;  %4450 = vst [vmem:[%s9137_s20 + $0xf0] sm:$0xff] %v6692_v6  ;;  %v4532_v62 = vmul.f32 %v6692_v6, %v4491_v37  ;;  %v4497_v46 = vld [vmem:[%s9333_s2 + $0x120] sm:$0xff] }
 0x3a1   : > { %v2427_v0 = vpop.f32.mrb[64].mxu1  ;;  %v4330_v5 = vpop.f32.mrb[62].mxu0 }
 0x3a2   : > { %v4572_v10 = vadd.f32 %v4571_v52, %v4532_v62  ;;  %v4619_v7 = vmul.f32 %v4532_v62, %v4532_v62  ;;  %v6693_v9 = vadd.f32 %v4330_v5, %v2422_v48  ;;  %v6135_v13 = vpop.f32.mrb[65].mxu1  ;;  %v6632_v21 = vpop.f32.mrb[63].mxu0 }
 0x3a4   : > { %v4659_v15 = vadd.f32 %v4658_v17, %v4619_v7  ;;  %4451 = vst [vmem:[%s9137_s20 + $0xf8] sm:$0xff] %v6693_v9  ;;  %v4533_v19 = vmul.f32 %v6693_v9, %v4492_v41  ;;  %v4498_v17 = vld [vmem:[%s9333_s2 + $0x128] sm:$0xff] }
 0x3a5   : > { %v2432_v23 = vpop.f32.mrb[66].mxu1  ;;  %v4335_v14 = vpop.f32.mrb[64].mxu0 }
 0x3a6   : > { %v4573_v45 = vadd.f32 %v4572_v10, %v4533_v19  ;;  %v4620_v57 = vmul.f32 %v4533_v19, %v4533_v19  ;;  %v6694_v61 = vadd.f32 %v4335_v14, %v2427_v0  ;;  %v6138_v25 = vpop.f32.mrb[67].mxu1  ;;  %v6635_v63 = vpop.f32.mrb[65].mxu0 }
 0x3a8   : > { %v4660_v4 = vadd.f32 %v4659_v15, %v4620_v57  ;;  %4452 = vst [vmem:[%s9137_s20 + $0x100] sm:$0xff] %v6694_v61  ;;  %v4534_v18 = vmul.f32 %v6694_v61, %v4493_v53  ;;  %v4499_v15 = vld [vmem:[%s9333_s2 + $0x130] sm:$0xff] }
 0x3a9   : > { %v2437_v8 = vpop.f32.mrb[68].mxu1  ;;  %v4340_v12 = vpop.f32.mrb[66].mxu0 }
 0x3aa   : > { %v4574_v51 = vadd.f32 %v4573_v45, %v4534_v18  ;;  %v4621_v20 = vmul.f32 %v4534_v18, %v4534_v18  ;;  %v6695_v55 = vadd.f32 %v4340_v12, %v2432_v23  ;;  %v6141_v24 = vpop.f32.mrb[69].mxu1  ;;  %v6638_v22 = vpop.f32.mrb[67].mxu0 }
 0x3ab   : > { %v4501_v22 = vld [vmem:[%s9333_s2 + $0x140] sm:$0xff] }
 0x3ac   : > { %v4661_v27 = vadd.f32 %v4660_v4, %v4621_v20  ;;  %4453 = vst [vmem:[%s9137_s20 + $0x108] sm:$0xff] %v6695_v55  ;;  %v4535_v28 = vmul.f32 %v6695_v55, %v4494_v16  ;;  %v4500_v4 = vld [vmem:[%s9333_s2 + $0x138] sm:$0xff] }
 0x3ad   : > { %v2442_v47 = vpop.f32.mrb[70].mxu1  ;;  %v4345_v49 = vpop.f32.mrb[68].mxu0 }
 0x3ae   : > { %v4575_v58 = vadd.f32 %v4574_v51, %v4535_v28  ;;  %v4622_v59 = vmul.f32 %v4535_v28, %v4535_v28  ;;  %v6696_v30 = vadd.f32 %v4345_v49, %v2437_v8  ;;  %v6144_v31 = vpop.f32.mrb[71].mxu1  ;;  %v6641_v26 = vpop.f32.mrb[69].mxu0 }
 0x3b0   : > { %v4662_v32 = vadd.f32 %v4661_v27, %v4622_v59  ;;  %4454 = vst [vmem:[%s9137_s20 + $0x110] sm:$0xff] %v6696_v30  ;;  %v4536_v34 = vmul.f32 %v6696_v30, %v4495_v29 }
 0x3b1   : > { %v2447_v35 = vpop.f32.mrb[72].mxu1  ;;  %v4350_v36 = vpop.f32.mrb[70].mxu0 }
 0x3b2   : > { %v4576_v2 = vadd.f32 %v4575_v58, %v4536_v34  ;;  %v4623_v3 = vmul.f32 %v4536_v34, %v4536_v34  ;;  %v6697_v33 = vadd.f32 %v4350_v36, %v2442_v47  ;;  %v6147_v39 = vpop.f32.mrb[73].mxu1  ;;  %v6644_v40 = vpop.f32.mrb[71].mxu0 }
 0x3b4   : > { %v4663_v42 = vadd.f32 %v4662_v32, %v4623_v3  ;;  %4455 = vst [vmem:[%s9137_s20 + $0x118] sm:$0xff] %v6697_v33  ;;  %v4537_v43 = vmul.f32 %v6697_v33, %v4496_v38 }
 0x3b5   : > { %v2452_v44 = vpop.f32.mrb[74].mxu1  ;;  %v4355_v1 = vpop.f32.mrb[72].mxu0 }
 0x3b6   : > { %v4577_v11 = vadd.f32 %v4576_v2, %v4537_v43  ;;  %v4624_v48 = vmul.f32 %v4537_v43, %v4537_v43  ;;  %v6698_v50 = vadd.f32 %v4355_v1, %v2447_v35  ;;  %v6150_v37 = vpop.f32.mrb[75].mxu1  ;;  %v6647_v52 = vpop.f32.mrb[73].mxu0  ;;  %v4676_v35 = vlaneseq }
 0x3b8   : > { %v4664_v54 = vadd.f32 %v4663_v42, %v4624_v48  ;;  %4456 = vst [vmem:[%s9137_s20 + $0x120] sm:$0xff] %v6698_v50  ;;  %v4538_v6 = vmul.f32 %v6698_v50, %v4497_v46  ;;  %v4677_v33 = vshrl.u32 %v4676_v35, 7 }
 0x3b9   : > { %v2457_v56 = vpop.f32.mrb[76].mxu1  ;;  %v4360_v60 = vpop.f32.mrb[74].mxu0 }
 0x3ba   : > { %v4578_v62 = vadd.f32 %v4577_v11, %v4538_v6  ;;  %v4625_v0 = vmul.f32 %v4538_v6, %v4538_v6  ;;  %v6699_v5 = vadd.f32 %v4360_v60, %v2452_v44  ;;  %v6153_v41 = vpop.f32.mrb[77].mxu1  ;;  %v6650_v10 = vpop.f32.mrb[75].mxu0  ;;  %vm4678_vm2 = vcmp.eq.s32.totalorder %v4677_v33, 0 }
 0x3bb   : > { %vm4680_vm3 = vcmp.eq.s32.totalorder %v4677_v33, 1 }
 0x3bc   : > { %v4665_v7 = vadd.f32 %v4664_v54, %v4625_v0  ;;  %4457 = vst [vmem:[%s9137_s20 + $0x128] sm:$0xff] %v6699_v5  ;;  %v4539_v9 = vmul.f32 %v6699_v5, %v4498_v17 }
 0x3bd   : > { %v2462_v13 = vpop.f32.mrb[78].mxu1  ;;  %v4365_v21 = vpop.f32.mrb[76].mxu0 }
 0x3be   : > { %v4579_v19 = vadd.f32 %v4578_v62, %v4539_v9  ;;  %v4626_v23 = vmul.f32 %v4539_v9, %v4539_v9  ;;  %v6700_v14 = vadd.f32 %v4365_v21, %v2457_v56  ;;  %v6156_v53 = vpop.f32.mrb[79].mxu1  ;;  %v6653_v45 = vpop.f32.mrb[77].mxu0 }
 0x3c0   : > { %v4666_v57 = vadd.f32 %v4665_v7, %v4626_v23  ;;  %4458 = vst [vmem:[%s9137_s20 + $0x130] sm:$0xff] %v6700_v14  ;;  %v4540_v61 = vmul.f32 %v6700_v14, %v4499_v15 }
 0x3c1   : > { %v2467_v25 = vpop.f32.mrb[80].mxu1  ;;  %v4370_v63 = vpop.f32.mrb[78].mxu0 }
 0x3c2   : > { %v4580_v18 = vadd.f32 %v4579_v19, %v4540_v61  ;;  %v4627_v8 = vmul.f32 %v4540_v61, %v4540_v61  ;;  %v6701_v12 = vadd.f32 %v4370_v63, %v2462_v13  ;;  %v6159_v16 = vpop.f32.mrb[81].mxu1  ;;  %v6656_v51 = vpop.f32.mrb[79].mxu0 }
 0x3c4   : > { %v4667_v20 = vadd.f32 %v4666_v57, %v4627_v8  ;;  %4459 = vst [vmem:[%s9137_s20 + $0x138] sm:$0xff] %v6701_v12  ;;  %v4541_v55 = vmul.f32 %v6701_v12, %v4500_v4 }
 0x3c5   : > { %v4375_v24 = vpop.f32.mrb[80].mxu0 }
 0x3c6   : > { %v4581_v27 = vadd.f32 %v4580_v18, %v4541_v55  ;;  %v4628_v28 = vmul.f32 %v4541_v55, %v4541_v55  ;;  %v6702_v47 = vadd.f32 %v4375_v24, %v2467_v25  ;;  %v6659_v49 = vpop.f32.mrb[81].mxu0 }
 0x3c8   : > { %v4668_v29 = vadd.f32 %v4667_v20, %v4628_v28  ;;  %4460 = vst [vmem:[%s9137_s20 + $0x140] sm:$0xff] %v6702_v47  ;;  %v4542_v58 = vmul.f32 %v6702_v47, %v4501_v22 }
 0x3ca   : > { %v4582_v59 = vadd.f32 %v4581_v27, %v4542_v58  ;;  %v4629_v30 = vmul.f32 %v4542_v58, %v4542_v58 }
 0x3cc   : > { %v4583_v31 = vrot.slane %v4582_v59, 4  ;;  %v4669_v26 = vadd.f32 %v4668_v29, %v4629_v30 }
 0x3ce   : > { %v4584_v32 = vadd.f32 %v4583_v31, %v4582_v59  ;;  %v4670_v34 = vrot.slane %v4669_v26, 4 }
 0x3d0   : > { %v4585_v36 = vrot.slane %v4584_v32, 2  ;;  %v4671_v38 = vadd.f32 %v4670_v34, %v4669_v26 }
 0x3d2   : > { %v4586_v2 = vadd.f32 %v4585_v36, %v4584_v32  ;;  %v4672_v3 = vrot.slane %v4671_v38, 2 }
 0x3d4   : > { %v4587_v39 = vrot.slane %v4586_v2, 1  ;;  %v4673_v40 = vadd.f32 %v4672_v3, %v4671_v38 }
 0x3d6   : > { %v4588_v42 = vadd.f32 %v4587_v39, %v4586_v2  ;;  %v4674_v43 = vrot.slane %v4673_v40, 1 }
 0x3d8   : > { %v4675_v44 = vadd.f32 %v4674_v43, %v4673_v40  ;;  %v4679_v1 = vsel %vm4678_vm2, %v4588_v42, 0.0 }
 0x3da   : > { %v4681_v46 = vsel %vm4680_vm3, %v4675_v44, 0.0 }
 0x3db   : > { %v4682_v11 = vadd.f32 %v4681_v46, %v4679_v1 }
 0x3dd   : > { %4683 = vst [vmem:[%s208_s10] sm:$0xff] %v4682_v11 }
 0x3de PF: > { %s15_s15 = sadd.s32 1, %s7296_s15  }
 0x3df   : > { %p12_p4 = scmp.ge.s32.totalorder %s15_s15, 4  }
 0x3e1   :  { %14 = sbr.rel (!%p12_p4) target bundleno = 1 (0x1), region = 82 }

</bundles_post_ra>
